<compile_context>
chip_gen: v5e
topology: v5e:2x2
jax: 0.10.0
libtpu: 0.0.40
codegen_flags: <defaults>
</compile_context>

<pallas_src>
import functools
import math

import jax
import jax.numpy as jnp
from jax.experimental import pallas as pl
from jax.experimental.pallas import tpu as pltpu


# Canonical ordering of stacked per-encoder weights (shared by both kernels).
ENC_KEYS = ("wq", "bq", "wk", "bk", "wv", "bv", "wo", "bo",
            "fc1w", "fc1b", "fc2w", "fc2b",
            "ln0g", "ln0b", "ln1g", "ln1b", "lnfg", "lnfb")


# -----------------------------------------------------------------------------
# In-kernel helpers (traced inside the Pallas kernels)
# -----------------------------------------------------------------------------
def _ln(x, g, b):
    """LayerNorm over the last dim. x:[M,D], g/b:[1,D]."""
    mu = jnp.mean(x, axis=-1, keepdims=True)
    xc = x - mu
    var = jnp.mean(xc * xc, axis=-1, keepdims=True)
    return xc * jax.lax.rsqrt(var + 1e-5) * g + b


def _encoder_layers(x2d, kv2d,
                    wq, bq, wk, bk, wv, bv, wo, bo,
                    fc1w, fc1b, fc2w, fc2b,
                    ln0g, ln0b, ln1g, ln1b, lnfg, lnfb,
                    *, B, T, D, H, L):
    """L pre-norm transformer encoder layers, fully in VMEM.

    x2d : [B*T, D]  query stream (rows ordered b*T + t, batch-major)
    kv2d: [B*T, D]  cross-modal key/value stream, or None for self-attention
    Weight refs are stacked along a leading layer axis L.
    Attention scaling (head_dim**-0.5) is already folded into W_q.
    """
    hd = D // H
    # Head lane-masks, hoisted out of the layer loop (broadcast_in_dim is not CSE'd).
    lane = jax.lax.broadcasted_iota(jnp.int32, (1, D), 1)
    head_masks = [((lane >= h * hd) & (lane < (h + 1) * hd)).astype(jnp.float32)
                  for h in range(H)]

    x = x2d
    for l in range(L):
        # --- attention block (normalize_before=True) --------------------------
        g0, b0 = ln0g[l], ln0b[l]
        xn = _ln(x, g0, b0)
        kn = xn if kv2d is None else _ln(kv2d, g0, b0)

        q = jnp.dot(xn, wq[l], preferred_element_type=jnp.float32) + bq[l]
        k = jnp.dot(kn, wk[l], preferred_element_type=jnp.float32) + bk[l]
        v = jnp.dot(kn, wv[l], preferred_element_type=jnp.float32) + bv[l]
        k3 = k.reshape(B, T, D)

        # Per-head attention with lane masks: (q*m_h)·k == q_h·k_h, and the
        # masked context summed over heads followed by a single full W_o matmul
        # equals the concat-heads out-projection.
        ctx = jnp.zeros_like(x)
        for h in range(H):
            m = head_masks[h]
            qh = (q * m).reshape(B, T, D)
            s = jnp.einsum('bqd,bkd->bqk', qh, k3,
                           preferred_element_type=jnp.float32)
            s = s - jnp.max(s, axis=-1, keepdims=True)
            p = jnp.exp(s)
            p = p * pl.reciprocal(jnp.sum(p, axis=-1, keepdims=True), approx=True)
            vh = (v * m).reshape(B, T, D)
            ctx = ctx + jnp.einsum('bqk,bkd->bqd', p, vh,
                                   preferred_element_type=jnp.float32
                                   ).reshape(B * T, D)
        x = x + jnp.dot(ctx, wo[l], preferred_element_type=jnp.float32) + bo[l]

        # --- feed-forward block ------------------------------------------------
        xn = _ln(x, ln1g[l], ln1b[l])
        h1 = jnp.dot(xn, fc1w[l], preferred_element_type=jnp.float32) + fc1b[l]
        h1 = jnp.maximum(h1, 0.0)
        x = x + jnp.dot(h1, fc2w[l], preferred_element_type=jnp.float32) + fc2b[l]

    # final encoder LayerNorm (normalize=True)
    return _ln(x, lnfg[...], lnfb[...])


def _scale_and_pos(z, pos, emb_scale, B, T, D):
    """z:[B,T,D] -> sqrt(D)*z + pos_emb (fairseq padding test on feature 0)."""
    mask = (z[:, :, 0:1] != 0.0).astype(jnp.float32)   # [B,T,1]; padding row is 0
    return (emb_scale * z + mask * pos[None, :, :]).reshape(B * T, D)


# -----------------------------------------------------------------------------
# Kernel 1: both cross-modal encoders (grid=(2,), "parallel" -> 2 TCs on v7x)
# -----------------------------------------------------------------------------
def _cross_modal_kernel(x_a_ref, x_v_ref, wpa_ref, wpv_ref, pos_ref,
                        wq, bq, wk, bk, wv, bv, wo, bo,
                        fc1w, fc1b, fc2w, fc2b,
                        ln0g, ln0b, ln1g, ln1b, lnfg, lnfb,
                        o_ref,
                        *, B, T, d, num_heads, num_layers):
    s = pl.program_id(0)

    # 1x1 Conv1d projections (kernel_size=1, bias=False) as in-VMEM matmuls.
    pa = jnp.dot(x_a_ref[...].reshape(B * T, -1), wpa_ref[...],
                 preferred_element_type=jnp.float32).reshape(B, T, d)
    pv = jnp.dot(x_v_ref[...].reshape(B * T, -1), wpv_ref[...],
                 preferred_element_type=jnp.float32).reshape(B, T, d)

    # stream 0: audio queries attend to vision; stream 1: vision attends to audio
    w0 = (s == 0).astype(jnp.float32)
    q_in = w0 * pa + (1.0 - w0) * pv
    kv_in = w0 * pv + (1.0 - w0) * pa

    pos = pos_ref[...]                       # [T, d], rows 1..T of sinusoid table
    emb_scale = math.sqrt(d)
    x2d = _scale_and_pos(q_in, pos, emb_scale, B, T, d)
    kv2d = _scale_and_pos(kv_in, pos, emb_scale, B, T, d)

    y = _encoder_layers(x2d, kv2d,
                        wq, bq, wk, bk, wv, bv, wo, bo,
                        fc1w, fc1b, fc2w, fc2b,
                        ln0g, ln0b, ln1g, ln1b, lnfg, lnfb,
                        B=B, T=T, D=d, H=num_heads, L=num_layers)
    o_ref[...] = y.reshape(B, T, d)


# -----------------------------------------------------------------------------
# Kernel 2: joint memory encoder (trans_ab_mem) fused with the output head
# -----------------------------------------------------------------------------
def _mem_head_kernel(x_ref, pos_ref, search_ref,
                     wq, bq, wk, bk, wv, bv, wo, bo,
                     fc1w, fc1b, fc2w, fc2b,
                     ln0g, ln0b, ln1g, ln1b, lnfg, lnfb,
                     p1w_ref, p1b_ref, p2w_ref, p2b_ref,
                     psw_ref, psb_ref, ps2w_ref, ps2b_ref,
                     ow_ref, ob_ref,
                     o_ref,
                     *, B, T, comb, num_heads, num_layers):
    xin = x_ref[...]                                   # [B, T, comb]  (last_hs)
    x2d = _scale_and_pos(xin, pos_ref[...], math.sqrt(comb), B, T, comb)

    y = _encoder_layers(x2d, None,
                        wq, bq, wk, bk, wv, bv, wo, bo,
                        fc1w, fc1b, fc2w, fc2b,
                        ln0g, ln0b, ln1g, ln1b, lnfg, lnfb,
                        B=B, T=T, D=comb, H=num_heads, L=num_layers)

    # l_final = h_hidd[-1]  (last timestep for each batch element)
    l_final = y.reshape(B, T, comb)[:, T - 1, :]       # [B, comb]

    # Output head (all dropouts are identity in eval mode).
    t1 = jnp.dot(l_final, p1w_ref[...], preferred_element_type=jnp.float32) + p1b_ref[...]
    t1 = jnp.maximum(t1, 0.0)
    last_hs_proj = (jnp.dot(t1, p2w_ref[...], preferred_element_type=jnp.float32)
                    + p2b_ref[...] + l_final)

    s1 = jnp.dot(search_ref[...], psw_ref[...],
                 preferred_element_type=jnp.float32) + psb_ref[...]
    s1 = jnp.maximum(s1, 0.0)
    search_embed = (jnp.dot(s1, ps2w_ref[...], preferred_element_type=jnp.float32)
                    + ps2b_ref[...])

    rep = last_hs_proj + search_embed
    o_ref[...] = jnp.dot(rep, ow_ref[...], preferred_element_type=jnp.float32) + ob_ref[...]


# -----------------------------------------------------------------------------
# Forward wrapper: exactly two pallas_calls + a tiny concat/transpose
# -----------------------------------------------------------------------------
def mult_forward(params, x_a, x_v, search_info, *, num_heads):
    B, T, da = x_a.shape
    dv = x_v.shape[2]
    cross = params["cross"]
    mem = params["mem"]
    head = params["head"]
    d = cross["wo"].shape[-1]          # 30
    comb = mem["wo"].shape[-1]         # 60
    L = cross["wq"].shape[1]
    Lm = mem["wq"].shape[0]
    out_dim = head["ow"].shape[1]

    def shared(shape):
        return pl.BlockSpec(shape, lambda s: (0,) * len(shape))

    def per_stream(shape):
        return pl.BlockSpec((None,) + tuple(shape),
                            lambda s: (s,) + (0,) * len(shape))

    cross_kernel = functools.partial(
        _cross_modal_kernel, B=B, T=T, d=d, num_heads=num_heads, num_layers=L)

    in_specs = ([shared((B, T, da)), shared((B, T, dv)),
                 shared((da, d)), shared((dv, d)), shared((T, d))]
                + [per_stream(cross[k].shape[1:]) for k in ENC_KEYS])

    out_cm = pl.pallas_call(
        cross_kernel,
        out_shape=jax.ShapeDtypeStruct((2, B, T, d), jnp.float32),
        grid=(2,),
        in_specs=in_specs,
        out_specs=pl.BlockSpec((None, B, T, d), lambda s: (s, 0, 0, 0)),
        compiler_params=pltpu.CompilerParams(dimension_semantics=("parallel",)),
    )(x_a, x_v, params["proj_a_w"], params["proj_v_w"], params["pos30"],
      *(cross[k] for k in ENC_KEYS))

    # last_hs = cat([last_h_a, last_h_v], dim=2) in seq-major layout [T, B, 60]
    last_hs_bt = jnp.concatenate([out_cm[0], out_cm[1]], axis=-1)   # [B, T, 60]
    last_hs = jnp.transpose(last_hs_bt, (1, 0, 2))                  # [T, B, 60]

    mem_head_kernel = functools.partial(
        _mem_head_kernel, B=B, T=T, comb=comb, num_heads=num_heads, num_layers=Lm)

    output = pl.pallas_call(
        mem_head_kernel,
        out_shape=jax.ShapeDtypeStruct((B, out_dim), jnp.float32),
    )(last_hs_bt, params["pos60"], search_info,
      *(mem[k] for k in ENC_KEYS),
      head["p1w"], head["p1b"], head["p2w"], head["p2b"],
      head["psw"], head["psb"], head["ps2w"], head["ps2b"],
      head["ow"], head["ob"])

    return output, last_hs


# -----------------------------------------------------------------------------
# Parameter construction (synthetic weights, stacked kernel layout)
# -----------------------------------------------------------------------------
def make_pos_table(T, D):
    """Rows 1..T of the fairseq sinusoidal table (padding row 0 is all-zero and
    is realized in-kernel as a mask multiply)."""
    half = D // 2
    inv = jnp.exp(jnp.arange(half, dtype=jnp.float32)
                  * -(math.log(10000.0) / (half - 1)))
    pos = jnp.arange(1, T + 1, dtype=jnp.float32)
    ang = pos[:, None] * inv[None, :]
    tab = jnp.concatenate([jnp.sin(ang), jnp.cos(ang)], axis=1)
    if D % 2 == 1:
        tab = jnp.concatenate([tab, jnp.zeros((T, 1), jnp.float32)], axis=1)
    return tab  # [T, D]


def init_encoder_stack(key, D, L, H, scale=0.1):
    """Per-layer weights stacked along a leading layer axis; attention scaling
    (head_dim**-0.5) is folded into W_q."""
    scaling = (D // H) ** -0.5

    def rnd(k, shape, s=scale):
        return jax.random.normal(k, shape, jnp.float32) * s

    wq, wk, wv, wo, fc1w, fc2w = [], [], [], [], [], []
    for lk in jax.random.split(key, L):
        k1, k2, k3, k4, k5, k6 = jax.random.split(lk, 6)
        wq.append(rnd(k1, (D, D)) * scaling)
        wk.append(rnd(k2, (D, D)))
        wv.append(rnd(k3, (D, D)))
        wo.append(rnd(k4, (D, D)))
        fc1w.append(rnd(k5, (D, 4 * D)))
        fc2w.append(rnd(k6, (4 * D, D)))

    def z1():
        return jnp.zeros((L, 1, D), jnp.float32)

    return dict(
        wq=jnp.stack(wq), bq=z1(), wk=jnp.stack(wk), bk=z1(),
        wv=jnp.stack(wv), bv=z1(), wo=jnp.stack(wo), bo=z1(),
        fc1w=jnp.stack(fc1w), fc1b=jnp.zeros((L, 1, 4 * D), jnp.float32),
        fc2w=jnp.stack(fc2w), fc2b=z1(),
        ln0g=jnp.ones((L, 1, D), jnp.float32), ln0b=z1(),
        ln1g=jnp.ones((L, 1, D), jnp.float32), ln1b=z1(),
        lnfg=jnp.ones((1, D), jnp.float32), lnfb=jnp.zeros((1, D), jnp.float32),
    )


def _dense(key, din, dout, scale=0.1):
    kw, kb = jax.random.split(key)
    return (jax.random.normal(kw, (din, dout), jnp.float32) * scale,
            jax.random.normal(kb, (1, dout), jnp.float32) * scale)


def init_mult_params(key, orig_d_a, orig_d_v, layers, num_heads, output_dim, T):
    d, comb, num_parcel = 30, 60, 100
    ks = jax.random.split(key, 10)
    p = {}
    # 1x1 Conv1d (bias=False); identity matrix when orig_d == d (passthrough case).
    p["proj_a_w"] = (jnp.eye(d, dtype=jnp.float32) if orig_d_a == d
                     else jax.random.normal(ks[0], (orig_d_a, d), jnp.float32) * 0.1)
    p["proj_v_w"] = (jnp.eye(d, dtype=jnp.float32) if orig_d_v == d
                     else jax.random.normal(ks[1], (orig_d_v, d), jnp.float32) * 0.1)
    # Stream 0 = trans_a_with_v, stream 1 = trans_v_with_a (stacked on axis 0).
    ea = init_encoder_stack(ks[2], d, layers, num_heads)
    ev = init_encoder_stack(ks[3], d, layers, num_heads)
    p["cross"] = {k: jnp.stack([ea[k], ev[k]], axis=0) for k in ENC_KEYS}
    p["mem"] = init_encoder_stack(ks[4], comb, max(layers, 3), num_heads)
    h = {}
    h["psw"], h["psb"] = _dense(ks[5], num_parcel, comb)   # proj_search_info
    h["ps2w"], h["ps2b"] = _dense(ks[6], comb, comb)       # proj_search2
    h["p1w"], h["p1b"] = _dense(ks[7], comb, comb)         # proj1
    h["p2w"], h["p2b"] = _dense(ks[8], comb, comb)         # proj2
    h["ow"], h["ob"] = _dense(ks[9], comb, output_dim)     # out_layer
    p["head"] = h
    p["pos30"] = make_pos_table(T, d)
    p["pos60"] = make_pos_table(T, comb)
    return p


# -----------------------------------------------------------------------------
if __name__ == "__main__":
    # Hyperparameters (small, consistent with the module):
    B, T = 2, 8
    ORIG_D_A, ORIG_D_V = 20, 24
    NUM_HEADS = 5          # divides both d=30 and combined_dim=60
    LAYERS = 2             # cross-modal encoders; memory encoder uses max(LAYERS, 3)=3
    OUTPUT_DIM = 3
    # lonly = aonly = vonly = True; attn_mask = False; eval mode (all dropouts = identity)

    key = jax.random.PRNGKey(0)
    k_params, k_a, k_v, k_s = jax.random.split(key, 4)

    params = init_mult_params(k_params, ORIG_D_A, ORIG_D_V, LAYERS,
                              NUM_HEADS, OUTPUT_DIM, T)

    x_a = jax.random.normal(k_a, (B, T, ORIG_D_A), jnp.float32)
    x_v = jax.random.normal(k_v, (B, T, ORIG_D_V), jnp.float32)
    search_info = jax.random.normal(k_s, (B, 100), jnp.float32)

    fwd = jax.jit(functools.partial(mult_forward, num_heads=NUM_HEADS))
    output, last_hs = fwd(params, x_a, x_v, search_info)
    jax.block_until_ready((output, last_hs))

    assert output.shape == (B, OUTPUT_DIM)
    assert last_hs.shape == (T, B, 60)
    assert bool(jnp.all(jnp.isfinite(output))) and bool(jnp.all(jnp.isfinite(last_hs)))
    print("KERNEL_OK")
</pallas_src>

<mosaic_0001>
module attributes {stable_mosaic.version = 11 : i64} {
  func.func @_cross_modal_kernel(%arg0: i32, %arg1: memref<2x8x20xf32, #tpu.memory_space<vmem>>, %arg2: memref<2x8x24xf32, #tpu.memory_space<vmem>>, %arg3: memref<20x30xf32, #tpu.memory_space<vmem>>, %arg4: memref<24x30xf32, #tpu.memory_space<vmem>>, %arg5: memref<8x30xf32, #tpu.memory_space<vmem>>, %arg6: memref<1x2x30x30xf32, #tpu.memory_space<vmem>>, %arg7: memref<1x2x1x30xf32, #tpu.memory_space<vmem>>, %arg8: memref<1x2x30x30xf32, #tpu.memory_space<vmem>>, %arg9: memref<1x2x1x30xf32, #tpu.memory_space<vmem>>, %arg10: memref<1x2x30x30xf32, #tpu.memory_space<vmem>>, %arg11: memref<1x2x1x30xf32, #tpu.memory_space<vmem>>, %arg12: memref<1x2x30x30xf32, #tpu.memory_space<vmem>>, %arg13: memref<1x2x1x30xf32, #tpu.memory_space<vmem>>, %arg14: memref<1x2x30x120xf32, #tpu.memory_space<vmem>>, %arg15: memref<1x2x1x120xf32, #tpu.memory_space<vmem>>, %arg16: memref<1x2x120x30xf32, #tpu.memory_space<vmem>>, %arg17: memref<1x2x1x30xf32, #tpu.memory_space<vmem>>, %arg18: memref<1x2x1x30xf32, #tpu.memory_space<vmem>>, %arg19: memref<1x2x1x30xf32, #tpu.memory_space<vmem>>, %arg20: memref<1x2x1x30xf32, #tpu.memory_space<vmem>>, %arg21: memref<1x2x1x30xf32, #tpu.memory_space<vmem>>, %arg22: memref<1x1x30xf32, #tpu.memory_space<vmem>>, %arg23: memref<1x1x30xf32, #tpu.memory_space<vmem>>, %arg24: memref<1x2x8x30xf32, #tpu.memory_space<vmem>>) attributes {dimension_semantics = [#tpu.dimension_semantics<parallel>], iteration_bounds = array<i64: 2>, scalar_prefetch = 0 : i64, scratch_operands = 0 : i64, tpu.core_type = #tpu.core_type<tc>, window_params = [{pipeline_mode = #tpu.pipeline_mode<synchronous>, transform_indices = @transform_0, window_bounds = array<i64: 2, 8, 20>}, {pipeline_mode = #tpu.pipeline_mode<synchronous>, transform_indices = @transform_1, window_bounds = array<i64: 2, 8, 24>}, {pipeline_mode = #tpu.pipeline_mode<synchronous>, transform_indices = @transform_2, window_bounds = array<i64: 20, 30>}, {pipeline_mode = #tpu.pipeline_mode<synchronous>, transform_indices = @transform_3, window_bounds = array<i64: 24, 30>}, {pipeline_mode = #tpu.pipeline_mode<synchronous>, transform_indices = @transform_4, window_bounds = array<i64: 8, 30>}, {transform_indices = @transform_5, window_bounds = array<i64: 1, 2, 30, 30>}, {transform_indices = @transform_6, window_bounds = array<i64: 1, 2, 1, 30>}, {transform_indices = @transform_7, window_bounds = array<i64: 1, 2, 30, 30>}, {transform_indices = @transform_8, window_bounds = array<i64: 1, 2, 1, 30>}, {transform_indices = @transform_9, window_bounds = array<i64: 1, 2, 30, 30>}, {transform_indices = @transform_10, window_bounds = array<i64: 1, 2, 1, 30>}, {transform_indices = @transform_11, window_bounds = array<i64: 1, 2, 30, 30>}, {transform_indices = @transform_12, window_bounds = array<i64: 1, 2, 1, 30>}, {transform_indices = @transform_13, window_bounds = array<i64: 1, 2, 30, 120>}, {transform_indices = @transform_14, window_bounds = array<i64: 1, 2, 1, 120>}, {transform_indices = @transform_15, window_bounds = array<i64: 1, 2, 120, 30>}, {transform_indices = @transform_16, window_bounds = array<i64: 1, 2, 1, 30>}, {transform_indices = @transform_17, window_bounds = array<i64: 1, 2, 1, 30>}, {transform_indices = @transform_18, window_bounds = array<i64: 1, 2, 1, 30>}, {transform_indices = @transform_19, window_bounds = array<i64: 1, 2, 1, 30>}, {transform_indices = @transform_20, window_bounds = array<i64: 1, 2, 1, 30>}, {transform_indices = @transform_21, window_bounds = array<i64: 1, 1, 30>}, {transform_indices = @transform_22, window_bounds = array<i64: 1, 1, 30>}, {transform_indices = @transform_23, window_bounds = array<i64: 1, 2, 8, 30>}]} {
    %c0 = arith.constant 0 : index
    %c0_0 = arith.constant 0 : index
    %c0_1 = arith.constant 0 : index
    %0 = vector.load %arg1[%c0, %c0_0, %c0_1] : memref<2x8x20xf32, #tpu.memory_space<vmem>>, vector<2x8x20xf32>
    %1 = vector.shape_cast %0 : vector<2x8x20xf32> to vector<16x20xf32>
    %c0_2 = arith.constant 0 : index
    %c0_3 = arith.constant 0 : index
    %2 = vector.load %arg3[%c0_2, %c0_3] : memref<20x30xf32, #tpu.memory_space<vmem>>, vector<20x30xf32>
    %cst = arith.constant dense<0.000000e+00> : vector<16x30xf32>
    %3 = tpu.matmul %1, %2, %cst {dimension_numbers = #tpu.dot_dimension_numbers<[1], [0], [0], [1], [0, 0, 1, 1], [], []>} : vector<16x20xf32>, vector<20x30xf32>, vector<16x30xf32> -> vector<16x30xf32>
    %4 = vector.shape_cast %3 : vector<16x30xf32> to vector<2x8x30xf32>
    %c0_4 = arith.constant 0 : index
    %c0_5 = arith.constant 0 : index
    %c0_6 = arith.constant 0 : index
    %5 = vector.load %arg2[%c0_4, %c0_5, %c0_6] : memref<2x8x24xf32, #tpu.memory_space<vmem>>, vector<2x8x24xf32>
    %6 = vector.shape_cast %5 : vector<2x8x24xf32> to vector<16x24xf32>
    %c0_7 = arith.constant 0 : index
    %c0_8 = arith.constant 0 : index
    %7 = vector.load %arg4[%c0_7, %c0_8] : memref<24x30xf32, #tpu.memory_space<vmem>>, vector<24x30xf32>
    %cst_9 = arith.constant dense<0.000000e+00> : vector<16x30xf32>
    %8 = tpu.matmul %6, %7, %cst_9 {dimension_numbers = #tpu.dot_dimension_numbers<[1], [0], [0], [1], [0, 0, 1, 1], [], []>} : vector<16x24xf32>, vector<24x30xf32>, vector<16x30xf32> -> vector<16x30xf32>
    %9 = vector.shape_cast %8 : vector<16x30xf32> to vector<2x8x30xf32>
    %c0_i32 = arith.constant 0 : i32
    %10 = arith.cmpi eq, %arg0, %c0_i32 : i32
    %11 = arith.extui %10 : i1 to i32
    %12 = arith.sitofp %11 : i32 to f32
    %13 = vector.broadcast %12 : f32 to vector<2x8x30xf32>
    %14 = arith.mulf %13, %4 : vector<2x8x30xf32>
    %cst_10 = arith.constant 1.000000e+00 : f32
    %15 = arith.subf %cst_10, %12 : f32
    %16 = vector.broadcast %15 : f32 to vector<2x8x30xf32>
    %17 = arith.mulf %16, %9 : vector<2x8x30xf32>
    %18 = arith.addf %14, %17 : vector<2x8x30xf32>
    %19 = vector.broadcast %12 : f32 to vector<2x8x30xf32>
    %20 = arith.mulf %19, %9 : vector<2x8x30xf32>
    %cst_11 = arith.constant 1.000000e+00 : f32
    %21 = arith.subf %cst_11, %12 : f32
    %22 = vector.broadcast %21 : f32 to vector<2x8x30xf32>
    %23 = arith.mulf %22, %4 : vector<2x8x30xf32>
    %24 = arith.addf %20, %23 : vector<2x8x30xf32>
    %c0_12 = arith.constant 0 : index
    %c0_13 = arith.constant 0 : index
    %25 = vector.load %arg5[%c0_12, %c0_13] : memref<8x30xf32, #tpu.memory_space<vmem>>, vector<8x30xf32>
    %26 = vector.extract_strided_slice %18 {offsets = [0, 0, 0], sizes = [2, 8, 1], strides = [1, 1, 1]} : vector<2x8x30xf32> to vector<2x8x1xf32>
    %cst_14 = arith.constant 0.000000e+00 : f32
    %27 = vector.broadcast %cst_14 : f32 to vector<2x8x1xf32>
    %28 = arith.cmpf one, %26, %27 : vector<2x8x1xf32>
    %29 = arith.extui %28 : vector<2x8x1xi1> to vector<2x8x1xi32>
    %30 = arith.sitofp %29 : vector<2x8x1xi32> to vector<2x8x1xf32>
    %cst_15 = arith.constant 5.47722578 : f32
    %31 = vector.broadcast %cst_15 : f32 to vector<2x8x30xf32>
    %32 = arith.mulf %31, %18 : vector<2x8x30xf32>
    %33 = vector.shape_cast %25 : vector<8x30xf32> to vector<1x8x30xf32>
    %34 = vector.broadcast %30 : vector<2x8x1xf32> to vector<2x8x30xf32>
    %35 = vector.broadcast %33 : vector<1x8x30xf32> to vector<2x8x30xf32>
    %36 = arith.mulf %34, %35 : vector<2x8x30xf32>
    %37 = arith.addf %32, %36 : vector<2x8x30xf32>
    %38 = vector.shape_cast %37 : vector<2x8x30xf32> to vector<16x30xf32>
    %39 = vector.extract_strided_slice %24 {offsets = [0, 0, 0], sizes = [2, 8, 1], strides = [1, 1, 1]} : vector<2x8x30xf32> to vector<2x8x1xf32>
    %cst_16 = arith.constant 0.000000e+00 : f32
    %40 = vector.broadcast %cst_16 : f32 to vector<2x8x1xf32>
    %41 = arith.cmpf one, %39, %40 : vector<2x8x1xf32>
    %42 = arith.extui %41 : vector<2x8x1xi1> to vector<2x8x1xi32>
    %43 = arith.sitofp %42 : vector<2x8x1xi32> to vector<2x8x1xf32>
    %cst_17 = arith.constant 5.47722578 : f32
    %44 = vector.broadcast %cst_17 : f32 to vector<2x8x30xf32>
    %45 = arith.mulf %44, %24 : vector<2x8x30xf32>
    %46 = vector.shape_cast %25 : vector<8x30xf32> to vector<1x8x30xf32>
    %47 = vector.broadcast %43 : vector<2x8x1xf32> to vector<2x8x30xf32>
    %48 = vector.broadcast %46 : vector<1x8x30xf32> to vector<2x8x30xf32>
    %49 = arith.mulf %47, %48 : vector<2x8x30xf32>
    %50 = arith.addf %45, %49 : vector<2x8x30xf32>
    %51 = vector.shape_cast %50 : vector<2x8x30xf32> to vector<16x30xf32>
    %52 = tpu.iota {dimensions = array<i32: 1>} : vector<1x30xi32>
    %c0_i32_18 = arith.constant 0 : i32
    %53 = vector.broadcast %c0_i32_18 : i32 to vector<1x30xi32>
    %54 = arith.cmpi sge, %52, %53 : vector<1x30xi32>
    %c6_i32 = arith.constant 6 : i32
    %55 = vector.broadcast %c6_i32 : i32 to vector<1x30xi32>
    %56 = arith.cmpi slt, %52, %55 : vector<1x30xi32>
    %57 = arith.andi %54, %56 : vector<1x30xi1>
    %58 = arith.extui %57 : vector<1x30xi1> to vector<1x30xi32>
    %59 = arith.sitofp %58 : vector<1x30xi32> to vector<1x30xf32>
    %c6_i32_19 = arith.constant 6 : i32
    %60 = vector.broadcast %c6_i32_19 : i32 to vector<1x30xi32>
    %61 = arith.cmpi sge, %52, %60 : vector<1x30xi32>
    %c12_i32 = arith.constant 12 : i32
    %62 = vector.broadcast %c12_i32 : i32 to vector<1x30xi32>
    %63 = arith.cmpi slt, %52, %62 : vector<1x30xi32>
    %64 = arith.andi %61, %63 : vector<1x30xi1>
    %65 = arith.extui %64 : vector<1x30xi1> to vector<1x30xi32>
    %66 = arith.sitofp %65 : vector<1x30xi32> to vector<1x30xf32>
    %c12_i32_20 = arith.constant 12 : i32
    %67 = vector.broadcast %c12_i32_20 : i32 to vector<1x30xi32>
    %68 = arith.cmpi sge, %52, %67 : vector<1x30xi32>
    %c18_i32 = arith.constant 18 : i32
    %69 = vector.broadcast %c18_i32 : i32 to vector<1x30xi32>
    %70 = arith.cmpi slt, %52, %69 : vector<1x30xi32>
    %71 = arith.andi %68, %70 : vector<1x30xi1>
    %72 = arith.extui %71 : vector<1x30xi1> to vector<1x30xi32>
    %73 = arith.sitofp %72 : vector<1x30xi32> to vector<1x30xf32>
    %c18_i32_21 = arith.constant 18 : i32
    %74 = vector.broadcast %c18_i32_21 : i32 to vector<1x30xi32>
    %75 = arith.cmpi sge, %52, %74 : vector<1x30xi32>
    %c24_i32 = arith.constant 24 : i32
    %76 = vector.broadcast %c24_i32 : i32 to vector<1x30xi32>
    %77 = arith.cmpi slt, %52, %76 : vector<1x30xi32>
    %78 = arith.andi %75, %77 : vector<1x30xi1>
    %79 = arith.extui %78 : vector<1x30xi1> to vector<1x30xi32>
    %80 = arith.sitofp %79 : vector<1x30xi32> to vector<1x30xf32>
    %c24_i32_22 = arith.constant 24 : i32
    %81 = vector.broadcast %c24_i32_22 : i32 to vector<1x30xi32>
    %82 = arith.cmpi sge, %52, %81 : vector<1x30xi32>
    %c30_i32 = arith.constant 30 : i32
    %83 = vector.broadcast %c30_i32 : i32 to vector<1x30xi32>
    %84 = arith.cmpi slt, %52, %83 : vector<1x30xi32>
    %85 = arith.andi %82, %84 : vector<1x30xi1>
    %86 = arith.extui %85 : vector<1x30xi1> to vector<1x30xi32>
    %87 = arith.sitofp %86 : vector<1x30xi32> to vector<1x30xf32>
    %c0_23 = arith.constant 0 : index
    %c0_24 = arith.constant 0 : index
    %c0_25 = arith.constant 0 : index
    %c0_26 = arith.constant 0 : index
    %88 = vector.load %arg18[%c0_23, %c0_24, %c0_25, %c0_26] : memref<1x2x1x30xf32, #tpu.memory_space<vmem>>, vector<1x1x1x30xf32>
    %89 = vector.shape_cast %88 : vector<1x1x1x30xf32> to vector<1x30xf32>
    %c0_27 = arith.constant 0 : index
    %c0_28 = arith.constant 0 : index
    %c0_29 = arith.constant 0 : index
    %c0_30 = arith.constant 0 : index
    %90 = vector.load %arg19[%c0_27, %c0_28, %c0_29, %c0_30] : memref<1x2x1x30xf32, #tpu.memory_space<vmem>>, vector<1x1x1x30xf32>
    %91 = vector.shape_cast %90 : vector<1x1x1x30xf32> to vector<1x30xf32>
    %cst_31 = arith.constant dense<0.000000e+00> : vector<16xf32>
    %92 = vector.multi_reduction <add>, %38, %cst_31 [1] : vector<16x30xf32> to vector<16xf32>
    %93 = vector.shape_cast %92 : vector<16xf32> to vector<16x1xf32>
    %cst_32 = arith.constant 3.000000e+01 : f32
    %94 = vector.broadcast %cst_32 : f32 to vector<16x1xf32>
    %95 = arith.divf %93, %94 : vector<16x1xf32>
    %96 = vector.broadcast %95 : vector<16x1xf32> to vector<16x30xf32>
    %97 = arith.subf %38, %96 : vector<16x30xf32>
    %98 = arith.mulf %97, %97 : vector<16x30xf32>
    %cst_33 = arith.constant dense<0.000000e+00> : vector<16xf32>
    %99 = vector.multi_reduction <add>, %98, %cst_33 [1] : vector<16x30xf32> to vector<16xf32>
    %100 = vector.shape_cast %99 : vector<16xf32> to vector<16x1xf32>
    %cst_34 = arith.constant 3.000000e+01 : f32
    %101 = vector.broadcast %cst_34 : f32 to vector<16x1xf32>
    %102 = arith.divf %100, %101 : vector<16x1xf32>
    %cst_35 = arith.constant 9.99999974E-6 : f32
    %103 = vector.broadcast %cst_35 : f32 to vector<16x1xf32>
    %104 = arith.addf %102, %103 : vector<16x1xf32>
    %105 = math.rsqrt %104 : vector<16x1xf32>
    %106 = vector.broadcast %105 : vector<16x1xf32> to vector<16x30xf32>
    %107 = arith.mulf %97, %106 : vector<16x30xf32>
    %108 = vector.broadcast %89 : vector<1x30xf32> to vector<16x30xf32>
    %109 = arith.mulf %107, %108 : vector<16x30xf32>
    %110 = vector.broadcast %91 : vector<1x30xf32> to vector<16x30xf32>
    %111 = arith.addf %109, %110 : vector<16x30xf32>
    %cst_36 = arith.constant dense<0.000000e+00> : vector<16xf32>
    %112 = vector.multi_reduction <add>, %51, %cst_36 [1] : vector<16x30xf32> to vector<16xf32>
    %113 = vector.shape_cast %112 : vector<16xf32> to vector<16x1xf32>
    %cst_37 = arith.constant 3.000000e+01 : f32
    %114 = vector.broadcast %cst_37 : f32 to vector<16x1xf32>
    %115 = arith.divf %113, %114 : vector<16x1xf32>
    %116 = vector.broadcast %115 : vector<16x1xf32> to vector<16x30xf32>
    %117 = arith.subf %51, %116 : vector<16x30xf32>
    %118 = arith.mulf %117, %117 : vector<16x30xf32>
    %cst_38 = arith.constant dense<0.000000e+00> : vector<16xf32>
    %119 = vector.multi_reduction <add>, %118, %cst_38 [1] : vector<16x30xf32> to vector<16xf32>
    %120 = vector.shape_cast %119 : vector<16xf32> to vector<16x1xf32>
    %cst_39 = arith.constant 3.000000e+01 : f32
    %121 = vector.broadcast %cst_39 : f32 to vector<16x1xf32>
    %122 = arith.divf %120, %121 : vector<16x1xf32>
    %cst_40 = arith.constant 9.99999974E-6 : f32
    %123 = vector.broadcast %cst_40 : f32 to vector<16x1xf32>
    %124 = arith.addf %122, %123 : vector<16x1xf32>
    %125 = math.rsqrt %124 : vector<16x1xf32>
    %126 = vector.broadcast %125 : vector<16x1xf32> to vector<16x30xf32>
    %127 = arith.mulf %117, %126 : vector<16x30xf32>
    %128 = vector.broadcast %89 : vector<1x30xf32> to vector<16x30xf32>
    %129 = arith.mulf %127, %128 : vector<16x30xf32>
    %130 = vector.broadcast %91 : vector<1x30xf32> to vector<16x30xf32>
    %131 = arith.addf %129, %130 : vector<16x30xf32>
    %c0_41 = arith.constant 0 : index
    %c0_42 = arith.constant 0 : index
    %c0_43 = arith.constant 0 : index
    %c0_44 = arith.constant 0 : index
    %132 = vector.load %arg6[%c0_41, %c0_42, %c0_43, %c0_44] : memref<1x2x30x30xf32, #tpu.memory_space<vmem>>, vector<1x1x30x30xf32>
    %133 = vector.shape_cast %132 : vector<1x1x30x30xf32> to vector<30x30xf32>
    %cst_45 = arith.constant dense<0.000000e+00> : vector<16x30xf32>
    %134 = tpu.matmul %111, %133, %cst_45 {dimension_numbers = #tpu.dot_dimension_numbers<[1], [0], [0], [1], [0, 0, 1, 1], [], []>} : vector<16x30xf32>, vector<30x30xf32>, vector<16x30xf32> -> vector<16x30xf32>
    %c0_46 = arith.constant 0 : index
    %c0_47 = arith.constant 0 : index
    %c0_48 = arith.constant 0 : index
    %c0_49 = arith.constant 0 : index
    %135 = vector.load %arg7[%c0_46, %c0_47, %c0_48, %c0_49] : memref<1x2x1x30xf32, #tpu.memory_space<vmem>>, vector<1x1x1x30xf32>
    %136 = vector.shape_cast %135 : vector<1x1x1x30xf32> to vector<1x30xf32>
    %137 = vector.broadcast %136 : vector<1x30xf32> to vector<16x30xf32>
    %138 = arith.addf %134, %137 : vector<16x30xf32>
    %c0_50 = arith.constant 0 : index
    %c0_51 = arith.constant 0 : index
    %c0_52 = arith.constant 0 : index
    %c0_53 = arith.constant 0 : index
    %139 = vector.load %arg8[%c0_50, %c0_51, %c0_52, %c0_53] : memref<1x2x30x30xf32, #tpu.memory_space<vmem>>, vector<1x1x30x30xf32>
    %140 = vector.shape_cast %139 : vector<1x1x30x30xf32> to vector<30x30xf32>
    %cst_54 = arith.constant dense<0.000000e+00> : vector<16x30xf32>
    %141 = tpu.matmul %131, %140, %cst_54 {dimension_numbers = #tpu.dot_dimension_numbers<[1], [0], [0], [1], [0, 0, 1, 1], [], []>} : vector<16x30xf32>, vector<30x30xf32>, vector<16x30xf32> -> vector<16x30xf32>
    %c0_55 = arith.constant 0 : index
    %c0_56 = arith.constant 0 : index
    %c0_57 = arith.constant 0 : index
    %c0_58 = arith.constant 0 : index
    %142 = vector.load %arg9[%c0_55, %c0_56, %c0_57, %c0_58] : memref<1x2x1x30xf32, #tpu.memory_space<vmem>>, vector<1x1x1x30xf32>
    %143 = vector.shape_cast %142 : vector<1x1x1x30xf32> to vector<1x30xf32>
    %144 = vector.broadcast %143 : vector<1x30xf32> to vector<16x30xf32>
    %145 = arith.addf %141, %144 : vector<16x30xf32>
    %c0_59 = arith.constant 0 : index
    %c0_60 = arith.constant 0 : index
    %c0_61 = arith.constant 0 : index
    %c0_62 = arith.constant 0 : index
    %146 = vector.load %arg10[%c0_59, %c0_60, %c0_61, %c0_62] : memref<1x2x30x30xf32, #tpu.memory_space<vmem>>, vector<1x1x30x30xf32>
    %147 = vector.shape_cast %146 : vector<1x1x30x30xf32> to vector<30x30xf32>
    %cst_63 = arith.constant dense<0.000000e+00> : vector<16x30xf32>
    %148 = tpu.matmul %131, %147, %cst_63 {dimension_numbers = #tpu.dot_dimension_numbers<[1], [0], [0], [1], [0, 0, 1, 1], [], []>} : vector<16x30xf32>, vector<30x30xf32>, vector<16x30xf32> -> vector<16x30xf32>
    %c0_64 = arith.constant 0 : index
    %c0_65 = arith.constant 0 : index
    %c0_66 = arith.constant 0 : index
    %c0_67 = arith.constant 0 : index
    %149 = vector.load %arg11[%c0_64, %c0_65, %c0_66, %c0_67] : memref<1x2x1x30xf32, #tpu.memory_space<vmem>>, vector<1x1x1x30xf32>
    %150 = vector.shape_cast %149 : vector<1x1x1x30xf32> to vector<1x30xf32>
    %151 = vector.broadcast %150 : vector<1x30xf32> to vector<16x30xf32>
    %152 = arith.addf %148, %151 : vector<16x30xf32>
    %153 = vector.shape_cast %145 : vector<16x30xf32> to vector<2x8x30xf32>
    %cst_68 = arith.constant 0.000000e+00 : f32
    %154 = vector.broadcast %cst_68 : f32 to vector<16x30xf32>
    %155 = vector.broadcast %59 : vector<1x30xf32> to vector<16x30xf32>
    %156 = arith.mulf %138, %155 : vector<16x30xf32>
    %157 = vector.shape_cast %156 : vector<16x30xf32> to vector<2x8x30xf32>
    "tpu.trace_start"() <{level = 10 : i32, message = "bqd,bkd->bqk"}> : () -> ()
    %cst_69 = arith.constant dense<0.000000e+00> : vector<2x8x8xf32>
    %158 = tpu.matmul %157, %153, %cst_69 {dimension_numbers = #tpu.dot_dimension_numbers<[2], [2], [1], [1], [0, 0, 0, 1, 1, 1], [0], [0]>} : vector<2x8x30xf32>, vector<2x8x30xf32>, vector<2x8x8xf32> -> vector<2x8x8xf32>
    "tpu.trace_stop"() : () -> ()
    %cst_70 = arith.constant dense<0xFF800000> : vector<2x8xf32>
    %159 = vector.multi_reduction <maximumf>, %158, %cst_70 [2] : vector<2x8x8xf32> to vector<2x8xf32>
    %160 = vector.shape_cast %159 : vector<2x8xf32> to vector<2x8x1xf32>
    %161 = vector.broadcast %160 : vector<2x8x1xf32> to vector<2x8x8xf32>
    %162 = arith.subf %158, %161 : vector<2x8x8xf32>
    %163 = math.exp %162 : vector<2x8x8xf32>
    %cst_71 = arith.constant dense<0.000000e+00> : vector<2x8xf32>
    %164 = vector.multi_reduction <add>, %163, %cst_71 [2] : vector<2x8x8xf32> to vector<2x8xf32>
    %165 = vector.shape_cast %164 : vector<2x8xf32> to vector<2x8x1xf32>
    %166 = tpu.reciprocal %165 {approx = true} : vector<2x8x1xf32> -> vector<2x8x1xf32>
    %167 = vector.broadcast %166 : vector<2x8x1xf32> to vector<2x8x8xf32>
    %168 = arith.mulf %163, %167 : vector<2x8x8xf32>
    %169 = vector.broadcast %59 : vector<1x30xf32> to vector<16x30xf32>
    %170 = arith.mulf %152, %169 : vector<16x30xf32>
    %171 = vector.shape_cast %170 : vector<16x30xf32> to vector<2x8x30xf32>
    "tpu.trace_start"() <{level = 10 : i32, message = "bqk,bkd->bqd"}> : () -> ()
    %cst_72 = arith.constant dense<0.000000e+00> : vector<2x8x30xf32>
    %172 = tpu.matmul %168, %171, %cst_72 {dimension_numbers = #tpu.dot_dimension_numbers<[2], [1], [1], [2], [0, 0, 0, 1, 1, 2], [0], [0]>} : vector<2x8x8xf32>, vector<2x8x30xf32>, vector<2x8x30xf32> -> vector<2x8x30xf32>
    "tpu.trace_stop"() : () -> ()
    %173 = vector.shape_cast %172 : vector<2x8x30xf32> to vector<16x30xf32>
    %174 = arith.addf %154, %173 : vector<16x30xf32>
    %175 = vector.broadcast %66 : vector<1x30xf32> to vector<16x30xf32>
    %176 = arith.mulf %138, %175 : vector<16x30xf32>
    %177 = vector.shape_cast %176 : vector<16x30xf32> to vector<2x8x30xf32>
    "tpu.trace_start"() <{level = 10 : i32, message = "bqd,bkd->bqk"}> : () -> ()
    %cst_73 = arith.constant dense<0.000000e+00> : vector<2x8x8xf32>
    %178 = tpu.matmul %177, %153, %cst_73 {dimension_numbers = #tpu.dot_dimension_numbers<[2], [2], [1], [1], [0, 0, 0, 1, 1, 1], [0], [0]>} : vector<2x8x30xf32>, vector<2x8x30xf32>, vector<2x8x8xf32> -> vector<2x8x8xf32>
    "tpu.trace_stop"() : () -> ()
    %cst_74 = arith.constant dense<0xFF800000> : vector<2x8xf32>
    %179 = vector.multi_reduction <maximumf>, %178, %cst_74 [2] : vector<2x8x8xf32> to vector<2x8xf32>
    %180 = vector.shape_cast %179 : vector<2x8xf32> to vector<2x8x1xf32>
    %181 = vector.broadcast %180 : vector<2x8x1xf32> to vector<2x8x8xf32>
    %182 = arith.subf %178, %181 : vector<2x8x8xf32>
    %183 = math.exp %182 : vector<2x8x8xf32>
    %cst_75 = arith.constant dense<0.000000e+00> : vector<2x8xf32>
    %184 = vector.multi_reduction <add>, %183, %cst_75 [2] : vector<2x8x8xf32> to vector<2x8xf32>
    %185 = vector.shape_cast %184 : vector<2x8xf32> to vector<2x8x1xf32>
    %186 = tpu.reciprocal %185 {approx = true} : vector<2x8x1xf32> -> vector<2x8x1xf32>
    %187 = vector.broadcast %186 : vector<2x8x1xf32> to vector<2x8x8xf32>
    %188 = arith.mulf %183, %187 : vector<2x8x8xf32>
    %189 = vector.broadcast %66 : vector<1x30xf32> to vector<16x30xf32>
    %190 = arith.mulf %152, %189 : vector<16x30xf32>
    %191 = vector.shape_cast %190 : vector<16x30xf32> to vector<2x8x30xf32>
    "tpu.trace_start"() <{level = 10 : i32, message = "bqk,bkd->bqd"}> : () -> ()
    %cst_76 = arith.constant dense<0.000000e+00> : vector<2x8x30xf32>
    %192 = tpu.matmul %188, %191, %cst_76 {dimension_numbers = #tpu.dot_dimension_numbers<[2], [1], [1], [2], [0, 0, 0, 1, 1, 2], [0], [0]>} : vector<2x8x8xf32>, vector<2x8x30xf32>, vector<2x8x30xf32> -> vector<2x8x30xf32>
    "tpu.trace_stop"() : () -> ()
    %193 = vector.shape_cast %192 : vector<2x8x30xf32> to vector<16x30xf32>
    %194 = arith.addf %174, %193 : vector<16x30xf32>
    %195 = vector.broadcast %73 : vector<1x30xf32> to vector<16x30xf32>
    %196 = arith.mulf %138, %195 : vector<16x30xf32>
    %197 = vector.shape_cast %196 : vector<16x30xf32> to vector<2x8x30xf32>
    "tpu.trace_start"() <{level = 10 : i32, message = "bqd,bkd->bqk"}> : () -> ()
    %cst_77 = arith.constant dense<0.000000e+00> : vector<2x8x8xf32>
    %198 = tpu.matmul %197, %153, %cst_77 {dimension_numbers = #tpu.dot_dimension_numbers<[2], [2], [1], [1], [0, 0, 0, 1, 1, 1], [0], [0]>} : vector<2x8x30xf32>, vector<2x8x30xf32>, vector<2x8x8xf32> -> vector<2x8x8xf32>
    "tpu.trace_stop"() : () -> ()
    %cst_78 = arith.constant dense<0xFF800000> : vector<2x8xf32>
    %199 = vector.multi_reduction <maximumf>, %198, %cst_78 [2] : vector<2x8x8xf32> to vector<2x8xf32>
    %200 = vector.shape_cast %199 : vector<2x8xf32> to vector<2x8x1xf32>
    %201 = vector.broadcast %200 : vector<2x8x1xf32> to vector<2x8x8xf32>
    %202 = arith.subf %198, %201 : vector<2x8x8xf32>
    %203 = math.exp %202 : vector<2x8x8xf32>
    %cst_79 = arith.constant dense<0.000000e+00> : vector<2x8xf32>
    %204 = vector.multi_reduction <add>, %203, %cst_79 [2] : vector<2x8x8xf32> to vector<2x8xf32>
    %205 = vector.shape_cast %204 : vector<2x8xf32> to vector<2x8x1xf32>
    %206 = tpu.reciprocal %205 {approx = true} : vector<2x8x1xf32> -> vector<2x8x1xf32>
    %207 = vector.broadcast %206 : vector<2x8x1xf32> to vector<2x8x8xf32>
    %208 = arith.mulf %203, %207 : vector<2x8x8xf32>
    %209 = vector.broadcast %73 : vector<1x30xf32> to vector<16x30xf32>
    %210 = arith.mulf %152, %209 : vector<16x30xf32>
    %211 = vector.shape_cast %210 : vector<16x30xf32> to vector<2x8x30xf32>
    "tpu.trace_start"() <{level = 10 : i32, message = "bqk,bkd->bqd"}> : () -> ()
    %cst_80 = arith.constant dense<0.000000e+00> : vector<2x8x30xf32>
    %212 = tpu.matmul %208, %211, %cst_80 {dimension_numbers = #tpu.dot_dimension_numbers<[2], [1], [1], [2], [0, 0, 0, 1, 1, 2], [0], [0]>} : vector<2x8x8xf32>, vector<2x8x30xf32>, vector<2x8x30xf32> -> vector<2x8x30xf32>
    "tpu.trace_stop"() : () -> ()
    %213 = vector.shape_cast %212 : vector<2x8x30xf32> to vector<16x30xf32>
    %214 = arith.addf %194, %213 : vector<16x30xf32>
    %215 = vector.broadcast %80 : vector<1x30xf32> to vector<16x30xf32>
    %216 = arith.mulf %138, %215 : vector<16x30xf32>
    %217 = vector.shape_cast %216 : vector<16x30xf32> to vector<2x8x30xf32>
    "tpu.trace_start"() <{level = 10 : i32, message = "bqd,bkd->bqk"}> : () -> ()
    %cst_81 = arith.constant dense<0.000000e+00> : vector<2x8x8xf32>
    %218 = tpu.matmul %217, %153, %cst_81 {dimension_numbers = #tpu.dot_dimension_numbers<[2], [2], [1], [1], [0, 0, 0, 1, 1, 1], [0], [0]>} : vector<2x8x30xf32>, vector<2x8x30xf32>, vector<2x8x8xf32> -> vector<2x8x8xf32>
    "tpu.trace_stop"() : () -> ()
    %cst_82 = arith.constant dense<0xFF800000> : vector<2x8xf32>
    %219 = vector.multi_reduction <maximumf>, %218, %cst_82 [2] : vector<2x8x8xf32> to vector<2x8xf32>
    %220 = vector.shape_cast %219 : vector<2x8xf32> to vector<2x8x1xf32>
    %221 = vector.broadcast %220 : vector<2x8x1xf32> to vector<2x8x8xf32>
    %222 = arith.subf %218, %221 : vector<2x8x8xf32>
    %223 = math.exp %222 : vector<2x8x8xf32>
    %cst_83 = arith.constant dense<0.000000e+00> : vector<2x8xf32>
    %224 = vector.multi_reduction <add>, %223, %cst_83 [2] : vector<2x8x8xf32> to vector<2x8xf32>
    %225 = vector.shape_cast %224 : vector<2x8xf32> to vector<2x8x1xf32>
    %226 = tpu.reciprocal %225 {approx = true} : vector<2x8x1xf32> -> vector<2x8x1xf32>
    %227 = vector.broadcast %226 : vector<2x8x1xf32> to vector<2x8x8xf32>
    %228 = arith.mulf %223, %227 : vector<2x8x8xf32>
    %229 = vector.broadcast %80 : vector<1x30xf32> to vector<16x30xf32>
    %230 = arith.mulf %152, %229 : vector<16x30xf32>
    %231 = vector.shape_cast %230 : vector<16x30xf32> to vector<2x8x30xf32>
    "tpu.trace_start"() <{level = 10 : i32, message = "bqk,bkd->bqd"}> : () -> ()
    %cst_84 = arith.constant dense<0.000000e+00> : vector<2x8x30xf32>
    %232 = tpu.matmul %228, %231, %cst_84 {dimension_numbers = #tpu.dot_dimension_numbers<[2], [1], [1], [2], [0, 0, 0, 1, 1, 2], [0], [0]>} : vector<2x8x8xf32>, vector<2x8x30xf32>, vector<2x8x30xf32> -> vector<2x8x30xf32>
    "tpu.trace_stop"() : () -> ()
    %233 = vector.shape_cast %232 : vector<2x8x30xf32> to vector<16x30xf32>
    %234 = arith.addf %214, %233 : vector<16x30xf32>
    %235 = vector.broadcast %87 : vector<1x30xf32> to vector<16x30xf32>
    %236 = arith.mulf %138, %235 : vector<16x30xf32>
    %237 = vector.shape_cast %236 : vector<16x30xf32> to vector<2x8x30xf32>
    "tpu.trace_start"() <{level = 10 : i32, message = "bqd,bkd->bqk"}> : () -> ()
    %cst_85 = arith.constant dense<0.000000e+00> : vector<2x8x8xf32>
    %238 = tpu.matmul %237, %153, %cst_85 {dimension_numbers = #tpu.dot_dimension_numbers<[2], [2], [1], [1], [0, 0, 0, 1, 1, 1], [0], [0]>} : vector<2x8x30xf32>, vector<2x8x30xf32>, vector<2x8x8xf32> -> vector<2x8x8xf32>
    "tpu.trace_stop"() : () -> ()
    %cst_86 = arith.constant dense<0xFF800000> : vector<2x8xf32>
    %239 = vector.multi_reduction <maximumf>, %238, %cst_86 [2] : vector<2x8x8xf32> to vector<2x8xf32>
    %240 = vector.shape_cast %239 : vector<2x8xf32> to vector<2x8x1xf32>
    %241 = vector.broadcast %240 : vector<2x8x1xf32> to vector<2x8x8xf32>
    %242 = arith.subf %238, %241 : vector<2x8x8xf32>
    %243 = math.exp %242 : vector<2x8x8xf32>
    %cst_87 = arith.constant dense<0.000000e+00> : vector<2x8xf32>
    %244 = vector.multi_reduction <add>, %243, %cst_87 [2] : vector<2x8x8xf32> to vector<2x8xf32>
    %245 = vector.shape_cast %244 : vector<2x8xf32> to vector<2x8x1xf32>
    %246 = tpu.reciprocal %245 {approx = true} : vector<2x8x1xf32> -> vector<2x8x1xf32>
    %247 = vector.broadcast %246 : vector<2x8x1xf32> to vector<2x8x8xf32>
    %248 = arith.mulf %243, %247 : vector<2x8x8xf32>
    %249 = vector.broadcast %87 : vector<1x30xf32> to vector<16x30xf32>
    %250 = arith.mulf %152, %249 : vector<16x30xf32>
    %251 = vector.shape_cast %250 : vector<16x30xf32> to vector<2x8x30xf32>
    "tpu.trace_start"() <{level = 10 : i32, message = "bqk,bkd->bqd"}> : () -> ()
    %cst_88 = arith.constant dense<0.000000e+00> : vector<2x8x30xf32>
    %252 = tpu.matmul %248, %251, %cst_88 {dimension_numbers = #tpu.dot_dimension_numbers<[2], [1], [1], [2], [0, 0, 0, 1, 1, 2], [0], [0]>} : vector<2x8x8xf32>, vector<2x8x30xf32>, vector<2x8x30xf32> -> vector<2x8x30xf32>
    "tpu.trace_stop"() : () -> ()
    %253 = vector.shape_cast %252 : vector<2x8x30xf32> to vector<16x30xf32>
    %254 = arith.addf %234, %253 : vector<16x30xf32>
    %c0_89 = arith.constant 0 : index
    %c0_90 = arith.constant 0 : index
    %c0_91 = arith.constant 0 : index
    %c0_92 = arith.constant 0 : index
    %255 = vector.load %arg12[%c0_89, %c0_90, %c0_91, %c0_92] : memref<1x2x30x30xf32, #tpu.memory_space<vmem>>, vector<1x1x30x30xf32>
    %256 = vector.shape_cast %255 : vector<1x1x30x30xf32> to vector<30x30xf32>
    %cst_93 = arith.constant dense<0.000000e+00> : vector<16x30xf32>
    %257 = tpu.matmul %254, %256, %cst_93 {dimension_numbers = #tpu.dot_dimension_numbers<[1], [0], [0], [1], [0, 0, 1, 1], [], []>} : vector<16x30xf32>, vector<30x30xf32>, vector<16x30xf32> -> vector<16x30xf32>
    %258 = arith.addf %38, %257 : vector<16x30xf32>
    %c0_94 = arith.constant 0 : index
    %c0_95 = arith.constant 0 : index
    %c0_96 = arith.constant 0 : index
    %c0_97 = arith.constant 0 : index
    %259 = vector.load %arg13[%c0_94, %c0_95, %c0_96, %c0_97] : memref<1x2x1x30xf32, #tpu.memory_space<vmem>>, vector<1x1x1x30xf32>
    %260 = vector.shape_cast %259 : vector<1x1x1x30xf32> to vector<1x30xf32>
    %261 = vector.broadcast %260 : vector<1x30xf32> to vector<16x30xf32>
    %262 = arith.addf %258, %261 : vector<16x30xf32>
    %c0_98 = arith.constant 0 : index
    %c0_99 = arith.constant 0 : index
    %c0_100 = arith.constant 0 : index
    %c0_101 = arith.constant 0 : index
    %263 = vector.load %arg20[%c0_98, %c0_99, %c0_100, %c0_101] : memref<1x2x1x30xf32, #tpu.memory_space<vmem>>, vector<1x1x1x30xf32>
    %264 = vector.shape_cast %263 : vector<1x1x1x30xf32> to vector<1x30xf32>
    %c0_102 = arith.constant 0 : index
    %c0_103 = arith.constant 0 : index
    %c0_104 = arith.constant 0 : index
    %c0_105 = arith.constant 0 : index
    %265 = vector.load %arg21[%c0_102, %c0_103, %c0_104, %c0_105] : memref<1x2x1x30xf32, #tpu.memory_space<vmem>>, vector<1x1x1x30xf32>
    %266 = vector.shape_cast %265 : vector<1x1x1x30xf32> to vector<1x30xf32>
    %cst_106 = arith.constant dense<0.000000e+00> : vector<16xf32>
    %267 = vector.multi_reduction <add>, %262, %cst_106 [1] : vector<16x30xf32> to vector<16xf32>
    %268 = vector.shape_cast %267 : vector<16xf32> to vector<16x1xf32>
    %cst_107 = arith.constant 3.000000e+01 : f32
    %269 = vector.broadcast %cst_107 : f32 to vector<16x1xf32>
    %270 = arith.divf %268, %269 : vector<16x1xf32>
    %271 = vector.broadcast %270 : vector<16x1xf32> to vector<16x30xf32>
    %272 = arith.subf %262, %271 : vector<16x30xf32>
    %273 = arith.mulf %272, %272 : vector<16x30xf32>
    %cst_108 = arith.constant dense<0.000000e+00> : vector<16xf32>
    %274 = vector.multi_reduction <add>, %273, %cst_108 [1] : vector<16x30xf32> to vector<16xf32>
    %275 = vector.shape_cast %274 : vector<16xf32> to vector<16x1xf32>
    %cst_109 = arith.constant 3.000000e+01 : f32
    %276 = vector.broadcast %cst_109 : f32 to vector<16x1xf32>
    %277 = arith.divf %275, %276 : vector<16x1xf32>
    %cst_110 = arith.constant 9.99999974E-6 : f32
    %278 = vector.broadcast %cst_110 : f32 to vector<16x1xf32>
    %279 = arith.addf %277, %278 : vector<16x1xf32>
    %280 = math.rsqrt %279 : vector<16x1xf32>
    %281 = vector.broadcast %280 : vector<16x1xf32> to vector<16x30xf32>
    %282 = arith.mulf %272, %281 : vector<16x30xf32>
    %283 = vector.broadcast %264 : vector<1x30xf32> to vector<16x30xf32>
    %284 = arith.mulf %282, %283 : vector<16x30xf32>
    %285 = vector.broadcast %266 : vector<1x30xf32> to vector<16x30xf32>
    %286 = arith.addf %284, %285 : vector<16x30xf32>
    %c0_111 = arith.constant 0 : index
    %c0_112 = arith.constant 0 : index
    %c0_113 = arith.constant 0 : index
    %c0_114 = arith.constant 0 : index
    %287 = vector.load %arg14[%c0_111, %c0_112, %c0_113, %c0_114] : memref<1x2x30x120xf32, #tpu.memory_space<vmem>>, vector<1x1x30x120xf32>
    %288 = vector.shape_cast %287 : vector<1x1x30x120xf32> to vector<30x120xf32>
    %cst_115 = arith.constant dense<0.000000e+00> : vector<16x120xf32>
    %289 = tpu.matmul %286, %288, %cst_115 {dimension_numbers = #tpu.dot_dimension_numbers<[1], [0], [0], [1], [0, 0, 1, 1], [], []>} : vector<16x30xf32>, vector<30x120xf32>, vector<16x120xf32> -> vector<16x120xf32>
    %c0_116 = arith.constant 0 : index
    %c0_117 = arith.constant 0 : index
    %c0_118 = arith.constant 0 : index
    %c0_119 = arith.constant 0 : index
    %290 = vector.load %arg15[%c0_116, %c0_117, %c0_118, %c0_119] : memref<1x2x1x120xf32, #tpu.memory_space<vmem>>, vector<1x1x1x120xf32>
    %291 = vector.shape_cast %290 : vector<1x1x1x120xf32> to vector<1x120xf32>
    %292 = vector.broadcast %291 : vector<1x120xf32> to vector<16x120xf32>
    %293 = arith.addf %289, %292 : vector<16x120xf32>
    %cst_120 = arith.constant 0.000000e+00 : f32
    %294 = vector.broadcast %cst_120 : f32 to vector<16x120xf32>
    %295 = arith.maximumf %293, %294 : vector<16x120xf32>
    %c0_121 = arith.constant 0 : index
    %c0_122 = arith.constant 0 : index
    %c0_123 = arith.constant 0 : index
    %c0_124 = arith.constant 0 : index
    %296 = vector.load %arg16[%c0_121, %c0_122, %c0_123, %c0_124] : memref<1x2x120x30xf32, #tpu.memory_space<vmem>>, vector<1x1x120x30xf32>
    %297 = vector.shape_cast %296 : vector<1x1x120x30xf32> to vector<120x30xf32>
    %cst_125 = arith.constant dense<0.000000e+00> : vector<16x30xf32>
    %298 = tpu.matmul %295, %297, %cst_125 {dimension_numbers = #tpu.dot_dimension_numbers<[1], [0], [0], [1], [0, 0, 1, 1], [], []>} : vector<16x120xf32>, vector<120x30xf32>, vector<16x30xf32> -> vector<16x30xf32>
    %299 = arith.addf %262, %298 : vector<16x30xf32>
    %c0_126 = arith.constant 0 : index
    %c0_127 = arith.constant 0 : index
    %c0_128 = arith.constant 0 : index
    %c0_129 = arith.constant 0 : index
    %300 = vector.load %arg17[%c0_126, %c0_127, %c0_128, %c0_129] : memref<1x2x1x30xf32, #tpu.memory_space<vmem>>, vector<1x1x1x30xf32>
    %301 = vector.shape_cast %300 : vector<1x1x1x30xf32> to vector<1x30xf32>
    %302 = vector.broadcast %301 : vector<1x30xf32> to vector<16x30xf32>
    %303 = arith.addf %299, %302 : vector<16x30xf32>
    %c0_130 = arith.constant 0 : index
    %c1 = arith.constant 1 : index
    %c0_131 = arith.constant 0 : index
    %c0_132 = arith.constant 0 : index
    %304 = vector.load %arg18[%c0_130, %c1, %c0_131, %c0_132] : memref<1x2x1x30xf32, #tpu.memory_space<vmem>>, vector<1x1x1x30xf32>
    %305 = vector.shape_cast %304 : vector<1x1x1x30xf32> to vector<1x30xf32>
    %c0_133 = arith.constant 0 : index
    %c1_134 = arith.constant 1 : index
    %c0_135 = arith.constant 0 : index
    %c0_136 = arith.constant 0 : index
    %306 = vector.load %arg19[%c0_133, %c1_134, %c0_135, %c0_136] : memref<1x2x1x30xf32, #tpu.memory_space<vmem>>, vector<1x1x1x30xf32>
    %307 = vector.shape_cast %306 : vector<1x1x1x30xf32> to vector<1x30xf32>
    %cst_137 = arith.constant dense<0.000000e+00> : vector<16xf32>
    %308 = vector.multi_reduction <add>, %303, %cst_137 [1] : vector<16x30xf32> to vector<16xf32>
    %309 = vector.shape_cast %308 : vector<16xf32> to vector<16x1xf32>
    %cst_138 = arith.constant 3.000000e+01 : f32
    %310 = vector.broadcast %cst_138 : f32 to vector<16x1xf32>
    %311 = arith.divf %309, %310 : vector<16x1xf32>
    %312 = vector.broadcast %311 : vector<16x1xf32> to vector<16x30xf32>
    %313 = arith.subf %303, %312 : vector<16x30xf32>
    %314 = arith.mulf %313, %313 : vector<16x30xf32>
    %cst_139 = arith.constant dense<0.000000e+00> : vector<16xf32>
    %315 = vector.multi_reduction <add>, %314, %cst_139 [1] : vector<16x30xf32> to vector<16xf32>
    %316 = vector.shape_cast %315 : vector<16xf32> to vector<16x1xf32>
    %cst_140 = arith.constant 3.000000e+01 : f32
    %317 = vector.broadcast %cst_140 : f32 to vector<16x1xf32>
    %318 = arith.divf %316, %317 : vector<16x1xf32>
    %cst_141 = arith.constant 9.99999974E-6 : f32
    %319 = vector.broadcast %cst_141 : f32 to vector<16x1xf32>
    %320 = arith.addf %318, %319 : vector<16x1xf32>
    %321 = math.rsqrt %320 : vector<16x1xf32>
    %322 = vector.broadcast %321 : vector<16x1xf32> to vector<16x30xf32>
    %323 = arith.mulf %313, %322 : vector<16x30xf32>
    %324 = vector.broadcast %305 : vector<1x30xf32> to vector<16x30xf32>
    %325 = arith.mulf %323, %324 : vector<16x30xf32>
    %326 = vector.broadcast %307 : vector<1x30xf32> to vector<16x30xf32>
    %327 = arith.addf %325, %326 : vector<16x30xf32>
    %cst_142 = arith.constant dense<0.000000e+00> : vector<16xf32>
    %328 = vector.multi_reduction <add>, %51, %cst_142 [1] : vector<16x30xf32> to vector<16xf32>
    %329 = vector.shape_cast %328 : vector<16xf32> to vector<16x1xf32>
    %cst_143 = arith.constant 3.000000e+01 : f32
    %330 = vector.broadcast %cst_143 : f32 to vector<16x1xf32>
    %331 = arith.divf %329, %330 : vector<16x1xf32>
    %332 = vector.broadcast %331 : vector<16x1xf32> to vector<16x30xf32>
    %333 = arith.subf %51, %332 : vector<16x30xf32>
    %334 = arith.mulf %333, %333 : vector<16x30xf32>
    %cst_144 = arith.constant dense<0.000000e+00> : vector<16xf32>
    %335 = vector.multi_reduction <add>, %334, %cst_144 [1] : vector<16x30xf32> to vector<16xf32>
    %336 = vector.shape_cast %335 : vector<16xf32> to vector<16x1xf32>
    %cst_145 = arith.constant 3.000000e+01 : f32
    %337 = vector.broadcast %cst_145 : f32 to vector<16x1xf32>
    %338 = arith.divf %336, %337 : vector<16x1xf32>
    %cst_146 = arith.constant 9.99999974E-6 : f32
    %339 = vector.broadcast %cst_146 : f32 to vector<16x1xf32>
    %340 = arith.addf %338, %339 : vector<16x1xf32>
    %341 = math.rsqrt %340 : vector<16x1xf32>
    %342 = vector.broadcast %341 : vector<16x1xf32> to vector<16x30xf32>
    %343 = arith.mulf %333, %342 : vector<16x30xf32>
    %344 = vector.broadcast %305 : vector<1x30xf32> to vector<16x30xf32>
    %345 = arith.mulf %343, %344 : vector<16x30xf32>
    %346 = vector.broadcast %307 : vector<1x30xf32> to vector<16x30xf32>
    %347 = arith.addf %345, %346 : vector<16x30xf32>
    %c0_147 = arith.constant 0 : index
    %c1_148 = arith.constant 1 : index
    %c0_149 = arith.constant 0 : index
    %c0_150 = arith.constant 0 : index
    %348 = vector.load %arg6[%c0_147, %c1_148, %c0_149, %c0_150] : memref<1x2x30x30xf32, #tpu.memory_space<vmem>>, vector<1x1x30x30xf32>
    %349 = vector.shape_cast %348 : vector<1x1x30x30xf32> to vector<30x30xf32>
    %cst_151 = arith.constant dense<0.000000e+00> : vector<16x30xf32>
    %350 = tpu.matmul %327, %349, %cst_151 {dimension_numbers = #tpu.dot_dimension_numbers<[1], [0], [0], [1], [0, 0, 1, 1], [], []>} : vector<16x30xf32>, vector<30x30xf32>, vector<16x30xf32> -> vector<16x30xf32>
    %c0_152 = arith.constant 0 : index
    %c1_153 = arith.constant 1 : index
    %c0_154 = arith.constant 0 : index
    %c0_155 = arith.constant 0 : index
    %351 = vector.load %arg7[%c0_152, %c1_153, %c0_154, %c0_155] : memref<1x2x1x30xf32, #tpu.memory_space<vmem>>, vector<1x1x1x30xf32>
    %352 = vector.shape_cast %351 : vector<1x1x1x30xf32> to vector<1x30xf32>
    %353 = vector.broadcast %352 : vector<1x30xf32> to vector<16x30xf32>
    %354 = arith.addf %350, %353 : vector<16x30xf32>
    %c0_156 = arith.constant 0 : index
    %c1_157 = arith.constant 1 : index
    %c0_158 = arith.constant 0 : index
    %c0_159 = arith.constant 0 : index
    %355 = vector.load %arg8[%c0_156, %c1_157, %c0_158, %c0_159] : memref<1x2x30x30xf32, #tpu.memory_space<vmem>>, vector<1x1x30x30xf32>
    %356 = vector.shape_cast %355 : vector<1x1x30x30xf32> to vector<30x30xf32>
    %cst_160 = arith.constant dense<0.000000e+00> : vector<16x30xf32>
    %357 = tpu.matmul %347, %356, %cst_160 {dimension_numbers = #tpu.dot_dimension_numbers<[1], [0], [0], [1], [0, 0, 1, 1], [], []>} : vector<16x30xf32>, vector<30x30xf32>, vector<16x30xf32> -> vector<16x30xf32>
    %c0_161 = arith.constant 0 : index
    %c1_162 = arith.constant 1 : index
    %c0_163 = arith.constant 0 : index
    %c0_164 = arith.constant 0 : index
    %358 = vector.load %arg9[%c0_161, %c1_162, %c0_163, %c0_164] : memref<1x2x1x30xf32, #tpu.memory_space<vmem>>, vector<1x1x1x30xf32>
    %359 = vector.shape_cast %358 : vector<1x1x1x30xf32> to vector<1x30xf32>
    %360 = vector.broadcast %359 : vector<1x30xf32> to vector<16x30xf32>
    %361 = arith.addf %357, %360 : vector<16x30xf32>
    %c0_165 = arith.constant 0 : index
    %c1_166 = arith.constant 1 : index
    %c0_167 = arith.constant 0 : index
    %c0_168 = arith.constant 0 : index
    %362 = vector.load %arg10[%c0_165, %c1_166, %c0_167, %c0_168] : memref<1x2x30x30xf32, #tpu.memory_space<vmem>>, vector<1x1x30x30xf32>
    %363 = vector.shape_cast %362 : vector<1x1x30x30xf32> to vector<30x30xf32>
    %cst_169 = arith.constant dense<0.000000e+00> : vector<16x30xf32>
    %364 = tpu.matmul %347, %363, %cst_169 {dimension_numbers = #tpu.dot_dimension_numbers<[1], [0], [0], [1], [0, 0, 1, 1], [], []>} : vector<16x30xf32>, vector<30x30xf32>, vector<16x30xf32> -> vector<16x30xf32>
    %c0_170 = arith.constant 0 : index
    %c1_171 = arith.constant 1 : index
    %c0_172 = arith.constant 0 : index
    %c0_173 = arith.constant 0 : index
    %365 = vector.load %arg11[%c0_170, %c1_171, %c0_172, %c0_173] : memref<1x2x1x30xf32, #tpu.memory_space<vmem>>, vector<1x1x1x30xf32>
    %366 = vector.shape_cast %365 : vector<1x1x1x30xf32> to vector<1x30xf32>
    %367 = vector.broadcast %366 : vector<1x30xf32> to vector<16x30xf32>
    %368 = arith.addf %364, %367 : vector<16x30xf32>
    %369 = vector.shape_cast %361 : vector<16x30xf32> to vector<2x8x30xf32>
    %cst_174 = arith.constant 0.000000e+00 : f32
    %370 = vector.broadcast %cst_174 : f32 to vector<16x30xf32>
    %371 = vector.broadcast %59 : vector<1x30xf32> to vector<16x30xf32>
    %372 = arith.mulf %354, %371 : vector<16x30xf32>
    %373 = vector.shape_cast %372 : vector<16x30xf32> to vector<2x8x30xf32>
    "tpu.trace_start"() <{level = 10 : i32, message = "bqd,bkd->bqk"}> : () -> ()
    %cst_175 = arith.constant dense<0.000000e+00> : vector<2x8x8xf32>
    %374 = tpu.matmul %373, %369, %cst_175 {dimension_numbers = #tpu.dot_dimension_numbers<[2], [2], [1], [1], [0, 0, 0, 1, 1, 1], [0], [0]>} : vector<2x8x30xf32>, vector<2x8x30xf32>, vector<2x8x8xf32> -> vector<2x8x8xf32>
    "tpu.trace_stop"() : () -> ()
    %cst_176 = arith.constant dense<0xFF800000> : vector<2x8xf32>
    %375 = vector.multi_reduction <maximumf>, %374, %cst_176 [2] : vector<2x8x8xf32> to vector<2x8xf32>
    %376 = vector.shape_cast %375 : vector<2x8xf32> to vector<2x8x1xf32>
    %377 = vector.broadcast %376 : vector<2x8x1xf32> to vector<2x8x8xf32>
    %378 = arith.subf %374, %377 : vector<2x8x8xf32>
    %379 = math.exp %378 : vector<2x8x8xf32>
    %cst_177 = arith.constant dense<0.000000e+00> : vector<2x8xf32>
    %380 = vector.multi_reduction <add>, %379, %cst_177 [2] : vector<2x8x8xf32> to vector<2x8xf32>
    %381 = vector.shape_cast %380 : vector<2x8xf32> to vector<2x8x1xf32>
    %382 = tpu.reciprocal %381 {approx = true} : vector<2x8x1xf32> -> vector<2x8x1xf32>
    %383 = vector.broadcast %382 : vector<2x8x1xf32> to vector<2x8x8xf32>
    %384 = arith.mulf %379, %383 : vector<2x8x8xf32>
    %385 = vector.broadcast %59 : vector<1x30xf32> to vector<16x30xf32>
    %386 = arith.mulf %368, %385 : vector<16x30xf32>
    %387 = vector.shape_cast %386 : vector<16x30xf32> to vector<2x8x30xf32>
    "tpu.trace_start"() <{level = 10 : i32, message = "bqk,bkd->bqd"}> : () -> ()
    %cst_178 = arith.constant dense<0.000000e+00> : vector<2x8x30xf32>
    %388 = tpu.matmul %384, %387, %cst_178 {dimension_numbers = #tpu.dot_dimension_numbers<[2], [1], [1], [2], [0, 0, 0, 1, 1, 2], [0], [0]>} : vector<2x8x8xf32>, vector<2x8x30xf32>, vector<2x8x30xf32> -> vector<2x8x30xf32>
    "tpu.trace_stop"() : () -> ()
    %389 = vector.shape_cast %388 : vector<2x8x30xf32> to vector<16x30xf32>
    %390 = arith.addf %370, %389 : vector<16x30xf32>
    %391 = vector.broadcast %66 : vector<1x30xf32> to vector<16x30xf32>
    %392 = arith.mulf %354, %391 : vector<16x30xf32>
    %393 = vector.shape_cast %392 : vector<16x30xf32> to vector<2x8x30xf32>
    "tpu.trace_start"() <{level = 10 : i32, message = "bqd,bkd->bqk"}> : () -> ()
    %cst_179 = arith.constant dense<0.000000e+00> : vector<2x8x8xf32>
    %394 = tpu.matmul %393, %369, %cst_179 {dimension_numbers = #tpu.dot_dimension_numbers<[2], [2], [1], [1], [0, 0, 0, 1, 1, 1], [0], [0]>} : vector<2x8x30xf32>, vector<2x8x30xf32>, vector<2x8x8xf32> -> vector<2x8x8xf32>
    "tpu.trace_stop"() : () -> ()
    %cst_180 = arith.constant dense<0xFF800000> : vector<2x8xf32>
    %395 = vector.multi_reduction <maximumf>, %394, %cst_180 [2] : vector<2x8x8xf32> to vector<2x8xf32>
    %396 = vector.shape_cast %395 : vector<2x8xf32> to vector<2x8x1xf32>
    %397 = vector.broadcast %396 : vector<2x8x1xf32> to vector<2x8x8xf32>
    %398 = arith.subf %394, %397 : vector<2x8x8xf32>
    %399 = math.exp %398 : vector<2x8x8xf32>
    %cst_181 = arith.constant dense<0.000000e+00> : vector<2x8xf32>
    %400 = vector.multi_reduction <add>, %399, %cst_181 [2] : vector<2x8x8xf32> to vector<2x8xf32>
    %401 = vector.shape_cast %400 : vector<2x8xf32> to vector<2x8x1xf32>
    %402 = tpu.reciprocal %401 {approx = true} : vector<2x8x1xf32> -> vector<2x8x1xf32>
    %403 = vector.broadcast %402 : vector<2x8x1xf32> to vector<2x8x8xf32>
    %404 = arith.mulf %399, %403 : vector<2x8x8xf32>
    %405 = vector.broadcast %66 : vector<1x30xf32> to vector<16x30xf32>
    %406 = arith.mulf %368, %405 : vector<16x30xf32>
    %407 = vector.shape_cast %406 : vector<16x30xf32> to vector<2x8x30xf32>
    "tpu.trace_start"() <{level = 10 : i32, message = "bqk,bkd->bqd"}> : () -> ()
    %cst_182 = arith.constant dense<0.000000e+00> : vector<2x8x30xf32>
    %408 = tpu.matmul %404, %407, %cst_182 {dimension_numbers = #tpu.dot_dimension_numbers<[2], [1], [1], [2], [0, 0, 0, 1, 1, 2], [0], [0]>} : vector<2x8x8xf32>, vector<2x8x30xf32>, vector<2x8x30xf32> -> vector<2x8x30xf32>
    "tpu.trace_stop"() : () -> ()
    %409 = vector.shape_cast %408 : vector<2x8x30xf32> to vector<16x30xf32>
    %410 = arith.addf %390, %409 : vector<16x30xf32>
    %411 = vector.broadcast %73 : vector<1x30xf32> to vector<16x30xf32>
    %412 = arith.mulf %354, %411 : vector<16x30xf32>
    %413 = vector.shape_cast %412 : vector<16x30xf32> to vector<2x8x30xf32>
    "tpu.trace_start"() <{level = 10 : i32, message = "bqd,bkd->bqk"}> : () -> ()
    %cst_183 = arith.constant dense<0.000000e+00> : vector<2x8x8xf32>
    %414 = tpu.matmul %413, %369, %cst_183 {dimension_numbers = #tpu.dot_dimension_numbers<[2], [2], [1], [1], [0, 0, 0, 1, 1, 1], [0], [0]>} : vector<2x8x30xf32>, vector<2x8x30xf32>, vector<2x8x8xf32> -> vector<2x8x8xf32>
    "tpu.trace_stop"() : () -> ()
    %cst_184 = arith.constant dense<0xFF800000> : vector<2x8xf32>
    %415 = vector.multi_reduction <maximumf>, %414, %cst_184 [2] : vector<2x8x8xf32> to vector<2x8xf32>
    %416 = vector.shape_cast %415 : vector<2x8xf32> to vector<2x8x1xf32>
    %417 = vector.broadcast %416 : vector<2x8x1xf32> to vector<2x8x8xf32>
    %418 = arith.subf %414, %417 : vector<2x8x8xf32>
    %419 = math.exp %418 : vector<2x8x8xf32>
    %cst_185 = arith.constant dense<0.000000e+00> : vector<2x8xf32>
    %420 = vector.multi_reduction <add>, %419, %cst_185 [2] : vector<2x8x8xf32> to vector<2x8xf32>
    %421 = vector.shape_cast %420 : vector<2x8xf32> to vector<2x8x1xf32>
    %422 = tpu.reciprocal %421 {approx = true} : vector<2x8x1xf32> -> vector<2x8x1xf32>
    %423 = vector.broadcast %422 : vector<2x8x1xf32> to vector<2x8x8xf32>
    %424 = arith.mulf %419, %423 : vector<2x8x8xf32>
    %425 = vector.broadcast %73 : vector<1x30xf32> to vector<16x30xf32>
    %426 = arith.mulf %368, %425 : vector<16x30xf32>
    %427 = vector.shape_cast %426 : vector<16x30xf32> to vector<2x8x30xf32>
    "tpu.trace_start"() <{level = 10 : i32, message = "bqk,bkd->bqd"}> : () -> ()
    %cst_186 = arith.constant dense<0.000000e+00> : vector<2x8x30xf32>
    %428 = tpu.matmul %424, %427, %cst_186 {dimension_numbers = #tpu.dot_dimension_numbers<[2], [1], [1], [2], [0, 0, 0, 1, 1, 2], [0], [0]>} : vector<2x8x8xf32>, vector<2x8x30xf32>, vector<2x8x30xf32> -> vector<2x8x30xf32>
    "tpu.trace_stop"() : () -> ()
    %429 = vector.shape_cast %428 : vector<2x8x30xf32> to vector<16x30xf32>
    %430 = arith.addf %410, %429 : vector<16x30xf32>
    %431 = vector.broadcast %80 : vector<1x30xf32> to vector<16x30xf32>
    %432 = arith.mulf %354, %431 : vector<16x30xf32>
    %433 = vector.shape_cast %432 : vector<16x30xf32> to vector<2x8x30xf32>
    "tpu.trace_start"() <{level = 10 : i32, message = "bqd,bkd->bqk"}> : () -> ()
    %cst_187 = arith.constant dense<0.000000e+00> : vector<2x8x8xf32>
    %434 = tpu.matmul %433, %369, %cst_187 {dimension_numbers = #tpu.dot_dimension_numbers<[2], [2], [1], [1], [0, 0, 0, 1, 1, 1], [0], [0]>} : vector<2x8x30xf32>, vector<2x8x30xf32>, vector<2x8x8xf32> -> vector<2x8x8xf32>
    "tpu.trace_stop"() : () -> ()
    %cst_188 = arith.constant dense<0xFF800000> : vector<2x8xf32>
    %435 = vector.multi_reduction <maximumf>, %434, %cst_188 [2] : vector<2x8x8xf32> to vector<2x8xf32>
    %436 = vector.shape_cast %435 : vector<2x8xf32> to vector<2x8x1xf32>
    %437 = vector.broadcast %436 : vector<2x8x1xf32> to vector<2x8x8xf32>
    %438 = arith.subf %434, %437 : vector<2x8x8xf32>
    %439 = math.exp %438 : vector<2x8x8xf32>
    %cst_189 = arith.constant dense<0.000000e+00> : vector<2x8xf32>
    %440 = vector.multi_reduction <add>, %439, %cst_189 [2] : vector<2x8x8xf32> to vector<2x8xf32>
    %441 = vector.shape_cast %440 : vector<2x8xf32> to vector<2x8x1xf32>
    %442 = tpu.reciprocal %441 {approx = true} : vector<2x8x1xf32> -> vector<2x8x1xf32>
    %443 = vector.broadcast %442 : vector<2x8x1xf32> to vector<2x8x8xf32>
    %444 = arith.mulf %439, %443 : vector<2x8x8xf32>
    %445 = vector.broadcast %80 : vector<1x30xf32> to vector<16x30xf32>
    %446 = arith.mulf %368, %445 : vector<16x30xf32>
    %447 = vector.shape_cast %446 : vector<16x30xf32> to vector<2x8x30xf32>
    "tpu.trace_start"() <{level = 10 : i32, message = "bqk,bkd->bqd"}> : () -> ()
    %cst_190 = arith.constant dense<0.000000e+00> : vector<2x8x30xf32>
    %448 = tpu.matmul %444, %447, %cst_190 {dimension_numbers = #tpu.dot_dimension_numbers<[2], [1], [1], [2], [0, 0, 0, 1, 1, 2], [0], [0]>} : vector<2x8x8xf32>, vector<2x8x30xf32>, vector<2x8x30xf32> -> vector<2x8x30xf32>
    "tpu.trace_stop"() : () -> ()
    %449 = vector.shape_cast %448 : vector<2x8x30xf32> to vector<16x30xf32>
    %450 = arith.addf %430, %449 : vector<16x30xf32>
    %451 = vector.broadcast %87 : vector<1x30xf32> to vector<16x30xf32>
    %452 = arith.mulf %354, %451 : vector<16x30xf32>
    %453 = vector.shape_cast %452 : vector<16x30xf32> to vector<2x8x30xf32>
    "tpu.trace_start"() <{level = 10 : i32, message = "bqd,bkd->bqk"}> : () -> ()
    %cst_191 = arith.constant dense<0.000000e+00> : vector<2x8x8xf32>
    %454 = tpu.matmul %453, %369, %cst_191 {dimension_numbers = #tpu.dot_dimension_numbers<[2], [2], [1], [1], [0, 0, 0, 1, 1, 1], [0], [0]>} : vector<2x8x30xf32>, vector<2x8x30xf32>, vector<2x8x8xf32> -> vector<2x8x8xf32>
    "tpu.trace_stop"() : () -> ()
    %cst_192 = arith.constant dense<0xFF800000> : vector<2x8xf32>
    %455 = vector.multi_reduction <maximumf>, %454, %cst_192 [2] : vector<2x8x8xf32> to vector<2x8xf32>
    %456 = vector.shape_cast %455 : vector<2x8xf32> to vector<2x8x1xf32>
    %457 = vector.broadcast %456 : vector<2x8x1xf32> to vector<2x8x8xf32>
    %458 = arith.subf %454, %457 : vector<2x8x8xf32>
    %459 = math.exp %458 : vector<2x8x8xf32>
    %cst_193 = arith.constant dense<0.000000e+00> : vector<2x8xf32>
    %460 = vector.multi_reduction <add>, %459, %cst_193 [2] : vector<2x8x8xf32> to vector<2x8xf32>
    %461 = vector.shape_cast %460 : vector<2x8xf32> to vector<2x8x1xf32>
    %462 = tpu.reciprocal %461 {approx = true} : vector<2x8x1xf32> -> vector<2x8x1xf32>
    %463 = vector.broadcast %462 : vector<2x8x1xf32> to vector<2x8x8xf32>
    %464 = arith.mulf %459, %463 : vector<2x8x8xf32>
    %465 = vector.broadcast %87 : vector<1x30xf32> to vector<16x30xf32>
    %466 = arith.mulf %368, %465 : vector<16x30xf32>
    %467 = vector.shape_cast %466 : vector<16x30xf32> to vector<2x8x30xf32>
    "tpu.trace_start"() <{level = 10 : i32, message = "bqk,bkd->bqd"}> : () -> ()
    %cst_194 = arith.constant dense<0.000000e+00> : vector<2x8x30xf32>
    %468 = tpu.matmul %464, %467, %cst_194 {dimension_numbers = #tpu.dot_dimension_numbers<[2], [1], [1], [2], [0, 0, 0, 1, 1, 2], [0], [0]>} : vector<2x8x8xf32>, vector<2x8x30xf32>, vector<2x8x30xf32> -> vector<2x8x30xf32>
    "tpu.trace_stop"() : () -> ()
    %469 = vector.shape_cast %468 : vector<2x8x30xf32> to vector<16x30xf32>
    %470 = arith.addf %450, %469 : vector<16x30xf32>
    %c0_195 = arith.constant 0 : index
    %c1_196 = arith.constant 1 : index
    %c0_197 = arith.constant 0 : index
    %c0_198 = arith.constant 0 : index
    %471 = vector.load %arg12[%c0_195, %c1_196, %c0_197, %c0_198] : memref<1x2x30x30xf32, #tpu.memory_space<vmem>>, vector<1x1x30x30xf32>
    %472 = vector.shape_cast %471 : vector<1x1x30x30xf32> to vector<30x30xf32>
    %cst_199 = arith.constant dense<0.000000e+00> : vector<16x30xf32>
    %473 = tpu.matmul %470, %472, %cst_199 {dimension_numbers = #tpu.dot_dimension_numbers<[1], [0], [0], [1], [0, 0, 1, 1], [], []>} : vector<16x30xf32>, vector<30x30xf32>, vector<16x30xf32> -> vector<16x30xf32>
    %474 = arith.addf %303, %473 : vector<16x30xf32>
    %c0_200 = arith.constant 0 : index
    %c1_201 = arith.constant 1 : index
    %c0_202 = arith.constant 0 : index
    %c0_203 = arith.constant 0 : index
    %475 = vector.load %arg13[%c0_200, %c1_201, %c0_202, %c0_203] : memref<1x2x1x30xf32, #tpu.memory_space<vmem>>, vector<1x1x1x30xf32>
    %476 = vector.shape_cast %475 : vector<1x1x1x30xf32> to vector<1x30xf32>
    %477 = vector.broadcast %476 : vector<1x30xf32> to vector<16x30xf32>
    %478 = arith.addf %474, %477 : vector<16x30xf32>
    %c0_204 = arith.constant 0 : index
    %c1_205 = arith.constant 1 : index
    %c0_206 = arith.constant 0 : index
    %c0_207 = arith.constant 0 : index
    %479 = vector.load %arg20[%c0_204, %c1_205, %c0_206, %c0_207] : memref<1x2x1x30xf32, #tpu.memory_space<vmem>>, vector<1x1x1x30xf32>
    %480 = vector.shape_cast %479 : vector<1x1x1x30xf32> to vector<1x30xf32>
    %c0_208 = arith.constant 0 : index
    %c1_209 = arith.constant 1 : index
    %c0_210 = arith.constant 0 : index
    %c0_211 = arith.constant 0 : index
    %481 = vector.load %arg21[%c0_208, %c1_209, %c0_210, %c0_211] : memref<1x2x1x30xf32, #tpu.memory_space<vmem>>, vector<1x1x1x30xf32>
    %482 = vector.shape_cast %481 : vector<1x1x1x30xf32> to vector<1x30xf32>
    %cst_212 = arith.constant dense<0.000000e+00> : vector<16xf32>
    %483 = vector.multi_reduction <add>, %478, %cst_212 [1] : vector<16x30xf32> to vector<16xf32>
    %484 = vector.shape_cast %483 : vector<16xf32> to vector<16x1xf32>
    %cst_213 = arith.constant 3.000000e+01 : f32
    %485 = vector.broadcast %cst_213 : f32 to vector<16x1xf32>
    %486 = arith.divf %484, %485 : vector<16x1xf32>
    %487 = vector.broadcast %486 : vector<16x1xf32> to vector<16x30xf32>
    %488 = arith.subf %478, %487 : vector<16x30xf32>
    %489 = arith.mulf %488, %488 : vector<16x30xf32>
    %cst_214 = arith.constant dense<0.000000e+00> : vector<16xf32>
    %490 = vector.multi_reduction <add>, %489, %cst_214 [1] : vector<16x30xf32> to vector<16xf32>
    %491 = vector.shape_cast %490 : vector<16xf32> to vector<16x1xf32>
    %cst_215 = arith.constant 3.000000e+01 : f32
    %492 = vector.broadcast %cst_215 : f32 to vector<16x1xf32>
    %493 = arith.divf %491, %492 : vector<16x1xf32>
    %cst_216 = arith.constant 9.99999974E-6 : f32
    %494 = vector.broadcast %cst_216 : f32 to vector<16x1xf32>
    %495 = arith.addf %493, %494 : vector<16x1xf32>
    %496 = math.rsqrt %495 : vector<16x1xf32>
    %497 = vector.broadcast %496 : vector<16x1xf32> to vector<16x30xf32>
    %498 = arith.mulf %488, %497 : vector<16x30xf32>
    %499 = vector.broadcast %480 : vector<1x30xf32> to vector<16x30xf32>
    %500 = arith.mulf %498, %499 : vector<16x30xf32>
    %501 = vector.broadcast %482 : vector<1x30xf32> to vector<16x30xf32>
    %502 = arith.addf %500, %501 : vector<16x30xf32>
    %c0_217 = arith.constant 0 : index
    %c1_218 = arith.constant 1 : index
    %c0_219 = arith.constant 0 : index
    %c0_220 = arith.constant 0 : index
    %503 = vector.load %arg14[%c0_217, %c1_218, %c0_219, %c0_220] : memref<1x2x30x120xf32, #tpu.memory_space<vmem>>, vector<1x1x30x120xf32>
    %504 = vector.shape_cast %503 : vector<1x1x30x120xf32> to vector<30x120xf32>
    %cst_221 = arith.constant dense<0.000000e+00> : vector<16x120xf32>
    %505 = tpu.matmul %502, %504, %cst_221 {dimension_numbers = #tpu.dot_dimension_numbers<[1], [0], [0], [1], [0, 0, 1, 1], [], []>} : vector<16x30xf32>, vector<30x120xf32>, vector<16x120xf32> -> vector<16x120xf32>
    %c0_222 = arith.constant 0 : index
    %c1_223 = arith.constant 1 : index
    %c0_224 = arith.constant 0 : index
    %c0_225 = arith.constant 0 : index
    %506 = vector.load %arg15[%c0_222, %c1_223, %c0_224, %c0_225] : memref<1x2x1x120xf32, #tpu.memory_space<vmem>>, vector<1x1x1x120xf32>
    %507 = vector.shape_cast %506 : vector<1x1x1x120xf32> to vector<1x120xf32>
    %508 = vector.broadcast %507 : vector<1x120xf32> to vector<16x120xf32>
    %509 = arith.addf %505, %508 : vector<16x120xf32>
    %cst_226 = arith.constant 0.000000e+00 : f32
    %510 = vector.broadcast %cst_226 : f32 to vector<16x120xf32>
    %511 = arith.maximumf %509, %510 : vector<16x120xf32>
    %c0_227 = arith.constant 0 : index
    %c1_228 = arith.constant 1 : index
    %c0_229 = arith.constant 0 : index
    %c0_230 = arith.constant 0 : index
    %512 = vector.load %arg16[%c0_227, %c1_228, %c0_229, %c0_230] : memref<1x2x120x30xf32, #tpu.memory_space<vmem>>, vector<1x1x120x30xf32>
    %513 = vector.shape_cast %512 : vector<1x1x120x30xf32> to vector<120x30xf32>
    %cst_231 = arith.constant dense<0.000000e+00> : vector<16x30xf32>
    %514 = tpu.matmul %511, %513, %cst_231 {dimension_numbers = #tpu.dot_dimension_numbers<[1], [0], [0], [1], [0, 0, 1, 1], [], []>} : vector<16x120xf32>, vector<120x30xf32>, vector<16x30xf32> -> vector<16x30xf32>
    %515 = arith.addf %478, %514 : vector<16x30xf32>
    %c0_232 = arith.constant 0 : index
    %c1_233 = arith.constant 1 : index
    %c0_234 = arith.constant 0 : index
    %c0_235 = arith.constant 0 : index
    %516 = vector.load %arg17[%c0_232, %c1_233, %c0_234, %c0_235] : memref<1x2x1x30xf32, #tpu.memory_space<vmem>>, vector<1x1x1x30xf32>
    %517 = vector.shape_cast %516 : vector<1x1x1x30xf32> to vector<1x30xf32>
    %518 = vector.broadcast %517 : vector<1x30xf32> to vector<16x30xf32>
    %519 = arith.addf %515, %518 : vector<16x30xf32>
    %c0_236 = arith.constant 0 : index
    %c0_237 = arith.constant 0 : index
    %c0_238 = arith.constant 0 : index
    %520 = vector.load %arg22[%c0_236, %c0_237, %c0_238] : memref<1x1x30xf32, #tpu.memory_space<vmem>>, vector<1x1x30xf32>
    %521 = vector.shape_cast %520 : vector<1x1x30xf32> to vector<1x30xf32>
    %c0_239 = arith.constant 0 : index
    %c0_240 = arith.constant 0 : index
    %c0_241 = arith.constant 0 : index
    %522 = vector.load %arg23[%c0_239, %c0_240, %c0_241] : memref<1x1x30xf32, #tpu.memory_space<vmem>>, vector<1x1x30xf32>
    %523 = vector.shape_cast %522 : vector<1x1x30xf32> to vector<1x30xf32>
    %cst_242 = arith.constant dense<0.000000e+00> : vector<16xf32>
    %524 = vector.multi_reduction <add>, %519, %cst_242 [1] : vector<16x30xf32> to vector<16xf32>
    %525 = vector.shape_cast %524 : vector<16xf32> to vector<16x1xf32>
    %cst_243 = arith.constant 3.000000e+01 : f32
    %526 = vector.broadcast %cst_243 : f32 to vector<16x1xf32>
    %527 = arith.divf %525, %526 : vector<16x1xf32>
    %528 = vector.broadcast %527 : vector<16x1xf32> to vector<16x30xf32>
    %529 = arith.subf %519, %528 : vector<16x30xf32>
    %530 = arith.mulf %529, %529 : vector<16x30xf32>
    %cst_244 = arith.constant dense<0.000000e+00> : vector<16xf32>
    %531 = vector.multi_reduction <add>, %530, %cst_244 [1] : vector<16x30xf32> to vector<16xf32>
    %532 = vector.shape_cast %531 : vector<16xf32> to vector<16x1xf32>
    %cst_245 = arith.constant 3.000000e+01 : f32
    %533 = vector.broadcast %cst_245 : f32 to vector<16x1xf32>
    %534 = arith.divf %532, %533 : vector<16x1xf32>
    %cst_246 = arith.constant 9.99999974E-6 : f32
    %535 = vector.broadcast %cst_246 : f32 to vector<16x1xf32>
    %536 = arith.addf %534, %535 : vector<16x1xf32>
    %537 = math.rsqrt %536 : vector<16x1xf32>
    %538 = vector.broadcast %537 : vector<16x1xf32> to vector<16x30xf32>
    %539 = arith.mulf %529, %538 : vector<16x30xf32>
    %540 = vector.broadcast %521 : vector<1x30xf32> to vector<16x30xf32>
    %541 = arith.mulf %539, %540 : vector<16x30xf32>
    %542 = vector.broadcast %523 : vector<1x30xf32> to vector<16x30xf32>
    %543 = arith.addf %541, %542 : vector<16x30xf32>
    %544 = vector.shape_cast %543 : vector<16x30xf32> to vector<2x8x30xf32>
    %c0_247 = arith.constant 0 : index
    %c0_248 = arith.constant 0 : index
    %c0_249 = arith.constant 0 : index
    %c0_250 = arith.constant 0 : index
    %545 = vector.load %arg24[%c0_247, %c0_248, %c0_249, %c0_250] : memref<1x2x8x30xf32, #tpu.memory_space<vmem>>, vector<1x2x8x30xf32>
    %546 = vector.shape_cast %545 : vector<1x2x8x30xf32> to vector<2x8x30xf32>
    %547 = vector.shape_cast %544 : vector<2x8x30xf32> to vector<1x2x8x30xf32>
    tpu.vector_store %arg24[%c0_247, %c0_248, %c0_249, %c0_250], %547 {strides = array<i32>} : memref<1x2x8x30xf32, #tpu.memory_space<vmem>>, vector<1x2x8x30xf32>,
    return
  }
  func.func @transform_0(%arg0: i32) -> (i32, i32, i32) {
    %c0_i32 = arith.constant 0 : i32
    %c0_i32_0 = arith.constant 0 : i32
    %c0_i32_1 = arith.constant 0 : i32
    %c0_i32_2 = arith.constant 0 : i32
    return %c0_i32, %c0_i32_0, %c0_i32_1 : i32, i32, i32
  }
  func.func @transform_1(%arg0: i32) -> (i32, i32, i32) {
    %c0_i32 = arith.constant 0 : i32
    %c0_i32_0 = arith.constant 0 : i32
    %c0_i32_1 = arith.constant 0 : i32
    %c0_i32_2 = arith.constant 0 : i32
    return %c0_i32, %c0_i32_0, %c0_i32_1 : i32, i32, i32
  }
  func.func @transform_2(%arg0: i32) -> (i32, i32) {
    %c0_i32 = arith.constant 0 : i32
    %c0_i32_0 = arith.constant 0 : i32
    %c0_i32_1 = arith.constant 0 : i32
    return %c0_i32, %c0_i32_0 : i32, i32
  }
  func.func @transform_3(%arg0: i32) -> (i32, i32) {
    %c0_i32 = arith.constant 0 : i32
    %c0_i32_0 = arith.constant 0 : i32
    %c0_i32_1 = arith.constant 0 : i32
    return %c0_i32, %c0_i32_0 : i32, i32
  }
  func.func @transform_4(%arg0: i32) -> (i32, i32) {
    %c0_i32 = arith.constant 0 : i32
    %c0_i32_0 = arith.constant 0 : i32
    %c0_i32_1 = arith.constant 0 : i32
    return %c0_i32, %c0_i32_0 : i32, i32
  }
  func.func @transform_5(%arg0: i32) -> (i32, i32, i32, i32) {
    %c0_i32 = arith.constant 0 : i32
    %c0_i32_0 = arith.constant 0 : i32
    %c0_i32_1 = arith.constant 0 : i32
    %c0_i32_2 = arith.constant 0 : i32
    return %arg0, %c0_i32, %c0_i32_0, %c0_i32_1 : i32, i32, i32, i32
  }
  func.func @transform_6(%arg0: i32) -> (i32, i32, i32, i32) {
    %c0_i32 = arith.constant 0 : i32
    %c0_i32_0 = arith.constant 0 : i32
    %c0_i32_1 = arith.constant 0 : i32
    %c0_i32_2 = arith.constant 0 : i32
    return %arg0, %c0_i32, %c0_i32_0, %c0_i32_1 : i32, i32, i32, i32
  }
  func.func @transform_7(%arg0: i32) -> (i32, i32, i32, i32) {
    %c0_i32 = arith.constant 0 : i32
    %c0_i32_0 = arith.constant 0 : i32
    %c0_i32_1 = arith.constant 0 : i32
    %c0_i32_2 = arith.constant 0 : i32
    return %arg0, %c0_i32, %c0_i32_0, %c0_i32_1 : i32, i32, i32, i32
  }
  func.func @transform_8(%arg0: i32) -> (i32, i32, i32, i32) {
    %c0_i32 = arith.constant 0 : i32
    %c0_i32_0 = arith.constant 0 : i32
    %c0_i32_1 = arith.constant 0 : i32
    %c0_i32_2 = arith.constant 0 : i32
    return %arg0, %c0_i32, %c0_i32_0, %c0_i32_1 : i32, i32, i32, i32
  }
  func.func @transform_9(%arg0: i32) -> (i32, i32, i32, i32) {
    %c0_i32 = arith.constant 0 : i32
    %c0_i32_0 = arith.constant 0 : i32
    %c0_i32_1 = arith.constant 0 : i32
    %c0_i32_2 = arith.constant 0 : i32
    return %arg0, %c0_i32, %c0_i32_0, %c0_i32_1 : i32, i32, i32, i32
  }
  func.func @transform_10(%arg0: i32) -> (i32, i32, i32, i32) {
    %c0_i32 = arith.constant 0 : i32
    %c0_i32_0 = arith.constant 0 : i32
    %c0_i32_1 = arith.constant 0 : i32
    %c0_i32_2 = arith.constant 0 : i32
    return %arg0, %c0_i32, %c0_i32_0, %c0_i32_1 : i32, i32, i32, i32
  }
  func.func @transform_11(%arg0: i32) -> (i32, i32, i32, i32) {
    %c0_i32 = arith.constant 0 : i32
    %c0_i32_0 = arith.constant 0 : i32
    %c0_i32_1 = arith.constant 0 : i32
    %c0_i32_2 = arith.constant 0 : i32
    return %arg0, %c0_i32, %c0_i32_0, %c0_i32_1 : i32, i32, i32, i32
  }
  func.func @transform_12(%arg0: i32) -> (i32, i32, i32, i32) {
    %c0_i32 = arith.constant 0 : i32
    %c0_i32_0 = arith.constant 0 : i32
    %c0_i32_1 = arith.constant 0 : i32
    %c0_i32_2 = arith.constant 0 : i32
    return %arg0, %c0_i32, %c0_i32_0, %c0_i32_1 : i32, i32, i32, i32
  }
  func.func @transform_13(%arg0: i32) -> (i32, i32, i32, i32) {
    %c0_i32 = arith.constant 0 : i32
    %c0_i32_0 = arith.constant 0 : i32
    %c0_i32_1 = arith.constant 0 : i32
    %c0_i32_2 = arith.constant 0 : i32
    return %arg0, %c0_i32, %c0_i32_0, %c0_i32_1 : i32, i32, i32, i32
  }
  func.func @transform_14(%arg0: i32) -> (i32, i32, i32, i32) {
    %c0_i32 = arith.constant 0 : i32
    %c0_i32_0 = arith.constant 0 : i32
    %c0_i32_1 = arith.constant 0 : i32
    %c0_i32_2 = arith.constant 0 : i32
    return %arg0, %c0_i32, %c0_i32_0, %c0_i32_1 : i32, i32, i32, i32
  }
  func.func @transform_15(%arg0: i32) -> (i32, i32, i32, i32) {
    %c0_i32 = arith.constant 0 : i32
    %c0_i32_0 = arith.constant 0 : i32
    %c0_i32_1 = arith.constant 0 : i32
    %c0_i32_2 = arith.constant 0 : i32
    return %arg0, %c0_i32, %c0_i32_0, %c0_i32_1 : i32, i32, i32, i32
  }
  func.func @transform_16(%arg0: i32) -> (i32, i32, i32, i32) {
    %c0_i32 = arith.constant 0 : i32
    %c0_i32_0 = arith.constant 0 : i32
    %c0_i32_1 = arith.constant 0 : i32
    %c0_i32_2 = arith.constant 0 : i32
    return %arg0, %c0_i32, %c0_i32_0, %c0_i32_1 : i32, i32, i32, i32
  }
  func.func @transform_17(%arg0: i32) -> (i32, i32, i32, i32) {
    %c0_i32 = arith.constant 0 : i32
    %c0_i32_0 = arith.constant 0 : i32
    %c0_i32_1 = arith.constant 0 : i32
    %c0_i32_2 = arith.constant 0 : i32
    return %arg0, %c0_i32, %c0_i32_0, %c0_i32_1 : i32, i32, i32, i32
  }
  func.func @transform_18(%arg0: i32) -> (i32, i32, i32, i32) {
    %c0_i32 = arith.constant 0 : i32
    %c0_i32_0 = arith.constant 0 : i32
    %c0_i32_1 = arith.constant 0 : i32
    %c0_i32_2 = arith.constant 0 : i32
    return %arg0, %c0_i32, %c0_i32_0, %c0_i32_1 : i32, i32, i32, i32
  }
  func.func @transform_19(%arg0: i32) -> (i32, i32, i32, i32) {
    %c0_i32 = arith.constant 0 : i32
    %c0_i32_0 = arith.constant 0 : i32
    %c0_i32_1 = arith.constant 0 : i32
    %c0_i32_2 = arith.constant 0 : i32
    return %arg0, %c0_i32, %c0_i32_0, %c0_i32_1 : i32, i32, i32, i32
  }
  func.func @transform_20(%arg0: i32) -> (i32, i32, i32, i32) {
    %c0_i32 = arith.constant 0 : i32
    %c0_i32_0 = arith.constant 0 : i32
    %c0_i32_1 = arith.constant 0 : i32
    %c0_i32_2 = arith.constant 0 : i32
    return %arg0, %c0_i32, %c0_i32_0, %c0_i32_1 : i32, i32, i32, i32
  }
  func.func @transform_21(%arg0: i32) -> (i32, i32, i32) {
    %c0_i32 = arith.constant 0 : i32
    %c0_i32_0 = arith.constant 0 : i32
    %c0_i32_1 = arith.constant 0 : i32
    return %arg0, %c0_i32, %c0_i32_0 : i32, i32, i32
  }
  func.func @transform_22(%arg0: i32) -> (i32, i32, i32) {
    %c0_i32 = arith.constant 0 : i32
    %c0_i32_0 = arith.constant 0 : i32
    %c0_i32_1 = arith.constant 0 : i32
    return %arg0, %c0_i32, %c0_i32_0 : i32, i32, i32
  }
  func.func @transform_23(%arg0: i32) -> (i32, i32, i32, i32) {
    %c0_i32 = arith.constant 0 : i32
    %c0_i32_0 = arith.constant 0 : i32
    %c0_i32_1 = arith.constant 0 : i32
    %c0_i32_2 = arith.constant 0 : i32
    return %arg0, %c0_i32, %c0_i32_0, %c0_i32_1 : i32, i32, i32, i32
  }
}

module attributes {stable_mosaic.version = 11 : i64} {
  func.func @_mem_head_kernel(%arg0: memref<2x8x60xf32, #tpu.memory_space<vmem>>, %arg1: memref<8x60xf32, #tpu.memory_space<vmem>>, %arg2: memref<2x100xf32, #tpu.memory_space<vmem>>, %arg3: memref<3x60x60xf32, #tpu.memory_space<vmem>>, %arg4: memref<3x1x60xf32, #tpu.memory_space<vmem>>, %arg5: memref<3x60x60xf32, #tpu.memory_space<vmem>>, %arg6: memref<3x1x60xf32, #tpu.memory_space<vmem>>, %arg7: memref<3x60x60xf32, #tpu.memory_space<vmem>>, %arg8: memref<3x1x60xf32, #tpu.memory_space<vmem>>, %arg9: memref<3x60x60xf32, #tpu.memory_space<vmem>>, %arg10: memref<3x1x60xf32, #tpu.memory_space<vmem>>, %arg11: memref<3x60x240xf32, #tpu.memory_space<vmem>>, %arg12: memref<3x1x240xf32, #tpu.memory_space<vmem>>, %arg13: memref<3x240x60xf32, #tpu.memory_space<vmem>>, %arg14: memref<3x1x60xf32, #tpu.memory_space<vmem>>, %arg15: memref<3x1x60xf32, #tpu.memory_space<vmem>>, %arg16: memref<3x1x60xf32, #tpu.memory_space<vmem>>, %arg17: memref<3x1x60xf32, #tpu.memory_space<vmem>>, %arg18: memref<3x1x60xf32, #tpu.memory_space<vmem>>, %arg19: memref<1x60xf32, #tpu.memory_space<vmem>>, %arg20: memref<1x60xf32, #tpu.memory_space<vmem>>, %arg21: memref<60x60xf32, #tpu.memory_space<vmem>>, %arg22: memref<1x60xf32, #tpu.memory_space<vmem>>, %arg23: memref<60x60xf32, #tpu.memory_space<vmem>>, %arg24: memref<1x60xf32, #tpu.memory_space<vmem>>, %arg25: memref<100x60xf32, #tpu.memory_space<vmem>>, %arg26: memref<1x60xf32, #tpu.memory_space<vmem>>, %arg27: memref<60x60xf32, #tpu.memory_space<vmem>>, %arg28: memref<1x60xf32, #tpu.memory_space<vmem>>, %arg29: memref<60x3xf32, #tpu.memory_space<vmem>>, %arg30: memref<1x3xf32, #tpu.memory_space<vmem>>, %arg31: memref<2x3xf32, #tpu.memory_space<vmem>>) attributes {dimension_semantics = [], scalar_prefetch = 0 : i64, scratch_operands = 0 : i64, tpu.core_type = #tpu.core_type<tc>} {
    %c0 = arith.constant 0 : index
    %c0_0 = arith.constant 0 : index
    %c0_1 = arith.constant 0 : index
    %0 = vector.load %arg0[%c0, %c0_0, %c0_1] : memref<2x8x60xf32, #tpu.memory_space<vmem>>, vector<2x8x60xf32>
    %c0_2 = arith.constant 0 : index
    %c0_3 = arith.constant 0 : index
    %1 = vector.load %arg1[%c0_2, %c0_3] : memref<8x60xf32, #tpu.memory_space<vmem>>, vector<8x60xf32>
    %2 = vector.extract_strided_slice %0 {offsets = [0, 0, 0], sizes = [2, 8, 1], strides = [1, 1, 1]} : vector<2x8x60xf32> to vector<2x8x1xf32>
    %cst = arith.constant 0.000000e+00 : f32
    %3 = vector.broadcast %cst : f32 to vector<2x8x1xf32>
    %4 = arith.cmpf one, %2, %3 : vector<2x8x1xf32>
    %5 = arith.extui %4 : vector<2x8x1xi1> to vector<2x8x1xi32>
    %6 = arith.sitofp %5 : vector<2x8x1xi32> to vector<2x8x1xf32>
    %cst_4 = arith.constant 7.74596691 : f32
    %7 = vector.broadcast %cst_4 : f32 to vector<2x8x60xf32>
    %8 = arith.mulf %7, %0 : vector<2x8x60xf32>
    %9 = vector.shape_cast %1 : vector<8x60xf32> to vector<1x8x60xf32>
    %10 = vector.broadcast %6 : vector<2x8x1xf32> to vector<2x8x60xf32>
    %11 = vector.broadcast %9 : vector<1x8x60xf32> to vector<2x8x60xf32>
    %12 = arith.mulf %10, %11 : vector<2x8x60xf32>
    %13 = arith.addf %8, %12 : vector<2x8x60xf32>
    %14 = vector.shape_cast %13 : vector<2x8x60xf32> to vector<16x60xf32>
    %15 = tpu.iota {dimensions = array<i32: 1>} : vector<1x60xi32>
    %c0_i32 = arith.constant 0 : i32
    %16 = vector.broadcast %c0_i32 : i32 to vector<1x60xi32>
    %17 = arith.cmpi sge, %15, %16 : vector<1x60xi32>
    %c12_i32 = arith.constant 12 : i32
    %18 = vector.broadcast %c12_i32 : i32 to vector<1x60xi32>
    %19 = arith.cmpi slt, %15, %18 : vector<1x60xi32>
    %20 = arith.andi %17, %19 : vector<1x60xi1>
    %21 = arith.extui %20 : vector<1x60xi1> to vector<1x60xi32>
    %22 = arith.sitofp %21 : vector<1x60xi32> to vector<1x60xf32>
    %c12_i32_5 = arith.constant 12 : i32
    %23 = vector.broadcast %c12_i32_5 : i32 to vector<1x60xi32>
    %24 = arith.cmpi sge, %15, %23 : vector<1x60xi32>
    %c24_i32 = arith.constant 24 : i32
    %25 = vector.broadcast %c24_i32 : i32 to vector<1x60xi32>
    %26 = arith.cmpi slt, %15, %25 : vector<1x60xi32>
    %27 = arith.andi %24, %26 : vector<1x60xi1>
    %28 = arith.extui %27 : vector<1x60xi1> to vector<1x60xi32>
    %29 = arith.sitofp %28 : vector<1x60xi32> to vector<1x60xf32>
    %c24_i32_6 = arith.constant 24 : i32
    %30 = vector.broadcast %c24_i32_6 : i32 to vector<1x60xi32>
    %31 = arith.cmpi sge, %15, %30 : vector<1x60xi32>
    %c36_i32 = arith.constant 36 : i32
    %32 = vector.broadcast %c36_i32 : i32 to vector<1x60xi32>
    %33 = arith.cmpi slt, %15, %32 : vector<1x60xi32>
    %34 = arith.andi %31, %33 : vector<1x60xi1>
    %35 = arith.extui %34 : vector<1x60xi1> to vector<1x60xi32>
    %36 = arith.sitofp %35 : vector<1x60xi32> to vector<1x60xf32>
    %c36_i32_7 = arith.constant 36 : i32
    %37 = vector.broadcast %c36_i32_7 : i32 to vector<1x60xi32>
    %38 = arith.cmpi sge, %15, %37 : vector<1x60xi32>
    %c48_i32 = arith.constant 48 : i32
    %39 = vector.broadcast %c48_i32 : i32 to vector<1x60xi32>
    %40 = arith.cmpi slt, %15, %39 : vector<1x60xi32>
    %41 = arith.andi %38, %40 : vector<1x60xi1>
    %42 = arith.extui %41 : vector<1x60xi1> to vector<1x60xi32>
    %43 = arith.sitofp %42 : vector<1x60xi32> to vector<1x60xf32>
    %c48_i32_8 = arith.constant 48 : i32
    %44 = vector.broadcast %c48_i32_8 : i32 to vector<1x60xi32>
    %45 = arith.cmpi sge, %15, %44 : vector<1x60xi32>
    %c60_i32 = arith.constant 60 : i32
    %46 = vector.broadcast %c60_i32 : i32 to vector<1x60xi32>
    %47 = arith.cmpi slt, %15, %46 : vector<1x60xi32>
    %48 = arith.andi %45, %47 : vector<1x60xi1>
    %49 = arith.extui %48 : vector<1x60xi1> to vector<1x60xi32>
    %50 = arith.sitofp %49 : vector<1x60xi32> to vector<1x60xf32>
    %c0_9 = arith.constant 0 : index
    %c0_10 = arith.constant 0 : index
    %c0_11 = arith.constant 0 : index
    %51 = vector.load %arg15[%c0_9, %c0_10, %c0_11] : memref<3x1x60xf32, #tpu.memory_space<vmem>>, vector<1x1x60xf32>
    %52 = vector.shape_cast %51 : vector<1x1x60xf32> to vector<1x60xf32>
    %c0_12 = arith.constant 0 : index
    %c0_13 = arith.constant 0 : index
    %c0_14 = arith.constant 0 : index
    %53 = vector.load %arg16[%c0_12, %c0_13, %c0_14] : memref<3x1x60xf32, #tpu.memory_space<vmem>>, vector<1x1x60xf32>
    %54 = vector.shape_cast %53 : vector<1x1x60xf32> to vector<1x60xf32>
    %cst_15 = arith.constant dense<0.000000e+00> : vector<16xf32>
    %55 = vector.multi_reduction <add>, %14, %cst_15 [1] : vector<16x60xf32> to vector<16xf32>
    %56 = vector.shape_cast %55 : vector<16xf32> to vector<16x1xf32>
    %cst_16 = arith.constant 6.000000e+01 : f32
    %57 = vector.broadcast %cst_16 : f32 to vector<16x1xf32>
    %58 = arith.divf %56, %57 : vector<16x1xf32>
    %59 = vector.broadcast %58 : vector<16x1xf32> to vector<16x60xf32>
    %60 = arith.subf %14, %59 : vector<16x60xf32>
    %61 = arith.mulf %60, %60 : vector<16x60xf32>
    %cst_17 = arith.constant dense<0.000000e+00> : vector<16xf32>
    %62 = vector.multi_reduction <add>, %61, %cst_17 [1] : vector<16x60xf32> to vector<16xf32>
    %63 = vector.shape_cast %62 : vector<16xf32> to vector<16x1xf32>
    %cst_18 = arith.constant 6.000000e+01 : f32
    %64 = vector.broadcast %cst_18 : f32 to vector<16x1xf32>
    %65 = arith.divf %63, %64 : vector<16x1xf32>
    %cst_19 = arith.constant 9.99999974E-6 : f32
    %66 = vector.broadcast %cst_19 : f32 to vector<16x1xf32>
    %67 = arith.addf %65, %66 : vector<16x1xf32>
    %68 = math.rsqrt %67 : vector<16x1xf32>
    %69 = vector.broadcast %68 : vector<16x1xf32> to vector<16x60xf32>
    %70 = arith.mulf %60, %69 : vector<16x60xf32>
    %71 = vector.broadcast %52 : vector<1x60xf32> to vector<16x60xf32>
    %72 = arith.mulf %70, %71 : vector<16x60xf32>
    %73 = vector.broadcast %54 : vector<1x60xf32> to vector<16x60xf32>
    %74 = arith.addf %72, %73 : vector<16x60xf32>
    %c0_20 = arith.constant 0 : index
    %c0_21 = arith.constant 0 : index
    %c0_22 = arith.constant 0 : index
    %75 = vector.load %arg3[%c0_20, %c0_21, %c0_22] : memref<3x60x60xf32, #tpu.memory_space<vmem>>, vector<1x60x60xf32>
    %76 = vector.shape_cast %75 : vector<1x60x60xf32> to vector<60x60xf32>
    %cst_23 = arith.constant dense<0.000000e+00> : vector<16x60xf32>
    %77 = tpu.matmul %74, %76, %cst_23 {dimension_numbers = #tpu.dot_dimension_numbers<[1], [0], [0], [1], [0, 0, 1, 1], [], []>} : vector<16x60xf32>, vector<60x60xf32>, vector<16x60xf32> -> vector<16x60xf32>
    %c0_24 = arith.constant 0 : index
    %c0_25 = arith.constant 0 : index
    %c0_26 = arith.constant 0 : index
    %78 = vector.load %arg4[%c0_24, %c0_25, %c0_26] : memref<3x1x60xf32, #tpu.memory_space<vmem>>, vector<1x1x60xf32>
    %79 = vector.shape_cast %78 : vector<1x1x60xf32> to vector<1x60xf32>
    %80 = vector.broadcast %79 : vector<1x60xf32> to vector<16x60xf32>
    %81 = arith.addf %77, %80 : vector<16x60xf32>
    %c0_27 = arith.constant 0 : index
    %c0_28 = arith.constant 0 : index
    %c0_29 = arith.constant 0 : index
    %82 = vector.load %arg5[%c0_27, %c0_28, %c0_29] : memref<3x60x60xf32, #tpu.memory_space<vmem>>, vector<1x60x60xf32>
    %83 = vector.shape_cast %82 : vector<1x60x60xf32> to vector<60x60xf32>
    %cst_30 = arith.constant dense<0.000000e+00> : vector<16x60xf32>
    %84 = tpu.matmul %74, %83, %cst_30 {dimension_numbers = #tpu.dot_dimension_numbers<[1], [0], [0], [1], [0, 0, 1, 1], [], []>} : vector<16x60xf32>, vector<60x60xf32>, vector<16x60xf32> -> vector<16x60xf32>
    %c0_31 = arith.constant 0 : index
    %c0_32 = arith.constant 0 : index
    %c0_33 = arith.constant 0 : index
    %85 = vector.load %arg6[%c0_31, %c0_32, %c0_33] : memref<3x1x60xf32, #tpu.memory_space<vmem>>, vector<1x1x60xf32>
    %86 = vector.shape_cast %85 : vector<1x1x60xf32> to vector<1x60xf32>
    %87 = vector.broadcast %86 : vector<1x60xf32> to vector<16x60xf32>
    %88 = arith.addf %84, %87 : vector<16x60xf32>
    %c0_34 = arith.constant 0 : index
    %c0_35 = arith.constant 0 : index
    %c0_36 = arith.constant 0 : index
    %89 = vector.load %arg7[%c0_34, %c0_35, %c0_36] : memref<3x60x60xf32, #tpu.memory_space<vmem>>, vector<1x60x60xf32>
    %90 = vector.shape_cast %89 : vector<1x60x60xf32> to vector<60x60xf32>
    %cst_37 = arith.constant dense<0.000000e+00> : vector<16x60xf32>
    %91 = tpu.matmul %74, %90, %cst_37 {dimension_numbers = #tpu.dot_dimension_numbers<[1], [0], [0], [1], [0, 0, 1, 1], [], []>} : vector<16x60xf32>, vector<60x60xf32>, vector<16x60xf32> -> vector<16x60xf32>
    %c0_38 = arith.constant 0 : index
    %c0_39 = arith.constant 0 : index
    %c0_40 = arith.constant 0 : index
    %92 = vector.load %arg8[%c0_38, %c0_39, %c0_40] : memref<3x1x60xf32, #tpu.memory_space<vmem>>, vector<1x1x60xf32>
    %93 = vector.shape_cast %92 : vector<1x1x60xf32> to vector<1x60xf32>
    %94 = vector.broadcast %93 : vector<1x60xf32> to vector<16x60xf32>
    %95 = arith.addf %91, %94 : vector<16x60xf32>
    %96 = vector.shape_cast %88 : vector<16x60xf32> to vector<2x8x60xf32>
    %cst_41 = arith.constant 0.000000e+00 : f32
    %97 = vector.broadcast %cst_41 : f32 to vector<16x60xf32>
    %98 = vector.broadcast %22 : vector<1x60xf32> to vector<16x60xf32>
    %99 = arith.mulf %81, %98 : vector<16x60xf32>
    %100 = vector.shape_cast %99 : vector<16x60xf32> to vector<2x8x60xf32>
    "tpu.trace_start"() <{level = 10 : i32, message = "bqd,bkd->bqk"}> : () -> ()
    %cst_42 = arith.constant dense<0.000000e+00> : vector<2x8x8xf32>
    %101 = tpu.matmul %100, %96, %cst_42 {dimension_numbers = #tpu.dot_dimension_numbers<[2], [2], [1], [1], [0, 0, 0, 1, 1, 1], [0], [0]>} : vector<2x8x60xf32>, vector<2x8x60xf32>, vector<2x8x8xf32> -> vector<2x8x8xf32>
    "tpu.trace_stop"() : () -> ()
    %cst_43 = arith.constant dense<0xFF800000> : vector<2x8xf32>
    %102 = vector.multi_reduction <maximumf>, %101, %cst_43 [2] : vector<2x8x8xf32> to vector<2x8xf32>
    %103 = vector.shape_cast %102 : vector<2x8xf32> to vector<2x8x1xf32>
    %104 = vector.broadcast %103 : vector<2x8x1xf32> to vector<2x8x8xf32>
    %105 = arith.subf %101, %104 : vector<2x8x8xf32>
    %106 = math.exp %105 : vector<2x8x8xf32>
    %cst_44 = arith.constant dense<0.000000e+00> : vector<2x8xf32>
    %107 = vector.multi_reduction <add>, %106, %cst_44 [2] : vector<2x8x8xf32> to vector<2x8xf32>
    %108 = vector.shape_cast %107 : vector<2x8xf32> to vector<2x8x1xf32>
    %109 = tpu.reciprocal %108 {approx = true} : vector<2x8x1xf32> -> vector<2x8x1xf32>
    %110 = vector.broadcast %109 : vector<2x8x1xf32> to vector<2x8x8xf32>
    %111 = arith.mulf %106, %110 : vector<2x8x8xf32>
    %112 = vector.broadcast %22 : vector<1x60xf32> to vector<16x60xf32>
    %113 = arith.mulf %95, %112 : vector<16x60xf32>
    %114 = vector.shape_cast %113 : vector<16x60xf32> to vector<2x8x60xf32>
    "tpu.trace_start"() <{level = 10 : i32, message = "bqk,bkd->bqd"}> : () -> ()
    %cst_45 = arith.constant dense<0.000000e+00> : vector<2x8x60xf32>
    %115 = tpu.matmul %111, %114, %cst_45 {dimension_numbers = #tpu.dot_dimension_numbers<[2], [1], [1], [2], [0, 0, 0, 1, 1, 2], [0], [0]>} : vector<2x8x8xf32>, vector<2x8x60xf32>, vector<2x8x60xf32> -> vector<2x8x60xf32>
    "tpu.trace_stop"() : () -> ()
    %116 = vector.shape_cast %115 : vector<2x8x60xf32> to vector<16x60xf32>
    %117 = arith.addf %97, %116 : vector<16x60xf32>
    %118 = vector.broadcast %29 : vector<1x60xf32> to vector<16x60xf32>
    %119 = arith.mulf %81, %118 : vector<16x60xf32>
    %120 = vector.shape_cast %119 : vector<16x60xf32> to vector<2x8x60xf32>
    "tpu.trace_start"() <{level = 10 : i32, message = "bqd,bkd->bqk"}> : () -> ()
    %cst_46 = arith.constant dense<0.000000e+00> : vector<2x8x8xf32>
    %121 = tpu.matmul %120, %96, %cst_46 {dimension_numbers = #tpu.dot_dimension_numbers<[2], [2], [1], [1], [0, 0, 0, 1, 1, 1], [0], [0]>} : vector<2x8x60xf32>, vector<2x8x60xf32>, vector<2x8x8xf32> -> vector<2x8x8xf32>
    "tpu.trace_stop"() : () -> ()
    %cst_47 = arith.constant dense<0xFF800000> : vector<2x8xf32>
    %122 = vector.multi_reduction <maximumf>, %121, %cst_47 [2] : vector<2x8x8xf32> to vector<2x8xf32>
    %123 = vector.shape_cast %122 : vector<2x8xf32> to vector<2x8x1xf32>
    %124 = vector.broadcast %123 : vector<2x8x1xf32> to vector<2x8x8xf32>
    %125 = arith.subf %121, %124 : vector<2x8x8xf32>
    %126 = math.exp %125 : vector<2x8x8xf32>
    %cst_48 = arith.constant dense<0.000000e+00> : vector<2x8xf32>
    %127 = vector.multi_reduction <add>, %126, %cst_48 [2] : vector<2x8x8xf32> to vector<2x8xf32>
    %128 = vector.shape_cast %127 : vector<2x8xf32> to vector<2x8x1xf32>
    %129 = tpu.reciprocal %128 {approx = true} : vector<2x8x1xf32> -> vector<2x8x1xf32>
    %130 = vector.broadcast %129 : vector<2x8x1xf32> to vector<2x8x8xf32>
    %131 = arith.mulf %126, %130 : vector<2x8x8xf32>
    %132 = vector.broadcast %29 : vector<1x60xf32> to vector<16x60xf32>
    %133 = arith.mulf %95, %132 : vector<16x60xf32>
    %134 = vector.shape_cast %133 : vector<16x60xf32> to vector<2x8x60xf32>
    "tpu.trace_start"() <{level = 10 : i32, message = "bqk,bkd->bqd"}> : () -> ()
    %cst_49 = arith.constant dense<0.000000e+00> : vector<2x8x60xf32>
    %135 = tpu.matmul %131, %134, %cst_49 {dimension_numbers = #tpu.dot_dimension_numbers<[2], [1], [1], [2], [0, 0, 0, 1, 1, 2], [0], [0]>} : vector<2x8x8xf32>, vector<2x8x60xf32>, vector<2x8x60xf32> -> vector<2x8x60xf32>
    "tpu.trace_stop"() : () -> ()
    %136 = vector.shape_cast %135 : vector<2x8x60xf32> to vector<16x60xf32>
    %137 = arith.addf %117, %136 : vector<16x60xf32>
    %138 = vector.broadcast %36 : vector<1x60xf32> to vector<16x60xf32>
    %139 = arith.mulf %81, %138 : vector<16x60xf32>
    %140 = vector.shape_cast %139 : vector<16x60xf32> to vector<2x8x60xf32>
    "tpu.trace_start"() <{level = 10 : i32, message = "bqd,bkd->bqk"}> : () -> ()
    %cst_50 = arith.constant dense<0.000000e+00> : vector<2x8x8xf32>
    %141 = tpu.matmul %140, %96, %cst_50 {dimension_numbers = #tpu.dot_dimension_numbers<[2], [2], [1], [1], [0, 0, 0, 1, 1, 1], [0], [0]>} : vector<2x8x60xf32>, vector<2x8x60xf32>, vector<2x8x8xf32> -> vector<2x8x8xf32>
    "tpu.trace_stop"() : () -> ()
    %cst_51 = arith.constant dense<0xFF800000> : vector<2x8xf32>
    %142 = vector.multi_reduction <maximumf>, %141, %cst_51 [2] : vector<2x8x8xf32> to vector<2x8xf32>
    %143 = vector.shape_cast %142 : vector<2x8xf32> to vector<2x8x1xf32>
    %144 = vector.broadcast %143 : vector<2x8x1xf32> to vector<2x8x8xf32>
    %145 = arith.subf %141, %144 : vector<2x8x8xf32>
    %146 = math.exp %145 : vector<2x8x8xf32>
    %cst_52 = arith.constant dense<0.000000e+00> : vector<2x8xf32>
    %147 = vector.multi_reduction <add>, %146, %cst_52 [2] : vector<2x8x8xf32> to vector<2x8xf32>
    %148 = vector.shape_cast %147 : vector<2x8xf32> to vector<2x8x1xf32>
    %149 = tpu.reciprocal %148 {approx = true} : vector<2x8x1xf32> -> vector<2x8x1xf32>
    %150 = vector.broadcast %149 : vector<2x8x1xf32> to vector<2x8x8xf32>
    %151 = arith.mulf %146, %150 : vector<2x8x8xf32>
    %152 = vector.broadcast %36 : vector<1x60xf32> to vector<16x60xf32>
    %153 = arith.mulf %95, %152 : vector<16x60xf32>
    %154 = vector.shape_cast %153 : vector<16x60xf32> to vector<2x8x60xf32>
    "tpu.trace_start"() <{level = 10 : i32, message = "bqk,bkd->bqd"}> : () -> ()
    %cst_53 = arith.constant dense<0.000000e+00> : vector<2x8x60xf32>
    %155 = tpu.matmul %151, %154, %cst_53 {dimension_numbers = #tpu.dot_dimension_numbers<[2], [1], [1], [2], [0, 0, 0, 1, 1, 2], [0], [0]>} : vector<2x8x8xf32>, vector<2x8x60xf32>, vector<2x8x60xf32> -> vector<2x8x60xf32>
    "tpu.trace_stop"() : () -> ()
    %156 = vector.shape_cast %155 : vector<2x8x60xf32> to vector<16x60xf32>
    %157 = arith.addf %137, %156 : vector<16x60xf32>
    %158 = vector.broadcast %43 : vector<1x60xf32> to vector<16x60xf32>
    %159 = arith.mulf %81, %158 : vector<16x60xf32>
    %160 = vector.shape_cast %159 : vector<16x60xf32> to vector<2x8x60xf32>
    "tpu.trace_start"() <{level = 10 : i32, message = "bqd,bkd->bqk"}> : () -> ()
    %cst_54 = arith.constant dense<0.000000e+00> : vector<2x8x8xf32>
    %161 = tpu.matmul %160, %96, %cst_54 {dimension_numbers = #tpu.dot_dimension_numbers<[2], [2], [1], [1], [0, 0, 0, 1, 1, 1], [0], [0]>} : vector<2x8x60xf32>, vector<2x8x60xf32>, vector<2x8x8xf32> -> vector<2x8x8xf32>
    "tpu.trace_stop"() : () -> ()
    %cst_55 = arith.constant dense<0xFF800000> : vector<2x8xf32>
    %162 = vector.multi_reduction <maximumf>, %161, %cst_55 [2] : vector<2x8x8xf32> to vector<2x8xf32>
    %163 = vector.shape_cast %162 : vector<2x8xf32> to vector<2x8x1xf32>
    %164 = vector.broadcast %163 : vector<2x8x1xf32> to vector<2x8x8xf32>
    %165 = arith.subf %161, %164 : vector<2x8x8xf32>
    %166 = math.exp %165 : vector<2x8x8xf32>
    %cst_56 = arith.constant dense<0.000000e+00> : vector<2x8xf32>
    %167 = vector.multi_reduction <add>, %166, %cst_56 [2] : vector<2x8x8xf32> to vector<2x8xf32>
    %168 = vector.shape_cast %167 : vector<2x8xf32> to vector<2x8x1xf32>
    %169 = tpu.reciprocal %168 {approx = true} : vector<2x8x1xf32> -> vector<2x8x1xf32>
    %170 = vector.broadcast %169 : vector<2x8x1xf32> to vector<2x8x8xf32>
    %171 = arith.mulf %166, %170 : vector<2x8x8xf32>
    %172 = vector.broadcast %43 : vector<1x60xf32> to vector<16x60xf32>
    %173 = arith.mulf %95, %172 : vector<16x60xf32>
    %174 = vector.shape_cast %173 : vector<16x60xf32> to vector<2x8x60xf32>
    "tpu.trace_start"() <{level = 10 : i32, message = "bqk,bkd->bqd"}> : () -> ()
    %cst_57 = arith.constant dense<0.000000e+00> : vector<2x8x60xf32>
    %175 = tpu.matmul %171, %174, %cst_57 {dimension_numbers = #tpu.dot_dimension_numbers<[2], [1], [1], [2], [0, 0, 0, 1, 1, 2], [0], [0]>} : vector<2x8x8xf32>, vector<2x8x60xf32>, vector<2x8x60xf32> -> vector<2x8x60xf32>
    "tpu.trace_stop"() : () -> ()
    %176 = vector.shape_cast %175 : vector<2x8x60xf32> to vector<16x60xf32>
    %177 = arith.addf %157, %176 : vector<16x60xf32>
    %178 = vector.broadcast %50 : vector<1x60xf32> to vector<16x60xf32>
    %179 = arith.mulf %81, %178 : vector<16x60xf32>
    %180 = vector.shape_cast %179 : vector<16x60xf32> to vector<2x8x60xf32>
    "tpu.trace_start"() <{level = 10 : i32, message = "bqd,bkd->bqk"}> : () -> ()
    %cst_58 = arith.constant dense<0.000000e+00> : vector<2x8x8xf32>
    %181 = tpu.matmul %180, %96, %cst_58 {dimension_numbers = #tpu.dot_dimension_numbers<[2], [2], [1], [1], [0, 0, 0, 1, 1, 1], [0], [0]>} : vector<2x8x60xf32>, vector<2x8x60xf32>, vector<2x8x8xf32> -> vector<2x8x8xf32>
    "tpu.trace_stop"() : () -> ()
    %cst_59 = arith.constant dense<0xFF800000> : vector<2x8xf32>
    %182 = vector.multi_reduction <maximumf>, %181, %cst_59 [2] : vector<2x8x8xf32> to vector<2x8xf32>
    %183 = vector.shape_cast %182 : vector<2x8xf32> to vector<2x8x1xf32>
    %184 = vector.broadcast %183 : vector<2x8x1xf32> to vector<2x8x8xf32>
    %185 = arith.subf %181, %184 : vector<2x8x8xf32>
    %186 = math.exp %185 : vector<2x8x8xf32>
    %cst_60 = arith.constant dense<0.000000e+00> : vector<2x8xf32>
    %187 = vector.multi_reduction <add>, %186, %cst_60 [2] : vector<2x8x8xf32> to vector<2x8xf32>
    %188 = vector.shape_cast %187 : vector<2x8xf32> to vector<2x8x1xf32>
    %189 = tpu.reciprocal %188 {approx = true} : vector<2x8x1xf32> -> vector<2x8x1xf32>
    %190 = vector.broadcast %189 : vector<2x8x1xf32> to vector<2x8x8xf32>
    %191 = arith.mulf %186, %190 : vector<2x8x8xf32>
    %192 = vector.broadcast %50 : vector<1x60xf32> to vector<16x60xf32>
    %193 = arith.mulf %95, %192 : vector<16x60xf32>
    %194 = vector.shape_cast %193 : vector<16x60xf32> to vector<2x8x60xf32>
    "tpu.trace_start"() <{level = 10 : i32, message = "bqk,bkd->bqd"}> : () -> ()
    %cst_61 = arith.constant dense<0.000000e+00> : vector<2x8x60xf32>
    %195 = tpu.matmul %191, %194, %cst_61 {dimension_numbers = #tpu.dot_dimension_numbers<[2], [1], [1], [2], [0, 0, 0, 1, 1, 2], [0], [0]>} : vector<2x8x8xf32>, vector<2x8x60xf32>, vector<2x8x60xf32> -> vector<2x8x60xf32>
    "tpu.trace_stop"() : () -> ()
    %196 = vector.shape_cast %195 : vector<2x8x60xf32> to vector<16x60xf32>
    %197 = arith.addf %177, %196 : vector<16x60xf32>
    %c0_62 = arith.constant 0 : index
    %c0_63 = arith.constant 0 : index
    %c0_64 = arith.constant 0 : index
    %198 = vector.load %arg9[%c0_62, %c0_63, %c0_64] : memref<3x60x60xf32, #tpu.memory_space<vmem>>, vector<1x60x60xf32>
    %199 = vector.shape_cast %198 : vector<1x60x60xf32> to vector<60x60xf32>
    %cst_65 = arith.constant dense<0.000000e+00> : vector<16x60xf32>
    %200 = tpu.matmul %197, %199, %cst_65 {dimension_numbers = #tpu.dot_dimension_numbers<[1], [0], [0], [1], [0, 0, 1, 1], [], []>} : vector<16x60xf32>, vector<60x60xf32>, vector<16x60xf32> -> vector<16x60xf32>
    %201 = arith.addf %14, %200 : vector<16x60xf32>
    %c0_66 = arith.constant 0 : index
    %c0_67 = arith.constant 0 : index
    %c0_68 = arith.constant 0 : index
    %202 = vector.load %arg10[%c0_66, %c0_67, %c0_68] : memref<3x1x60xf32, #tpu.memory_space<vmem>>, vector<1x1x60xf32>
    %203 = vector.shape_cast %202 : vector<1x1x60xf32> to vector<1x60xf32>
    %204 = vector.broadcast %203 : vector<1x60xf32> to vector<16x60xf32>
    %205 = arith.addf %201, %204 : vector<16x60xf32>
    %c0_69 = arith.constant 0 : index
    %c0_70 = arith.constant 0 : index
    %c0_71 = arith.constant 0 : index
    %206 = vector.load %arg17[%c0_69, %c0_70, %c0_71] : memref<3x1x60xf32, #tpu.memory_space<vmem>>, vector<1x1x60xf32>
    %207 = vector.shape_cast %206 : vector<1x1x60xf32> to vector<1x60xf32>
    %c0_72 = arith.constant 0 : index
    %c0_73 = arith.constant 0 : index
    %c0_74 = arith.constant 0 : index
    %208 = vector.load %arg18[%c0_72, %c0_73, %c0_74] : memref<3x1x60xf32, #tpu.memory_space<vmem>>, vector<1x1x60xf32>
    %209 = vector.shape_cast %208 : vector<1x1x60xf32> to vector<1x60xf32>
    %cst_75 = arith.constant dense<0.000000e+00> : vector<16xf32>
    %210 = vector.multi_reduction <add>, %205, %cst_75 [1] : vector<16x60xf32> to vector<16xf32>
    %211 = vector.shape_cast %210 : vector<16xf32> to vector<16x1xf32>
    %cst_76 = arith.constant 6.000000e+01 : f32
    %212 = vector.broadcast %cst_76 : f32 to vector<16x1xf32>
    %213 = arith.divf %211, %212 : vector<16x1xf32>
    %214 = vector.broadcast %213 : vector<16x1xf32> to vector<16x60xf32>
    %215 = arith.subf %205, %214 : vector<16x60xf32>
    %216 = arith.mulf %215, %215 : vector<16x60xf32>
    %cst_77 = arith.constant dense<0.000000e+00> : vector<16xf32>
    %217 = vector.multi_reduction <add>, %216, %cst_77 [1] : vector<16x60xf32> to vector<16xf32>
    %218 = vector.shape_cast %217 : vector<16xf32> to vector<16x1xf32>
    %cst_78 = arith.constant 6.000000e+01 : f32
    %219 = vector.broadcast %cst_78 : f32 to vector<16x1xf32>
    %220 = arith.divf %218, %219 : vector<16x1xf32>
    %cst_79 = arith.constant 9.99999974E-6 : f32
    %221 = vector.broadcast %cst_79 : f32 to vector<16x1xf32>
    %222 = arith.addf %220, %221 : vector<16x1xf32>
    %223 = math.rsqrt %222 : vector<16x1xf32>
    %224 = vector.broadcast %223 : vector<16x1xf32> to vector<16x60xf32>
    %225 = arith.mulf %215, %224 : vector<16x60xf32>
    %226 = vector.broadcast %207 : vector<1x60xf32> to vector<16x60xf32>
    %227 = arith.mulf %225, %226 : vector<16x60xf32>
    %228 = vector.broadcast %209 : vector<1x60xf32> to vector<16x60xf32>
    %229 = arith.addf %227, %228 : vector<16x60xf32>
    %c0_80 = arith.constant 0 : index
    %c0_81 = arith.constant 0 : index
    %c0_82 = arith.constant 0 : index
    %230 = vector.load %arg11[%c0_80, %c0_81, %c0_82] : memref<3x60x240xf32, #tpu.memory_space<vmem>>, vector<1x60x240xf32>
    %231 = vector.shape_cast %230 : vector<1x60x240xf32> to vector<60x240xf32>
    %cst_83 = arith.constant dense<0.000000e+00> : vector<16x240xf32>
    %232 = tpu.matmul %229, %231, %cst_83 {dimension_numbers = #tpu.dot_dimension_numbers<[1], [0], [0], [1], [0, 0, 1, 1], [], []>} : vector<16x60xf32>, vector<60x240xf32>, vector<16x240xf32> -> vector<16x240xf32>
    %c0_84 = arith.constant 0 : index
    %c0_85 = arith.constant 0 : index
    %c0_86 = arith.constant 0 : index
    %233 = vector.load %arg12[%c0_84, %c0_85, %c0_86] : memref<3x1x240xf32, #tpu.memory_space<vmem>>, vector<1x1x240xf32>
    %234 = vector.shape_cast %233 : vector<1x1x240xf32> to vector<1x240xf32>
    %235 = vector.broadcast %234 : vector<1x240xf32> to vector<16x240xf32>
    %236 = arith.addf %232, %235 : vector<16x240xf32>
    %cst_87 = arith.constant 0.000000e+00 : f32
    %237 = vector.broadcast %cst_87 : f32 to vector<16x240xf32>
    %238 = arith.maximumf %236, %237 : vector<16x240xf32>
    %c0_88 = arith.constant 0 : index
    %c0_89 = arith.constant 0 : index
    %c0_90 = arith.constant 0 : index
    %239 = vector.load %arg13[%c0_88, %c0_89, %c0_90] : memref<3x240x60xf32, #tpu.memory_space<vmem>>, vector<1x240x60xf32>
    %240 = vector.shape_cast %239 : vector<1x240x60xf32> to vector<240x60xf32>
    %cst_91 = arith.constant dense<0.000000e+00> : vector<16x60xf32>
    %241 = tpu.matmul %238, %240, %cst_91 {dimension_numbers = #tpu.dot_dimension_numbers<[1], [0], [0], [1], [0, 0, 1, 1], [], []>} : vector<16x240xf32>, vector<240x60xf32>, vector<16x60xf32> -> vector<16x60xf32>
    %242 = arith.addf %205, %241 : vector<16x60xf32>
    %c0_92 = arith.constant 0 : index
    %c0_93 = arith.constant 0 : index
    %c0_94 = arith.constant 0 : index
    %243 = vector.load %arg14[%c0_92, %c0_93, %c0_94] : memref<3x1x60xf32, #tpu.memory_space<vmem>>, vector<1x1x60xf32>
    %244 = vector.shape_cast %243 : vector<1x1x60xf32> to vector<1x60xf32>
    %245 = vector.broadcast %244 : vector<1x60xf32> to vector<16x60xf32>
    %246 = arith.addf %242, %245 : vector<16x60xf32>
    %c1 = arith.constant 1 : index
    %c0_95 = arith.constant 0 : index
    %c0_96 = arith.constant 0 : index
    %247 = vector.load %arg15[%c1, %c0_95, %c0_96] : memref<3x1x60xf32, #tpu.memory_space<vmem>>, vector<1x1x60xf32>
    %248 = vector.shape_cast %247 : vector<1x1x60xf32> to vector<1x60xf32>
    %c1_97 = arith.constant 1 : index
    %c0_98 = arith.constant 0 : index
    %c0_99 = arith.constant 0 : index
    %249 = vector.load %arg16[%c1_97, %c0_98, %c0_99] : memref<3x1x60xf32, #tpu.memory_space<vmem>>, vector<1x1x60xf32>
    %250 = vector.shape_cast %249 : vector<1x1x60xf32> to vector<1x60xf32>
    %cst_100 = arith.constant dense<0.000000e+00> : vector<16xf32>
    %251 = vector.multi_reduction <add>, %246, %cst_100 [1] : vector<16x60xf32> to vector<16xf32>
    %252 = vector.shape_cast %251 : vector<16xf32> to vector<16x1xf32>
    %cst_101 = arith.constant 6.000000e+01 : f32
    %253 = vector.broadcast %cst_101 : f32 to vector<16x1xf32>
    %254 = arith.divf %252, %253 : vector<16x1xf32>
    %255 = vector.broadcast %254 : vector<16x1xf32> to vector<16x60xf32>
    %256 = arith.subf %246, %255 : vector<16x60xf32>
    %257 = arith.mulf %256, %256 : vector<16x60xf32>
    %cst_102 = arith.constant dense<0.000000e+00> : vector<16xf32>
    %258 = vector.multi_reduction <add>, %257, %cst_102 [1] : vector<16x60xf32> to vector<16xf32>
    %259 = vector.shape_cast %258 : vector<16xf32> to vector<16x1xf32>
    %cst_103 = arith.constant 6.000000e+01 : f32
    %260 = vector.broadcast %cst_103 : f32 to vector<16x1xf32>
    %261 = arith.divf %259, %260 : vector<16x1xf32>
    %cst_104 = arith.constant 9.99999974E-6 : f32
    %262 = vector.broadcast %cst_104 : f32 to vector<16x1xf32>
    %263 = arith.addf %261, %262 : vector<16x1xf32>
    %264 = math.rsqrt %263 : vector<16x1xf32>
    %265 = vector.broadcast %264 : vector<16x1xf32> to vector<16x60xf32>
    %266 = arith.mulf %256, %265 : vector<16x60xf32>
    %267 = vector.broadcast %248 : vector<1x60xf32> to vector<16x60xf32>
    %268 = arith.mulf %266, %267 : vector<16x60xf32>
    %269 = vector.broadcast %250 : vector<1x60xf32> to vector<16x60xf32>
    %270 = arith.addf %268, %269 : vector<16x60xf32>
    %c1_105 = arith.constant 1 : index
    %c0_106 = arith.constant 0 : index
    %c0_107 = arith.constant 0 : index
    %271 = vector.load %arg3[%c1_105, %c0_106, %c0_107] : memref<3x60x60xf32, #tpu.memory_space<vmem>>, vector<1x60x60xf32>
    %272 = vector.shape_cast %271 : vector<1x60x60xf32> to vector<60x60xf32>
    %cst_108 = arith.constant dense<0.000000e+00> : vector<16x60xf32>
    %273 = tpu.matmul %270, %272, %cst_108 {dimension_numbers = #tpu.dot_dimension_numbers<[1], [0], [0], [1], [0, 0, 1, 1], [], []>} : vector<16x60xf32>, vector<60x60xf32>, vector<16x60xf32> -> vector<16x60xf32>
    %c1_109 = arith.constant 1 : index
    %c0_110 = arith.constant 0 : index
    %c0_111 = arith.constant 0 : index
    %274 = vector.load %arg4[%c1_109, %c0_110, %c0_111] : memref<3x1x60xf32, #tpu.memory_space<vmem>>, vector<1x1x60xf32>
    %275 = vector.shape_cast %274 : vector<1x1x60xf32> to vector<1x60xf32>
    %276 = vector.broadcast %275 : vector<1x60xf32> to vector<16x60xf32>
    %277 = arith.addf %273, %276 : vector<16x60xf32>
    %c1_112 = arith.constant 1 : index
    %c0_113 = arith.constant 0 : index
    %c0_114 = arith.constant 0 : index
    %278 = vector.load %arg5[%c1_112, %c0_113, %c0_114] : memref<3x60x60xf32, #tpu.memory_space<vmem>>, vector<1x60x60xf32>
    %279 = vector.shape_cast %278 : vector<1x60x60xf32> to vector<60x60xf32>
    %cst_115 = arith.constant dense<0.000000e+00> : vector<16x60xf32>
    %280 = tpu.matmul %270, %279, %cst_115 {dimension_numbers = #tpu.dot_dimension_numbers<[1], [0], [0], [1], [0, 0, 1, 1], [], []>} : vector<16x60xf32>, vector<60x60xf32>, vector<16x60xf32> -> vector<16x60xf32>
    %c1_116 = arith.constant 1 : index
    %c0_117 = arith.constant 0 : index
    %c0_118 = arith.constant 0 : index
    %281 = vector.load %arg6[%c1_116, %c0_117, %c0_118] : memref<3x1x60xf32, #tpu.memory_space<vmem>>, vector<1x1x60xf32>
    %282 = vector.shape_cast %281 : vector<1x1x60xf32> to vector<1x60xf32>
    %283 = vector.broadcast %282 : vector<1x60xf32> to vector<16x60xf32>
    %284 = arith.addf %280, %283 : vector<16x60xf32>
    %c1_119 = arith.constant 1 : index
    %c0_120 = arith.constant 0 : index
    %c0_121 = arith.constant 0 : index
    %285 = vector.load %arg7[%c1_119, %c0_120, %c0_121] : memref<3x60x60xf32, #tpu.memory_space<vmem>>, vector<1x60x60xf32>
    %286 = vector.shape_cast %285 : vector<1x60x60xf32> to vector<60x60xf32>
    %cst_122 = arith.constant dense<0.000000e+00> : vector<16x60xf32>
    %287 = tpu.matmul %270, %286, %cst_122 {dimension_numbers = #tpu.dot_dimension_numbers<[1], [0], [0], [1], [0, 0, 1, 1], [], []>} : vector<16x60xf32>, vector<60x60xf32>, vector<16x60xf32> -> vector<16x60xf32>
    %c1_123 = arith.constant 1 : index
    %c0_124 = arith.constant 0 : index
    %c0_125 = arith.constant 0 : index
    %288 = vector.load %arg8[%c1_123, %c0_124, %c0_125] : memref<3x1x60xf32, #tpu.memory_space<vmem>>, vector<1x1x60xf32>
    %289 = vector.shape_cast %288 : vector<1x1x60xf32> to vector<1x60xf32>
    %290 = vector.broadcast %289 : vector<1x60xf32> to vector<16x60xf32>
    %291 = arith.addf %287, %290 : vector<16x60xf32>
    %292 = vector.shape_cast %284 : vector<16x60xf32> to vector<2x8x60xf32>
    %cst_126 = arith.constant 0.000000e+00 : f32
    %293 = vector.broadcast %cst_126 : f32 to vector<16x60xf32>
    %294 = vector.broadcast %22 : vector<1x60xf32> to vector<16x60xf32>
    %295 = arith.mulf %277, %294 : vector<16x60xf32>
    %296 = vector.shape_cast %295 : vector<16x60xf32> to vector<2x8x60xf32>
    "tpu.trace_start"() <{level = 10 : i32, message = "bqd,bkd->bqk"}> : () -> ()
    %cst_127 = arith.constant dense<0.000000e+00> : vector<2x8x8xf32>
    %297 = tpu.matmul %296, %292, %cst_127 {dimension_numbers = #tpu.dot_dimension_numbers<[2], [2], [1], [1], [0, 0, 0, 1, 1, 1], [0], [0]>} : vector<2x8x60xf32>, vector<2x8x60xf32>, vector<2x8x8xf32> -> vector<2x8x8xf32>
    "tpu.trace_stop"() : () -> ()
    %cst_128 = arith.constant dense<0xFF800000> : vector<2x8xf32>
    %298 = vector.multi_reduction <maximumf>, %297, %cst_128 [2] : vector<2x8x8xf32> to vector<2x8xf32>
    %299 = vector.shape_cast %298 : vector<2x8xf32> to vector<2x8x1xf32>
    %300 = vector.broadcast %299 : vector<2x8x1xf32> to vector<2x8x8xf32>
    %301 = arith.subf %297, %300 : vector<2x8x8xf32>
    %302 = math.exp %301 : vector<2x8x8xf32>
    %cst_129 = arith.constant dense<0.000000e+00> : vector<2x8xf32>
    %303 = vector.multi_reduction <add>, %302, %cst_129 [2] : vector<2x8x8xf32> to vector<2x8xf32>
    %304 = vector.shape_cast %303 : vector<2x8xf32> to vector<2x8x1xf32>
    %305 = tpu.reciprocal %304 {approx = true} : vector<2x8x1xf32> -> vector<2x8x1xf32>
    %306 = vector.broadcast %305 : vector<2x8x1xf32> to vector<2x8x8xf32>
    %307 = arith.mulf %302, %306 : vector<2x8x8xf32>
    %308 = vector.broadcast %22 : vector<1x60xf32> to vector<16x60xf32>
    %309 = arith.mulf %291, %308 : vector<16x60xf32>
    %310 = vector.shape_cast %309 : vector<16x60xf32> to vector<2x8x60xf32>
    "tpu.trace_start"() <{level = 10 : i32, message = "bqk,bkd->bqd"}> : () -> ()
    %cst_130 = arith.constant dense<0.000000e+00> : vector<2x8x60xf32>
    %311 = tpu.matmul %307, %310, %cst_130 {dimension_numbers = #tpu.dot_dimension_numbers<[2], [1], [1], [2], [0, 0, 0, 1, 1, 2], [0], [0]>} : vector<2x8x8xf32>, vector<2x8x60xf32>, vector<2x8x60xf32> -> vector<2x8x60xf32>
    "tpu.trace_stop"() : () -> ()
    %312 = vector.shape_cast %311 : vector<2x8x60xf32> to vector<16x60xf32>
    %313 = arith.addf %293, %312 : vector<16x60xf32>
    %314 = vector.broadcast %29 : vector<1x60xf32> to vector<16x60xf32>
    %315 = arith.mulf %277, %314 : vector<16x60xf32>
    %316 = vector.shape_cast %315 : vector<16x60xf32> to vector<2x8x60xf32>
    "tpu.trace_start"() <{level = 10 : i32, message = "bqd,bkd->bqk"}> : () -> ()
    %cst_131 = arith.constant dense<0.000000e+00> : vector<2x8x8xf32>
    %317 = tpu.matmul %316, %292, %cst_131 {dimension_numbers = #tpu.dot_dimension_numbers<[2], [2], [1], [1], [0, 0, 0, 1, 1, 1], [0], [0]>} : vector<2x8x60xf32>, vector<2x8x60xf32>, vector<2x8x8xf32> -> vector<2x8x8xf32>
    "tpu.trace_stop"() : () -> ()
    %cst_132 = arith.constant dense<0xFF800000> : vector<2x8xf32>
    %318 = vector.multi_reduction <maximumf>, %317, %cst_132 [2] : vector<2x8x8xf32> to vector<2x8xf32>
    %319 = vector.shape_cast %318 : vector<2x8xf32> to vector<2x8x1xf32>
    %320 = vector.broadcast %319 : vector<2x8x1xf32> to vector<2x8x8xf32>
    %321 = arith.subf %317, %320 : vector<2x8x8xf32>
    %322 = math.exp %321 : vector<2x8x8xf32>
    %cst_133 = arith.constant dense<0.000000e+00> : vector<2x8xf32>
    %323 = vector.multi_reduction <add>, %322, %cst_133 [2] : vector<2x8x8xf32> to vector<2x8xf32>
    %324 = vector.shape_cast %323 : vector<2x8xf32> to vector<2x8x1xf32>
    %325 = tpu.reciprocal %324 {approx = true} : vector<2x8x1xf32> -> vector<2x8x1xf32>
    %326 = vector.broadcast %325 : vector<2x8x1xf32> to vector<2x8x8xf32>
    %327 = arith.mulf %322, %326 : vector<2x8x8xf32>
    %328 = vector.broadcast %29 : vector<1x60xf32> to vector<16x60xf32>
    %329 = arith.mulf %291, %328 : vector<16x60xf32>
    %330 = vector.shape_cast %329 : vector<16x60xf32> to vector<2x8x60xf32>
    "tpu.trace_start"() <{level = 10 : i32, message = "bqk,bkd->bqd"}> : () -> ()
    %cst_134 = arith.constant dense<0.000000e+00> : vector<2x8x60xf32>
    %331 = tpu.matmul %327, %330, %cst_134 {dimension_numbers = #tpu.dot_dimension_numbers<[2], [1], [1], [2], [0, 0, 0, 1, 1, 2], [0], [0]>} : vector<2x8x8xf32>, vector<2x8x60xf32>, vector<2x8x60xf32> -> vector<2x8x60xf32>
    "tpu.trace_stop"() : () -> ()
    %332 = vector.shape_cast %331 : vector<2x8x60xf32> to vector<16x60xf32>
    %333 = arith.addf %313, %332 : vector<16x60xf32>
    %334 = vector.broadcast %36 : vector<1x60xf32> to vector<16x60xf32>
    %335 = arith.mulf %277, %334 : vector<16x60xf32>
    %336 = vector.shape_cast %335 : vector<16x60xf32> to vector<2x8x60xf32>
    "tpu.trace_start"() <{level = 10 : i32, message = "bqd,bkd->bqk"}> : () -> ()
    %cst_135 = arith.constant dense<0.000000e+00> : vector<2x8x8xf32>
    %337 = tpu.matmul %336, %292, %cst_135 {dimension_numbers = #tpu.dot_dimension_numbers<[2], [2], [1], [1], [0, 0, 0, 1, 1, 1], [0], [0]>} : vector<2x8x60xf32>, vector<2x8x60xf32>, vector<2x8x8xf32> -> vector<2x8x8xf32>
    "tpu.trace_stop"() : () -> ()
    %cst_136 = arith.constant dense<0xFF800000> : vector<2x8xf32>
    %338 = vector.multi_reduction <maximumf>, %337, %cst_136 [2] : vector<2x8x8xf32> to vector<2x8xf32>
    %339 = vector.shape_cast %338 : vector<2x8xf32> to vector<2x8x1xf32>
    %340 = vector.broadcast %339 : vector<2x8x1xf32> to vector<2x8x8xf32>
    %341 = arith.subf %337, %340 : vector<2x8x8xf32>
    %342 = math.exp %341 : vector<2x8x8xf32>
    %cst_137 = arith.constant dense<0.000000e+00> : vector<2x8xf32>
    %343 = vector.multi_reduction <add>, %342, %cst_137 [2] : vector<2x8x8xf32> to vector<2x8xf32>
    %344 = vector.shape_cast %343 : vector<2x8xf32> to vector<2x8x1xf32>
    %345 = tpu.reciprocal %344 {approx = true} : vector<2x8x1xf32> -> vector<2x8x1xf32>
    %346 = vector.broadcast %345 : vector<2x8x1xf32> to vector<2x8x8xf32>
    %347 = arith.mulf %342, %346 : vector<2x8x8xf32>
    %348 = vector.broadcast %36 : vector<1x60xf32> to vector<16x60xf32>
    %349 = arith.mulf %291, %348 : vector<16x60xf32>
    %350 = vector.shape_cast %349 : vector<16x60xf32> to vector<2x8x60xf32>
    "tpu.trace_start"() <{level = 10 : i32, message = "bqk,bkd->bqd"}> : () -> ()
    %cst_138 = arith.constant dense<0.000000e+00> : vector<2x8x60xf32>
    %351 = tpu.matmul %347, %350, %cst_138 {dimension_numbers = #tpu.dot_dimension_numbers<[2], [1], [1], [2], [0, 0, 0, 1, 1, 2], [0], [0]>} : vector<2x8x8xf32>, vector<2x8x60xf32>, vector<2x8x60xf32> -> vector<2x8x60xf32>
    "tpu.trace_stop"() : () -> ()
    %352 = vector.shape_cast %351 : vector<2x8x60xf32> to vector<16x60xf32>
    %353 = arith.addf %333, %352 : vector<16x60xf32>
    %354 = vector.broadcast %43 : vector<1x60xf32> to vector<16x60xf32>
    %355 = arith.mulf %277, %354 : vector<16x60xf32>
    %356 = vector.shape_cast %355 : vector<16x60xf32> to vector<2x8x60xf32>
    "tpu.trace_start"() <{level = 10 : i32, message = "bqd,bkd->bqk"}> : () -> ()
    %cst_139 = arith.constant dense<0.000000e+00> : vector<2x8x8xf32>
    %357 = tpu.matmul %356, %292, %cst_139 {dimension_numbers = #tpu.dot_dimension_numbers<[2], [2], [1], [1], [0, 0, 0, 1, 1, 1], [0], [0]>} : vector<2x8x60xf32>, vector<2x8x60xf32>, vector<2x8x8xf32> -> vector<2x8x8xf32>
    "tpu.trace_stop"() : () -> ()
    %cst_140 = arith.constant dense<0xFF800000> : vector<2x8xf32>
    %358 = vector.multi_reduction <maximumf>, %357, %cst_140 [2] : vector<2x8x8xf32> to vector<2x8xf32>
    %359 = vector.shape_cast %358 : vector<2x8xf32> to vector<2x8x1xf32>
    %360 = vector.broadcast %359 : vector<2x8x1xf32> to vector<2x8x8xf32>
    %361 = arith.subf %357, %360 : vector<2x8x8xf32>
    %362 = math.exp %361 : vector<2x8x8xf32>
    %cst_141 = arith.constant dense<0.000000e+00> : vector<2x8xf32>
    %363 = vector.multi_reduction <add>, %362, %cst_141 [2] : vector<2x8x8xf32> to vector<2x8xf32>
    %364 = vector.shape_cast %363 : vector<2x8xf32> to vector<2x8x1xf32>
    %365 = tpu.reciprocal %364 {approx = true} : vector<2x8x1xf32> -> vector<2x8x1xf32>
    %366 = vector.broadcast %365 : vector<2x8x1xf32> to vector<2x8x8xf32>
    %367 = arith.mulf %362, %366 : vector<2x8x8xf32>
    %368 = vector.broadcast %43 : vector<1x60xf32> to vector<16x60xf32>
    %369 = arith.mulf %291, %368 : vector<16x60xf32>
    %370 = vector.shape_cast %369 : vector<16x60xf32> to vector<2x8x60xf32>
    "tpu.trace_start"() <{level = 10 : i32, message = "bqk,bkd->bqd"}> : () -> ()
    %cst_142 = arith.constant dense<0.000000e+00> : vector<2x8x60xf32>
    %371 = tpu.matmul %367, %370, %cst_142 {dimension_numbers = #tpu.dot_dimension_numbers<[2], [1], [1], [2], [0, 0, 0, 1, 1, 2], [0], [0]>} : vector<2x8x8xf32>, vector<2x8x60xf32>, vector<2x8x60xf32> -> vector<2x8x60xf32>
    "tpu.trace_stop"() : () -> ()
    %372 = vector.shape_cast %371 : vector<2x8x60xf32> to vector<16x60xf32>
    %373 = arith.addf %353, %372 : vector<16x60xf32>
    %374 = vector.broadcast %50 : vector<1x60xf32> to vector<16x60xf32>
    %375 = arith.mulf %277, %374 : vector<16x60xf32>
    %376 = vector.shape_cast %375 : vector<16x60xf32> to vector<2x8x60xf32>
    "tpu.trace_start"() <{level = 10 : i32, message = "bqd,bkd->bqk"}> : () -> ()
    %cst_143 = arith.constant dense<0.000000e+00> : vector<2x8x8xf32>
    %377 = tpu.matmul %376, %292, %cst_143 {dimension_numbers = #tpu.dot_dimension_numbers<[2], [2], [1], [1], [0, 0, 0, 1, 1, 1], [0], [0]>} : vector<2x8x60xf32>, vector<2x8x60xf32>, vector<2x8x8xf32> -> vector<2x8x8xf32>
    "tpu.trace_stop"() : () -> ()
    %cst_144 = arith.constant dense<0xFF800000> : vector<2x8xf32>
    %378 = vector.multi_reduction <maximumf>, %377, %cst_144 [2] : vector<2x8x8xf32> to vector<2x8xf32>
    %379 = vector.shape_cast %378 : vector<2x8xf32> to vector<2x8x1xf32>
    %380 = vector.broadcast %379 : vector<2x8x1xf32> to vector<2x8x8xf32>
    %381 = arith.subf %377, %380 : vector<2x8x8xf32>
    %382 = math.exp %381 : vector<2x8x8xf32>
    %cst_145 = arith.constant dense<0.000000e+00> : vector<2x8xf32>
    %383 = vector.multi_reduction <add>, %382, %cst_145 [2] : vector<2x8x8xf32> to vector<2x8xf32>
    %384 = vector.shape_cast %383 : vector<2x8xf32> to vector<2x8x1xf32>
    %385 = tpu.reciprocal %384 {approx = true} : vector<2x8x1xf32> -> vector<2x8x1xf32>
    %386 = vector.broadcast %385 : vector<2x8x1xf32> to vector<2x8x8xf32>
    %387 = arith.mulf %382, %386 : vector<2x8x8xf32>
    %388 = vector.broadcast %50 : vector<1x60xf32> to vector<16x60xf32>
    %389 = arith.mulf %291, %388 : vector<16x60xf32>
    %390 = vector.shape_cast %389 : vector<16x60xf32> to vector<2x8x60xf32>
    "tpu.trace_start"() <{level = 10 : i32, message = "bqk,bkd->bqd"}> : () -> ()
    %cst_146 = arith.constant dense<0.000000e+00> : vector<2x8x60xf32>
    %391 = tpu.matmul %387, %390, %cst_146 {dimension_numbers = #tpu.dot_dimension_numbers<[2], [1], [1], [2], [0, 0, 0, 1, 1, 2], [0], [0]>} : vector<2x8x8xf32>, vector<2x8x60xf32>, vector<2x8x60xf32> -> vector<2x8x60xf32>
    "tpu.trace_stop"() : () -> ()
    %392 = vector.shape_cast %391 : vector<2x8x60xf32> to vector<16x60xf32>
    %393 = arith.addf %373, %392 : vector<16x60xf32>
    %c1_147 = arith.constant 1 : index
    %c0_148 = arith.constant 0 : index
    %c0_149 = arith.constant 0 : index
    %394 = vector.load %arg9[%c1_147, %c0_148, %c0_149] : memref<3x60x60xf32, #tpu.memory_space<vmem>>, vector<1x60x60xf32>
    %395 = vector.shape_cast %394 : vector<1x60x60xf32> to vector<60x60xf32>
    %cst_150 = arith.constant dense<0.000000e+00> : vector<16x60xf32>
    %396 = tpu.matmul %393, %395, %cst_150 {dimension_numbers = #tpu.dot_dimension_numbers<[1], [0], [0], [1], [0, 0, 1, 1], [], []>} : vector<16x60xf32>, vector<60x60xf32>, vector<16x60xf32> -> vector<16x60xf32>
    %397 = arith.addf %246, %396 : vector<16x60xf32>
    %c1_151 = arith.constant 1 : index
    %c0_152 = arith.constant 0 : index
    %c0_153 = arith.constant 0 : index
    %398 = vector.load %arg10[%c1_151, %c0_152, %c0_153] : memref<3x1x60xf32, #tpu.memory_space<vmem>>, vector<1x1x60xf32>
    %399 = vector.shape_cast %398 : vector<1x1x60xf32> to vector<1x60xf32>
    %400 = vector.broadcast %399 : vector<1x60xf32> to vector<16x60xf32>
    %401 = arith.addf %397, %400 : vector<16x60xf32>
    %c1_154 = arith.constant 1 : index
    %c0_155 = arith.constant 0 : index
    %c0_156 = arith.constant 0 : index
    %402 = vector.load %arg17[%c1_154, %c0_155, %c0_156] : memref<3x1x60xf32, #tpu.memory_space<vmem>>, vector<1x1x60xf32>
    %403 = vector.shape_cast %402 : vector<1x1x60xf32> to vector<1x60xf32>
    %c1_157 = arith.constant 1 : index
    %c0_158 = arith.constant 0 : index
    %c0_159 = arith.constant 0 : index
    %404 = vector.load %arg18[%c1_157, %c0_158, %c0_159] : memref<3x1x60xf32, #tpu.memory_space<vmem>>, vector<1x1x60xf32>
    %405 = vector.shape_cast %404 : vector<1x1x60xf32> to vector<1x60xf32>
    %cst_160 = arith.constant dense<0.000000e+00> : vector<16xf32>
    %406 = vector.multi_reduction <add>, %401, %cst_160 [1] : vector<16x60xf32> to vector<16xf32>
    %407 = vector.shape_cast %406 : vector<16xf32> to vector<16x1xf32>
    %cst_161 = arith.constant 6.000000e+01 : f32
    %408 = vector.broadcast %cst_161 : f32 to vector<16x1xf32>
    %409 = arith.divf %407, %408 : vector<16x1xf32>
    %410 = vector.broadcast %409 : vector<16x1xf32> to vector<16x60xf32>
    %411 = arith.subf %401, %410 : vector<16x60xf32>
    %412 = arith.mulf %411, %411 : vector<16x60xf32>
    %cst_162 = arith.constant dense<0.000000e+00> : vector<16xf32>
    %413 = vector.multi_reduction <add>, %412, %cst_162 [1] : vector<16x60xf32> to vector<16xf32>
    %414 = vector.shape_cast %413 : vector<16xf32> to vector<16x1xf32>
    %cst_163 = arith.constant 6.000000e+01 : f32
    %415 = vector.broadcast %cst_163 : f32 to vector<16x1xf32>
    %416 = arith.divf %414, %415 : vector<16x1xf32>
    %cst_164 = arith.constant 9.99999974E-6 : f32
    %417 = vector.broadcast %cst_164 : f32 to vector<16x1xf32>
    %418 = arith.addf %416, %417 : vector<16x1xf32>
    %419 = math.rsqrt %418 : vector<16x1xf32>
    %420 = vector.broadcast %419 : vector<16x1xf32> to vector<16x60xf32>
    %421 = arith.mulf %411, %420 : vector<16x60xf32>
    %422 = vector.broadcast %403 : vector<1x60xf32> to vector<16x60xf32>
    %423 = arith.mulf %421, %422 : vector<16x60xf32>
    %424 = vector.broadcast %405 : vector<1x60xf32> to vector<16x60xf32>
    %425 = arith.addf %423, %424 : vector<16x60xf32>
    %c1_165 = arith.constant 1 : index
    %c0_166 = arith.constant 0 : index
    %c0_167 = arith.constant 0 : index
    %426 = vector.load %arg11[%c1_165, %c0_166, %c0_167] : memref<3x60x240xf32, #tpu.memory_space<vmem>>, vector<1x60x240xf32>
    %427 = vector.shape_cast %426 : vector<1x60x240xf32> to vector<60x240xf32>
    %cst_168 = arith.constant dense<0.000000e+00> : vector<16x240xf32>
    %428 = tpu.matmul %425, %427, %cst_168 {dimension_numbers = #tpu.dot_dimension_numbers<[1], [0], [0], [1], [0, 0, 1, 1], [], []>} : vector<16x60xf32>, vector<60x240xf32>, vector<16x240xf32> -> vector<16x240xf32>
    %c1_169 = arith.constant 1 : index
    %c0_170 = arith.constant 0 : index
    %c0_171 = arith.constant 0 : index
    %429 = vector.load %arg12[%c1_169, %c0_170, %c0_171] : memref<3x1x240xf32, #tpu.memory_space<vmem>>, vector<1x1x240xf32>
    %430 = vector.shape_cast %429 : vector<1x1x240xf32> to vector<1x240xf32>
    %431 = vector.broadcast %430 : vector<1x240xf32> to vector<16x240xf32>
    %432 = arith.addf %428, %431 : vector<16x240xf32>
    %cst_172 = arith.constant 0.000000e+00 : f32
    %433 = vector.broadcast %cst_172 : f32 to vector<16x240xf32>
    %434 = arith.maximumf %432, %433 : vector<16x240xf32>
    %c1_173 = arith.constant 1 : index
    %c0_174 = arith.constant 0 : index
    %c0_175 = arith.constant 0 : index
    %435 = vector.load %arg13[%c1_173, %c0_174, %c0_175] : memref<3x240x60xf32, #tpu.memory_space<vmem>>, vector<1x240x60xf32>
    %436 = vector.shape_cast %435 : vector<1x240x60xf32> to vector<240x60xf32>
    %cst_176 = arith.constant dense<0.000000e+00> : vector<16x60xf32>
    %437 = tpu.matmul %434, %436, %cst_176 {dimension_numbers = #tpu.dot_dimension_numbers<[1], [0], [0], [1], [0, 0, 1, 1], [], []>} : vector<16x240xf32>, vector<240x60xf32>, vector<16x60xf32> -> vector<16x60xf32>
    %438 = arith.addf %401, %437 : vector<16x60xf32>
    %c1_177 = arith.constant 1 : index
    %c0_178 = arith.constant 0 : index
    %c0_179 = arith.constant 0 : index
    %439 = vector.load %arg14[%c1_177, %c0_178, %c0_179] : memref<3x1x60xf32, #tpu.memory_space<vmem>>, vector<1x1x60xf32>
    %440 = vector.shape_cast %439 : vector<1x1x60xf32> to vector<1x60xf32>
    %441 = vector.broadcast %440 : vector<1x60xf32> to vector<16x60xf32>
    %442 = arith.addf %438, %441 : vector<16x60xf32>
    %c2 = arith.constant 2 : index
    %c0_180 = arith.constant 0 : index
    %c0_181 = arith.constant 0 : index
    %443 = vector.load %arg15[%c2, %c0_180, %c0_181] : memref<3x1x60xf32, #tpu.memory_space<vmem>>, vector<1x1x60xf32>
    %444 = vector.shape_cast %443 : vector<1x1x60xf32> to vector<1x60xf32>
    %c2_182 = arith.constant 2 : index
    %c0_183 = arith.constant 0 : index
    %c0_184 = arith.constant 0 : index
    %445 = vector.load %arg16[%c2_182, %c0_183, %c0_184] : memref<3x1x60xf32, #tpu.memory_space<vmem>>, vector<1x1x60xf32>
    %446 = vector.shape_cast %445 : vector<1x1x60xf32> to vector<1x60xf32>
    %cst_185 = arith.constant dense<0.000000e+00> : vector<16xf32>
    %447 = vector.multi_reduction <add>, %442, %cst_185 [1] : vector<16x60xf32> to vector<16xf32>
    %448 = vector.shape_cast %447 : vector<16xf32> to vector<16x1xf32>
    %cst_186 = arith.constant 6.000000e+01 : f32
    %449 = vector.broadcast %cst_186 : f32 to vector<16x1xf32>
    %450 = arith.divf %448, %449 : vector<16x1xf32>
    %451 = vector.broadcast %450 : vector<16x1xf32> to vector<16x60xf32>
    %452 = arith.subf %442, %451 : vector<16x60xf32>
    %453 = arith.mulf %452, %452 : vector<16x60xf32>
    %cst_187 = arith.constant dense<0.000000e+00> : vector<16xf32>
    %454 = vector.multi_reduction <add>, %453, %cst_187 [1] : vector<16x60xf32> to vector<16xf32>
    %455 = vector.shape_cast %454 : vector<16xf32> to vector<16x1xf32>
    %cst_188 = arith.constant 6.000000e+01 : f32
    %456 = vector.broadcast %cst_188 : f32 to vector<16x1xf32>
    %457 = arith.divf %455, %456 : vector<16x1xf32>
    %cst_189 = arith.constant 9.99999974E-6 : f32
    %458 = vector.broadcast %cst_189 : f32 to vector<16x1xf32>
    %459 = arith.addf %457, %458 : vector<16x1xf32>
    %460 = math.rsqrt %459 : vector<16x1xf32>
    %461 = vector.broadcast %460 : vector<16x1xf32> to vector<16x60xf32>
    %462 = arith.mulf %452, %461 : vector<16x60xf32>
    %463 = vector.broadcast %444 : vector<1x60xf32> to vector<16x60xf32>
    %464 = arith.mulf %462, %463 : vector<16x60xf32>
    %465 = vector.broadcast %446 : vector<1x60xf32> to vector<16x60xf32>
    %466 = arith.addf %464, %465 : vector<16x60xf32>
    %c2_190 = arith.constant 2 : index
    %c0_191 = arith.constant 0 : index
    %c0_192 = arith.constant 0 : index
    %467 = vector.load %arg3[%c2_190, %c0_191, %c0_192] : memref<3x60x60xf32, #tpu.memory_space<vmem>>, vector<1x60x60xf32>
    %468 = vector.shape_cast %467 : vector<1x60x60xf32> to vector<60x60xf32>
    %cst_193 = arith.constant dense<0.000000e+00> : vector<16x60xf32>
    %469 = tpu.matmul %466, %468, %cst_193 {dimension_numbers = #tpu.dot_dimension_numbers<[1], [0], [0], [1], [0, 0, 1, 1], [], []>} : vector<16x60xf32>, vector<60x60xf32>, vector<16x60xf32> -> vector<16x60xf32>
    %c2_194 = arith.constant 2 : index
    %c0_195 = arith.constant 0 : index
    %c0_196 = arith.constant 0 : index
    %470 = vector.load %arg4[%c2_194, %c0_195, %c0_196] : memref<3x1x60xf32, #tpu.memory_space<vmem>>, vector<1x1x60xf32>
    %471 = vector.shape_cast %470 : vector<1x1x60xf32> to vector<1x60xf32>
    %472 = vector.broadcast %471 : vector<1x60xf32> to vector<16x60xf32>
    %473 = arith.addf %469, %472 : vector<16x60xf32>
    %c2_197 = arith.constant 2 : index
    %c0_198 = arith.constant 0 : index
    %c0_199 = arith.constant 0 : index
    %474 = vector.load %arg5[%c2_197, %c0_198, %c0_199] : memref<3x60x60xf32, #tpu.memory_space<vmem>>, vector<1x60x60xf32>
    %475 = vector.shape_cast %474 : vector<1x60x60xf32> to vector<60x60xf32>
    %cst_200 = arith.constant dense<0.000000e+00> : vector<16x60xf32>
    %476 = tpu.matmul %466, %475, %cst_200 {dimension_numbers = #tpu.dot_dimension_numbers<[1], [0], [0], [1], [0, 0, 1, 1], [], []>} : vector<16x60xf32>, vector<60x60xf32>, vector<16x60xf32> -> vector<16x60xf32>
    %c2_201 = arith.constant 2 : index
    %c0_202 = arith.constant 0 : index
    %c0_203 = arith.constant 0 : index
    %477 = vector.load %arg6[%c2_201, %c0_202, %c0_203] : memref<3x1x60xf32, #tpu.memory_space<vmem>>, vector<1x1x60xf32>
    %478 = vector.shape_cast %477 : vector<1x1x60xf32> to vector<1x60xf32>
    %479 = vector.broadcast %478 : vector<1x60xf32> to vector<16x60xf32>
    %480 = arith.addf %476, %479 : vector<16x60xf32>
    %c2_204 = arith.constant 2 : index
    %c0_205 = arith.constant 0 : index
    %c0_206 = arith.constant 0 : index
    %481 = vector.load %arg7[%c2_204, %c0_205, %c0_206] : memref<3x60x60xf32, #tpu.memory_space<vmem>>, vector<1x60x60xf32>
    %482 = vector.shape_cast %481 : vector<1x60x60xf32> to vector<60x60xf32>
    %cst_207 = arith.constant dense<0.000000e+00> : vector<16x60xf32>
    %483 = tpu.matmul %466, %482, %cst_207 {dimension_numbers = #tpu.dot_dimension_numbers<[1], [0], [0], [1], [0, 0, 1, 1], [], []>} : vector<16x60xf32>, vector<60x60xf32>, vector<16x60xf32> -> vector<16x60xf32>
    %c2_208 = arith.constant 2 : index
    %c0_209 = arith.constant 0 : index
    %c0_210 = arith.constant 0 : index
    %484 = vector.load %arg8[%c2_208, %c0_209, %c0_210] : memref<3x1x60xf32, #tpu.memory_space<vmem>>, vector<1x1x60xf32>
    %485 = vector.shape_cast %484 : vector<1x1x60xf32> to vector<1x60xf32>
    %486 = vector.broadcast %485 : vector<1x60xf32> to vector<16x60xf32>
    %487 = arith.addf %483, %486 : vector<16x60xf32>
    %488 = vector.shape_cast %480 : vector<16x60xf32> to vector<2x8x60xf32>
    %cst_211 = arith.constant 0.000000e+00 : f32
    %489 = vector.broadcast %cst_211 : f32 to vector<16x60xf32>
    %490 = vector.broadcast %22 : vector<1x60xf32> to vector<16x60xf32>
    %491 = arith.mulf %473, %490 : vector<16x60xf32>
    %492 = vector.shape_cast %491 : vector<16x60xf32> to vector<2x8x60xf32>
    "tpu.trace_start"() <{level = 10 : i32, message = "bqd,bkd->bqk"}> : () -> ()
    %cst_212 = arith.constant dense<0.000000e+00> : vector<2x8x8xf32>
    %493 = tpu.matmul %492, %488, %cst_212 {dimension_numbers = #tpu.dot_dimension_numbers<[2], [2], [1], [1], [0, 0, 0, 1, 1, 1], [0], [0]>} : vector<2x8x60xf32>, vector<2x8x60xf32>, vector<2x8x8xf32> -> vector<2x8x8xf32>
    "tpu.trace_stop"() : () -> ()
    %cst_213 = arith.constant dense<0xFF800000> : vector<2x8xf32>
    %494 = vector.multi_reduction <maximumf>, %493, %cst_213 [2] : vector<2x8x8xf32> to vector<2x8xf32>
    %495 = vector.shape_cast %494 : vector<2x8xf32> to vector<2x8x1xf32>
    %496 = vector.broadcast %495 : vector<2x8x1xf32> to vector<2x8x8xf32>
    %497 = arith.subf %493, %496 : vector<2x8x8xf32>
    %498 = math.exp %497 : vector<2x8x8xf32>
    %cst_214 = arith.constant dense<0.000000e+00> : vector<2x8xf32>
    %499 = vector.multi_reduction <add>, %498, %cst_214 [2] : vector<2x8x8xf32> to vector<2x8xf32>
    %500 = vector.shape_cast %499 : vector<2x8xf32> to vector<2x8x1xf32>
    %501 = tpu.reciprocal %500 {approx = true} : vector<2x8x1xf32> -> vector<2x8x1xf32>
    %502 = vector.broadcast %501 : vector<2x8x1xf32> to vector<2x8x8xf32>
    %503 = arith.mulf %498, %502 : vector<2x8x8xf32>
    %504 = vector.broadcast %22 : vector<1x60xf32> to vector<16x60xf32>
    %505 = arith.mulf %487, %504 : vector<16x60xf32>
    %506 = vector.shape_cast %505 : vector<16x60xf32> to vector<2x8x60xf32>
    "tpu.trace_start"() <{level = 10 : i32, message = "bqk,bkd->bqd"}> : () -> ()
    %cst_215 = arith.constant dense<0.000000e+00> : vector<2x8x60xf32>
    %507 = tpu.matmul %503, %506, %cst_215 {dimension_numbers = #tpu.dot_dimension_numbers<[2], [1], [1], [2], [0, 0, 0, 1, 1, 2], [0], [0]>} : vector<2x8x8xf32>, vector<2x8x60xf32>, vector<2x8x60xf32> -> vector<2x8x60xf32>
    "tpu.trace_stop"() : () -> ()
    %508 = vector.shape_cast %507 : vector<2x8x60xf32> to vector<16x60xf32>
    %509 = arith.addf %489, %508 : vector<16x60xf32>
    %510 = vector.broadcast %29 : vector<1x60xf32> to vector<16x60xf32>
    %511 = arith.mulf %473, %510 : vector<16x60xf32>
    %512 = vector.shape_cast %511 : vector<16x60xf32> to vector<2x8x60xf32>
    "tpu.trace_start"() <{level = 10 : i32, message = "bqd,bkd->bqk"}> : () -> ()
    %cst_216 = arith.constant dense<0.000000e+00> : vector<2x8x8xf32>
    %513 = tpu.matmul %512, %488, %cst_216 {dimension_numbers = #tpu.dot_dimension_numbers<[2], [2], [1], [1], [0, 0, 0, 1, 1, 1], [0], [0]>} : vector<2x8x60xf32>, vector<2x8x60xf32>, vector<2x8x8xf32> -> vector<2x8x8xf32>
    "tpu.trace_stop"() : () -> ()
    %cst_217 = arith.constant dense<0xFF800000> : vector<2x8xf32>
    %514 = vector.multi_reduction <maximumf>, %513, %cst_217 [2] : vector<2x8x8xf32> to vector<2x8xf32>
    %515 = vector.shape_cast %514 : vector<2x8xf32> to vector<2x8x1xf32>
    %516 = vector.broadcast %515 : vector<2x8x1xf32> to vector<2x8x8xf32>
    %517 = arith.subf %513, %516 : vector<2x8x8xf32>
    %518 = math.exp %517 : vector<2x8x8xf32>
    %cst_218 = arith.constant dense<0.000000e+00> : vector<2x8xf32>
    %519 = vector.multi_reduction <add>, %518, %cst_218 [2] : vector<2x8x8xf32> to vector<2x8xf32>
    %520 = vector.shape_cast %519 : vector<2x8xf32> to vector<2x8x1xf32>
    %521 = tpu.reciprocal %520 {approx = true} : vector<2x8x1xf32> -> vector<2x8x1xf32>
    %522 = vector.broadcast %521 : vector<2x8x1xf32> to vector<2x8x8xf32>
    %523 = arith.mulf %518, %522 : vector<2x8x8xf32>
    %524 = vector.broadcast %29 : vector<1x60xf32> to vector<16x60xf32>
    %525 = arith.mulf %487, %524 : vector<16x60xf32>
    %526 = vector.shape_cast %525 : vector<16x60xf32> to vector<2x8x60xf32>
    "tpu.trace_start"() <{level = 10 : i32, message = "bqk,bkd->bqd"}> : () -> ()
    %cst_219 = arith.constant dense<0.000000e+00> : vector<2x8x60xf32>
    %527 = tpu.matmul %523, %526, %cst_219 {dimension_numbers = #tpu.dot_dimension_numbers<[2], [1], [1], [2], [0, 0, 0, 1, 1, 2], [0], [0]>} : vector<2x8x8xf32>, vector<2x8x60xf32>, vector<2x8x60xf32> -> vector<2x8x60xf32>
    "tpu.trace_stop"() : () -> ()
    %528 = vector.shape_cast %527 : vector<2x8x60xf32> to vector<16x60xf32>
    %529 = arith.addf %509, %528 : vector<16x60xf32>
    %530 = vector.broadcast %36 : vector<1x60xf32> to vector<16x60xf32>
    %531 = arith.mulf %473, %530 : vector<16x60xf32>
    %532 = vector.shape_cast %531 : vector<16x60xf32> to vector<2x8x60xf32>
    "tpu.trace_start"() <{level = 10 : i32, message = "bqd,bkd->bqk"}> : () -> ()
    %cst_220 = arith.constant dense<0.000000e+00> : vector<2x8x8xf32>
    %533 = tpu.matmul %532, %488, %cst_220 {dimension_numbers = #tpu.dot_dimension_numbers<[2], [2], [1], [1], [0, 0, 0, 1, 1, 1], [0], [0]>} : vector<2x8x60xf32>, vector<2x8x60xf32>, vector<2x8x8xf32> -> vector<2x8x8xf32>
    "tpu.trace_stop"() : () -> ()
    %cst_221 = arith.constant dense<0xFF800000> : vector<2x8xf32>
    %534 = vector.multi_reduction <maximumf>, %533, %cst_221 [2] : vector<2x8x8xf32> to vector<2x8xf32>
    %535 = vector.shape_cast %534 : vector<2x8xf32> to vector<2x8x1xf32>
    %536 = vector.broadcast %535 : vector<2x8x1xf32> to vector<2x8x8xf32>
    %537 = arith.subf %533, %536 : vector<2x8x8xf32>
    %538 = math.exp %537 : vector<2x8x8xf32>
    %cst_222 = arith.constant dense<0.000000e+00> : vector<2x8xf32>
    %539 = vector.multi_reduction <add>, %538, %cst_222 [2] : vector<2x8x8xf32> to vector<2x8xf32>
    %540 = vector.shape_cast %539 : vector<2x8xf32> to vector<2x8x1xf32>
    %541 = tpu.reciprocal %540 {approx = true} : vector<2x8x1xf32> -> vector<2x8x1xf32>
    %542 = vector.broadcast %541 : vector<2x8x1xf32> to vector<2x8x8xf32>
    %543 = arith.mulf %538, %542 : vector<2x8x8xf32>
    %544 = vector.broadcast %36 : vector<1x60xf32> to vector<16x60xf32>
    %545 = arith.mulf %487, %544 : vector<16x60xf32>
    %546 = vector.shape_cast %545 : vector<16x60xf32> to vector<2x8x60xf32>
    "tpu.trace_start"() <{level = 10 : i32, message = "bqk,bkd->bqd"}> : () -> ()
    %cst_223 = arith.constant dense<0.000000e+00> : vector<2x8x60xf32>
    %547 = tpu.matmul %543, %546, %cst_223 {dimension_numbers = #tpu.dot_dimension_numbers<[2], [1], [1], [2], [0, 0, 0, 1, 1, 2], [0], [0]>} : vector<2x8x8xf32>, vector<2x8x60xf32>, vector<2x8x60xf32> -> vector<2x8x60xf32>
    "tpu.trace_stop"() : () -> ()
    %548 = vector.shape_cast %547 : vector<2x8x60xf32> to vector<16x60xf32>
    %549 = arith.addf %529, %548 : vector<16x60xf32>
    %550 = vector.broadcast %43 : vector<1x60xf32> to vector<16x60xf32>
    %551 = arith.mulf %473, %550 : vector<16x60xf32>
    %552 = vector.shape_cast %551 : vector<16x60xf32> to vector<2x8x60xf32>
    "tpu.trace_start"() <{level = 10 : i32, message = "bqd,bkd->bqk"}> : () -> ()
    %cst_224 = arith.constant dense<0.000000e+00> : vector<2x8x8xf32>
    %553 = tpu.matmul %552, %488, %cst_224 {dimension_numbers = #tpu.dot_dimension_numbers<[2], [2], [1], [1], [0, 0, 0, 1, 1, 1], [0], [0]>} : vector<2x8x60xf32>, vector<2x8x60xf32>, vector<2x8x8xf32> -> vector<2x8x8xf32>
    "tpu.trace_stop"() : () -> ()
    %cst_225 = arith.constant dense<0xFF800000> : vector<2x8xf32>
    %554 = vector.multi_reduction <maximumf>, %553, %cst_225 [2] : vector<2x8x8xf32> to vector<2x8xf32>
    %555 = vector.shape_cast %554 : vector<2x8xf32> to vector<2x8x1xf32>
    %556 = vector.broadcast %555 : vector<2x8x1xf32> to vector<2x8x8xf32>
    %557 = arith.subf %553, %556 : vector<2x8x8xf32>
    %558 = math.exp %557 : vector<2x8x8xf32>
    %cst_226 = arith.constant dense<0.000000e+00> : vector<2x8xf32>
    %559 = vector.multi_reduction <add>, %558, %cst_226 [2] : vector<2x8x8xf32> to vector<2x8xf32>
    %560 = vector.shape_cast %559 : vector<2x8xf32> to vector<2x8x1xf32>
    %561 = tpu.reciprocal %560 {approx = true} : vector<2x8x1xf32> -> vector<2x8x1xf32>
    %562 = vector.broadcast %561 : vector<2x8x1xf32> to vector<2x8x8xf32>
    %563 = arith.mulf %558, %562 : vector<2x8x8xf32>
    %564 = vector.broadcast %43 : vector<1x60xf32> to vector<16x60xf32>
    %565 = arith.mulf %487, %564 : vector<16x60xf32>
    %566 = vector.shape_cast %565 : vector<16x60xf32> to vector<2x8x60xf32>
    "tpu.trace_start"() <{level = 10 : i32, message = "bqk,bkd->bqd"}> : () -> ()
    %cst_227 = arith.constant dense<0.000000e+00> : vector<2x8x60xf32>
    %567 = tpu.matmul %563, %566, %cst_227 {dimension_numbers = #tpu.dot_dimension_numbers<[2], [1], [1], [2], [0, 0, 0, 1, 1, 2], [0], [0]>} : vector<2x8x8xf32>, vector<2x8x60xf32>, vector<2x8x60xf32> -> vector<2x8x60xf32>
    "tpu.trace_stop"() : () -> ()
    %568 = vector.shape_cast %567 : vector<2x8x60xf32> to vector<16x60xf32>
    %569 = arith.addf %549, %568 : vector<16x60xf32>
    %570 = vector.broadcast %50 : vector<1x60xf32> to vector<16x60xf32>
    %571 = arith.mulf %473, %570 : vector<16x60xf32>
    %572 = vector.shape_cast %571 : vector<16x60xf32> to vector<2x8x60xf32>
    "tpu.trace_start"() <{level = 10 : i32, message = "bqd,bkd->bqk"}> : () -> ()
    %cst_228 = arith.constant dense<0.000000e+00> : vector<2x8x8xf32>
    %573 = tpu.matmul %572, %488, %cst_228 {dimension_numbers = #tpu.dot_dimension_numbers<[2], [2], [1], [1], [0, 0, 0, 1, 1, 1], [0], [0]>} : vector<2x8x60xf32>, vector<2x8x60xf32>, vector<2x8x8xf32> -> vector<2x8x8xf32>
    "tpu.trace_stop"() : () -> ()
    %cst_229 = arith.constant dense<0xFF800000> : vector<2x8xf32>
    %574 = vector.multi_reduction <maximumf>, %573, %cst_229 [2] : vector<2x8x8xf32> to vector<2x8xf32>
    %575 = vector.shape_cast %574 : vector<2x8xf32> to vector<2x8x1xf32>
    %576 = vector.broadcast %575 : vector<2x8x1xf32> to vector<2x8x8xf32>
    %577 = arith.subf %573, %576 : vector<2x8x8xf32>
    %578 = math.exp %577 : vector<2x8x8xf32>
    %cst_230 = arith.constant dense<0.000000e+00> : vector<2x8xf32>
    %579 = vector.multi_reduction <add>, %578, %cst_230 [2] : vector<2x8x8xf32> to vector<2x8xf32>
    %580 = vector.shape_cast %579 : vector<2x8xf32> to vector<2x8x1xf32>
    %581 = tpu.reciprocal %580 {approx = true} : vector<2x8x1xf32> -> vector<2x8x1xf32>
    %582 = vector.broadcast %581 : vector<2x8x1xf32> to vector<2x8x8xf32>
    %583 = arith.mulf %578, %582 : vector<2x8x8xf32>
    %584 = vector.broadcast %50 : vector<1x60xf32> to vector<16x60xf32>
    %585 = arith.mulf %487, %584 : vector<16x60xf32>
    %586 = vector.shape_cast %585 : vector<16x60xf32> to vector<2x8x60xf32>
    "tpu.trace_start"() <{level = 10 : i32, message = "bqk,bkd->bqd"}> : () -> ()
    %cst_231 = arith.constant dense<0.000000e+00> : vector<2x8x60xf32>
    %587 = tpu.matmul %583, %586, %cst_231 {dimension_numbers = #tpu.dot_dimension_numbers<[2], [1], [1], [2], [0, 0, 0, 1, 1, 2], [0], [0]>} : vector<2x8x8xf32>, vector<2x8x60xf32>, vector<2x8x60xf32> -> vector<2x8x60xf32>
    "tpu.trace_stop"() : () -> ()
    %588 = vector.shape_cast %587 : vector<2x8x60xf32> to vector<16x60xf32>
    %589 = arith.addf %569, %588 : vector<16x60xf32>
    %c2_232 = arith.constant 2 : index
    %c0_233 = arith.constant 0 : index
    %c0_234 = arith.constant 0 : index
    %590 = vector.load %arg9[%c2_232, %c0_233, %c0_234] : memref<3x60x60xf32, #tpu.memory_space<vmem>>, vector<1x60x60xf32>
    %591 = vector.shape_cast %590 : vector<1x60x60xf32> to vector<60x60xf32>
    %cst_235 = arith.constant dense<0.000000e+00> : vector<16x60xf32>
    %592 = tpu.matmul %589, %591, %cst_235 {dimension_numbers = #tpu.dot_dimension_numbers<[1], [0], [0], [1], [0, 0, 1, 1], [], []>} : vector<16x60xf32>, vector<60x60xf32>, vector<16x60xf32> -> vector<16x60xf32>
    %593 = arith.addf %442, %592 : vector<16x60xf32>
    %c2_236 = arith.constant 2 : index
    %c0_237 = arith.constant 0 : index
    %c0_238 = arith.constant 0 : index
    %594 = vector.load %arg10[%c2_236, %c0_237, %c0_238] : memref<3x1x60xf32, #tpu.memory_space<vmem>>, vector<1x1x60xf32>
    %595 = vector.shape_cast %594 : vector<1x1x60xf32> to vector<1x60xf32>
    %596 = vector.broadcast %595 : vector<1x60xf32> to vector<16x60xf32>
    %597 = arith.addf %593, %596 : vector<16x60xf32>
    %c2_239 = arith.constant 2 : index
    %c0_240 = arith.constant 0 : index
    %c0_241 = arith.constant 0 : index
    %598 = vector.load %arg17[%c2_239, %c0_240, %c0_241] : memref<3x1x60xf32, #tpu.memory_space<vmem>>, vector<1x1x60xf32>
    %599 = vector.shape_cast %598 : vector<1x1x60xf32> to vector<1x60xf32>
    %c2_242 = arith.constant 2 : index
    %c0_243 = arith.constant 0 : index
    %c0_244 = arith.constant 0 : index
    %600 = vector.load %arg18[%c2_242, %c0_243, %c0_244] : memref<3x1x60xf32, #tpu.memory_space<vmem>>, vector<1x1x60xf32>
    %601 = vector.shape_cast %600 : vector<1x1x60xf32> to vector<1x60xf32>
    %cst_245 = arith.constant dense<0.000000e+00> : vector<16xf32>
    %602 = vector.multi_reduction <add>, %597, %cst_245 [1] : vector<16x60xf32> to vector<16xf32>
    %603 = vector.shape_cast %602 : vector<16xf32> to vector<16x1xf32>
    %cst_246 = arith.constant 6.000000e+01 : f32
    %604 = vector.broadcast %cst_246 : f32 to vector<16x1xf32>
    %605 = arith.divf %603, %604 : vector<16x1xf32>
    %606 = vector.broadcast %605 : vector<16x1xf32> to vector<16x60xf32>
    %607 = arith.subf %597, %606 : vector<16x60xf32>
    %608 = arith.mulf %607, %607 : vector<16x60xf32>
    %cst_247 = arith.constant dense<0.000000e+00> : vector<16xf32>
    %609 = vector.multi_reduction <add>, %608, %cst_247 [1] : vector<16x60xf32> to vector<16xf32>
    %610 = vector.shape_cast %609 : vector<16xf32> to vector<16x1xf32>
    %cst_248 = arith.constant 6.000000e+01 : f32
    %611 = vector.broadcast %cst_248 : f32 to vector<16x1xf32>
    %612 = arith.divf %610, %611 : vector<16x1xf32>
    %cst_249 = arith.constant 9.99999974E-6 : f32
    %613 = vector.broadcast %cst_249 : f32 to vector<16x1xf32>
    %614 = arith.addf %612, %613 : vector<16x1xf32>
    %615 = math.rsqrt %614 : vector<16x1xf32>
    %616 = vector.broadcast %615 : vector<16x1xf32> to vector<16x60xf32>
    %617 = arith.mulf %607, %616 : vector<16x60xf32>
    %618 = vector.broadcast %599 : vector<1x60xf32> to vector<16x60xf32>
    %619 = arith.mulf %617, %618 : vector<16x60xf32>
    %620 = vector.broadcast %601 : vector<1x60xf32> to vector<16x60xf32>
    %621 = arith.addf %619, %620 : vector<16x60xf32>
    %c2_250 = arith.constant 2 : index
    %c0_251 = arith.constant 0 : index
    %c0_252 = arith.constant 0 : index
    %622 = vector.load %arg11[%c2_250, %c0_251, %c0_252] : memref<3x60x240xf32, #tpu.memory_space<vmem>>, vector<1x60x240xf32>
    %623 = vector.shape_cast %622 : vector<1x60x240xf32> to vector<60x240xf32>
    %cst_253 = arith.constant dense<0.000000e+00> : vector<16x240xf32>
    %624 = tpu.matmul %621, %623, %cst_253 {dimension_numbers = #tpu.dot_dimension_numbers<[1], [0], [0], [1], [0, 0, 1, 1], [], []>} : vector<16x60xf32>, vector<60x240xf32>, vector<16x240xf32> -> vector<16x240xf32>
    %c2_254 = arith.constant 2 : index
    %c0_255 = arith.constant 0 : index
    %c0_256 = arith.constant 0 : index
    %625 = vector.load %arg12[%c2_254, %c0_255, %c0_256] : memref<3x1x240xf32, #tpu.memory_space<vmem>>, vector<1x1x240xf32>
    %626 = vector.shape_cast %625 : vector<1x1x240xf32> to vector<1x240xf32>
    %627 = vector.broadcast %626 : vector<1x240xf32> to vector<16x240xf32>
    %628 = arith.addf %624, %627 : vector<16x240xf32>
    %cst_257 = arith.constant 0.000000e+00 : f32
    %629 = vector.broadcast %cst_257 : f32 to vector<16x240xf32>
    %630 = arith.maximumf %628, %629 : vector<16x240xf32>
    %c2_258 = arith.constant 2 : index
    %c0_259 = arith.constant 0 : index
    %c0_260 = arith.constant 0 : index
    %631 = vector.load %arg13[%c2_258, %c0_259, %c0_260] : memref<3x240x60xf32, #tpu.memory_space<vmem>>, vector<1x240x60xf32>
    %632 = vector.shape_cast %631 : vector<1x240x60xf32> to vector<240x60xf32>
    %cst_261 = arith.constant dense<0.000000e+00> : vector<16x60xf32>
    %633 = tpu.matmul %630, %632, %cst_261 {dimension_numbers = #tpu.dot_dimension_numbers<[1], [0], [0], [1], [0, 0, 1, 1], [], []>} : vector<16x240xf32>, vector<240x60xf32>, vector<16x60xf32> -> vector<16x60xf32>
    %634 = arith.addf %597, %633 : vector<16x60xf32>
    %c2_262 = arith.constant 2 : index
    %c0_263 = arith.constant 0 : index
    %c0_264 = arith.constant 0 : index
    %635 = vector.load %arg14[%c2_262, %c0_263, %c0_264] : memref<3x1x60xf32, #tpu.memory_space<vmem>>, vector<1x1x60xf32>
    %636 = vector.shape_cast %635 : vector<1x1x60xf32> to vector<1x60xf32>
    %637 = vector.broadcast %636 : vector<1x60xf32> to vector<16x60xf32>
    %638 = arith.addf %634, %637 : vector<16x60xf32>
    %c0_265 = arith.constant 0 : index
    %c0_266 = arith.constant 0 : index
    %639 = vector.load %arg19[%c0_265, %c0_266] : memref<1x60xf32, #tpu.memory_space<vmem>>, vector<1x60xf32>
    %c0_267 = arith.constant 0 : index
    %c0_268 = arith.constant 0 : index
    %640 = vector.load %arg20[%c0_267, %c0_268] : memref<1x60xf32, #tpu.memory_space<vmem>>, vector<1x60xf32>
    %cst_269 = arith.constant dense<0.000000e+00> : vector<16xf32>
    %641 = vector.multi_reduction <add>, %638, %cst_269 [1] : vector<16x60xf32> to vector<16xf32>
    %642 = vector.shape_cast %641 : vector<16xf32> to vector<16x1xf32>
    %cst_270 = arith.constant 6.000000e+01 : f32
    %643 = vector.broadcast %cst_270 : f32 to vector<16x1xf32>
    %644 = arith.divf %642, %643 : vector<16x1xf32>
    %645 = vector.broadcast %644 : vector<16x1xf32> to vector<16x60xf32>
    %646 = arith.subf %638, %645 : vector<16x60xf32>
    %647 = arith.mulf %646, %646 : vector<16x60xf32>
    %cst_271 = arith.constant dense<0.000000e+00> : vector<16xf32>
    %648 = vector.multi_reduction <add>, %647, %cst_271 [1] : vector<16x60xf32> to vector<16xf32>
    %649 = vector.shape_cast %648 : vector<16xf32> to vector<16x1xf32>
    %cst_272 = arith.constant 6.000000e+01 : f32
    %650 = vector.broadcast %cst_272 : f32 to vector<16x1xf32>
    %651 = arith.divf %649, %650 : vector<16x1xf32>
    %cst_273 = arith.constant 9.99999974E-6 : f32
    %652 = vector.broadcast %cst_273 : f32 to vector<16x1xf32>
    %653 = arith.addf %651, %652 : vector<16x1xf32>
    %654 = math.rsqrt %653 : vector<16x1xf32>
    %655 = vector.broadcast %654 : vector<16x1xf32> to vector<16x60xf32>
    %656 = arith.mulf %646, %655 : vector<16x60xf32>
    %657 = vector.broadcast %639 : vector<1x60xf32> to vector<16x60xf32>
    %658 = arith.mulf %656, %657 : vector<16x60xf32>
    %659 = vector.broadcast %640 : vector<1x60xf32> to vector<16x60xf32>
    %660 = arith.addf %658, %659 : vector<16x60xf32>
    %661 = vector.shape_cast %660 : vector<16x60xf32> to vector<2x8x60xf32>
    %662 = vector.extract_strided_slice %661 {offsets = [0, 7, 0], sizes = [2, 1, 60], strides = [1, 1, 1]} : vector<2x8x60xf32> to vector<2x1x60xf32>
    %663 = vector.shape_cast %662 : vector<2x1x60xf32> to vector<2x60xf32>
    %c0_274 = arith.constant 0 : index
    %c0_275 = arith.constant 0 : index
    %664 = vector.load %arg21[%c0_274, %c0_275] : memref<60x60xf32, #tpu.memory_space<vmem>>, vector<60x60xf32>
    %cst_276 = arith.constant dense<0.000000e+00> : vector<2x60xf32>
    %665 = tpu.matmul %663, %664, %cst_276 {dimension_numbers = #tpu.dot_dimension_numbers<[1], [0], [0], [1], [0, 0, 1, 1], [], []>} : vector<2x60xf32>, vector<60x60xf32>, vector<2x60xf32> -> vector<2x60xf32>
    %c0_277 = arith.constant 0 : index
    %c0_278 = arith.constant 0 : index
    %666 = vector.load %arg22[%c0_277, %c0_278] : memref<1x60xf32, #tpu.memory_space<vmem>>, vector<1x60xf32>
    %667 = vector.broadcast %666 : vector<1x60xf32> to vector<2x60xf32>
    %668 = arith.addf %665, %667 : vector<2x60xf32>
    %cst_279 = arith.constant 0.000000e+00 : f32
    %669 = vector.broadcast %cst_279 : f32 to vector<2x60xf32>
    %670 = arith.maximumf %668, %669 : vector<2x60xf32>
    %c0_280 = arith.constant 0 : index
    %c0_281 = arith.constant 0 : index
    %671 = vector.load %arg23[%c0_280, %c0_281] : memref<60x60xf32, #tpu.memory_space<vmem>>, vector<60x60xf32>
    %cst_282 = arith.constant dense<0.000000e+00> : vector<2x60xf32>
    %672 = tpu.matmul %670, %671, %cst_282 {dimension_numbers = #tpu.dot_dimension_numbers<[1], [0], [0], [1], [0, 0, 1, 1], [], []>} : vector<2x60xf32>, vector<60x60xf32>, vector<2x60xf32> -> vector<2x60xf32>
    %c0_283 = arith.constant 0 : index
    %c0_284 = arith.constant 0 : index
    %673 = vector.load %arg24[%c0_283, %c0_284] : memref<1x60xf32, #tpu.memory_space<vmem>>, vector<1x60xf32>
    %674 = vector.broadcast %673 : vector<1x60xf32> to vector<2x60xf32>
    %675 = arith.addf %672, %674 : vector<2x60xf32>
    %676 = arith.addf %675, %663 : vector<2x60xf32>
    %c0_285 = arith.constant 0 : index
    %c0_286 = arith.constant 0 : index
    %677 = vector.load %arg2[%c0_285, %c0_286] : memref<2x100xf32, #tpu.memory_space<vmem>>, vector<2x100xf32>
    %c0_287 = arith.constant 0 : index
    %c0_288 = arith.constant 0 : index
    %678 = vector.load %arg25[%c0_287, %c0_288] : memref<100x60xf32, #tpu.memory_space<vmem>>, vector<100x60xf32>
    %cst_289 = arith.constant dense<0.000000e+00> : vector<2x60xf32>
    %679 = tpu.matmul %677, %678, %cst_289 {dimension_numbers = #tpu.dot_dimension_numbers<[1], [0], [0], [1], [0, 0, 1, 1], [], []>} : vector<2x100xf32>, vector<100x60xf32>, vector<2x60xf32> -> vector<2x60xf32>
    %c0_290 = arith.constant 0 : index
    %c0_291 = arith.constant 0 : index
    %680 = vector.load %arg26[%c0_290, %c0_291] : memref<1x60xf32, #tpu.memory_space<vmem>>, vector<1x60xf32>
    %681 = vector.broadcast %680 : vector<1x60xf32> to vector<2x60xf32>
    %682 = arith.addf %679, %681 : vector<2x60xf32>
    %cst_292 = arith.constant 0.000000e+00 : f32
    %683 = vector.broadcast %cst_292 : f32 to vector<2x60xf32>
    %684 = arith.maximumf %682, %683 : vector<2x60xf32>
    %c0_293 = arith.constant 0 : index
    %c0_294 = arith.constant 0 : index
    %685 = vector.load %arg27[%c0_293, %c0_294] : memref<60x60xf32, #tpu.memory_space<vmem>>, vector<60x60xf32>
    %cst_295 = arith.constant dense<0.000000e+00> : vector<2x60xf32>
    %686 = tpu.matmul %684, %685, %cst_295 {dimension_numbers = #tpu.dot_dimension_numbers<[1], [0], [0], [1], [0, 0, 1, 1], [], []>} : vector<2x60xf32>, vector<60x60xf32>, vector<2x60xf32> -> vector<2x60xf32>
    %c0_296 = arith.constant 0 : index
    %c0_297 = arith.constant 0 : index
    %687 = vector.load %arg28[%c0_296, %c0_297] : memref<1x60xf32, #tpu.memory_space<vmem>>, vector<1x60xf32>
    %688 = vector.broadcast %687 : vector<1x60xf32> to vector<2x60xf32>
    %689 = arith.addf %686, %688 : vector<2x60xf32>
    %690 = arith.addf %676, %689 : vector<2x60xf32>
    %c0_298 = arith.constant 0 : index
    %c0_299 = arith.constant 0 : index
    %691 = vector.load %arg29[%c0_298, %c0_299] : memref<60x3xf32, #tpu.memory_space<vmem>>, vector<60x3xf32>
    %cst_300 = arith.constant dense<0.000000e+00> : vector<2x3xf32>
    %692 = tpu.matmul %690, %691, %cst_300 {dimension_numbers = #tpu.dot_dimension_numbers<[1], [0], [0], [1], [0, 0, 1, 1], [], []>} : vector<2x60xf32>, vector<60x3xf32>, vector<2x3xf32> -> vector<2x3xf32>
    %c0_301 = arith.constant 0 : index
    %c0_302 = arith.constant 0 : index
    %693 = vector.load %arg30[%c0_301, %c0_302] : memref<1x3xf32, #tpu.memory_space<vmem>>, vector<1x3xf32>
    %694 = vector.broadcast %693 : vector<1x3xf32> to vector<2x3xf32>
    %695 = arith.addf %692, %694 : vector<2x3xf32>
    %c0_303 = arith.constant 0 : index
    %c0_304 = arith.constant 0 : index
    %696 = vector.load %arg31[%c0_303, %c0_304] : memref<2x3xf32, #tpu.memory_space<vmem>>, vector<2x3xf32>
    tpu.vector_store %arg31[%c0_303, %c0_304], %695 {strides = array<i32>} : memref<2x3xf32, #tpu.memory_space<vmem>>, vector<2x3xf32>,
    return
  }
}

</mosaic_0001>

<bundles_post_ra>
// kernel: mult_forward.2
= control target key start
LH: loop header
LB: loop body
LE: loop exit
PB: predicated region body
PF: predicated region fallthrough
CT: control target
= control target key end

     0   :  { %s4690_s0 = inlined_call_operand.vmem [shape: f32[2,8,20], index: 0, kind: input, shape index: {}]   ;;  %s4691_s1 = inlined_call_operand.vmem [shape: f32[2,8,24], index: 1, kind: input, shape index: {}]   ;;  %s4692_s2 = inlined_call_operand.vmem [shape: f32[20,30], index: 2, kind: input, shape index: {}]   ;;  %s4693_s3 = inlined_call_operand.vmem [shape: f32[24,30], index: 3, kind: input, shape index: {}]   ;;  %s4694_s4 = inlined_call_operand.vmem [shape: f32[8,30], index: 4, kind: input, shape index: {}]   ;;  %s4695_s5 = inlined_call_operand.vmem [shape: f32[2,2,30,30], index: 5, kind: input, shape index: {}]   ;;  %s4696_s6 = inlined_call_operand.vmem [shape: f32[2,2,1,30], index: 6, kind: input, shape index: {}]   ;;  %s4697_s7 = inlined_call_operand.vmem [shape: f32[2,2,30,30], index: 7, kind: input, shape index: {}]   ;;  %s4698_s8 = inlined_call_operand.vmem [shape: f32[2,2,1,30], index: 8, kind: input, shape index: {}]   ;;  %s4699_s9 = inlined_call_operand.vmem [shape: f32[2,2,30,30], index: 9, kind: input, shape index: {}]   ;;  %s4700_s10 = inlined_call_operand.vmem [shape: f32[2,2,1,30], index: 10, kind: input, shape index: {}]   ;;  %s4701_s11 = inlined_call_operand.vmem [shape: f32[2,2,30,30], index: 11, kind: input, shape index: {}]   ;;  %s4702_s12 = inlined_call_operand.vmem [shape: f32[2,2,1,30], index: 12, kind: input, shape index: {}]   ;;  %s4703_s13 = inlined_call_operand.vmem [shape: f32[2,2,30,120], index: 13, kind: input, shape index: {}]   ;;  %s4704_s14 = inlined_call_operand.vmem [shape: f32[2,2,1,120], index: 14, kind: input, shape index: {}]   ;;  %s4705_s15 = inlined_call_operand.vmem [shape: f32[2,2,120,30], index: 15, kind: input, shape index: {}]   ;;  %s4706_s16 = inlined_call_operand.vmem [shape: f32[2,2,1,30], index: 16, kind: input, shape index: {}]   ;;  %s4707_s17 = inlined_call_operand.vmem [shape: f32[2,2,1,30], index: 17, kind: input, shape index: {}]   ;;  %s4708_s18 = inlined_call_operand.vmem [shape: f32[2,2,1,30], index: 18, kind: input, shape index: {}]   ;;  %s4709_s19 = inlined_call_operand.vmem [shape: f32[2,2,1,30], index: 19, kind: input, shape index: {}]   ;;  %s4710_s20 = inlined_call_operand.vmem [shape: f32[2,2,1,30], index: 20, kind: input, shape index: {}]   ;;  %s4711_s21 = inlined_call_operand.vmem [shape: f32[2,1,30], index: 21, kind: input, shape index: {}]   ;;  %s4712_s22 = inlined_call_operand.vmem [shape: f32[2,1,30], index: 22, kind: input, shape index: {}]   ;;  %s4713_s23 = inlined_call_operand.vmem [shape: f32[2,2,8,30], index: 23, kind: output, shape index: {}]  }
   0x1   :  { %4721 = sst [smem:[#allocation2_spill]] %s4690_s0 }
   0x2   :  { %4722 = sst [smem:[#allocation3_spill]] %s4691_s1 }
   0x3   :  { %4723 = sst [smem:[#allocation4_spill]] %s4692_s2 }
   0x4   :  { %4724 = sst [smem:[#allocation5_spill]] %s4693_s3 }
   0x5   :  { %4725 = sst [smem:[#allocation6_spill]] %s4694_s4  ;;  %s3965_s4 = smov 0  }
   0x6   :  { %4726 = sst [smem:[#allocation7_spill]] %s4695_s5 }
   0x7   :  { %4727 = sst [smem:[#allocation8_spill]] %s4696_s6 }
   0x8   :  { %4728 = sst [smem:[#allocation9_spill]] %s4697_s7 }
   0x9   :  { %4729 = sst [smem:[#allocation10_spill]] %s4698_s8 }
   0xa   :  { %4730 = sst [smem:[#allocation11_spill]] %s4699_s9 }
   0xb   :  { %4731 = sst [smem:[#allocation12_spill]] %s4700_s10 }
   0xc   :  { %4732 = sst [smem:[#allocation13_spill]] %s4707_s17 }
   0xd LB: > { %s3971_s30 = sadd.s32 4294967295, %s3840_s4   ;;  %p3507_p0 = scmp.ge.s32.totalorder %s3840_s4, 1  ;;  %s3840_s4 = sphi %s3965_s4, %s33_s4  }
   0xe   : > { %p793_p1 = scmp.lt.s32.totalorder %s3840_s4, 3 }
  0x10   : > { %p794_p2 = pnand %p3507_p0, %p793_p1 }
  0x11   : > { %s4733_s5 = sld [smem:[#allocation4_spill]] (!%p794_p2)  ;;  %p1083_p3 = scmp.eq.s32.totalorder (!%p794_p2), %s3971_s30, 0 }
  0x12   : > { %797 = sbr.rel (%p794_p2) target bundleno = 4425 (0x1149), region = 112  ;;  %s4734_s2 = sld [smem:[#allocation5_spill]] (!%p794_p2) }
  0x13   : > { %s4735_s26 = sld [smem:[#allocation2_spill]] (!%p794_p2)  ;;  %p928_p4 = scmp.lt.s32.totalorder (!%p794_p2), %s3971_s30, 1 }
  0x14   : > { %s4736_s7 = sld [smem:[#allocation3_spill]] (!%p794_p2) }
  0x15   : > { %s4737_s28 = sld [smem:[#allocation6_spill]] (!%p794_p2) }
  0x16   : > { %s4738_s17 = sld [smem:[#allocation13_spill]] (!%p794_p2) }
  0x17   : > { %v1013_v0 = vld [vmem:[%s4733_s5 + $0x10] sm:$0xf]  ;;  %vm1021_vm0 = vcmask 1043456   ;;  %v1012_v2 = vld [vmem:[%s4733_s5 + $0x8] sm:$0xff]  ;;  %v1011_v4 = vld [vmem:[%s4733_s5] sm:$0xff]  ;;  %vm1014_vm1 = vcmask 162816  }
  0x18   : > { %v1052_v1 = vld [vmem:[%s4734_s2 + $0x10] sm:$0xff]  ;;  %3531 = vmatpush.msk.msra.mxu0 %vm1021_vm0, %v1013_v0  ;;  %v1051_v3 = vld [vmem:[%s4734_s2 + $0x8] sm:$0xff]  ;;  %v1050_v5 = vld [vmem:[%s4734_s2] sm:$0xff]  ;;  %vm1053_vm2 = vcmask 195584   ;;  %v3842_v10 = vmov 0   ;;  %v3843_v20 = vmov 0.0  }
  0x19   : > { %1073 = vmatpush.msra.mxu1 %v1052_v1  ;;  %v1009_v6 = vld [vmem:[%s4735_s26] sm:$0xff]  ;;  %v1010_v8 = vld [vmem:[%s4735_s26 + $0x8] sm:$0xff]  ;;  %3704 = vset.pattern.permute.xlu0 %v3842_v10  ;;  %s1084_s24 = scalar_select %p1083_p3, 1, 0  ;;  %vm1175_vm6 = vcmask 244736   ;;  %v3844_v45 = vmov 30.0  }
  0x1a   : > { %1039 = vmatpush.msra.mxu0 %v1012_v2  ;;  %v1048_v7 = vld [vmem:[%s4736_s7] sm:$0xff]  ;;  %v1049_v9 = vld [vmem:[%s4736_s7 + $0x8] sm:$0xff]  ;;  %3705 = vset.pattern.permute.xlu1 %v3842_v10  ;;  %3728 = vrcp.f32 %v3844_v45  ;;  %s4746_s30 = smov (!%p928_p4, %s3971_s30), 1  ;;  %s4739_s0 = sld [smem:[#allocation7_spill]]  ;;  %vm1299_vm9 = vcmask 1045504  }
  0x1b   : > { %1074 = vmatpush.msra.mxu1 %v1051_v3  ;;  %s1085_s25 = scvt.s32.f32 %s1084_s24  ;;  %v1101_v33 = vld [vmem:[%s4737_s28] sm:$0xff]  ;;  %s4038_s29 = sshll.u32 %s4746_s30, 1 }
  0x1c   : > { %1040 = vmatpush.msra.mxu0 %v1011_v4  ;;  %s4044_s24 = scalar_lea.vmem %s4738_s17, %s4038_s29  ;;  %s4052_s6 = scalar_lea.vmem %s4708_s18, %s4038_s29 }
  0x1d   : > { %1075 = vmatpush.msra.mxu1 %v1050_v5  ;;  %3532 = vmatmul.msk.f32.vlgmr.msra.gmra.mxu0 %vm1014_vm1, %v1009_v6  ;;  %s1089_s1 = ssub.f32 1.0, %s1085_s25  ;;  %v1086_v11 = vstv %s1085_s25  ;;  %s4061_s27 = sshll.u32 %s4746_s30, 6 }
  0x1e   : > { %3534 = vmatmul.msk.f32.vlgmr.msra.gmra.mxu1 %vm1053_vm2, %v1048_v7  ;;  %s4740_s5 = sld [smem:[#allocation9_spill]]  ;;  %s4358_s2 = scalar_lea.vmem %s4709_s19, %s4038_s29 }
  0x1f   : > { %v1090_v12 = vstv %s1089_s1  ;;  %s4741_s28 = sld [smem:[#allocation8_spill]]  ;;  %s4297_s1 = scalar_lea.vmem %s4701_s11, %s4061_s27 }
  0x20   : > { %v3729_v46 = vpop.eup %3728  ;;  %s4067_s25 = scalar_lea.vmem %s4739_s0, %s4061_s27  ;;  %s4742_s8 = sld [smem:[#allocation10_spill]] }
  0x21   : > { %v1183_v47 = vmul.f32 30.0, %v3729_v46  ;;  %vm1187_vm8 = vweird.f32 %v3729_v46  ;;  %v1286_v10 = vld [vmem:[%s4067_s25 + $0x8] sm:$0xff]  ;;  %s4743_s9 = sld [smem:[#allocation11_spill]]  ;;  %s4394_s0 = scalar_lea.vmem %s4704_s14, %s4038_s29 }
  0x22   : > { %s4744_s10 = sld [smem:[#allocation12_spill]] }
  0x23   : > { %v1184_v48 = vsub.f32 1.0, %v1183_v47 }
  0x24   : > { %s4077_s7 = scalar_lea.vmem %s4740_s5, %s4061_s27 }
  0x25   : > { %3533 = vmatmul.msk.f32.gmra.mxu0 %vm1014_vm1, %v1010_v8  ;;  %v1185_v49 = vmul.f32 %v3729_v46, %v1184_v48  ;;  %v1288_v8 = vld [vmem:[%s4067_s25 + $0x18] sm:$0x3f]  ;;  %s4108_s3 = scalar_lea.vmem %s4741_s28, %s4038_s29 }
  0x26   : > { %3535 = vmatmul.msk.f32.gmra.mxu1 %vm1053_vm2, %v1049_v9  ;;  %3545 = vmatpush.msk.msra.mxu2 %vm1299_vm9, %v1288_v8  ;;  %v1287_v9 = vld [vmem:[%s4067_s25 + $0x10] sm:$0xff]  ;;  %s4118_s17 = scalar_lea.vmem %s4742_s8, %s4038_s29  ;;  %s4314_s8 = scalar_lea.vmem %s4702_s12, %s4038_s29 }
  0x27   : > { %v1186_v50 = vadd.f32 %v3729_v46, %v1185_v49  ;;  %s4134_s28 = scalar_lea.vmem %s4743_s9, %s4061_s27  ;;  %s3692_s9 = smul.u32 240, %s4746_s30 }
  0x28   : > { %1316 = vmatpush.msra.mxu2 %v1287_v9  ;;  %s4173_s5 = scalar_lea.vmem %s4744_s10, %s4038_s29  ;;  %s4383_s10 = scalar_lea.vmem %s4703_s13, %s4061_s27 }
  0x29   : > { %v4018_v51 = vsel %vm1187_vm8, %v3729_v46, %v1186_v50  ;;  %vm1454_vm8 = vcmask 64512  }
  0x2a   : > { %1317 = vmatpush.msra.mxu2 %v1286_v10 }
  0x9a   : > { %v1042_v13 = vpop.f32.mrf.mxu0 }
  0x9b   : > { %v1077_v14 = vpop.f32.mrf.mxu1  ;;  %v1087_v15 = vmul.f32 %v1086_v11, %v1042_v13  ;;  %v1097_v17 = vmul.f32 %v1090_v12, %v1042_v13  ;;  %v1328_v13 = vld [vmem:[%s4077_s7 + $0x10] sm:$0xff] }
  0x9c   : > { %v1091_v16 = vmul.f32 %v1090_v12, %v1077_v14  ;;  %v1095_v18 = vmul.f32 %v1086_v11, %v1077_v14 }
  0x9e   : > { %v1093_v19 = vadd.f32 %v1091_v16, %v1087_v15  ;;  %v1099_v22 = vadd.f32 %v1097_v17, %v1095_v18  ;;  %v1327_v16 = vld [vmem:[%s4077_s7 + $0x8] sm:$0xff]  ;;  %v1326_v17 = vld [vmem:[%s4077_s7] sm:$0xff] }
  0xa0   : > { %vm1102_vm3 = vcmp.ne.f32.partialorder %v1093_v19, 0.0  ;;  %vm1124_vm4 = vcmp.ne.f32.partialorder %v1099_v22, 0.0  ;;  %v1108_v35 = vmul.f32 5.477226, %v1093_v19  ;;  %v1130_v41 = vmul.f32 5.477226, %v1099_v22 }
  0xa1   : > { %v3536_v21 = vsel %vm1102_vm3, 1.0, %v3843_v20  ;;  %v3538_v31 = vsel %vm1124_vm4, 1.0, %v3843_v20 }
  0xa2   : > { %1112 = vperm.xlu0 %3704, %v3536_v21   ;;  %v1045_v23 = vpop.f32.mrf.mxu0 }
  0xa3   : > { %v1080_v24 = vpop.f32.mrf.mxu1  ;;  %v1088_v25 = vmul.f32 %v1086_v11, %v1045_v23  ;;  %v1098_v26 = vmul.f32 %v1090_v12, %v1045_v23 }
  0xa4   : > { %v1092_v27 = vmul.f32 %v1090_v12, %v1080_v24  ;;  %v1096_v28 = vmul.f32 %v1086_v11, %v1080_v24  ;;  %v1285_v11 = vld [vmem:[%s4067_s25] sm:$0xff]  ;;  %v1329_v12 = vld [vmem:[%s4077_s7 + $0x18] sm:$0x3f] }
  0xa5   : > { %1318 = vmatpush.msra.mxu2 %v1285_v11  ;;  %3548 = vmatpush.msk.msrb.mxu0 %vm1299_vm9, %v1329_v12  ;;  %v3710_v11 = vld [vmem:[%s4108_s3] ss:$0 sm:$0xff] }
  0xa6   : > { %v1100_v29 = vadd.f32 %v1098_v26, %v1096_v28  ;;  %v1094_v30 = vadd.f32 %v1092_v27, %v1088_v25 }
  0xa7   : > { %1356 = vmatpush.msrb.mxu0 %v1328_v13  ;;  %v3711_v13 = vld [vmem:[%s4118_s17] ss:$0 sm:$0xff] }
  0xa8   : > { %vm1103_vm5 = vcmp.ne.f32.partialorder %v1094_v30, 0.0  ;;  %vm1125_vm7 = vcmp.ne.f32.partialorder %v1100_v29, 0.0  ;;  %v1109_v62 = vmul.f32 5.477226, %v1094_v30  ;;  %v1131_v5 = vmul.f32 5.477226, %v1100_v29 }
  0xa9   : > { %v3537_v32 = vsel %vm1103_vm5, 1.0, %v3843_v20  ;;  %v3539_v44 = vsel %vm1125_vm7, 1.0, %v3843_v20  ;;  %1357 = vmatpush.msrb.mxu0 %v1327_v16 }
  0xaa   : > { %1134 = vperm.xlu0 %3704, %v3538_v31  }
  0xab   : > { %1358 = vmatpush.msrb.mxu0 %v1326_v17 }
  0xb2   : > { %1117 = vperm.xlu0 %3704, %v3537_v32  }
 0x114   : > { %v1113_v34 = vpop.permute.xlu0 %1112 }
 0x115   : > { %v1120_v36 = vmul.f32 %v1113_v34, %v1101_v33 }
 0x117   : > { %v4012_v37 = vadd.f32 %v1120_v36, %v1108_v35  ;;  %v4094_v35 = vld [vmem:[%s4044_s24] ss:$0 sm:$0xff] }
 0x119   : > { %v1176_v38 = vsel %vm1175_vm6, %v4012_v37, 0.0 }
 0x11a   : > { %1177 = vadd.xlane.f32.xlu1 %v1176_v38 }
 0x11c   : > { %v1135_v39 = vpop.permute.xlu0 %1134 }
 0x11d   : > { %v1142_v40 = vmul.f32 %v1135_v39, %v1101_v33 }
 0x11f   : > { %v1144_v42 = vadd.f32 %v1142_v40, %v1130_v41  ;;  %v4099_v41 = vld [vmem:[%s4052_s6] ss:$0 sm:$0xff] }
 0x121   : > { %v1237_v43 = vsel %vm1175_vm6, %v1144_v42, 0.0 }
 0x122   : > { %1238 = vadd.xlane.f32.xlu1 %v1237_v43 }
 0x124   : > { %v1118_v60 = vpop.permute.xlu0 %1117 }
 0x125   : > { %v1121_v63 = vmul.f32 %v1118_v60, %v1101_v33 }
 0x127   : > { %v4046_v1 = vadd.f32 %v1121_v63, %v1109_v62  ;;  %v1368_v62 = vld [vmem:[%s4134_s28 + $0x10] sm:$0xff] }
 0x129   : > { %v1179_v2 = vsel %vm1175_vm6, %v4046_v1, 0.0 }
 0x13b   : > { %1139 = vperm.xlu1 %3705, %v3539_v44  }
 0x18d   : > { %v1178_v52 = vpop.xlane.xlu1 %1177 }
 0x18e   : > { %v1189_v53 = vmul.f32 %v4018_v51, %v1178_v52 }
 0x190   : > { %v4022_v54 = vsub.f32 %v4012_v37, %v1189_v53 }
 0x192   : > { %v1193_v55 = vmul.f32 %v4022_v54, %v4022_v54 }
 0x194   : > { %v1195_v56 = vsel %vm1175_vm6, %v1193_v55, 0.0 }
 0x195   : > { %1196 = vadd.xlane.f32.xlu2 %v1195_v56  ;;  %v1239_v57 = vpop.xlane.xlu1 %1238 }
 0x196   : > { %v1243_v58 = vmul.f32 %v1239_v57, %v4018_v51 }
 0x198   : > { %v4029_v59 = vsub.f32 %v1144_v42, %v1243_v58 }
 0x19a   : > { %v1247_v61 = vmul.f32 %v4029_v59, %v4029_v59 }
 0x19c   : > { %v1249_v0 = vsel %vm1175_vm6, %v1247_v61, 0.0  ;;  %v1369_v61 = vld [vmem:[%s4134_s28 + $0x18] sm:$0x3f] }
 0x19d   : > { %1250 = vadd.xlane.f32.xlu2 %v1249_v0  ;;  %3551 = vmatpush.msk.msra.mxu0 %vm1299_vm9, %v1369_v61  ;;  %v1146_v0 = vlaneseq }
 0x19f   : > { %1390 = vmatpush.msra.mxu0 %v1368_v62  ;;  %v4142_v9 = vand.u32 127, %v1146_v0 }
 0x1a1   : > { %vm1149_vm3 = vcmp.lt.s32.totalorder %v4142_v9, 6 }
 0x1a5   : > { %1180 = vadd.xlane.f32.xlu2 %v1179_v2  ;;  %v1367_v2 = vld [vmem:[%s4134_s28 + $0x8] sm:$0xff] }
 0x1a6   : > { %1391 = vmatpush.msra.mxu0 %v1367_v2 }
 0x1ad   : > { %v1140_v3 = vpop.permute.xlu1 %1139 }
 0x1ae   : > { %v1143_v4 = vmul.f32 %v1140_v3, %v1101_v33 }
 0x1b0   : > { %v4056_v6 = vadd.f32 %v1143_v4, %v1131_v5 }
 0x1b2   : > { %v1240_v7 = vsel %vm1175_vm6, %v4056_v6, 0.0 }
 0x1b3   : > { %1241 = vadd.xlane.f32.xlu0 %v1240_v7 }
 0x208   : > { %v1197_v14 = vpop.xlane.xlu2 %1196 }
 0x209   : > { %v1201_v15 = vmul.f32 %v1197_v14, %v4018_v51 }
 0x20b   : > { %v1203_v18 = vadd.f32 1e-05, %v1201_v15 }
 0x20d   : > { %3730 = vrsqrt.f32 %v1203_v18  ;;  %vm1211_vm11 = vweird.f32 %v1203_v18 }
 0x210   : > { %v1251_v19 = vpop.xlane.xlu2 %1250 }
 0x211   : > { %v1255_v21 = vmul.f32 %v1251_v19, %v4018_v51 }
 0x213   : > { %v3731_v22 = vpop.eup %3730  ;;  %v1257_v23 = vadd.f32 1e-05, %v1255_v21  ;;  %v4153_v21 = vsel %vm1149_vm3, 1.0, %v3843_v20  ;;  %vm1168_vm3 = vcmp.ge.s32.totalorder %v4142_v9, 24 }
 0x214   : > { %v1206_v24 = vmul.f32 %v3731_v22, %v1203_v18  ;;  %vm1212_vm10 = vweird.f32 %v3731_v22 }
 0x215   : > { %3732 = vrsqrt.f32 %v1257_v23  ;;  %vm1213_vm12 = vmor %vm1211_vm11, %vm1212_vm10  ;;  %vm1265_vm14 = vweird.f32 %v1257_v23  ;;  %vm1153_vm10 = vcmp.ge.s32.totalorder %v4142_v9, 6  ;;  %vm1154_vm11 = vcmp.lt.s32.totalorder %v4142_v9, 12 }
 0x216   : > { %v1207_v25 = vmul.f32 %v3731_v22, %v1206_v24 }
 0x218   : > { %v1208_v26 = vmul.f32 0.5, %v1207_v25  ;;  %v1181_v27 = vpop.xlane.xlu2 %1180 }
 0x219   : > { %v1190_v28 = vmul.f32 %v4018_v51, %v1181_v27 }
 0x21a   : > { %v1209_v29 = vsub.f32 1.5, %v1208_v26 }
 0x21b   : > { %v3733_v30 = vpop.eup %3732  ;;  %v4089_v31 = vsub.f32 %v4046_v1, %v1190_v28 }
 0x21c   : > { %v1210_v32 = vmul.f32 %v3731_v22, %v1209_v29  ;;  %v1260_v33 = vmul.f32 %v3733_v30, %v1257_v23  ;;  %vm1266_vm13 = vweird.f32 %v3733_v30 }
 0x21d   : > { %v1194_v34 = vmul.f32 %v4089_v31, %v4089_v31  ;;  %vm1267_vm15 = vmor %vm1265_vm14, %vm1266_vm13  ;;  %vm1159_vm13 = vcmp.lt.s32.totalorder %v4142_v9, 18 }
 0x21e   : > { %v1214_v36 = vsel %vm1213_vm12, %v3731_v22, %v1210_v32  ;;  %v1261_v38 = vmul.f32 %v3733_v30, %v1260_v33  ;;  %vm1158_vm12 = vcmp.ge.s32.totalorder %v4142_v9, 12  ;;  %vm1155_vm14 = vmand %vm1153_vm10, %vm1154_vm11 }
 0x21f   : > { %v1198_v39 = vsel %vm1175_vm6, %v1194_v34, 0.0  ;;  %v1225_v40 = vmul.f32 %v1214_v36, %v4022_v54 }
 0x220   : > { %v1262_v42 = vmul.f32 0.5, %v1261_v38  ;;  %1199 = vadd.xlane.f32.xlu2 %v1198_v39 }
 0x221   : > { %v1230_v43 = vmul.f32 %v4094_v35, %v1225_v40 }
 0x222   : > { %v1263_v44 = vsub.f32 1.5, %v1262_v42 }
 0x223   : > { %v1235_v45 = vadd.f32 %v4099_v41, %v1230_v43  ;;  %v3712_v43 = vld [vmem:[%s4173_s5] ss:$0 sm:$0xff] }
 0x224   : > { %v1264_v46 = vmul.f32 %v3733_v30, %v1263_v44 }
 0x225   : > { %3546 = vmatmul.msk.f32.vlgmr.msra.gmra.mxu2 %vm1175_vm6, %v1235_v45 }
 0x226   : > { %v1268_v47 = vsel %vm1267_vm15, %v3733_v30, %v1264_v46  ;;  %v1242_v48 = vpop.xlane.xlu0 %1241  ;;  %vm1160_vm15 = vmand %vm1158_vm12, %vm1159_vm13  ;;  %v4200_v46 = vsel %vm1155_vm14, 1.0, %v3843_v20  ;;  %vm2164_vm12 = vcmask 982016  }
 0x227   : > { %v4111_v49 = vmul.f32 %v1268_v47, %v4029_v59  ;;  %v1244_v50 = vmul.f32 %v1242_v48, %v4018_v51  ;;  %v4203_v47 = vsel %vm1160_vm15, 1.0, %v3843_v20 }
 0x229   : > { %v1246_v52 = vsub.f32 %v4056_v6, %v1244_v50  ;;  %v1281_v53 = vmul.f32 %v4094_v35, %v4111_v49  ;;  %v1366_v6 = vld [vmem:[%s4134_s28] sm:$0xff] }
 0x22a   : > { %1392 = vmatpush.msra.mxu0 %v1366_v6 }
 0x22b   : > { %v4124_v54 = vadd.f32 %v4099_v41, %v1281_v53  ;;  %v1248_v55 = vmul.f32 %v1246_v52, %v1246_v52 }
 0x22d   : > { %3549 = vmatmul.msk.f32.vlgmr.msrb.gmra.mxu0 %vm1175_vm6, %v4124_v54  ;;  %v1252_v56 = vsel %vm1175_vm6, %v1248_v55, 0.0 }
 0x22e   : > { %1253 = vadd.xlane.f32.xlu2 %v1252_v56 }
 0x293   : > { %v1200_v57 = vpop.xlane.xlu2 %1199 }
 0x294   : > { %v1202_v58 = vmul.f32 %v1200_v57, %v4018_v51 }
 0x296   : > { %v1204_v59 = vadd.f32 1e-05, %v1202_v58 }
 0x298   : > { %3734 = vrsqrt.f32 %v1204_v59  ;;  %vm1221_vm1 = vweird.f32 %v1204_v59 }
 0x29e   : > { %v3735_v60 = vpop.eup %3734 }
 0x29f   : > { %v1216_v63 = vmul.f32 %v3735_v60, %v1204_v59  ;;  %vm1222_vm0 = vweird.f32 %v3735_v60 }
 0x2a0   : > { %vm1223_vm2 = vmor %vm1221_vm1, %vm1222_vm0  ;;  %vm1163_vm0 = vcmp.ge.s32.totalorder %v4142_v9, 18  ;;  %vm1164_vm1 = vcmp.lt.s32.totalorder %v4142_v9, 24 }
 0x2a1   : > { %v1217_v3 = vmul.f32 %v3735_v60, %v1216_v63  ;;  %v1254_v4 = vpop.xlane.xlu2 %1253 }
 0x2a2   : > { %v1256_v5 = vmul.f32 %v1254_v4, %v4018_v51 }
 0x2a3   : > { %v1218_v7 = vmul.f32 0.5, %v1217_v3 }
 0x2a4   : > { %v1258_v8 = vadd.f32 1e-05, %v1256_v5 }
 0x2a5   : > { %v1219_v10 = vsub.f32 1.5, %v1218_v7 }
 0x2a6   : > { %3736 = vrsqrt.f32 %v1258_v8  ;;  %vm1275_vm5 = vweird.f32 %v1258_v8 }
 0x2a7   : > { %v1220_v12 = vmul.f32 %v3735_v60, %v1219_v10 }
 0x2a8   : > { %v1320_v14 = vpop.f32.mrf.mxu2 }
 0x2a9   : > { %v1224_v15 = vsel %vm1223_vm2, %v3735_v60, %v1220_v12  ;;  %v4147_v16 = vadd.f32 %v3710_v11, %v1320_v14  ;;  %vm1165_vm2 = vmand %vm1163_vm0, %vm1164_vm1 }
 0x2aa   : > { %v1360_v17 = vpop.f32.mrf.mxu0  ;;  %v1226_v18 = vmul.f32 %v1224_v15, %v4089_v31  ;;  %v4232_v59 = vsel %vm1165_vm2, 1.0, %v3843_v20 }
 0x2ab   : > { %v4150_v19 = vadd.f32 %v3711_v13, %v1360_v17  ;;  %v1400_v26 = vmul.f32 %v4153_v21, %v4147_v16  ;;  %v1527_v53 = vmul.f32 %v4200_v46, %v4147_v16  ;;  %v1647_v58 = vmul.f32 %v4203_v47, %v4147_v16 }
 0x2ac   : > { %v3737_v22 = vpop.eup %3736  ;;  %v1231_v23 = vmul.f32 %v4094_v35, %v1226_v18  ;;  %v1767_v60 = vmul.f32 %v4232_v59, %v4147_v16 }
 0x2ad   : > { %v1270_v24 = vmul.f32 %v3737_v22, %v1258_v8  ;;  %3554 = vmatpush.xpose.msk.msrb.mxu1 %vm1175_vm6, %v4150_v19  ;;  %vm1276_vm4 = vweird.f32 %v3737_v22 }
 0x2ae   : > { %v1236_v25 = vadd.f32 %v4099_v41, %v1231_v23  ;;  %vm1277_vm7 = vmor %vm1275_vm5, %vm1276_vm4  ;;  %vm1169_vm4 = vcmp.lt.s32.totalorder %v4142_v9, 30 }
 0x2af   : > { %v1271_v27 = vmul.f32 %v3737_v22, %v1270_v24  ;;  %vm1170_vm5 = vmand %vm1168_vm3, %vm1169_vm4 }
 0x2b0   : > { %3547 = vmatmul.msk.f32.gmra.mxu2 %vm1175_vm6, %v1236_v25  ;;  %3555 = vmatmul.msk.f32.vlgmr.msrb.gmra.mxu1 %vm1175_vm6, %v1400_v26  ;;  %v4240_v61 = vsel %vm1170_vm5, 1.0, %v3843_v20 }
 0x2b1   : > { %v1272_v28 = vmul.f32 0.5, %v1271_v27  ;;  %v1887_v62 = vmul.f32 %v4240_v61, %v4147_v16 }
 0x2b3   : > { %v1273_v29 = vsub.f32 1.5, %v1272_v28 }
 0x2b5   : > { %v1274_v30 = vmul.f32 %v3737_v22, %v1273_v29 }
 0x2b7   : > { %v1278_v31 = vsel %vm1277_vm7, %v3737_v22, %v1274_v30 }
 0x2b8   : > { %v4163_v32 = vmul.f32 %v1278_v31, %v1246_v52 }
 0x2ba   : > { %v1282_v33 = vmul.f32 %v4094_v35, %v4163_v32 }
 0x2bc   : > { %v1284_v34 = vadd.f32 %v4099_v41, %v1282_v33 }
 0x2be   : > { %3550 = vmatmul.msk.f32.gmra.mxu0 %vm1175_vm6, %v1284_v34 }
 0x2c6   : > { %3552 = vmatmul.msk.f32.vlgmr.msra.gmra.mxu0 %vm1175_vm6, %v4124_v54 }
 0x2ce   : > { %3553 = vmatmul.msk.f32.gmra.mxu0 %vm1175_vm6, %v1284_v34 }
 0x32d   : > { %v1425_v36 = vpop.f32.mrf.mxu1 }
 0x32e   : > { %v1455_v38 = vsel %vm1454_vm8, %v1425_v36, -inf }
 0x32f   : > { %1456 = vmax.xlane.f32.xlu2 %v1455_v38 }
 0x333   : > { %v1323_v35 = vpop.f32.mrf.mxu2 }
 0x334   : > { %v4179_v39 = vadd.f32 %v3710_v11, %v1323_v35 }
 0x336   : > { %v1401_v42 = vmul.f32 %v4153_v21, %v4179_v39  ;;  %v1528_v17 = vmul.f32 %v4200_v46, %v4179_v39  ;;  %v1648_v18 = vmul.f32 %v4203_v47, %v4179_v39  ;;  %v1768_v23 = vmul.f32 %v4232_v59, %v4179_v39 }
 0x337   : > { %v1888_v27 = vmul.f32 %v4240_v61, %v4179_v39 }
 0x33b   : > { %v1363_v40 = vpop.f32.mrf.mxu0 }
 0x33c   : > { %v4181_v41 = vadd.f32 %v3711_v13, %v1363_v40 }
 0x33e   : > { %3556 = vmatpush.xpose.msk.msrb.mxu2 %vm1175_vm6, %v4181_v41 }
 0x341   : > { %3557 = vmatmul.msk.f32.vlgmr.msrb.gmra.mxu2 %vm1175_vm6, %v1401_v42 }
 0x342   : > { %3560 = vmatpush.xpose.msk.msra.mxu2 %vm1175_vm6, %v4150_v19 }
 0x343   : > { %v1394_v44 = vpop.f32.mrf.mxu0 }
 0x344   : > { %v4197_v45 = vadd.f32 %v3712_v43, %v1394_v44 }
 0x346   : > { %3566 = vmatpush.xpose.msk.msrb.mxu2 %vm1175_vm6, %v4150_v19  ;;  %v1477_v48 = vmul.f32 %v4153_v21, %v4197_v45  ;;  %v1597_v50 = vmul.f32 %v4200_v46, %v4197_v45  ;;  %v1717_v52 = vmul.f32 %v4203_v47, %v4197_v45 }
 0x348   : > { %1497 = vmatpush.msra.mxu3 %v1477_v48  ;;  %1617 = vmatpush.msrb.mxu0 %v1597_v50 }
 0x349   : > { %3561 = vmatmul.msk.f32.vlgmr.msra.gmra.mxu2 %vm1175_vm6, %v1527_v53 }
 0x34a   : > { %3562 = vmatpush.xpose.msk.msrb.mxu3 %vm1175_vm6, %v4181_v41  ;;  %1737 = vmatpush.msra.mxu0 %v1717_v52 }
 0x34b   : > { %3572 = vmatpush.xpose.msk.msra.mxu2 %vm1175_vm6, %v4150_v19  ;;  %v1397_v54 = vpop.f32.mrf.mxu0 }
 0x34c   : > { %v4218_v55 = vadd.f32 %v3712_v43, %v1397_v54 }
 0x34e   : > { %v1478_v56 = vmul.f32 %v4153_v21, %v4218_v55  ;;  %v1598_v57 = vmul.f32 %v4200_v46, %v4218_v55 }
 0x350   : > { %1520 = vmatpush.msra.mxu1 %v1478_v56 }
 0x351   : > { %3567 = vmatmul.msk.f32.vlgmr.msrb.gmra.mxu2 %vm1175_vm6, %v1647_v58 }
 0x352   : > { %1640 = vmatpush.msrb.mxu1 %v1598_v57  ;;  %3578 = vmatpush.xpose.msk.msrb.mxu2 %vm1175_vm6, %v4150_v19 }
 0x359   : > { %3573 = vmatmul.msk.f32.vlgmr.msra.gmra.mxu2 %vm1175_vm6, %v1767_v60 }
 0x361   : > { %3579 = vmatmul.msk.f32.vlgmr.msrb.gmra.mxu2 %vm1175_vm6, %v1887_v62 }
 0x3a2   : > { %v1457_v63 = vpop.xlane.xlu2 %1456 }
 0x3a3   : > { %v1461_v0 = vsub.f32 %v1425_v36, %v1457_v63 }
 0x3a5   : > { %v1463_v2 = vmul.f32 1.442695, %v1461_v0 }
 0x3a7   : > { %3738 = vpow2.f32 %v1463_v2 }
 0x3ad   : > { %v3739_v3 = vpop.eup %3738 }
 0x3ae   : > { %v1467_v4 = vsel %vm1454_vm8, %v3739_v3, 0.0 }
 0x3af   : > { %1468 = vadd.xlane.f32.xlu1 %v1467_v4 }
 0x3c4   : > { %v4246_v5 = vpop.f32.mrf.mxu2 }
 0x3c5   : > { %v1458_v6 = vsel %vm1454_vm8, %v4246_v5, -inf }
 0x3c6   : > { %1459 = vmax.xlane.f32.xlu1 %v1458_v6  ;;  %v1837_v6 = vmul.f32 %v4232_v59, %v4197_v45 }
 0x3cc   : > { %v1549_v20 = vpop.f32.mrf.mxu2 }
 0x3cd   : > { %v1575_v7 = vsel %vm1454_vm8, %v1549_v20, -inf }
 0x3ce   : > { %1576 = vmax.xlane.f32.xlu2 %v1575_v7 }
 0x3d4   : > { %v1669_v8 = vpop.f32.mrf.mxu2 }
 0x3d5   : > { %v1695_v9 = vsel %vm1454_vm8, %v1669_v8, -inf }
 0x3d6   : > { %1696 = vmax.xlane.f32.xlu2 %v1695_v9 }
 0x3dc   : > { %v1789_v10 = vpop.f32.mrf.mxu2 }
 0x3dd   : > { %v1815_v11 = vsel %vm1454_vm8, %v1789_v10, -inf }
 0x3de   : > { %1816 = vmax.xlane.f32.xlu2 %v1815_v11  ;;  %v1957_v11 = vmul.f32 %v4240_v61, %v4197_v45 }
 0x3e4   : > { %v1909_v12 = vpop.f32.mrf.mxu2 }
 0x3e5   : > { %v1935_v13 = vsel %vm1454_vm8, %v1909_v12, -inf }
 0x3e6   : > { %1936 = vmax.xlane.f32.xlu0 %v1935_v13 }
 0x422   : > { %v1469_v14 = vpop.xlane.xlu1 %1468 }
 0x423   : > { %3740 = vrcp.f32 %v1469_v14 }
 0x429   : > { %v3741_v15 = vpop.eup %3740 }
 0x42a   : > { %v1475_v16 = vmul.f32 %v3741_v15, %v3739_v3 }
 0x42c   : > { %3558 = vmatmul.msk.f32.vlgmr.msra.gmra.mxu3 %vm1454_vm8, %v1475_v16 }
 0x42d   : > { %3568 = vmatpush.xpose.msk.msra.mxu3 %vm1175_vm6, %v4181_v41 }
 0x434   : > { %3563 = vmatmul.msk.f32.vlgmr.msrb.gmra.mxu3 %vm1175_vm6, %v1528_v17 }
 0x435   : > { %3574 = vmatpush.xpose.msk.msrb.mxu3 %vm1175_vm6, %v4181_v41 }
 0x439   : > { %v1460_v50 = vpop.xlane.xlu1 %1459 }
 0x43a   : > { %v1462_v52 = vsub.f32 %v4246_v5, %v1460_v50 }
 0x43c   : > { %3569 = vmatmul.msk.f32.vlgmr.msra.gmra.mxu3 %vm1175_vm6, %v1648_v18  ;;  %v1465_v56 = vmul.f32 1.442695, %v1462_v52 }
 0x43d   : > { %3580 = vmatpush.xpose.msk.msra.mxu3 %vm1175_vm6, %v4181_v41 }
 0x441   : > { %v1577_v19 = vpop.xlane.xlu2 %1576 }
 0x442   : > { %v1581_v22 = vsub.f32 %v1549_v20, %v1577_v19 }
 0x444   : > { %v1583_v24 = vmul.f32 1.442695, %v1581_v22  ;;  %3575 = vmatmul.msk.f32.vlgmr.msrb.gmra.mxu3 %vm1175_vm6, %v1768_v23 }
 0x446   : > { %3742 = vpow2.f32 %v1583_v24 }
 0x449   : > { %v1697_v25 = vpop.xlane.xlu2 %1696 }
 0x44a   : > { %v1701_v26 = vsub.f32 %v1669_v8, %v1697_v25 }
 0x44c   : > { %v3743_v28 = vpop.eup %3742  ;;  %v1703_v29 = vmul.f32 1.442695, %v1701_v26  ;;  %3581 = vmatmul.msk.f32.vlgmr.msra.gmra.mxu3 %vm1175_vm6, %v1888_v27  ;;  %v2010_v26 = vld [vmem:[%s4297_s1 + $0x18] sm:$0x3f]  ;;  %v2009_v27 = vld [vmem:[%s4297_s1 + $0x10] sm:$0xff] }
 0x44d   : > { %v1587_v30 = vsel %vm1454_vm8, %v3743_v28, 0.0  ;;  %3584 = vmatpush.msk.msra.mxu2 %vm1299_vm9, %v2010_v26 }
 0x44e   : > { %3744 = vpow2.f32 %v1703_v29  ;;  %1588 = vadd.xlane.f32.xlu2 %v1587_v30 }
 0x44f   : > { %2033 = vmatpush.msra.mxu2 %v2009_v27 }
 0x451   : > { %v1817_v31 = vpop.xlane.xlu2 %1816 }
 0x452   : > { %v1821_v33 = vsub.f32 %v1789_v10, %v1817_v31 }
 0x454   : > { %v3745_v34 = vpop.eup %3744  ;;  %v1823_v36 = vmul.f32 1.442695, %v1821_v33 }
 0x455   : > { %v1707_v38 = vsel %vm1454_vm8, %v3745_v34, 0.0 }
 0x456   : > { %3746 = vpow2.f32 %v1823_v36  ;;  %1708 = vadd.xlane.f32.xlu0 %v1707_v38  ;;  %v2008_v36 = vld [vmem:[%s4297_s1 + $0x8] sm:$0xff]  ;;  %v2007_v38 = vld [vmem:[%s4297_s1] sm:$0xff] }
 0x457   : > { %2034 = vmatpush.msra.mxu2 %v2008_v36 }
 0x459   : > { %v1937_v35 = vpop.xlane.xlu0 %1936  ;;  %2035 = vmatpush.msra.mxu2 %v2007_v38 }
 0x45a   : > { %v1941_v40 = vsub.f32 %v1909_v12, %v1937_v35 }
 0x45c   : > { %v3747_v41 = vpop.eup %3746  ;;  %v1943_v39 = vmul.f32 1.442695, %v1941_v40 }
 0x45d   : > { %v1827_v42 = vsel %vm1454_vm8, %v3747_v41, 0.0 }
 0x45e   : > { %3748 = vpow2.f32 %v1943_v39  ;;  %1828 = vadd.xlane.f32.xlu2 %v1827_v42  ;;  %v1718_v42 = vmul.f32 %v4203_v47, %v4218_v55 }
 0x45f   : > { %3750 = vpow2.f32 %v1465_v56 }
 0x464   : > { %v3749_v43 = vpop.eup %3748 }
 0x465   : > { %v1947_v44 = vsel %vm1454_vm8, %v3749_v43, 0.0  ;;  %v3751_v62 = vpop.eup %3750 }
 0x466   : > { %1948 = vadd.xlane.f32.xlu0 %v1947_v44  ;;  %v1470_v3 = vsel %vm1454_vm8, %v3751_v62, 0.0 }
 0x4af   : > { %v4277_v48 = vpop.f32.mrf.mxu3 }
 0x4b7   : > { %v1572_v53 = vpop.f32.mrf.mxu3 }
 0x4b8   : > { %v1578_v54 = vsel %vm1454_vm8, %v1572_v53, -inf }
 0x4b9   : > { %1579 = vmax.xlane.f32.xlu2 %v1578_v54 }
 0x4bf   : > { %v1692_v57 = vpop.f32.mrf.mxu3 }
 0x4c0   : > { %v1698_v58 = vsel %vm1454_vm8, %v1692_v57, -inf }
 0x4c1   : > { %1699 = vmax.xlane.f32.xlu0 %v1698_v58  ;;  %v1589_v60 = vpop.xlane.xlu2 %1588 }
 0x4c2   : > { %3752 = vrcp.f32 %v1589_v60 }
 0x4c7   : > { %v1812_v63 = vpop.f32.mrf.mxu3 }
 0x4c8   : > { %v3753_v0 = vpop.eup %3752  ;;  %v1818_v2 = vsel %vm1454_vm8, %v1812_v63, -inf }
 0x4c9   : > { %v1595_v4 = vmul.f32 %v3753_v0, %v3743_v28  ;;  %1819 = vmax.xlane.f32.xlu1 %v1818_v2  ;;  %1471 = vadd.xlane.f32.xlu0 %v1470_v3  ;;  %v1709_v5 = vpop.xlane.xlu0 %1708 }
 0x4ca   : > { %3754 = vrcp.f32 %v1709_v5 }
 0x4cb   : > { %3564 = vmatmul.msk.f32.vlgmr.msrb.gmra.mxu0 %vm1454_vm8, %v1595_v4 }
 0x4cc   : > { %1857 = vmatpush.msrb.mxu0 %v1837_v6  ;;  %v1838_v6 = vmul.f32 %v4232_v59, %v4218_v55 }
 0x4cf   : > { %v1932_v20 = vpop.f32.mrf.mxu3 }
 0x4d0   : > { %v3755_v7 = vpop.eup %3754  ;;  %v1938_v8 = vsel %vm1454_vm8, %v1932_v20, -inf }
 0x4d1   : > { %v1715_v9 = vmul.f32 %v3755_v7, %v3745_v34  ;;  %1939 = vmax.xlane.f32.xlu2 %v1938_v8  ;;  %v1829_v10 = vpop.xlane.xlu2 %1828  ;;  %v1958_v8 = vmul.f32 %v4240_v61, %v4218_v55 }
 0x4d2   : > { %3756 = vrcp.f32 %v1829_v10 }
 0x4d3   : > { %3570 = vmatmul.msk.f32.vlgmr.msra.gmra.mxu0 %vm1454_vm8, %v1715_v9 }
 0x4d4   : > { %1977 = vmatpush.msra.mxu0 %v1957_v11 }
 0x4d8   : > { %v3757_v12 = vpop.eup %3756 }
 0x4d9   : > { %v1835_v13 = vmul.f32 %v3757_v12, %v3747_v41  ;;  %v1949_v14 = vpop.xlane.xlu0 %1948 }
 0x4da   : > { %3758 = vrcp.f32 %v1949_v14  ;;  %v3713_v14 = vld [vmem:[%s4314_s8] ss:$0 sm:$0xff] }
 0x4db   : > { %3576 = vmatmul.msk.f32.vlgmr.msrb.gmra.mxu0 %vm1454_vm8, %v1835_v13 }
 0x4e0   : > { %v3759_v15 = vpop.eup %3758 }
 0x4e1   : > { %v1955_v16 = vmul.f32 %v3759_v15, %v3749_v43 }
 0x4e3   : > { %3582 = vmatmul.msk.f32.vlgmr.msra.gmra.mxu0 %vm1454_vm8, %v1955_v16 }
 0x52c   : > { %v1580_v17 = vpop.xlane.xlu2 %1579 }
 0x52d   : > { %v1582_v18 = vsub.f32 %v1572_v53, %v1580_v17 }
 0x52f   : > { %v1585_v19 = vmul.f32 1.442695, %v1582_v18 }
 0x531   : > { %3760 = vpow2.f32 %v1585_v19  ;;  %v3605_v19 = vld [vmem:[%s4077_s7 + $0x38] sm:$0x3f] }
 0x532   : > { %3607 = vmatpush.msk.msrb.mxu2 %vm1299_vm9, %v3605_v19 }
 0x534   : > { %v1700_v22 = vpop.xlane.xlu0 %1699 }
 0x535   : > { %v1702_v45 = vsub.f32 %v1692_v57, %v1700_v22  ;;  %v3604_v22 = vld [vmem:[%s4077_s7 + $0x30] sm:$0xff] }
 0x536   : > { %2338 = vmatpush.msrb.mxu2 %v3604_v22 }
 0x537   : > { %v3761_v23 = vpop.eup %3760  ;;  %v1705_v24 = vmul.f32 1.442695, %v1702_v45  ;;  %v3603_v45 = vld [vmem:[%s4077_s7 + $0x28] sm:$0xff] }
 0x538   : > { %v1590_v25 = vsel %vm1454_vm8, %v3761_v23, 0.0  ;;  %2339 = vmatpush.msrb.mxu2 %v3603_v45 }
 0x539   : > { %3762 = vpow2.f32 %v1705_v24  ;;  %1591 = vadd.xlane.f32.xlu1 %v1590_v25 }
 0x53c   : > { %v1820_v28 = vpop.xlane.xlu1 %1819  ;;  %v1472_v29 = vpop.xlane.xlu0 %1471 }
 0x53d   : > { %v1822_v30 = vsub.f32 %v1812_v63, %v1820_v28  ;;  %3764 = vrcp.f32 %v1472_v29 }
 0x53f   : > { %v3763_v31 = vpop.eup %3762  ;;  %v1825_v33 = vmul.f32 1.442695, %v1822_v30  ;;  %v4339_v30 = vld [vmem:[%s4044_s24 + $0x1] ss:$0 sm:$0xff]  ;;  %s4423_s24 = scalar_lea.vmem %s4705_s15, %s3692_s9  ;;  %s4447_s9 = scalar_lea.vmem %s4706_s16, %s4038_s29 }
 0x540   : > { %v1710_v34 = vsel %vm1454_vm8, %v3763_v31, 0.0  ;;  %v2261_v38 = vmul.f32 %v4339_v30, %v4163_v32  ;;  %v2159_v19 = vld [vmem:[%s4423_s24 + $0x50] sm:$0xff]  ;;  %v2158_v22 = vld [vmem:[%s4423_s24 + $0x48] sm:$0xff]  ;;  %v2157_v45 = vld [vmem:[%s4423_s24 + $0x40] sm:$0xff] }
 0x541   : > { %3766 = vpow2.f32 %v1825_v33  ;;  %1711 = vadd.xlane.f32.xlu2 %v1710_v34  ;;  %v2260_v33 = vmul.f32 %v4339_v30, %v4111_v49  ;;  %v4345_v34 = vld [vmem:[%s4052_s6 + $0x1] ss:$0 sm:$0xff] }
 0x542   : > { %v4361_v49 = vadd.f32 %v4345_v34, %v2261_v38  ;;  %v2151_v38 = vld [vmem:[%s4423_s24 + $0x10] sm:$0xff] }
 0x543   : > { %v3765_v35 = vpop.eup %3764  ;;  %v4348_v36 = vadd.f32 %v4345_v34, %v2260_v33 }
 0x544   : > { %v1476_v40 = vmul.f32 %v3765_v35, %v3751_v62  ;;  %v1940_v41 = vpop.xlane.xlu2 %1939 }
 0x545   : > { %v1942_v39 = vsub.f32 %v1932_v20, %v1940_v41 }
 0x546   : > { %3559 = vmatmul.msk.f32.vlgmr.msra.gmra.mxu1 %vm1454_vm8, %v1476_v40 }
 0x547   : > { %v3767_v43 = vpop.eup %3766  ;;  %v1945_v44 = vmul.f32 1.442695, %v1942_v39  ;;  %1760 = vmatpush.msra.mxu1 %v1718_v42  ;;  %v3597_v42 = vld [vmem:[%s4067_s25 + $0x38] sm:$0x3f] }
 0x548   : > { %v1619_v50 = vpop.f32.mrf.mxu0  ;;  %v1830_v52 = vsel %vm1454_vm8, %v3767_v43, 0.0 }
 0x549   : > { %3768 = vpow2.f32 %v1945_v44  ;;  %1831 = vadd.xlane.f32.xlu0 %v1830_v52  ;;  %v1645_v58 = vadd.f32 %v1619_v50, %v4277_v48  ;;  %v3595_v44 = vld [vmem:[%s4067_s25 + $0x28] sm:$0xff]  ;;  %v3594_v50 = vld [vmem:[%s4067_s25 + $0x20] sm:$0xff]  ;;  %v2110_v52 = vld [vmem:[%s4383_s10 + $0x18] sm:$0x3f] }
 0x54a   : > { %3587 = vmatpush.msk.msrb.mxu3 %vm1299_vm9, %v2110_v52 }
 0x54f   : > { %v3769_v53 = vpop.eup %3768 }
 0x550   : > { %v1739_v54 = vpop.f32.mrf.mxu0  ;;  %v1950_v56 = vsel %vm1454_vm8, %v3769_v53, 0.0 }
 0x551   : > { %1951 = vadd.xlane.f32.xlu1 %v1950_v56  ;;  %v1765_v60 = vadd.f32 %v1739_v54, %v1645_v58  ;;  %v2109_v56 = vld [vmem:[%s4383_s10 + $0x10] sm:$0xff] }
 0x552   : > { %2137 = vmatpush.msrb.mxu3 %v2109_v56 }
 0x558   : > { %v1859_v57 = vpop.f32.mrf.mxu0 }
 0x559   : > { %v1885_v62 = vadd.f32 %v1859_v57, %v1765_v60  ;;  %v2108_v57 = vld [vmem:[%s4383_s10 + $0x8] sm:$0xff]  ;;  %v2107_v60 = vld [vmem:[%s4383_s10] sm:$0xff] }
 0x55a   : > { %2138 = vmatpush.msrb.mxu3 %v2108_v57 }
 0x55c   : > { %2139 = vmatpush.msrb.mxu3 %v2107_v60 }
 0x560   : > { %v1979_v63 = vpop.f32.mrf.mxu0 }
 0x561   : > { %v2005_v0 = vadd.f32 %v1979_v63, %v1885_v62  ;;  %v4402_v63 = vld [vmem:[%s4118_s17 + $0x1] ss:$0 sm:$0xff] }
 0x563   : > { %3585 = vmatmul.msk.f32.vlgmr.msra.gmra.mxu2 %vm1175_vm6, %v2005_v0 }
 0x5ac   : > { %v1592_v2 = vpop.xlane.xlu1 %1591 }
 0x5ad   : > { %3770 = vrcp.f32 %v1592_v2 }
 0x5b3   : > { %v3771_v3 = vpop.eup %3770 }
 0x5b4   : > { %v1596_v4 = vmul.f32 %v3771_v3, %v3761_v23  ;;  %v1712_v5 = vpop.xlane.xlu2 %1711  ;;  %v3602_v23 = vld [vmem:[%s4077_s7 + $0x20] sm:$0xff]  ;;  %s4372_s7 = scalar_lea.vmem %s4710_s20, %s4038_s29  ;;  %s1000_s29 = scalar_lea.vmem %s4711_s21, %s4746_s30 }
 0x5b5   : > { %3772 = vrcp.f32 %v1712_v5  ;;  %2340 = vmatpush.msrb.mxu2 %v3602_v23  ;;  %v2156_v23 = vld [vmem:[%s4423_s24 + $0x38] sm:$0xff] }
 0x5b6   : > { %3565 = vmatmul.msk.f32.vlgmr.msrb.gmra.mxu1 %vm1454_vm8, %v1596_v4 }
 0x5b7   : > { %1880 = vmatpush.msrb.mxu1 %v1838_v6 }
 0x5bb   : > { %v3773_v48 = vpop.eup %3772 }
 0x5bc   : > { %v1716_v20 = vmul.f32 %v3773_v48, %v3763_v31  ;;  %v1832_v7 = vpop.xlane.xlu0 %1831 }
 0x5bd   : > { %3774 = vrcp.f32 %v1832_v7 }
 0x5be   : > { %3571 = vmatmul.msk.f32.vlgmr.msra.gmra.mxu1 %vm1454_vm8, %v1716_v20 }
 0x5bf   : > { %2000 = vmatpush.msra.mxu1 %v1958_v8 }
 0x5c3   : > { %v3775_v9 = vpop.eup %3774  ;;  %v1522_v18 = vpop.f32.mrf.mxu1 }
 0x5c4   : > { %v1836_v10 = vmul.f32 %v3775_v9, %v3767_v43  ;;  %v1952_v11 = vpop.xlane.xlu1 %1951  ;;  %v3596_v43 = vld [vmem:[%s4067_s25 + $0x30] sm:$0xff]  ;;  %v4411_v9 = vld [vmem:[%s4358_s2] ss:$0 sm:$0xff] }
 0x5c5   : > { %3776 = vrcp.f32 %v1952_v11 }
 0x5c6   : > { %3577 = vmatmul.msk.f32.vlgmr.msrb.gmra.mxu1 %vm1454_vm8, %v1836_v10 }
 0x5c7   : > { %3599 = vmatpush.msk.msrb.mxu1 %vm1299_vm9, %v3597_v42 }
 0x5c9   : > { %2296 = vmatpush.msrb.mxu1 %v3596_v43  ;;  %v3613_v43 = vld [vmem:[%s4134_s28 + $0x38] sm:$0x3f] }
 0x5ca   : > { %3615 = vmatpush.msk.msra.mxu3 %vm1299_vm9, %v3613_v43 }
 0x5cb   : > { %v3777_v12 = vpop.eup %3776  ;;  %2297 = vmatpush.msrb.mxu1 %v3595_v44  ;;  %v3612_v44 = vld [vmem:[%s4134_s28 + $0x30] sm:$0xff] }
 0x5cc   : > { %v1956_v13 = vmul.f32 %v3777_v12, %v3769_v53  ;;  %v4414_v12 = vld [vmem:[%s4372_s7] ss:$0 sm:$0xff]  ;;  %2374 = vmatpush.msra.mxu3 %v3612_v44 }
 0x5cd   : > { %2298 = vmatpush.msrb.mxu1 %v3594_v50  ;;  %v3611_v50 = vld [vmem:[%s4134_s28 + $0x28] sm:$0xff] }
 0x5ce   : > { %3583 = vmatmul.msk.f32.vlgmr.msra.gmra.mxu1 %vm1454_vm8, %v1956_v13  ;;  %2375 = vmatpush.msra.mxu3 %v3611_v50 }
 0x5e6   : > { %v2037_v15 = vpop.f32.mrf.mxu2 }
 0x5e7   : > { %v2043_v55 = vadd.f32 %v2037_v15, %v4012_v37  ;;  %v2163_v15 = vld [vmem:[%s4423_s24 + $0x70] sm:$0xff] }
 0x5e8   : > { %2172 = vmatpush.msrb.mxu0 %v2163_v15 }
 0x5e9   : > { %v4329_v16 = vadd.f32 %v3713_v14, %v2043_v55  ;;  %v2162_v55 = vld [vmem:[%s4423_s24 + $0x68] sm:$0xff] }
 0x5ea   : > { %2173 = vmatpush.msrb.mxu0 %v2162_v55 }
 0x5eb   : > { %v2053_v17 = vsel %vm1175_vm6, %v4329_v16, 0.0 }
 0x5ec   : > { %2054 = vadd.xlane.f32.xlu2 %v2053_v17  ;;  %v2161_v17 = vld [vmem:[%s4423_s24 + $0x60] sm:$0xff] }
 0x5ed   : > { %2174 = vmatpush.msrb.mxu0 %v2161_v17 }
 0x633   : > { %v1642_v24 = vpop.f32.mrf.mxu1 }
 0x634   : > { %v1646_v26 = vadd.f32 %v1642_v24, %v1522_v18  ;;  %v2160_v18 = vld [vmem:[%s4423_s24 + $0x58] sm:$0xff]  ;;  %v2155_v24 = vld [vmem:[%s4423_s24 + $0x30] sm:$0xff] }
 0x635   : > { %2175 = vmatpush.msrb.mxu0 %v2160_v18 }
 0x637   : > { %2176 = vmatpush.msrb.mxu0 %v2159_v19 }
 0x639   : > { %2177 = vmatpush.msrb.mxu0 %v2158_v22 }
 0x63b   : > { %v1762_v37 = vpop.f32.mrf.mxu1  ;;  %2178 = vmatpush.msrb.mxu0 %v2157_v45 }
 0x63c   : > { %v1766_v27 = vadd.f32 %v1762_v37, %v1646_v26  ;;  %v2154_v37 = vld [vmem:[%s4423_s24 + $0x28] sm:$0xff]  ;;  %v2152_v26 = vld [vmem:[%s4423_s24 + $0x18] sm:$0xff] }
 0x63d   : > { %2179 = vmatpush.msrb.mxu0 %v2156_v23 }
 0x63f   : > { %2180 = vmatpush.msrb.mxu0 %v2155_v24 }
 0x641   : > { %2181 = vmatpush.msrb.mxu0 %v2154_v37 }
 0x643   : > { %v1882_v25 = vpop.f32.mrf.mxu1 }
 0x644   : > { %v1886_v28 = vadd.f32 %v1882_v25, %v1766_v27  ;;  %v2153_v25 = vld [vmem:[%s4423_s24 + $0x20] sm:$0xff] }
 0x645   : > { %2182 = vmatpush.msrb.mxu0 %v2153_v25 }
 0x647   : > { %2183 = vmatpush.msrb.mxu0 %v2152_v26 }
 0x649   : > { %2184 = vmatpush.msrb.mxu0 %v2151_v38 }
 0x64b   : > { %v2002_v29 = vpop.f32.mrf.mxu1 }
 0x64c   : > { %v2006_v31 = vadd.f32 %v2002_v29, %v1886_v28 }
 0x64e   : > { %3586 = vmatmul.msk.f32.gmra.mxu2 %vm1175_vm6, %v2006_v31 }
 0x656   : > { %3608 = vmatmul.msk.f32.vlgmr.msrb.gmra.mxu2 %vm1175_vm6, %v4348_v36 }
 0x65e   : > { %3609 = vmatmul.msk.f32.gmra.mxu2 %vm1175_vm6, %v4361_v49 }
 0x65f   : > { %v2055_v35 = vpop.xlane.xlu2 %2054 }
 0x660   : > { %v2059_v40 = vmul.f32 %v2055_v35, %v4018_v51  ;;  %v2150_v35 = vld [vmem:[%s4423_s24 + $0x8] sm:$0xff] }
 0x661   : > { %2185 = vmatpush.msrb.mxu0 %v2150_v35 }
 0x662   : > { %v2061_v41 = vsub.f32 %v4329_v16, %v2059_v40  ;;  %v2149_v40 = vld [vmem:[%s4423_s24] sm:$0xff] }
 0x663   : > { %2186 = vmatpush.msrb.mxu0 %v2149_v40 }
 0x664   : > { %v2063_v39 = vmul.f32 %v2061_v41, %v2061_v41 }
 0x666   : > { %v2065_v32 = vsel %vm1175_vm6, %v2063_v39, 0.0 }
 0x667   : > { %2066 = vadd.xlane.f32.xlu0 %v2065_v32 }
 0x6d1   : > { %v2040_v53 = vpop.f32.mrf.mxu2 }
 0x6d2   : > { %v2044_v54 = vadd.f32 %v2040_v53, %v4046_v1 }
 0x6d4   : > { %v4396_v58 = vadd.f32 %v3713_v14, %v2044_v54  ;;  %v3610_v54 = vld [vmem:[%s4134_s28 + $0x20] sm:$0xff] }
 0x6d5   : > { %2376 = vmatpush.msra.mxu3 %v3610_v54 }
 0x6d6   : > { %v2056_v62 = vsel %vm1175_vm6, %v4396_v58, 0.0 }
 0x6d7   : > { %2057 = vadd.xlane.f32.xlu1 %v2056_v62 }
 0x6d9   : > { %v2342_v1 = vpop.f32.mrf.mxu2 }
 0x6da   : > { %v4405_v0 = vadd.f32 %v4402_v63, %v2342_v1  ;;  %v2067_v2 = vpop.xlane.xlu0 %2066 }
 0x6db   : > { %v2071_v3 = vmul.f32 %v2067_v2, %v4018_v51 }
 0x6dc   : > { %3618 = vmatpush.xpose.msk.msra.mxu1 %vm1175_vm6, %v4405_v0 }
 0x6dd   : > { %v2073_v4 = vadd.f32 1e-05, %v2071_v3 }
 0x6df   : > { %3778 = vrsqrt.f32 %v2073_v4  ;;  %vm2081_vm10 = vweird.f32 %v2073_v4 }
 0x6e1   : > { %v2345_v15 = vpop.f32.mrf.mxu2 }
 0x6e5   : > { %v3779_v5 = vpop.eup %3778 }
 0x6e6   : > { %v2076_v6 = vmul.f32 %v3779_v5, %v2073_v4  ;;  %vm2082_vm7 = vweird.f32 %v3779_v5 }
 0x6e7   : > { %vm2083_vm11 = vmor %vm2081_vm10, %vm2082_vm7 }
 0x6e8   : > { %v2077_v48 = vmul.f32 %v3779_v5, %v2076_v6 }
 0x6ea   : > { %v2078_v20 = vmul.f32 0.5, %v2077_v48 }
 0x6ec   : > { %v2079_v7 = vsub.f32 1.5, %v2078_v20  ;;  %v3718_v20 = vld [vmem:[%s4447_s9] ss:$0 sm:$0xff] }
 0x6ee   : > { %v2080_v8 = vmul.f32 %v3779_v5, %v2079_v7 }
 0x6f0   : > { %v2084_v10 = vsel %vm2083_vm11, %v3779_v5, %v2080_v8 }
 0x6f1   : > { %v2095_v11 = vmul.f32 %v2084_v10, %v2061_v41  ;;  %v3717_v41 = vld [vmem:[%s4394_s0] ss:$0 sm:$0xff] }
 0x6f3   : > { %v2100_v13 = vmul.f32 %v4411_v9, %v2095_v11 }
 0x6f5   : > { %v2105_v14 = vadd.f32 %v4414_v12, %v2100_v13 }
 0x6f7   : > { %3588 = vmatmul.msk.f32.vlgmr.msrb.gmra.mxu3 %vm1175_vm6, %v2105_v14  ;;  %v3719_v14 = vld [vmem:[%s4173_s5 + $0x1] ss:$0 sm:$0xff]  ;;  %s1003_s5 = scalar_lea.vmem %s4712_s22, %s4746_s30 }
 0x74a   : > { %v2058_v27 = vpop.xlane.xlu1 %2057 }
 0x74b   : > { %v2060_v28 = vmul.f32 %v2058_v27, %v4018_v51 }
 0x74d   : > { %v2062_v29 = vsub.f32 %v4396_v58, %v2060_v28 }
 0x74f   : > { %v2064_v31 = vmul.f32 %v2062_v29, %v2062_v29 }
 0x751   : > { %v2068_v33 = vsel %vm1175_vm6, %v2064_v31, 0.0 }
 0x752   : > { %2069 = vadd.xlane.f32.xlu2 %v2068_v33 }
 0x77a   : > { %v2141_v39 = vpop.f32.mrf.mxu3 }
 0x77b   : > { %v2142_v32 = vadd.f32 %v3717_v41, %v2141_v39 }
 0x77d   : > { %v2147_v42 = vmax.f32 %v2142_v32, 0.0 }
 0x77f   : > { %3590 = vmatmul.msk.f32.vlgmr.msrb.gmra.mxu0 %vm2164_vm12, %v2147_v42 }
 0x7c5   : > { %v2070_v52 = vpop.xlane.xlu2 %2069 }
 0x7c6   : > { %v2072_v53 = vmul.f32 %v2070_v52, %v4018_v51 }
 0x7c8   : > { %v2074_v56 = vadd.f32 1e-05, %v2072_v53 }
 0x7ca   : > { %3780 = vrsqrt.f32 %v2074_v56  ;;  %vm2091_vm14 = vweird.f32 %v2074_v56 }
 0x7d0   : > { %v3781_v57 = vpop.eup %3780 }
 0x7d1   : > { %v2086_v60 = vmul.f32 %v3781_v57, %v2074_v56  ;;  %vm2092_vm13 = vweird.f32 %v3781_v57 }
 0x7d2   : > { %vm2093_vm15 = vmor %vm2091_vm14, %vm2092_vm13 }
 0x7d3   : > { %v2087_v62 = vmul.f32 %v3781_v57, %v2086_v60 }
 0x7d5   : > { %v2088_v1 = vmul.f32 0.5, %v2087_v62 }
 0x7d7   : > { %v2089_v2 = vsub.f32 1.5, %v2088_v1 }
 0x7d9   : > { %v2090_v3 = vmul.f32 %v3781_v57, %v2089_v2 }
 0x7db   : > { %v2094_v4 = vsel %vm2093_vm15, %v3781_v57, %v2090_v3 }
 0x7dc   : > { %v2096_v5 = vmul.f32 %v2094_v4, %v2062_v29 }
 0x7de   : > { %v2101_v6 = vmul.f32 %v4411_v9, %v2096_v5 }
 0x7e0   : > { %v2106_v48 = vadd.f32 %v4414_v12, %v2101_v6 }
 0x7e2   : > { %3589 = vmatmul.msk.f32.gmra.mxu3 %vm1175_vm6, %v2106_v48 }
 0x7ea   : > { %3616 = vmatmul.msk.f32.vlgmr.msra.gmra.mxu3 %vm1175_vm6, %v4348_v36 }
 0x7f2   : > { %3617 = vmatmul.msk.f32.gmra.mxu3 %vm1175_vm6, %v4361_v49 }
 0x7fc   : > { %v2188_v7 = vpop.f32.mrf.mxu0 }
 0x7fd   : > { %v2194_v8 = vadd.f32 %v2188_v7, %v4329_v16  ;;  %v4477_v16 = vadd.f32 %v4402_v63, %v2345_v15 }
 0x7ff   : > { %v4466_v10 = vadd.f32 %v3718_v20, %v2194_v8 }
 0x801   : > { %v2206_v11 = vsel %vm1175_vm6, %v4466_v10, 0.0 }
 0x802   : > { %2207 = vadd.xlane.f32.xlu0 %v2206_v11 }
 0x865   : > { %v2144_v9 = vpop.f32.mrf.mxu3 }
 0x866   : > { %v2145_v12 = vadd.f32 %v3717_v41, %v2144_v9  ;;  %v3720_v9 = vld [vmem:[%s4108_s3 + $0x1] ss:$0 sm:$0xff] }
 0x868   : > { %v2148_v13 = vmax.f32 %v2145_v12, 0.0 }
 0x86a   : > { %3591 = vmatmul.msk.f32.gmra.mxu0 %vm2164_vm12, %v2148_v13 }
 0x86d   : > { %v2378_v36 = vpop.f32.mrf.mxu3 }
 0x86e   : > { %v4472_v55 = vadd.f32 %v3719_v14, %v2378_v36 }
 0x870   : > { %v2460_v49 = vmul.f32 %v4153_v21, %v4472_v55  ;;  %v2580_v37 = vmul.f32 %v4200_v46, %v4472_v55 }
 0x872   : > { %2480 = vmatpush.msra.mxu2 %v2460_v49 }
 0x874   : > { %3626 = vmatpush.xpose.msk.msrb.mxu2 %vm1175_vm6, %v4477_v16 }
 0x875   : > { %v2208_v17 = vpop.xlane.xlu0 %2207  ;;  %v2381_v18 = vpop.f32.mrf.mxu3 }
 0x876   : > { %v2212_v19 = vmul.f32 %v2208_v17, %v4018_v51  ;;  %v4482_v22 = vadd.f32 %v3719_v14, %v2381_v18 }
 0x878   : > { %v2214_v45 = vsub.f32 %v4466_v10, %v2212_v19  ;;  %v2461_v23 = vmul.f32 %v4153_v21, %v4482_v22  ;;  %v2581_v24 = vmul.f32 %v4200_v46, %v4482_v22  ;;  %v2701_v63 = vmul.f32 %v4203_v47, %v4482_v22 }
 0x87a   : > { %2503 = vmatpush.msrb.mxu3 %v2461_v23  ;;  %2623 = vmatpush.msra.mxu0 %v2581_v24  ;;  %v2216_v25 = vmul.f32 %v2214_v45, %v2214_v45 }
 0x87c   : > { %2600 = vmatpush.msra.mxu3 %v2580_v37  ;;  %2743 = vmatpush.msrb.mxu0 %v2701_v63  ;;  %v2218_v26 = vsel %vm1175_vm6, %v2216_v25, 0.0 }
 0x87d   : > { %2219 = vadd.xlane.f32.xlu1 %v2218_v26 }
 0x8e7   : > { %v2191_v27 = vpop.f32.mrf.mxu0 }
 0x8e8   : > { %v2195_v28 = vadd.f32 %v2191_v27, %v4396_v58 }
 0x8ea   : > { %v4495_v29 = vadd.f32 %v3718_v20, %v2195_v28 }
 0x8ec   : > { %v2209_v31 = vsel %vm1175_vm6, %v4495_v29, 0.0 }
 0x8ed   : > { %2210 = vadd.xlane.f32.xlu2 %v2209_v31 }
 0x8f0   : > { %v2220_v33 = vpop.xlane.xlu1 %2219 }
 0x8f1   : > { %v2224_v38 = vmul.f32 %v2220_v33, %v4018_v51 }
 0x8f3   : > { %v2226_v35 = vadd.f32 1e-05, %v2224_v38 }
 0x8f5   : > { %3782 = vrsqrt.f32 %v2226_v35  ;;  %vm2234_vm1 = vweird.f32 %v2226_v35 }
 0x8fb   : > { %v3783_v40 = vpop.eup %3782 }
 0x8fc   : > { %v2229_v41 = vmul.f32 %v3783_v40, %v2226_v35  ;;  %vm2235_vm0 = vweird.f32 %v3783_v40 }
 0x8fd   : > { %vm2236_vm2 = vmor %vm2234_vm1, %vm2235_vm0 }
 0x8fe   : > { %v2230_v39 = vmul.f32 %v3783_v40, %v2229_v41 }
 0x900   : > { %v2231_v32 = vmul.f32 0.5, %v2230_v39 }
 0x902   : > { %v2232_v42 = vsub.f32 1.5, %v2231_v32 }
 0x904   : > { %v2233_v43 = vmul.f32 %v3783_v40, %v2232_v42 }
 0x906   : > { %v2237_v58 = vsel %vm2236_vm2, %v3783_v40, %v2233_v43 }
 0x907   : > { %v2248_v44 = vmul.f32 %v2237_v58, %v2214_v45 }
 0x909   : > { %v2253_v50 = vmul.f32 %v4339_v30, %v2248_v44 }
 0x90b   : > { %v2258_v52 = vadd.f32 %v4345_v34, %v2253_v50 }
 0x90d   : > { %3600 = vmatmul.msk.f32.vlgmr.msrb.gmra.mxu1 %vm1175_vm6, %v2258_v52 }
 0x90e   : > { %3620 = vmatpush.xpose.msk.msrb.mxu1 %vm1175_vm6, %v4477_v16 }
 0x960   : > { %v2211_v53 = vpop.xlane.xlu2 %2210 }
 0x961   : > { %v2213_v54 = vmul.f32 %v2211_v53, %v4018_v51 }
 0x963   : > { %v2215_v56 = vsub.f32 %v4495_v29, %v2213_v54 }
 0x965   : > { %v2217_v57 = vmul.f32 %v2215_v56, %v2215_v56 }
 0x967   : > { %v2221_v60 = vsel %vm1175_vm6, %v2217_v57, 0.0 }
 0x968   : > { %2222 = vadd.xlane.f32.xlu0 %v2221_v60 }
 0x98a   : > { %v2300_v13 = vpop.f32.mrf.mxu1 }
 0x98b   : > { %v2301_v14 = vadd.f32 %v3720_v9, %v2300_v13 }
 0x98d   : > { %v2384_v36 = vmul.f32 %v4153_v21, %v2301_v14  ;;  %v2510_v18 = vmul.f32 %v4200_v46, %v2301_v14  ;;  %v2630_v19 = vmul.f32 %v4203_v47, %v2301_v14  ;;  %v2870_v45 = vmul.f32 %v4240_v61, %v2301_v14 }
 0x9db   : > { %v2223_v62 = vpop.xlane.xlu0 %2222 }
 0x9dc   : > { %v2225_v1 = vmul.f32 %v2223_v62, %v4018_v51 }
 0x9de   : > { %v2227_v2 = vadd.f32 1e-05, %v2225_v1 }
 0x9e0   : > { %3784 = vrsqrt.f32 %v2227_v2  ;;  %vm2244_vm4 = vweird.f32 %v2227_v2 }
 0x9e6   : > { %v3785_v3 = vpop.eup %3784 }
 0x9e7   : > { %v2239_v4 = vmul.f32 %v3785_v3, %v2227_v2  ;;  %vm2245_vm3 = vweird.f32 %v3785_v3 }
 0x9e8   : > { %vm2246_vm5 = vmor %vm2244_vm4, %vm2245_vm3 }
 0x9e9   : > { %v2240_v5 = vmul.f32 %v3785_v3, %v2239_v4 }
 0x9eb   : > { %v2241_v6 = vmul.f32 0.5, %v2240_v5 }
 0x9ed   : > { %v2242_v48 = vsub.f32 1.5, %v2241_v6 }
 0x9ef   : > { %v2243_v20 = vmul.f32 %v3785_v3, %v2242_v48 }
 0x9f1   : > { %v2247_v7 = vsel %vm2246_vm5, %v3785_v3, %v2243_v20 }
 0x9f2   : > { %v2249_v8 = vmul.f32 %v2247_v7, %v2215_v56 }
 0x9f4   : > { %v2254_v11 = vmul.f32 %v4339_v30, %v2249_v8 }
 0x9f6   : > { %v2259_v12 = vadd.f32 %v4345_v34, %v2254_v11 }
 0x9f8   : > { %3601 = vmatmul.msk.f32.gmra.mxu1 %vm1175_vm6, %v2259_v12 }
 0xa00   : > { %3619 = vmatmul.msk.f32.vlgmr.msra.gmra.mxu1 %vm1175_vm6, %v2384_v36 }
 0xa01   : > { %3624 = vmatpush.xpose.msk.msra.mxu1 %vm1175_vm6, %v4405_v0 }
 0xa75   : > { %v2303_v15 = vpop.f32.mrf.mxu1 }
 0xa76   : > { %v2304_v49 = vadd.f32 %v3720_v9, %v2303_v15 }
 0xa78   : > { %v2385_v17 = vmul.f32 %v4153_v21, %v2304_v49  ;;  %v2750_v21 = vmul.f32 %v4232_v59, %v2301_v14  ;;  %v2511_v32 = vmul.f32 %v4200_v46, %v2304_v49  ;;  %v2631_v42 = vmul.f32 %v4203_v47, %v2304_v49 }
 0xa79   : > { %v2751_v43 = vmul.f32 %v4232_v59, %v2304_v49  ;;  %v2871_v58 = vmul.f32 %v4240_v61, %v2304_v49 }
 0xa7a   : > { %3621 = vmatmul.msk.f32.vlgmr.msrb.gmra.mxu1 %vm1175_vm6, %v2385_v17 }
 0xa7b   : > { %3630 = vmatpush.xpose.msk.msrb.mxu1 %vm1175_vm6, %v4405_v0 }
 0xa7d   : > { %v2409_v30 = vpop.f32.mrf.mxu1 }
 0xa7e   : > { %v2438_v34 = vsel %vm1454_vm8, %v2409_v30, -inf }
 0xa7f   : > { %2439 = vmax.xlane.f32.xlu1 %v2438_v34 }
 0xa82   : > { %3625 = vmatmul.msk.f32.vlgmr.msra.gmra.mxu1 %vm1175_vm6, %v2510_v18 }
 0xa83   : > { %3636 = vmatpush.xpose.msk.msra.mxu1 %vm1175_vm6, %v4405_v0 }
 0xa8a   : > { %3631 = vmatmul.msk.f32.vlgmr.msrb.gmra.mxu1 %vm1175_vm6, %v2630_v19 }
 0xa8b   : > { %3642 = vmatpush.xpose.msk.msrb.mxu1 %vm1175_vm6, %v4405_v0 }
 0xa92   : > { %3637 = vmatmul.msk.f32.vlgmr.msra.gmra.mxu1 %vm1175_vm6, %v2750_v21 }
 0xa9a   : > { %3643 = vmatmul.msk.f32.vlgmr.msrb.gmra.mxu1 %vm1175_vm6, %v2870_v45 }
 0xaf2   : > { %v2440_v23 = vpop.xlane.xlu1 %2439 }
 0xaf3   : > { %v2444_v24 = vsub.f32 %v2409_v30, %v2440_v23 }
 0xaf5   : > { %v2446_v63 = vmul.f32 1.442695, %v2444_v24 }
 0xaf7   : > { %3786 = vpow2.f32 %v2446_v63  ;;  %v2435_v37 = vpop.f32.mrf.mxu1 }
 0xaf8   : > { %v2441_v25 = vsel %vm1454_vm8, %v2435_v37, -inf }
 0xaf9   : > { %2442 = vmax.xlane.f32.xlu0 %v2441_v25 }
 0xafd   : > { %v3787_v26 = vpop.eup %3786 }
 0xafe   : > { %v2450_v27 = vsel %vm1454_vm8, %v3787_v26, 0.0 }
 0xaff   : > { %2451 = vadd.xlane.f32.xlu2 %v2450_v27  ;;  %v2532_v0 = vpop.f32.mrf.mxu1 }
 0xb00   : > { %v2558_v28 = vsel %vm1454_vm8, %v2532_v0, -inf }
 0xb01   : > { %2559 = vmax.xlane.f32.xlu1 %v2558_v28 }
 0xb07   : > { %v2652_v31 = vpop.f32.mrf.mxu1 }
 0xb08   : > { %v2678_v33 = vsel %vm1454_vm8, %v2652_v31, -inf }
 0xb09   : > { %2679 = vmax.xlane.f32.xlu2 %v2678_v33 }
 0xb0f   : > { %v2772_v38 = vpop.f32.mrf.mxu1 }
 0xb10   : > { %v2798_v35 = vsel %vm1454_vm8, %v2772_v38, -inf }
 0xb11   : > { %2799 = vmax.xlane.f32.xlu1 %v2798_v35 }
 0xb17   : > { %v2892_v57 = vpop.f32.mrf.mxu1 }
 0xb18   : > { %v2918_v1 = vsel %vm1454_vm8, %v2892_v57, -inf }
 0xb6c   : > { %v2443_v44 = vpop.xlane.xlu0 %2442 }
 0xb6d   : > { %v2445_v50 = vsub.f32 %v2435_v37, %v2443_v44 }
 0xb6f   : > { %v2448_v54 = vmul.f32 1.442695, %v2445_v50 }
 0xb72   : > { %v2452_v40 = vpop.xlane.xlu2 %2451 }
 0xb73   : > { %3788 = vrcp.f32 %v2452_v40 }
 0xb74   : > { %v2560_v56 = vpop.xlane.xlu1 %2559  ;;  %3790 = vpow2.f32 %v2448_v54 }
 0xb79   : > { %v3789_v41 = vpop.eup %3788 }
 0xb7a   : > { %v2458_v39 = vmul.f32 %v3789_v41, %v3787_v26  ;;  %v3791_v5 = vpop.eup %3790 }
 0xb7b   : > { %v2453_v8 = vsel %vm1454_vm8, %v3791_v5, 0.0 }
 0xb7c   : > { %3622 = vmatmul.msk.f32.vlgmr.msra.gmra.mxu2 %vm1454_vm8, %v2458_v39  ;;  %v2680_v3 = vpop.xlane.xlu2 %2679 }
 0xb7d   : > { %3632 = vmatpush.xpose.msk.msra.mxu2 %vm1175_vm6, %v4477_v16  ;;  %v2684_v6 = vsub.f32 %v2652_v31, %v2680_v3 }
 0xb7f   : > { %v2686_v11 = vmul.f32 1.442695, %v2684_v6 }
 0xb84   : > { %3627 = vmatmul.msk.f32.vlgmr.msrb.gmra.mxu2 %vm1175_vm6, %v2511_v32  ;;  %v2800_v4 = vpop.xlane.xlu1 %2799 }
 0xb85   : > { %3638 = vmatpush.xpose.msk.msrb.mxu2 %vm1175_vm6, %v4477_v16  ;;  %v2804_v48 = vsub.f32 %v2772_v38, %v2800_v4 }
 0xb87   : > { %v2806_v9 = vmul.f32 1.442695, %v2804_v48 }
 0xb8c   : > { %3633 = vmatmul.msk.f32.vlgmr.msra.gmra.mxu2 %vm1175_vm6, %v2631_v42 }
 0xb8d   : > { %3644 = vmatpush.xpose.msk.msra.mxu2 %vm1175_vm6, %v4477_v16  ;;  %v2564_v16 = vsub.f32 %v2532_v0, %v2560_v56 }
 0xb8f   : > { %v2566_v2 = vmul.f32 1.442695, %v2564_v16 }
 0xb91   : > { %3792 = vpow2.f32 %v2566_v2  ;;  %v2940_v2 = vmul.f32 %v4240_v61, %v4472_v55 }
 0xb92   : > { %3794 = vpow2.f32 %v2686_v11 }
 0xb93   : > { %3796 = vpow2.f32 %v2806_v9 }
 0xb94   : > { %3639 = vmatmul.msk.f32.vlgmr.msrb.gmra.mxu2 %vm1175_vm6, %v2751_v43 }
 0xb97   : > { %v3793_v12 = vpop.eup %3792 }
 0xb98   : > { %v2570_v36 = vsel %vm1454_vm8, %v3793_v12, 0.0  ;;  %v3795_v15 = vpop.eup %3794 }
 0xb99   : > { %v4563_v49 = vpop.eup %3796  ;;  %v2690_v17 = vsel %vm1454_vm8, %v3795_v15, 0.0 }
 0xb9a   : > { %v2810_v30 = vsel %vm1454_vm8, %v4563_v49, 0.0 }
 0xb9c   : > { %3645 = vmatmul.msk.f32.vlgmr.msra.gmra.mxu2 %vm1175_vm6, %v2871_v58  ;;  %v2700_v58 = vmul.f32 %v4203_v47, %v4472_v55 }
 0xbff   : > { %v4554_v46 = vpop.f32.mrf.mxu2 }
 0xc07   : > { %v2555_v52 = vpop.f32.mrf.mxu2 }
 0xc08   : > { %v2561_v53 = vsel %vm1454_vm8, %v2555_v52, -inf }
 0xc09   : > { %2562 = vmax.xlane.f32.xlu0 %v2561_v53 }
 0xc0f   : > { %v2675_v60 = vpop.f32.mrf.mxu2 }
 0xc10   : > { %v2681_v62 = vsel %vm1454_vm8, %v2675_v60, -inf }
 0xc11   : > { %2682 = vmax.xlane.f32.xlu2 %v2681_v62  ;;  %2919 = vmax.xlane.f32.xlu0 %v2918_v1 }
 0xc17   : > { %v2795_v20 = vpop.f32.mrf.mxu2 }
 0xc18   : > { %v2801_v7 = vsel %vm1454_vm8, %v2795_v20, -inf }
 0xc19   : > { %2802 = vmax.xlane.f32.xlu1 %v2801_v7  ;;  %2454 = vadd.xlane.f32.xlu0 %v2453_v8  ;;  %v2821_v8 = vmul.f32 %v4232_v59, %v4482_v22 }
 0xc1f   : > { %v2915_v13 = vpop.f32.mrf.mxu2 }
 0xc20   : > { %v2921_v14 = vsel %vm1454_vm8, %v2915_v13, -inf }
 0xc21   : > { %2922 = vmax.xlane.f32.xlu2 %v2921_v14  ;;  %2571 = vadd.xlane.f32.xlu1 %v2570_v36  ;;  %v2941_v14 = vmul.f32 %v4240_v61, %v4482_v22  ;;  %v3650_v61 = vld [vmem:[%s4297_s1 + $0x30] sm:$0xff]  ;;  %v3649_v22 = vld [vmem:[%s4297_s1 + $0x28] sm:$0xff] }
 0xc29   : > { %2691 = vadd.xlane.f32.xlu2 %v2690_v17  ;;  %2811 = vadd.xlane.f32.xlu1 %v2810_v30 }
 0xc7c   : > { %v2563_v34 = vpop.xlane.xlu0 %2562 }
 0xc7d   : > { %v2565_v18 = vsub.f32 %v2555_v52, %v2563_v34  ;;  %v3651_v34 = vld [vmem:[%s4297_s1 + $0x38] sm:$0x3f] }
 0xc7e   : > { %3652 = vmatpush.msk.msra.mxu1 %vm1299_vm9, %v3651_v34 }
 0xc7f   : > { %v2568_v19 = vmul.f32 1.442695, %v2565_v18  ;;  %v3648_v18 = vld [vmem:[%s4297_s1 + $0x20] sm:$0xff] }
 0xc80   : > { %3017 = vmatpush.msra.mxu1 %v3650_v61  ;;  %v3672_v61 = vld [vmem:[%s4423_s24 + $0xa8] sm:$0xff] }
 0xc81   : > { %3798 = vpow2.f32 %v2568_v19 }
 0xc82   : > { %3018 = vmatpush.msra.mxu1 %v3649_v22  ;;  %v3722_v22 = vld [vmem:[%s4358_s2 + $0x1] ss:$0 sm:$0xff] }
 0xc84   : > { %v2683_v21 = vpop.xlane.xlu2 %2682  ;;  %v2920_v45 = vpop.xlane.xlu0 %2919  ;;  %3019 = vmatpush.msra.mxu1 %v3648_v18 }
 0xc85   : > { %v2685_v23 = vsub.f32 %v2675_v60, %v2683_v21  ;;  %v2924_v24 = vsub.f32 %v2892_v57, %v2920_v45  ;;  %v2820_v57 = vmul.f32 %v4232_v59, %v4472_v55 }
 0xc87   : > { %v3799_v63 = vpop.eup %3798  ;;  %v2688_v37 = vmul.f32 1.442695, %v2685_v23  ;;  %v2926_v25 = vmul.f32 1.442695, %v2924_v24 }
 0xc88   : > { %v2573_v26 = vsel %vm1454_vm8, %v3799_v63, 0.0 }
 0xc89   : > { %3800 = vpow2.f32 %v2688_v37  ;;  %2574 = vadd.xlane.f32.xlu0 %v2573_v26 }
 0xc8a   : > { %3802 = vpow2.f32 %v2926_v25 }
 0xc8c   : > { %v2803_v27 = vpop.xlane.xlu1 %2802  ;;  %v2455_v0 = vpop.xlane.xlu0 %2454 }
 0xc8d   : > { %v2805_v28 = vsub.f32 %v2795_v20, %v2803_v27  ;;  %3804 = vrcp.f32 %v2455_v0 }
 0xc8f   : > { %v3801_v31 = vpop.eup %3800  ;;  %v2808_v33 = vmul.f32 1.442695, %v2805_v28 }
 0xc90   : > { %v3803_v38 = vpop.eup %3802  ;;  %v2693_v35 = vsel %vm1454_vm8, %v3801_v31, 0.0 }
 0xc91   : > { %3806 = vpow2.f32 %v2808_v33  ;;  %2694 = vadd.xlane.f32.xlu2 %v2693_v35  ;;  %v2930_v40 = vsel %vm1454_vm8, %v3803_v38, 0.0 }
 0xc92   : > { %2931 = vadd.xlane.f32.xlu0 %v2930_v40  ;;  %v3721_v40 = vld [vmem:[%s4314_s8 + $0x1] ss:$0 sm:$0xff] }
 0xc93   : > { %v3805_v41 = vpop.eup %3804 }
 0xc94   : > { %v2459_v39 = vmul.f32 %v3805_v41, %v3791_v5  ;;  %v2923_v32 = vpop.xlane.xlu2 %2922  ;;  %v2572_v42 = vpop.xlane.xlu1 %2571 }
 0xc95   : > { %v2925_v43 = vsub.f32 %v2915_v13, %v2923_v32  ;;  %3808 = vrcp.f32 %v2572_v42 }
 0xc96   : > { %3623 = vmatmul.msk.f32.vlgmr.msrb.gmra.mxu3 %vm1454_vm8, %v2459_v39 }
 0xc97   : > { %v3807_v44 = vpop.eup %3806  ;;  %v2928_v50 = vmul.f32 1.442695, %v2925_v43  ;;  %2720 = vmatpush.msrb.mxu3 %v2700_v58 }
 0xc98   : > { %v2813_v52 = vsel %vm1454_vm8, %v3807_v44, 0.0 }
 0xc99   : > { %3810 = vpow2.f32 %v2928_v50  ;;  %2814 = vadd.xlane.f32.xlu1 %v2813_v52 }
 0xc9b   : > { %v3809_v53 = vpop.eup %3808 }
 0xc9c   : > { %v2578_v54 = vmul.f32 %v3809_v53, %v3793_v12  ;;  %v2692_v56 = vpop.xlane.xlu2 %2691  ;;  %v2812_v47 = vpop.xlane.xlu1 %2811 }
 0xc9d   : > { %3812 = vrcp.f32 %v2692_v56 }
 0xc9e   : > { %3628 = vmatmul.msk.f32.vlgmr.msra.gmra.mxu3 %vm1454_vm8, %v2578_v54  ;;  %3814 = vrcp.f32 %v2812_v47 }
 0xc9f   : > { %v3811_v16 = vpop.eup %3810  ;;  %2840 = vmatpush.msra.mxu3 %v2820_v57 }
 0xca0   : > { %v2933_v60 = vsel %vm1454_vm8, %v3811_v16, 0.0 }
 0xca1   : > { %2934 = vadd.xlane.f32.xlu2 %v2933_v60  ;;  %v3661_v60 = vld [vmem:[%s4383_s10 + $0x38] sm:$0x3f] }
 0xca2   : > { %3663 = vmatpush.msk.msrb.mxu2 %vm1299_vm9, %v3661_v60 }
 0xca3   : > { %v3813_v62 = vpop.eup %3812 }
 0xca4   : > { %v2698_v1 = vmul.f32 %v3813_v62, %v3795_v15  ;;  %v3815_v3 = vpop.eup %3814  ;;  %v3660_v62 = vld [vmem:[%s4383_s10 + $0x30] sm:$0xff] }
 0xca5   : > { %v2818_v4 = vmul.f32 %v3815_v3, %v4563_v49  ;;  %3126 = vmatpush.msrb.mxu2 %v3660_v62 }
 0xca6   : > { %3634 = vmatmul.msk.f32.vlgmr.msrb.gmra.mxu3 %vm1454_vm8, %v2698_v1  ;;  %v3659_v1 = vld [vmem:[%s4383_s10 + $0x28] sm:$0xff] }
 0xca7   : > { %2960 = vmatpush.msrb.mxu3 %v2940_v2  ;;  %3127 = vmatpush.msrb.mxu2 %v3659_v1  ;;  %v3658_v2 = vld [vmem:[%s4383_s10 + $0x20] sm:$0xff] }
 0xca9   : > { %3128 = vmatpush.msrb.mxu2 %v3658_v2 }
 0xcae   : > { %3640 = vmatmul.msk.f32.vlgmr.msra.gmra.mxu3 %vm1454_vm8, %v2818_v4 }
 0xcfc   : > { %v2575_v5 = vpop.xlane.xlu0 %2574 }
 0xcfd   : > { %3816 = vrcp.f32 %v2575_v5 }
 0xd03   : > { %v3817_v6 = vpop.eup %3816 }
 0xd04   : > { %v2579_v48 = vmul.f32 %v3817_v6, %v3799_v63  ;;  %v2695_v20 = vpop.xlane.xlu2 %2694  ;;  %v3680_v6 = vld [vmem:[%s4423_s24 + $0xe8] sm:$0xff] }
 0xd05   : > { %3818 = vrcp.f32 %v2695_v20  ;;  %v2932_v7 = vpop.xlane.xlu0 %2931  ;;  %3161 = vmatpush.msra.mxu3 %v3680_v6  ;;  %v3678_v20 = vld [vmem:[%s4423_s24 + $0xd8] sm:$0xff] }
 0xd06   : > { %3820 = vrcp.f32 %v2932_v7  ;;  %3629 = vmatmul.msk.f32.vlgmr.msra.gmra.mxu0 %vm1454_vm8, %v2579_v48  ;;  %v3679_v48 = vld [vmem:[%s4423_s24 + $0xe0] sm:$0xff] }
 0xd07   : > { %2863 = vmatpush.msra.mxu0 %v2821_v8  ;;  %3162 = vmatpush.msra.mxu3 %v3679_v48 }
 0xd09   : > { %3163 = vmatpush.msra.mxu3 %v3678_v20 }
 0xd0b   : > { %v3819_v55 = vpop.eup %3818 }
 0xd0c   : > { %v3821_v11 = vpop.eup %3820  ;;  %v2699_v9 = vmul.f32 %v3819_v55, %v3801_v31  ;;  %v2815_v12 = vpop.xlane.xlu1 %2814  ;;  %v3677_v55 = vld [vmem:[%s4423_s24 + $0xd0] sm:$0xff] }
 0xd0d   : > { %v2938_v13 = vmul.f32 %v3821_v11, %v3803_v38  ;;  %3822 = vrcp.f32 %v2815_v12  ;;  %3164 = vmatpush.msra.mxu3 %v3677_v55 }
 0xd0e   : > { %3635 = vmatmul.msk.f32.vlgmr.msrb.gmra.mxu0 %vm1454_vm8, %v2699_v9 }
 0xd0f   : > { %3646 = vmatmul.msk.f32.vlgmr.msrb.gmra.mxu3 %vm1454_vm8, %v2938_v13  ;;  %2983 = vmatpush.msrb.mxu0 %v2941_v14  ;;  %v3676_v13 = vld [vmem:[%s4423_s24 + $0xc8] sm:$0xff] }
 0xd10   : > { %3165 = vmatpush.msra.mxu3 %v3676_v13 }
 0xd13   : > { %v3823_v59 = vpop.eup %3822 }
 0xd14   : > { %v2819_v36 = vmul.f32 %v3823_v59, %v3807_v44  ;;  %v2935_v15 = vpop.xlane.xlu2 %2934  ;;  %v3675_v59 = vld [vmem:[%s4423_s24 + $0xc0] sm:$0xff] }
 0xd15   : > { %3824 = vrcp.f32 %v2935_v15  ;;  %v3674_v15 = vld [vmem:[%s4423_s24 + $0xb8] sm:$0xff]  ;;  %3166 = vmatpush.msra.mxu3 %v3675_v59 }
 0xd16   : > { %3641 = vmatmul.msk.f32.vlgmr.msra.gmra.mxu0 %vm1454_vm8, %v2819_v36 }
 0xd17   : > { %3167 = vmatpush.msra.mxu3 %v3674_v15 }
 0xd19   : > { %v2505_v30 = vpop.f32.mrf.mxu3 }
 0xd1b   : > { %v3825_v49 = vpop.eup %3824 }
 0xd1c   : > { %v2939_v17 = vmul.f32 %v3825_v49, %v3811_v16 }
 0xd1e   : > { %3647 = vmatmul.msk.f32.vlgmr.msrb.gmra.mxu0 %vm1454_vm8, %v2939_v17  ;;  %v3673_v17 = vld [vmem:[%s4423_s24 + $0xb0] sm:$0xff] }
 0xd1f   : > { %3168 = vmatpush.msra.mxu3 %v3673_v17 }
 0xd21   : > { %v2602_v19 = vpop.f32.mrf.mxu3  ;;  %3169 = vmatpush.msra.mxu3 %v3672_v61  ;;  %v3727_v61 = vld [vmem:[%s1003_s5] ss:$0 sm:$0xff] }
 0xd22   : > { %v2628_v63 = vadd.f32 %v2602_v19, %v4554_v46 }
 0xd29   : > { %v2722_v21 = vpop.f32.mrf.mxu3 }
 0xd2a   : > { %v2748_v37 = vadd.f32 %v2722_v21, %v2628_v63  ;;  %v3671_v21 = vld [vmem:[%s4423_s24 + $0xa0] sm:$0xff]  ;;  %v3670_v63 = vld [vmem:[%s4423_s24 + $0x98] sm:$0xff] }
 0xd2b   : > { %3170 = vmatpush.msra.mxu3 %v3671_v21 }
 0xd2d   : > { %3171 = vmatpush.msra.mxu3 %v3670_v63 }
 0xd31   : > { %v2842_v23 = vpop.f32.mrf.mxu3 }
 0xd32   : > { %v2868_v25 = vadd.f32 %v2842_v23, %v2748_v37 }
 0xd83   : > { %v2625_v45 = vpop.f32.mrf.mxu0 }
 0xd84   : > { %v2629_v28 = vadd.f32 %v2625_v45, %v2505_v30 }
 0xd8b   : > { %v2745_v24 = vpop.f32.mrf.mxu0 }
 0xd8c   : > { %v2749_v31 = vadd.f32 %v2745_v24, %v2629_v28  ;;  %v3723_v24 = vld [vmem:[%s4372_s7 + $0x1] ss:$0 sm:$0xff]  ;;  %s3691_s7 = sshll.u32 %s4746_s30, 4 }
 0xd8d   : > { %s1008_s25 = scalar_lea.vmem %s4713_s23, %s3691_s7 }
 0xd92   : > { %v2962_v26 = vpop.f32.mrf.mxu3 }
 0xd93   : > { %v2988_v27 = vadd.f32 %v2962_v26, %v2868_v25  ;;  %v2865_v0 = vpop.f32.mrf.mxu0  ;;  %v3669_v26 = vld [vmem:[%s4423_s24 + $0x90] sm:$0xff] }
 0xd94   : > { %v2869_v33 = vadd.f32 %v2865_v0, %v2749_v31  ;;  %3172 = vmatpush.msra.mxu3 %v3669_v26 }
 0xd95   : > { %3653 = vmatmul.msk.f32.vlgmr.msra.gmra.mxu1 %vm1175_vm6, %v2988_v27 }
 0xd9b   : > { %v2985_v38 = vpop.f32.mrf.mxu0 }
 0xd9c   : > { %v2989_v35 = vadd.f32 %v2985_v38, %v2869_v33 }
 0xd9e   : > { %3654 = vmatmul.msk.f32.gmra.mxu1 %vm1175_vm6, %v2989_v35 }
 0xe12   : > { %v3021_v41 = vpop.f32.mrf.mxu1 }
 0xe13   : > { %v3027_v39 = vadd.f32 %v3021_v41, %v4466_v10  ;;  %v3667_v41 = vld [vmem:[%s4423_s24 + $0x80] sm:$0xff] }
 0xe15   : > { %v4603_v32 = vadd.f32 %v3721_v40, %v3027_v39  ;;  %v3666_v39 = vld [vmem:[%s4423_s24 + $0x78] sm:$0xff] }
 0xe17   : > { %v3040_v46 = vsel %vm1175_vm6, %v4603_v32, 0.0 }
 0xe18   : > { %3041 = vadd.xlane.f32.xlu0 %v3040_v46  ;;  %v3724_v46 = vld [vmem:[%s4394_s0 + $0x1] ss:$0 sm:$0xff] }
 0xe1b   : > { %v3024_v42 = vpop.f32.mrf.mxu1 }
 0xe1c   : > { %v3028_v43 = vadd.f32 %v3024_v42, %v4495_v29 }
 0xe1e   : > { %v4608_v58 = vadd.f32 %v3721_v40, %v3028_v43  ;;  %v3668_v40 = vld [vmem:[%s4423_s24 + $0x88] sm:$0xff] }
 0xe1f   : > { %3173 = vmatpush.msra.mxu3 %v3668_v40 }
 0xe20   : > { %v3043_v44 = vsel %vm1175_vm6, %v4608_v58, 0.0 }
 0xe21   : > { %3044 = vadd.xlane.f32.xlu1 %v3043_v44  ;;  %3174 = vmatpush.msra.mxu3 %v3667_v41 }
 0xe23   : > { %3175 = vmatpush.msra.mxu3 %v3666_v39 }
 0xe8b   : > { %v3042_v50 = vpop.xlane.xlu0 %3041 }
 0xe8c   : > { %v3046_v10 = vmul.f32 %v3042_v50, %v4018_v51 }
 0xe8e   : > { %v3048_v52 = vsub.f32 %v4603_v32, %v3046_v10 }
 0xe90   : > { %v3050_v53 = vmul.f32 %v3048_v52, %v3048_v52 }
 0xe92   : > { %v3052_v54 = vsel %vm1175_vm6, %v3050_v53, 0.0  ;;  %v3725_v53 = vld [vmem:[%s4447_s9 + $0x1] ss:$0 sm:$0xff] }
 0xe93   : > { %3053 = vadd.xlane.f32.xlu2 %v3052_v54 }
 0xe94   : > { %v3045_v29 = vpop.xlane.xlu1 %3044 }
 0xe95   : > { %v3047_v56 = vmul.f32 %v3045_v29, %v4018_v51 }
 0xe97   : > { %v4617_v57 = vsub.f32 %v4608_v58, %v3047_v56 }
 0xe99   : > { %v3051_v16 = vmul.f32 %v4617_v57, %v4617_v57 }
 0xe9b   : > { %v3055_v47 = vsel %vm1175_vm6, %v3051_v16, 0.0 }
 0xe9c   : > { %3056 = vadd.xlane.f32.xlu0 %v3055_v47 }
 0xf06   : > { %v3054_v3 = vpop.xlane.xlu2 %3053 }
 0xf07   : > { %v3058_v4 = vmul.f32 %v3054_v3, %v4018_v51 }
 0xf09   : > { %v3060_v5 = vadd.f32 1e-05, %v3058_v4 }
 0xf0b   : > { %3826 = vrsqrt.f32 %v3060_v5  ;;  %vm3068_vm8 = vweird.f32 %v3060_v5 }
 0xf0f   : > { %v3057_v7 = vpop.xlane.xlu0 %3056 }
 0xf10   : > { %v3059_v8 = vmul.f32 %v3057_v7, %v4018_v51 }
 0xf11   : > { %v3827_v11 = vpop.eup %3826 }
 0xf12   : > { %v3063_v9 = vmul.f32 %v3827_v11, %v3060_v5  ;;  %v3061_v12 = vadd.f32 1e-05, %v3059_v8  ;;  %vm3069_vm9 = vweird.f32 %v3827_v11 }
 0xf13   : > { %vm3070_vm7 = vmor %vm3068_vm8, %vm3069_vm9 }
 0xf14   : > { %v3064_v14 = vmul.f32 %v3827_v11, %v3063_v9  ;;  %3828 = vrsqrt.f32 %v3061_v12  ;;  %vm3078_vm11 = vweird.f32 %v3061_v12 }
 0xf16   : > { %v3065_v36 = vmul.f32 0.5, %v3064_v14 }
 0xf18   : > { %v3066_v49 = vsub.f32 1.5, %v3065_v36 }
 0xf1a   : > { %v3829_v30 = vpop.eup %3828  ;;  %v3067_v34 = vmul.f32 %v3827_v11, %v3066_v49 }
 0xf1b   : > { %v3073_v18 = vmul.f32 %v3829_v30, %v3061_v12  ;;  %vm3079_vm10 = vweird.f32 %v3829_v30 }
 0xf1c   : > { %v3071_v19 = vsel %vm3070_vm7, %v3827_v11, %v3067_v34  ;;  %vm3080_vm13 = vmor %vm3078_vm11, %vm3079_vm10 }
 0xf1d   : > { %v3082_v45 = vmul.f32 %v3071_v19, %v3048_v52  ;;  %v3074_v23 = vmul.f32 %v3829_v30, %v3073_v18 }
 0xf1f   : > { %v3087_v37 = vmul.f32 %v3722_v22, %v3082_v45  ;;  %v3075_v25 = vmul.f32 0.5, %v3074_v23 }
 0xf21   : > { %v3076_v27 = vsub.f32 1.5, %v3075_v25  ;;  %v3092_v0 = vadd.f32 %v3723_v24, %v3087_v37 }
 0xf23   : > { %v3077_v28 = vmul.f32 %v3829_v30, %v3076_v27  ;;  %3664 = vmatmul.msk.f32.vlgmr.msrb.gmra.mxu2 %vm1175_vm6, %v3092_v0 }
 0xf25   : > { %v3081_v31 = vsel %vm3080_vm13, %v3829_v30, %v3077_v28  ;;  %v3726_v30 = vld [vmem:[%s1000_s29] ss:$0 sm:$0xff] }
 0xf26   : > { %v3083_v33 = vmul.f32 %v3081_v31, %v4617_v57 }
 0xf28   : > { %v3088_v38 = vmul.f32 %v3722_v22, %v3083_v33 }
 0xf2a   : > { %v3093_v35 = vadd.f32 %v3723_v24, %v3088_v38 }
 0xf2c   : > { %3665 = vmatmul.msk.f32.gmra.mxu2 %vm1175_vm6, %v3093_v35 }
 0xfa6   : > { %v3130_v42 = vpop.f32.mrf.mxu2 }
 0xfa7   : > { %v3131_v43 = vadd.f32 %v3724_v46, %v3130_v42 }
 0xfa9   : > { %v3136_v44 = vmax.f32 %v3131_v43, 0.0 }
 0xfab   : > { %3681 = vmatmul.msk.f32.vlgmr.msra.gmra.mxu3 %vm2164_vm12, %v3136_v44 }
 0xfaf   : > { %v3133_v50 = vpop.f32.mrf.mxu2 }
 0xfb0   : > { %v3134_v10 = vadd.f32 %v3724_v46, %v3133_v50 }
 0xfb2   : > { %v3137_v52 = vmax.f32 %v3134_v10, 0.0 }
 0xfb4   : > { %3682 = vmatmul.msk.f32.gmra.mxu3 %vm2164_vm12, %v3137_v52 }
0x102e   : > { %v3177_v54 = vpop.f32.mrf.mxu3 }
0x102f   : > { %v3183_v29 = vadd.f32 %v3177_v54, %v4603_v32 }
0x1031   : > { %v3190_v56 = vadd.f32 %v3725_v53, %v3183_v29 }
0x1033   : > { %v3194_v57 = vsel %vm1175_vm6, %v3190_v56, 0.0 }
0x1034   : > { %3195 = vadd.xlane.f32.xlu1 %v3194_v57 }
0x1037   : > { %v3180_v16 = vpop.f32.mrf.mxu3 }
0x1038   : > { %v3184_v47 = vadd.f32 %v3180_v16, %v4608_v58 }
0x103a   : > { %v3191_v60 = vadd.f32 %v3725_v53, %v3184_v47 }
0x103c   : > { %v3197_v62 = vsel %vm1175_vm6, %v3191_v60, 0.0 }
0x103d   : > { %3198 = vadd.xlane.f32.xlu2 %v3197_v62 }
0x10a7   : > { %v3196_v32 = vpop.xlane.xlu1 %3195 }
0x10a8   : > { %v3200_v1 = vmul.f32 %v3196_v32, %v4018_v51 }
0x10aa   : > { %v3202_v2 = vsub.f32 %v3190_v56, %v3200_v1 }
0x10ac   : > { %v3204_v3 = vmul.f32 %v3202_v2, %v3202_v2 }
0x10ae   : > { %v3206_v4 = vsel %vm1175_vm6, %v3204_v3, 0.0 }
0x10af   : > { %3207 = vadd.xlane.f32.xlu0 %v3206_v4 }
0x10b0   : > { %v3199_v58 = vpop.xlane.xlu2 %3198 }
0x10b1   : > { %v3201_v5 = vmul.f32 %v3199_v58, %v4018_v51 }
0x10b3   : > { %v3203_v6 = vsub.f32 %v3191_v60, %v3201_v5 }
0x10b5   : > { %v3205_v48 = vmul.f32 %v3203_v6, %v3203_v6 }
0x10b7   : > { %v3209_v20 = vsel %vm1175_vm6, %v3205_v48, 0.0 }
0x10b8   : > { %3210 = vadd.xlane.f32.xlu1 %v3209_v20 }
0x1122   : > { %v3208_v7 = vpop.xlane.xlu0 %3207 }
0x1123   : > { %v3212_v8 = vmul.f32 %v3208_v7, %v4018_v51 }
0x1125   : > { %v3214_v55 = vadd.f32 1e-05, %v3212_v8 }
0x1127   : > { %3830 = vrsqrt.f32 %v3214_v55  ;;  %vm3222_vm14 = vweird.f32 %v3214_v55 }
0x112b   : > { %v3211_v11 = vpop.xlane.xlu1 %3210 }
0x112c   : > { %v3213_v9 = vmul.f32 %v3211_v11, %v4018_v51 }
0x112d   : > { %v3831_v12 = vpop.eup %3830 }
0x112e   : > { %v3217_v13 = vmul.f32 %v3831_v12, %v3214_v55  ;;  %v3215_v14 = vadd.f32 1e-05, %v3213_v9  ;;  %vm3223_vm12 = vweird.f32 %v3831_v12 }
0x112f   : > { %vm3224_vm15 = vmor %vm3222_vm14, %vm3223_vm12 }
0x1130   : > { %v3218_v59 = vmul.f32 %v3831_v12, %v3217_v13  ;;  %3832 = vrsqrt.f32 %v3215_v14  ;;  %vm3232_vm1 = vweird.f32 %v3215_v14 }
0x1132   : > { %v3219_v36 = vmul.f32 0.5, %v3218_v59 }
0x1134   : > { %v3220_v15 = vsub.f32 1.5, %v3219_v36 }
0x1136   : > { %v3833_v49 = vpop.eup %3832  ;;  %v3221_v17 = vmul.f32 %v3831_v12, %v3220_v15 }
0x1137   : > { %v3227_v51 = vmul.f32 %v3833_v49, %v3215_v14  ;;  %vm3233_vm0 = vweird.f32 %v3833_v49 }
0x1138   : > { %v3225_v34 = vsel %vm3224_vm15, %v3831_v12, %v3221_v17  ;;  %vm3234_vm2 = vmor %vm3232_vm1, %vm3233_vm0 }
0x1139   : > { %v3236_v22 = vmul.f32 %v3225_v34, %v3202_v2  ;;  %v3228_v18 = vmul.f32 %v3833_v49, %v3227_v51 }
0x113b   : > { %v3241_v19 = vmul.f32 %v3726_v30, %v3236_v22  ;;  %v3229_v21 = vmul.f32 0.5, %v3228_v18 }
0x113d   : > { %v3246_v45 = vadd.f32 %v3727_v61, %v3241_v19  ;;  %v3230_v23 = vsub.f32 1.5, %v3229_v21 }
0x113f   : > { %3248 = vst.msk [vmem:[%s1008_s25] sm:$0xff] %vm1175_vm6, %v3246_v45  ;;  %v3231_v24 = vmul.f32 %v3833_v49, %v3230_v23 }
0x1141   : > { %v3235_v63 = vsel %vm3234_vm2, %v3833_v49, %v3231_v24 }
0x1142   : > { %v3237_v37 = vmul.f32 %v3235_v63, %v3203_v6 }
0x1144   : > { %v3242_v25 = vmul.f32 %v3726_v30, %v3237_v37 }
0x1146   : > { %v3247_v26 = vadd.f32 %v3727_v61, %v3242_v25 }
0x1148   : > { %3249 = vst.msk [vmem:[%s1008_s25 + $0x8] sm:$0xff] %vm1175_vm6, %v3247_v26 }
0x1149 PF: > { %s33_s4 = sadd.s32 1, %s3840_s4  }
0x114a   : > { %p30_p5 = scmp.ge.s32.totalorder %s33_s4, 4  }
0x114c   :  { %32 = sbr.rel (!%p30_p5) target bundleno = 13 (0xd), region = 209 }

// kernel: mult_forward.3
= control target key start
LH: loop header
LB: loop body
LE: loop exit
PB: predicated region body
PF: predicated region fallthrough
CT: control target
= control target key end

     0   :  { %s4315_s6 = smov 1   ;;  %s4316_s10 = smov 2   ;;  %s5492_s0 = inlined_call_operand.smem [shape: u32[32], index: -1, kind: input, shape index: {}] }
   0x1   :  { %s4358_s5 = sld [smem:[%s5492_s0]]   ;;  %s4317_s14 = smov 3  }
   0x2   :  { %s4363_s9 = sld [smem:[%s5492_s0 + %s4315_s6]]   ;;  %s4318_s18 = smov 4  }
   0x3   :  { %s4368_s13 = sld [smem:[%s5492_s0 + %s4316_s10]]   ;;  %s4319_s22 = smov 5  }
   0x4   :  { %s4373_s17 = sld [smem:[%s5492_s0 + %s4317_s14]]   ;;  %s4320_s26 = smov 6  }
   0x5   :  { %s4378_s21 = sld [smem:[%s5492_s0 + %s4318_s18]]   ;;  %s4321_s30 = smov 7  }
   0x6   :  { %s4383_s25 = sld [smem:[%s5492_s0 + %s4319_s22]]   ;;  %s4322_s4 = smov 8  }
   0x7   :  { %s4388_s29 = sld [smem:[%s5492_s0 + %s4320_s26]]   ;;  %s4323_s10 = smov 9  }
   0x8   :  { %s4393_s3 = sld [smem:[%s5492_s0 + %s4321_s30]]   ;;  %s4324_s15 = smov 10  }
   0x9   :  { %5501 = sst [smem:[#allocation5_spill]] %s4368_s13  ;;  %s4325_s20 = smov 11  }
   0xa   :  { %s4398_s8 = sld [smem:[%s5492_s0 + %s4322_s4]]   ;;  %s4326_s26 = smov 12  }
   0xb   :  { %s4403_s14 = sld [smem:[%s5492_s0 + %s4323_s10]]   ;;  %s4327_s1 = smov 13  }
   0xc   :  { %s4408_s19 = sld [smem:[%s5492_s0 + %s4324_s15]]   ;;  %s4328_s7 = smov 14  }
   0xd   :  { %s4413_s24 = sld [smem:[%s5492_s0 + %s4325_s20]]   ;;  %s4329_s15 = smov 15  }
   0xe   :  { %s4418_s30 = sld [smem:[%s5492_s0 + %s4326_s26]]   ;;  %s4330_s22 = smov 16  }
   0xf   :  { %s4423_s6 = sld [smem:[%s5492_s0 + %s4327_s1]]   ;;  %s4331_s28 = smov 17  }
  0x10   :  { %s4428_s12 = sld [smem:[%s5492_s0 + %s4328_s7]]   ;;  %s4332_s7 = smov 18  }
  0x11   :  { %s4433_s20 = sld [smem:[%s5492_s0 + %s4329_s15]]   ;;  %s4333_s15 = smov 19  }
  0x12   :  { %s4438_s27 = sld [smem:[%s5492_s0 + %s4330_s22]]   ;;  %s4334_s22 = smov 20  }
  0x13   :  { %s4443_s4 = sld [smem:[%s5492_s0 + %s4331_s28]]   ;;  %s4335_s28 = smov 21  }
  0x14   :  { %5502 = sst [smem:[#allocation6_spill]] %s4418_s30 }
  0x15   :  { %s4448_s13 = sld [smem:[%s5492_s0 + %s4332_s7]]   ;;  %s4336_s7 = smov 22  }
  0x16   :  { %5503 = sst [smem:[#allocation7_spill]] %s4428_s12 }
  0x17   :  { %s4453_s12 = sld [smem:[%s5492_s0 + %s4333_s15]]   ;;  %s4337_s15 = smov 23  }
  0x18   :  { %s4458_s30 = sld [smem:[%s5492_s0 + %s4334_s22]]   ;;  %s4338_s22 = smov 24  }
  0x19   :  { %5504 = sst [smem:[#allocation8_spill]] %s4443_s4 }
  0x1a   :  { %s4463_s4 = sld [smem:[%s5492_s0 + %s4335_s28]]   ;;  %s4339_s28 = smov 25  }
  0x1b   :  { %5505 = sst [smem:[#allocation9_spill]] %s4448_s13 }
  0x1c   :  { %s4468_s13 = sld [smem:[%s5492_s0 + %s4336_s7]]   ;;  %s4340_s7 = smov 26  }
  0x1d   :  { %5506 = sst [smem:[#allocation10_spill]] %s4453_s12 }
  0x1e   :  { %5507 = sst [smem:[#allocation11_spill]] %s4458_s30 }
  0x1f   :  { %s4473_s12 = sld [smem:[%s5492_s0 + %s4337_s15]]   ;;  %s4341_s15 = smov 27  }
  0x20   :  { %5508 = sst [smem:[#allocation12_spill]] %s4463_s4 }
  0x21   :  { %s4478_s30 = sld [smem:[%s5492_s0 + %s4338_s22]]   ;;  %s4342_s22 = smov 28  }
  0x22   :  { %5509 = sst [smem:[#allocation13_spill]] %s4468_s13 }
  0x23   :  { %s4483_s4 = sld [smem:[%s5492_s0 + %s4339_s28]]   ;;  %s4343_s28 = smov 29  }
  0x24   :  { %s4488_s13 = sld [smem:[%s5492_s0 + %s4340_s7]]   ;;  %s4344_s7 = smov 30  }
  0x25   :  { %5510 = sst [smem:[#allocation14_spill]] %s4473_s12 }
  0x26   :  { %s4493_s12 = sld [smem:[%s5492_s0 + %s4341_s15]]   ;;  %s4345_s15 = smov 31  }
  0x27   :  { %5511 = sst [smem:[#allocation15_spill]] %s4478_s30 }
  0x28   :  { %s4498_s30 = sld [smem:[%s5492_s0 + %s4342_s22]]  }
  0x29   :  { %5512 = sst [smem:[#allocation16_spill]] %s4483_s4 }
  0x2a   :  { %5513 = sst [smem:[#allocation17_spill]] %s4488_s13 }
  0x2b   :  { %s4503_s4 = sld [smem:[%s5492_s0 + %s4343_s28]]  }
  0x2c   :  { %5514 = sst [smem:[#allocation18_spill]] %s4493_s12 }
  0x2d   :  { %s4508_s13 = sld [smem:[%s5492_s0 + %s4344_s7]]  }
  0x2e   :  { %s4513_s12 = sld [smem:[%s5492_s0 + %s4345_s15]]  }
  0x2f   :  { %v131_v0 = vld [vmem:[%s4358_s5] sm:$0xff]  ;;  %v4346_v1 = vmov 0   ;;  %v4347_v2 = vmov 0.0   ;;  %v132_v4 = vld [vmem:[%s4358_s5 + $0x8] sm:$0xff] }
  0x30   :  { %4104 = vset.pattern.permute.xlu0 %v4346_v1  ;;  %vm134_vm0 = vcmp.ne.f32.partialorder %v131_v0, 0.0  ;;  %vm135_vm1 = vcmp.ne.f32.partialorder %v132_v4, 0.0 }
  0x31   :  { %v3718_v3 = vsel %vm134_vm0, 1.0, %v4347_v2  ;;  %v3719_v5 = vsel %vm135_vm1, 1.0, %v4347_v2 }
  0x32   :  { %144 = vperm.xlu0 %4104, %v3718_v3  }
  0x3a   :  { %149 = vperm.xlu0 %4104, %v3719_v5  }
  0x3b   :  { %68 = vsyncpa [#allocation3], 0  ;;  %v133_v6 = vld [vmem:[%s4363_s9] sm:$0xff]  ;;  %v140_v7 = vmul.f32 7.745967, %v131_v0  ;;  %vm185_vm2 = vcmask 490496  }
  0x3c   :  { %v141_v12 = vmul.f32 7.745967, %v132_v4  ;;  %v4348_v17 = vmov 60.0   ;;  %v254_v34 = vld [vmem:[%s4373_s17 + $0x38] sm:$0xf]  ;;  %vm265_vm4 = vcmask 1043456  }
  0x3d   :  { %4139 = vrcp.f32 %v4348_v17  ;;  %v337_v35 = vld [vmem:[%s4393_s3 + $0x38] sm:$0xf]  ;;  %3725 = vmatpush.msk.msra.mxu0 %vm265_vm4, %v254_v34  ;;  %v253_v36 = vld [vmem:[%s4373_s17 + $0x30] sm:$0xff]  ;;  %v252_v38 = vld [vmem:[%s4373_s17 + $0x28] sm:$0xff]  ;;  %s5515_s0 = sld [smem:[#allocation8_spill]]  ;;  %s3678_s23 = sshll.u32 %s4513_s12, 4  ;;  %s3679_s23 = int_to_ptr.hbm [resolvable:$true] %s3678_s23 }
  0x3e   :  { %3731 = vmatpush.msk.msra.mxu2 %vm265_vm4, %v337_v35  ;;  %v336_v37 = vld [vmem:[%s4393_s3 + $0x30] sm:$0xff]  ;;  %v335_v39 = vld [vmem:[%s4393_s3 + $0x28] sm:$0xff]  ;;  %v251_v40 = vld [vmem:[%s4373_s17 + $0x20] sm:$0xff]  ;;  %s5516_s5 = sld [smem:[#allocation9_spill]]  ;;  %s4305_s26 = scalar_lea.hbm %s4513_s12, 2 }
  0x3f   :  { %278 = vmatpush.msra.mxu0 %v253_v36  ;;  %v334_v41 = vld [vmem:[%s4393_s3 + $0x20] sm:$0xff]  ;;  %v250_v42 = vld [vmem:[%s4373_s17 + $0x18] sm:$0xff]  ;;  %v249_v45 = vld [vmem:[%s4373_s17 + $0x10] sm:$0xff]  ;;  %s5517_s9 = sld [smem:[#allocation6_spill]] }
  0x40   :  { %354 = vmatpush.msra.mxu2 %v336_v37  ;;  %v299_v43 = vld [vmem:[%s4383_s25 + $0x38] sm:$0xf]  ;;  %v298_v46 = vld [vmem:[%s4383_s25 + $0x30] sm:$0xff]  ;;  %v248_v48 = vld [vmem:[%s4373_s17 + $0x8] sm:$0xff]  ;;  %s5518_s22 = sld [smem:[#allocation7_spill]] }
  0x41   :  { %279 = vmatpush.msra.mxu0 %v252_v38  ;;  %v333_v44 = vld [vmem:[%s4393_s3 + $0x18] sm:$0xff]  ;;  %4061 = vmatpush.msk.msra.mxu1 %vm265_vm4, %v299_v43  ;;  %v332_v47 = vld [vmem:[%s4393_s3 + $0x10] sm:$0xff]  ;;  %v297_v49 = vld [vmem:[%s4383_s25 + $0x28] sm:$0xff] }
  0x42   :  { %355 = vmatpush.msra.mxu2 %v335_v39  ;;  %v331_v50 = vld [vmem:[%s4393_s3 + $0x8] sm:$0xff]  ;;  %v247_v51 = vld [vmem:[%s4373_s17] sm:$0xff]  ;;  %v295_v54 = vld [vmem:[%s4383_s25 + $0x18] sm:$0xff] }
  0x43   :  { %v4140_v18 = vpop.eup %4139  ;;  %280 = vmatpush.msra.mxu0 %v251_v40  ;;  %4062 = vmatpush.msra.mxu1 %v298_v46  ;;  %v296_v52 = vld [vmem:[%s4383_s25 + $0x20] sm:$0xff]  ;;  %v294_v55 = vld [vmem:[%s4383_s25 + $0x10] sm:$0xff]  ;;  %v293_v56 = vld [vmem:[%s4383_s25 + $0x8] sm:$0xff] }
  0x44   :  { %v193_v19 = vmul.f32 60.0, %v4140_v18  ;;  %vm197_vm3 = vweird.f32 %v4140_v18  ;;  %356 = vmatpush.msra.mxu2 %v334_v41  ;;  %v330_v53 = vld [vmem:[%s4393_s3] sm:$0xff] }
  0x45   :  { %281 = vmatpush.msra.mxu0 %v250_v42  ;;  %4063 = vmatpush.msra.mxu1 %v297_v49  ;;  %v292_v59 = vld [vmem:[%s4383_s25] sm:$0xff] }
  0x46   :  { %v194_v20 = vsub.f32 1.0, %v193_v19  ;;  %357 = vmatpush.msra.mxu2 %v333_v44 }
  0x47   :  { %282 = vmatpush.msra.mxu0 %v249_v45  ;;  %4064 = vmatpush.msra.mxu1 %v296_v52 }
  0x48   :  { %v195_v21 = vmul.f32 %v4140_v18, %v194_v20  ;;  %358 = vmatpush.msra.mxu2 %v332_v47 }
  0x49   :  { %283 = vmatpush.msra.mxu0 %v248_v48  ;;  %4065 = vmatpush.msra.mxu1 %v295_v54 }
  0x4a   :  { %v196_v22 = vadd.f32 %v4140_v18, %v195_v21  ;;  %359 = vmatpush.msra.mxu2 %v331_v50 }
  0x4b   :  { %284 = vmatpush.msra.mxu0 %v247_v51  ;;  %4066 = vmatpush.msra.mxu1 %v294_v55 }
  0x4c   :  { %v4528_v23 = vsel %vm197_vm3, %v4140_v18, %v196_v22  ;;  %360 = vmatpush.msra.mxu2 %v330_v53 }
  0x4d   :  { %3728 = vmatpush.msk.msrb.mxu0 %vm265_vm4, %v299_v43  ;;  %4067 = vmatpush.msra.mxu1 %v293_v56 }
  0x4f   :  { %316 = vmatpush.msrb.mxu0 %v298_v46  ;;  %4068 = vmatpush.msra.mxu1 %v292_v59 }
  0x51   :  { %317 = vmatpush.msrb.mxu0 %v297_v49 }
  0x53   :  { %318 = vmatpush.msrb.mxu0 %v296_v52 }
  0x55   :  { %319 = vmatpush.msrb.mxu0 %v295_v54 }
  0x57   :  { %320 = vmatpush.msrb.mxu0 %v294_v55 }
  0x59   :  { %321 = vmatpush.msrb.mxu0 %v293_v56 }
  0x5b   :  { %322 = vmatpush.msrb.mxu0 %v292_v59 }
  0xa4   :  { %v145_v8 = vpop.permute.xlu0 %144 }
  0xa5   :  { %v152_v9 = vmul.f32 %v145_v8, %v133_v6 }
  0xa7   :  { %v4520_v10 = vadd.f32 %v152_v9, %v140_v7  ;;  %v4105_v9 = vld [vmem:[%s4433_s20] ss:$0 sm:$0xff] }
  0xa9   :  { %v186_v11 = vsel %vm185_vm2, %v4520_v10, 0.0 }
  0xaa   :  { %187 = vadd.xlane.f32.xlu1 %v186_v11 }
  0xac   :  { %v150_v13 = vpop.permute.xlu0 %149 }
  0xad   :  { %v153_v14 = vmul.f32 %v150_v13, %v133_v6 }
  0xaf   :  { %v4524_v15 = vadd.f32 %v153_v14, %v141_v12  ;;  %v4106_v14 = vld [vmem:[%s4438_s27] ss:$0 sm:$0xff] }
  0xb1   :  { %v189_v16 = vsel %vm185_vm2, %v4524_v15, 0.0 }
  0xb2   :  { %190 = vadd.xlane.f32.xlu1 %v189_v16 }
 0x11d   :  { %v188_v24 = vpop.xlane.xlu1 %187 }
 0x11e   :  { %v199_v25 = vmul.f32 %v4528_v23, %v188_v24 }
 0x120   :  { %v4532_v26 = vsub.f32 %v4520_v10, %v199_v25 }
 0x122   :  { %v203_v27 = vmul.f32 %v4532_v26, %v4532_v26 }
 0x124   :  { %v205_v28 = vsel %vm185_vm2, %v203_v27, 0.0 }
 0x125   :  { %206 = vadd.xlane.f32.xlu2 %v205_v28  ;;  %v191_v29 = vpop.xlane.xlu1 %190 }
 0x126   :  { %v200_v30 = vmul.f32 %v4528_v23, %v191_v29  ;;  %v4108_v29 = vld [vmem:[%s4398_s8] ss:$0 sm:$0xff] }
 0x128   :  { %v4539_v31 = vsub.f32 %v4524_v15, %v200_v30  ;;  %v4109_v30 = vld [vmem:[%s4388_s29] ss:$0 sm:$0xff] }
 0x12a   :  { %v204_v32 = vmul.f32 %v4539_v31, %v4539_v31 }
 0x12c   :  { %v208_v33 = vsel %vm185_vm2, %v204_v32, 0.0  ;;  %v4107_v32 = vld [vmem:[%s4378_s21] ss:$0 sm:$0xff] }
 0x12d   :  { %209 = vadd.xlane.f32.xlu2 %v208_v33 }
 0x198   :  { %v207_v57 = vpop.xlane.xlu2 %206 }
 0x199   :  { %v211_v58 = vmul.f32 %v207_v57, %v4528_v23 }
 0x19b   :  { %v213_v60 = vadd.f32 1e-05, %v211_v58 }
 0x19d   :  { %4141 = vrsqrt.f32 %v213_v60  ;;  %vm221_vm6 = vweird.f32 %v213_v60 }
 0x1a0   :  { %v210_v61 = vpop.xlane.xlu2 %209 }
 0x1a1   :  { %v212_v62 = vmul.f32 %v210_v61, %v4528_v23 }
 0x1a3   :  { %v4142_v63 = vpop.eup %4141  ;;  %v214_v0 = vadd.f32 1e-05, %v212_v62 }
 0x1a4   :  { %v216_v1 = vmul.f32 %v4142_v63, %v213_v60  ;;  %vm222_vm5 = vweird.f32 %v4142_v63 }
 0x1a5   :  { %4143 = vrsqrt.f32 %v214_v0  ;;  %vm223_vm7 = vmor %vm221_vm6, %vm222_vm5  ;;  %vm231_vm9 = vweird.f32 %v214_v0 }
 0x1a6   :  { %v217_v3 = vmul.f32 %v4142_v63, %v216_v1 }
 0x1a8   :  { %v218_v4 = vmul.f32 0.5, %v217_v3 }
 0x1aa   :  { %v219_v5 = vsub.f32 1.5, %v218_v4 }
 0x1ab   :  { %v4144_v6 = vpop.eup %4143 }
 0x1ac   :  { %v220_v7 = vmul.f32 %v4142_v63, %v219_v5  ;;  %v226_v8 = vmul.f32 %v4144_v6, %v214_v0  ;;  %vm232_vm8 = vweird.f32 %v4144_v6 }
 0x1ad   :  { %vm233_vm10 = vmor %vm231_vm9, %vm232_vm8 }
 0x1ae   :  { %v224_v11 = vsel %vm223_vm7, %v4142_v63, %v220_v7  ;;  %v227_v12 = vmul.f32 %v4144_v6, %v226_v8 }
 0x1af   :  { %v235_v13 = vmul.f32 %v224_v11, %v4532_v26  ;;  %v156_v26 = vlaneseq }
 0x1b0   :  { %v228_v16 = vmul.f32 0.5, %v227_v12 }
 0x1b1   :  { %v240_v17 = vmul.f32 %v4105_v9, %v235_v13  ;;  %v4584_v27 = vand.u32 127, %v156_v26 }
 0x1b2   :  { %v229_v18 = vsub.f32 1.5, %v228_v16 }
 0x1b3   :  { %v245_v19 = vadd.f32 %v4106_v14, %v240_v17  ;;  %vm163_vm11 = vcmp.ge.s32.totalorder %v4584_v27, 12  ;;  %vm164_vm12 = vcmp.lt.s32.totalorder %v4584_v27, 24  ;;  %vm168_vm13 = vcmp.ge.s32.totalorder %v4584_v27, 24 }
 0x1b4   :  { %v230_v20 = vmul.f32 %v4144_v6, %v229_v18  ;;  %vm169_vm14 = vcmp.lt.s32.totalorder %v4584_v27, 36  ;;  %vm165_vm15 = vmand %vm163_vm11, %vm164_vm12  ;;  %vm159_vm1 = vcmp.lt.s32.totalorder %v4584_v27, 12  ;;  %vm173_vm3 = vcmp.ge.s32.totalorder %v4584_v27, 36 }
 0x1b5   :  { %3726 = vmatmul.msk.f32.vlgmr.msra.gmra.mxu0 %vm185_vm2, %v245_v19  ;;  %3732 = vmatmul.msk.f32.vlgmr.msra.gmra.mxu2 %vm185_vm2, %v245_v19  ;;  %vm170_vm0 = vmand %vm168_vm13, %vm169_vm14  ;;  %v4596_v34 = vsel %vm165_vm15, 1.0, %v4347_v2  ;;  %v4612_v45 = vsel %vm159_vm1, 1.0, %v4347_v2  ;;  %vm174_vm5 = vcmp.lt.s32.totalorder %v4584_v27, 48  ;;  %vm178_vm7 = vcmp.ge.s32.totalorder %v4584_v27, 48 }
 0x1b6   :  { %v234_v21 = vsel %vm233_vm10, %v4144_v6, %v230_v20  ;;  %v4599_v35 = vsel %vm170_vm0, 1.0, %v4347_v2  ;;  %vm175_vm6 = vmand %vm173_vm3, %vm174_vm5  ;;  %vm179_vm8 = vcmp.lt.s32.totalorder %v4584_v27, 60  ;;  %vm422_vm10 = vcmask 64512  }
 0x1b7   :  { %v236_v22 = vmul.f32 %v234_v21, %v4539_v31  ;;  %v4633_v53 = vsel %vm175_vm6, 1.0, %v4347_v2  ;;  %vm180_vm9 = vmand %vm178_vm7, %vm179_vm8  ;;  %vm1193_vm1 = vcmask 916480  }
 0x1b8   :  { %v4647_v58 = vsel %vm180_vm9, 1.0, %v4347_v2 }
 0x1b9   :  { %v241_v24 = vmul.f32 %v4105_v9, %v236_v22 }
 0x1bb   :  { %v246_v25 = vadd.f32 %v4106_v14, %v241_v24 }
 0x1bd   :  { %3727 = vmatmul.msk.f32.gmra.mxu0 %vm185_vm2, %v246_v25  ;;  %3730 = vmatmul.msk.f32.vlgmr.msra.gmra.mxu1 %vm185_vm2, %v246_v25 }
 0x1be   :  { %3733 = vmatmul.msk.f32.gmra.mxu2 %vm185_vm2, %v246_v25 }
 0x1c5   :  { %3729 = vmatmul.msk.f32.vlgmr.msrb.gmra.mxu0 %vm185_vm2, %v245_v19 }
 0x232   :  { %v286_v28 = vpop.f32.mrf.mxu0 }
 0x233   :  { %v287_v43 = vadd.f32 %v4107_v32, %v286_v28 }
 0x235   :  { %v368_v47 = vmul.f32 %v4612_v45, %v287_v43  ;;  %v495_v48 = vmul.f32 %v4596_v34, %v287_v43  ;;  %v615_v55 = vmul.f32 %v4599_v35, %v287_v43  ;;  %v735_v59 = vmul.f32 %v4633_v53, %v287_v43 }
 0x236   :  { %v855_v61 = vmul.f32 %v4647_v58, %v287_v43 }
 0x238   :  { %v362_v31 = vpop.f32.mrf.mxu2 }
 0x239   :  { %v4593_v33 = vadd.f32 %v4108_v29, %v362_v31 }
 0x23a   :  { %v289_v36 = vpop.f32.mrf.mxu0  ;;  %v327_v37 = vpop.f32.mrf.mxu1 }
 0x23b   :  { %v290_v38 = vadd.f32 %v4107_v32, %v289_v36  ;;  %v328_v39 = vadd.f32 %v4109_v30, %v327_v37  ;;  %v565_v40 = vmul.f32 %v4596_v34, %v4593_v33  ;;  %v685_v41 = vmul.f32 %v4599_v35, %v4593_v33 }
 0x23c   :  { %v445_v50 = vmul.f32 %v4612_v45, %v4593_v33 }
 0x23d   :  { %3742 = vmatpush.xpose.msk.msrb.mxu1 %vm185_vm2, %v328_v39  ;;  %585 = vmatpush.msrb.mxu2 %v565_v40  ;;  %v496_v42 = vmul.f32 %v4596_v34, %v290_v38  ;;  %v616_v49 = vmul.f32 %v4599_v35, %v290_v38  ;;  %v369_v54 = vmul.f32 %v4612_v45, %v290_v38 }
 0x23e   :  { %v736_v57 = vmul.f32 %v4633_v53, %v290_v38  ;;  %v856_v60 = vmul.f32 %v4647_v58, %v290_v38 }
 0x23f   :  { %705 = vmatpush.msra.mxu2 %v685_v41 }
 0x240   :  { %3743 = vmatmul.msk.f32.vlgmr.msrb.gmra.mxu1 %vm185_vm2, %v496_v42 }
 0x241   :  { %3748 = vmatpush.xpose.msk.msra.mxu1 %vm185_vm2, %v328_v39  ;;  %v365_v51 = vpop.f32.mrf.mxu2 }
 0x242   :  { %v324_v44 = vpop.f32.mrf.mxu0  ;;  %v4630_v52 = vadd.f32 %v4108_v29, %v365_v51 }
 0x243   :  { %v325_v46 = vadd.f32 %v4109_v30, %v324_v44 }
 0x244   :  { %v446_v56 = vmul.f32 %v4612_v45, %v4630_v52 }
 0x245   :  { %3754 = vmatpush.xpose.msk.msrb.mxu1 %vm185_vm2, %v328_v39  ;;  %3734 = vmatpush.xpose.msk.msra.mxu3 %vm185_vm2, %v325_v46 }
 0x246   :  { %3740 = vmatpush.xpose.msk.msra.mxu0 %vm185_vm2, %v325_v46 }
 0x248   :  { %3735 = vmatmul.msk.f32.vlgmr.msra.gmra.mxu3 %vm185_vm2, %v368_v47  ;;  %3749 = vmatmul.msk.f32.vlgmr.msra.gmra.mxu1 %vm185_vm2, %v616_v49 }
 0x249   :  { %3736 = vmatpush.xpose.msk.msrb.mxu3 %vm185_vm2, %v328_v39  ;;  %3741 = vmatmul.msk.f32.vlgmr.msra.gmra.mxu0 %vm185_vm2, %v495_v48 }
 0x24a   :  { %3746 = vmatpush.xpose.msk.msrb.mxu0 %vm185_vm2, %v325_v46  ;;  %3760 = vmatpush.xpose.msk.msra.mxu1 %vm185_vm2, %v328_v39 }
 0x24d   :  { %465 = vmatpush.msra.mxu3 %v445_v50 }
 0x24e   :  { %3752 = vmatpush.xpose.msk.msra.mxu0 %vm185_vm2, %v325_v46 }
 0x250   :  { %3737 = vmatmul.msk.f32.vlgmr.msrb.gmra.mxu3 %vm185_vm2, %v369_v54  ;;  %3755 = vmatmul.msk.f32.vlgmr.msrb.gmra.mxu1 %vm185_vm2, %v736_v57 }
 0x251   :  { %3747 = vmatmul.msk.f32.vlgmr.msrb.gmra.mxu0 %vm185_vm2, %v615_v55  ;;  %488 = vmatpush.msrb.mxu3 %v446_v56 }
 0x252   :  { %3758 = vmatpush.xpose.msk.msrb.mxu0 %vm185_vm2, %v325_v46 }
 0x258   :  { %3761 = vmatmul.msk.f32.vlgmr.msra.gmra.mxu1 %vm185_vm2, %v856_v60 }
 0x259   :  { %3753 = vmatmul.msk.f32.vlgmr.msra.gmra.mxu0 %vm185_vm2, %v735_v59 }
 0x261   :  { %3759 = vmatmul.msk.f32.vlgmr.msrb.gmra.mxu0 %vm185_vm2, %v855_v61 }
 0x2bd   :  { %v540_v4 = vpop.f32.mrf.mxu1 }
 0x2be   :  { %v546_v9 = vsel %vm422_vm10, %v540_v4, -inf }
 0x2c5   :  { %v660_v11 = vpop.f32.mrf.mxu1 }
 0x2c6   :  { %v517_v62 = vpop.f32.mrf.mxu0  ;;  %v666_v14 = vsel %vm422_vm10, %v660_v11, -inf }
 0x2c7   :  { %v543_v63 = vsel %vm422_vm10, %v517_v62, -inf }
 0x2c8   :  { %544 = vmax.xlane.f32.xlu2 %v543_v63 }
 0x2cb   :  { %v393_v0 = vpop.f32.mrf.mxu3 }
 0x2cc   :  { %v423_v2 = vsel %vm422_vm10, %v393_v0, -inf }
 0x2cd   :  { %424 = vmax.xlane.f32.xlu0 %v423_v2  ;;  %v780_v16 = vpop.f32.mrf.mxu1 }
 0x2ce   :  { %v637_v1 = vpop.f32.mrf.mxu0  ;;  %v786_v17 = vsel %vm422_vm10, %v780_v16, -inf }
 0x2cf   :  { %v663_v3 = vsel %vm422_vm10, %v637_v1, -inf }
 0x2d0   :  { %664 = vmax.xlane.f32.xlu2 %v663_v3 }
 0x2d3   :  { %v419_v5 = vpop.f32.mrf.mxu3 }
 0x2d4   :  { %v426_v6 = vsel %vm422_vm10, %v419_v5, -inf }
 0x2d5   :  { %427 = vmax.xlane.f32.xlu1 %v426_v6  ;;  %v4664_v18 = vpop.f32.mrf.mxu1 }
 0x2d6   :  { %v757_v7 = vpop.f32.mrf.mxu0  ;;  %v906_v19 = vsel %vm422_vm10, %v4664_v18, -inf }
 0x2d7   :  { %v783_v8 = vsel %vm422_vm10, %v757_v7, -inf }
 0x2d8   :  { %784 = vmax.xlane.f32.xlu2 %v783_v8 }
 0x2dd   :  { %547 = vmax.xlane.f32.xlu1 %v546_v9 }
 0x2de   :  { %v877_v12 = vpop.f32.mrf.mxu0 }
 0x2df   :  { %v903_v13 = vsel %vm422_vm10, %v877_v12, -inf }
 0x2e0   :  { %904 = vmax.xlane.f32.xlu2 %v903_v13 }
 0x2e5   :  { %667 = vmax.xlane.f32.xlu1 %v666_v14 }
 0x2ed   :  { %787 = vmax.xlane.f32.xlu1 %v786_v17 }
 0x2f5   :  { %907 = vmax.xlane.f32.xlu1 %v906_v19 }
 0x33b   :  { %v545_v20 = vpop.xlane.xlu2 %544 }
 0x33c   :  { %v549_v24 = vsub.f32 %v517_v62, %v545_v20 }
 0x33e   :  { %v551_v27 = vmul.f32 1.442695, %v549_v24 }
 0x340   :  { %v425_v21 = vpop.xlane.xlu0 %424 }
 0x341   :  { %v429_v22 = vsub.f32 %v393_v0, %v425_v21  ;;  %v566_v21 = vmul.f32 %v4596_v34, %v4630_v52 }
 0x343   :  { %v431_v25 = vmul.f32 1.442695, %v429_v22  ;;  %v665_v26 = vpop.xlane.xlu2 %664 }
 0x344   :  { %v669_v31 = vsub.f32 %v637_v1, %v665_v26 }
 0x345   :  { %4145 = vpow2.f32 %v431_v25 }
 0x346   :  { %4147 = vpow2.f32 %v551_v27  ;;  %v671_v38 = vmul.f32 1.442695, %v669_v31 }
 0x348   :  { %v428_v28 = vpop.xlane.xlu1 %427 }
 0x349   :  { %v430_v29 = vsub.f32 %v419_v5, %v428_v28 }
 0x34b   :  { %v4668_v30 = vpop.eup %4145  ;;  %v433_v32 = vmul.f32 1.442695, %v430_v29  ;;  %v785_v37 = vpop.xlane.xlu2 %784  ;;  %v805_v29 = vmul.f32 %v4633_v53, %v4593_v33 }
 0x34c   :  { %v435_v36 = vsel %vm422_vm10, %v4668_v30, 0.0  ;;  %v4672_v40 = vpop.eup %4147  ;;  %v789_v43 = vsub.f32 %v757_v7, %v785_v37 }
 0x34d   :  { %4149 = vpow2.f32 %v433_v32  ;;  %436 = vadd.xlane.f32.xlu2 %v435_v36  ;;  %v555_v46 = vsel %vm422_vm10, %v4672_v40, 0.0 }
 0x34e   :  { %4151 = vpow2.f32 %v671_v38  ;;  %v791_v48 = vmul.f32 1.442695, %v789_v43 }
 0x350   :  { %v548_v39 = vpop.xlane.xlu1 %547 }
 0x351   :  { %v550_v41 = vsub.f32 %v540_v4, %v548_v39 }
 0x353   :  { %v4674_v42 = vpop.eup %4149  ;;  %v553_v44 = vmul.f32 1.442695, %v550_v41  ;;  %v905_v49 = vpop.xlane.xlu2 %904  ;;  %v925_v41 = vmul.f32 %v4647_v58, %v4593_v33  ;;  %v926_v33 = vmul.f32 %v4647_v58, %v4630_v52 }
 0x354   :  { %v438_v47 = vsel %vm422_vm10, %v4674_v42, 0.0  ;;  %v4680_v51 = vpop.eup %4151  ;;  %v909_v56 = vsub.f32 %v877_v12, %v905_v49 }
 0x355   :  { %4153 = vpow2.f32 %v553_v44  ;;  %556 = vadd.xlane.f32.xlu2 %v555_v46  ;;  %439 = vadd.xlane.f32.xlu1 %v438_v47  ;;  %v675_v59 = vsel %vm422_vm10, %v4680_v51, 0.0 }
 0x356   :  { %4155 = vpow2.f32 %v791_v48  ;;  %v911_v61 = vmul.f32 1.442695, %v909_v56 }
 0x358   :  { %v668_v50 = vpop.xlane.xlu1 %667 }
 0x359   :  { %v670_v54 = vsub.f32 %v660_v11, %v668_v50 }
 0x35b   :  { %v4154_v55 = vpop.eup %4153  ;;  %v673_v57 = vmul.f32 1.442695, %v670_v54 }
 0x35c   :  { %v558_v60 = vsel %vm422_vm10, %v4154_v55, 0.0  ;;  %v4685_v63 = vpop.eup %4155 }
 0x35d   :  { %4157 = vpow2.f32 %v673_v57  ;;  %676 = vadd.xlane.f32.xlu1 %v675_v59  ;;  %559 = vadd.xlane.f32.xlu0 %v558_v60  ;;  %v795_v3 = vsel %vm422_vm10, %v4685_v63, 0.0  ;;  %v982_v57 = vld [vmem:[%s4403_s14 + $0x38] sm:$0xf]  ;;  %v981_v59 = vld [vmem:[%s4403_s14 + $0x30] sm:$0xff]  ;;  %v980_v60 = vld [vmem:[%s4403_s14 + $0x28] sm:$0xff] }
 0x35e   :  { %4159 = vpow2.f32 %v911_v61  ;;  %3764 = vmatpush.msk.msra.mxu0 %vm265_vm4, %v982_v57  ;;  %v979_v61 = vld [vmem:[%s4403_s14 + $0x20] sm:$0xff]  ;;  %v1082_v57 = vld [vmem:[%s4413_s24 + $0x18] sm:$0xff] }
 0x360   :  { %v788_v62 = vpop.xlane.xlu1 %787  ;;  %1001 = vmatpush.msra.mxu0 %v981_v59  ;;  %v1079_v59 = vld [vmem:[%s4413_s24] sm:$0xff] }
 0x361   :  { %v790_v0 = vsub.f32 %v780_v16, %v788_v62  ;;  %v978_v62 = vld [vmem:[%s4403_s14 + $0x18] sm:$0xff] }
 0x362   :  { %1002 = vmatpush.msra.mxu0 %v980_v60  ;;  %v1080_v60 = vld [vmem:[%s4413_s24 + $0x8] sm:$0xff] }
 0x363   :  { %v4687_v2 = vpop.eup %4157  ;;  %v793_v1 = vmul.f32 1.442695, %v790_v0 }
 0x364   :  { %v678_v4 = vsel %vm422_vm10, %v4687_v2, 0.0  ;;  %v4693_v6 = vpop.eup %4159  ;;  %1003 = vmatpush.msra.mxu0 %v979_v61 }
 0x365   :  { %4161 = vpow2.f32 %v793_v1  ;;  %796 = vadd.xlane.f32.xlu0 %v795_v3  ;;  %679 = vadd.xlane.f32.xlu2 %v678_v4  ;;  %v915_v11 = vsel %vm422_vm10, %v4693_v6, 0.0  ;;  %v975_v1 = vld [vmem:[%s4403_s14] sm:$0xff] }
 0x366   :  { %1004 = vmatpush.msra.mxu0 %v978_v62 }
 0x368   :  { %v908_v5 = vpop.xlane.xlu1 %907 }
 0x369   :  { %v910_v7 = vsub.f32 %v4664_v18, %v908_v5 }
 0x36b   :  { %v4696_v8 = vpop.eup %4161  ;;  %v913_v9 = vmul.f32 1.442695, %v910_v7 }
 0x36c   :  { %v798_v12 = vsel %vm422_vm10, %v4696_v8, 0.0 }
 0x36d   :  { %4163 = vpow2.f32 %v913_v9  ;;  %916 = vadd.xlane.f32.xlu2 %v915_v11  ;;  %799 = vadd.xlane.f32.xlu1 %v798_v12 }
 0x373   :  { %v4702_v13 = vpop.eup %4163 }
 0x374   :  { %v918_v14 = vsel %vm422_vm10, %v4702_v13, 0.0 }
 0x375   :  { %919 = vadd.xlane.f32.xlu0 %v918_v14 }
 0x3c0   :  { %v437_v16 = vpop.xlane.xlu2 %436 }
 0x3c1   :  { %4165 = vrcp.f32 %v437_v16 }
 0x3c7   :  { %v4166_v17 = vpop.eup %4165 }
 0x3c8   :  { %v443_v18 = vmul.f32 %v4166_v17, %v4668_v30  ;;  %v557_v19 = vpop.xlane.xlu2 %556  ;;  %v440_v20 = vpop.xlane.xlu1 %439  ;;  %v686_v30 = vmul.f32 %v4599_v35, %v4630_v52 }
 0x3c9   :  { %4167 = vrcp.f32 %v557_v19 }
 0x3ca   :  { %4169 = vrcp.f32 %v440_v20  ;;  %3738 = vmatmul.msk.f32.vlgmr.msra.gmra.mxu3 %vm422_vm10, %v443_v18 }
 0x3cb   :  { %608 = vmatpush.msra.mxu3 %v566_v21 }
 0x3cf   :  { %v4168_v22 = vpop.eup %4167 }
 0x3d0   :  { %v4170_v24 = vpop.eup %4169  ;;  %v560_v25 = vpop.xlane.xlu0 %559  ;;  %v563_v27 = vmul.f32 %v4168_v22, %v4672_v40  ;;  %v806_v40 = vmul.f32 %v4633_v53, %v4630_v52  ;;  %v4110_v22 = vld [vmem:[%s4408_s19] ss:$0 sm:$0xff] }
 0x3d1   :  { %v677_v26 = vpop.xlane.xlu1 %676  ;;  %v444_v28 = vmul.f32 %v4170_v24, %v4674_v42  ;;  %4171 = vrcp.f32 %v560_v25 }
 0x3d2   :  { %4173 = vrcp.f32 %v677_v26  ;;  %3744 = vmatmul.msk.f32.vlgmr.msrb.gmra.mxu2 %vm422_vm10, %v563_v27 }
 0x3d3   :  { %3739 = vmatmul.msk.f32.vlgmr.msrb.gmra.mxu3 %vm422_vm10, %v444_v28  ;;  %825 = vmatpush.msrb.mxu2 %v805_v29 }
 0x3d4   :  { %728 = vmatpush.msrb.mxu3 %v686_v30 }
 0x3d7   :  { %v4172_v31 = vpop.eup %4171 }
 0x3d8   :  { %v4174_v32 = vpop.eup %4173  ;;  %v564_v36 = vmul.f32 %v4172_v31, %v4154_v55  ;;  %v797_v37 = vpop.xlane.xlu0 %796 }
 0x3d9   :  { %v680_v38 = vpop.xlane.xlu2 %679  ;;  %v683_v39 = vmul.f32 %v4174_v32, %v4680_v51  ;;  %4175 = vrcp.f32 %v797_v37 }
 0x3da   :  { %4177 = vrcp.f32 %v680_v38 }
 0x3db   :  { %3745 = vmatmul.msk.f32.vlgmr.msra.gmra.mxu3 %vm422_vm10, %v564_v36  ;;  %3750 = vmatmul.msk.f32.vlgmr.msra.gmra.mxu2 %vm422_vm10, %v683_v39 }
 0x3dc   :  { %848 = vmatpush.msra.mxu3 %v806_v40  ;;  %945 = vmatpush.msra.mxu2 %v925_v41 }
 0x3df   :  { %v4176_v42 = vpop.eup %4175 }
 0x3e0   :  { %v4178_v43 = vpop.eup %4177  ;;  %v803_v44 = vmul.f32 %v4176_v42, %v4685_v63  ;;  %v800_v47 = vpop.xlane.xlu1 %799  ;;  %v977_v63 = vld [vmem:[%s4403_s14 + $0x10] sm:$0xff] }
 0x3e1   :  { %v917_v46 = vpop.xlane.xlu2 %916  ;;  %v684_v48 = vmul.f32 %v4178_v43, %v4687_v2  ;;  %1005 = vmatpush.msra.mxu0 %v977_v63  ;;  %v976_v2 = vld [vmem:[%s4403_s14 + $0x8] sm:$0xff]  ;;  %v1093_v43 = vld [vmem:[%s4413_s24 + $0x70] sm:$0xf] }
 0x3e2   :  { %4179 = vrcp.f32 %v917_v46  ;;  %3767 = vmatpush.msk.msrb.mxu1 %vm265_vm4, %v1093_v43  ;;  %v1091_v46 = vld [vmem:[%s4413_s24 + $0x60] sm:$0xff] }
 0x3e3   :  { %4181 = vrcp.f32 %v800_v47  ;;  %3751 = vmatmul.msk.f32.vlgmr.msrb.gmra.mxu3 %vm422_vm10, %v684_v48  ;;  %3756 = vmatmul.msk.f32.vlgmr.msrb.gmra.mxu2 %vm422_vm10, %v803_v44  ;;  %v1094_v44 = vld [vmem:[%s4413_s24 + $0x78] sm:$0xf]  ;;  %v1092_v47 = vld [vmem:[%s4413_s24 + $0x68] sm:$0xff]  ;;  %v1089_v48 = vld [vmem:[%s4413_s24 + $0x50] sm:$0xff] }
 0x3e4   :  { %968 = vmatpush.msrb.mxu3 %v926_v33  ;;  %1006 = vmatpush.msra.mxu0 %v976_v2  ;;  %v1090_v33 = vld [vmem:[%s4413_s24 + $0x58] sm:$0xff]  ;;  %v1177_v2 = vld [vmem:[%s4423_s6 + $0x70] sm:$0xff] }
 0x3e5   :  { %3770 = vmatpush.msk.msrb.mxu2 %vm265_vm4, %v1094_v44  ;;  %1122 = vmatpush.msrb.mxu1 %v1091_v46  ;;  %v1167_v46 = vld [vmem:[%s4423_s6 + $0x20] sm:$0xff] }
 0x3e6   :  { %1007 = vmatpush.msra.mxu0 %v975_v1  ;;  %v1176_v1 = vld [vmem:[%s4423_s6 + $0x68] sm:$0xff] }
 0x3e7   :  { %1145 = vmatpush.msrb.mxu2 %v1092_v47  ;;  %1123 = vmatpush.msrb.mxu1 %v1089_v48 }
 0x3e8   :  { %v4180_v49 = vpop.eup %4179  ;;  %v920_v54 = vpop.xlane.xlu0 %919 }
 0x3e9   :  { %v4182_v50 = vpop.eup %4181  ;;  %v923_v51 = vmul.f32 %v4180_v49, %v4693_v6  ;;  %4183 = vrcp.f32 %v920_v54  ;;  %1146 = vmatpush.msrb.mxu2 %v1090_v33  ;;  %v1087_v49 = vld [vmem:[%s4413_s24 + $0x40] sm:$0xff]  ;;  %v1086_v54 = vld [vmem:[%s4413_s24 + $0x38] sm:$0xff] }
 0x3ea   :  { %v804_v55 = vmul.f32 %v4182_v50, %v4696_v8  ;;  %v1088_v50 = vld [vmem:[%s4413_s24 + $0x48] sm:$0xff]  ;;  %1124 = vmatpush.msrb.mxu1 %v1087_v49  ;;  %v1166_v33 = vld [vmem:[%s4423_s6 + $0x18] sm:$0xff] }
 0x3eb   :  { %3762 = vmatmul.msk.f32.vlgmr.msra.gmra.mxu2 %vm422_vm10, %v923_v51  ;;  %v1085_v51 = vld [vmem:[%s4413_s24 + $0x30] sm:$0xff] }
 0x3ec   :  { %3757 = vmatmul.msk.f32.vlgmr.msra.gmra.mxu3 %vm422_vm10, %v804_v55  ;;  %1147 = vmatpush.msrb.mxu2 %v1088_v50  ;;  %v1083_v55 = vld [vmem:[%s4413_s24 + $0x20] sm:$0xff] }
 0x3ed   :  { %1125 = vmatpush.msrb.mxu1 %v1085_v51 }
 0x3ee   :  { %1148 = vmatpush.msrb.mxu2 %v1086_v54 }
 0x3ef   :  { %v4184_v52 = vpop.eup %4183  ;;  %1126 = vmatpush.msrb.mxu1 %v1083_v55  ;;  %v1165_v55 = vld [vmem:[%s4423_s6 + $0x10] sm:$0xff] }
 0x3f0   :  { %v924_v56 = vmul.f32 %v4184_v52, %v4702_v13  ;;  %v1084_v52 = vld [vmem:[%s4413_s24 + $0x28] sm:$0xff] }
 0x3f1   :  { %1149 = vmatpush.msrb.mxu2 %v1084_v52  ;;  %v1184_v52 = vld [vmem:[%s4423_s6 + $0xa8] sm:$0xff] }
 0x3f3   :  { %1150 = vmatpush.msrb.mxu2 %v1082_v57  ;;  %v1183_v57 = vld [vmem:[%s4423_s6 + $0xa0] sm:$0xff] }
 0x3f4   :  { %3763 = vmatmul.msk.f32.vlgmr.msrb.gmra.mxu3 %vm422_vm10, %v924_v56  ;;  %v1081_v56 = vld [vmem:[%s4413_s24 + $0x10] sm:$0xff] }
 0x3f5   :  { %1127 = vmatpush.msrb.mxu1 %v1081_v56  ;;  %1151 = vmatpush.msrb.mxu2 %v1080_v60  ;;  %v1164_v56 = vld [vmem:[%s4423_s6 + $0x8] sm:$0xff]  ;;  %v1181_v60 = vld [vmem:[%s4423_s6 + $0x90] sm:$0xff] }
 0x3f7   :  { %1128 = vmatpush.msrb.mxu1 %v1079_v59  ;;  %v1163_v59 = vld [vmem:[%s4423_s6] sm:$0xff] }
 0x44d   :  { %v467_v0 = vpop.f32.mrf.mxu3 }
 0x455   :  { %v587_v3 = vpop.f32.mrf.mxu2 }
 0x456   :  { %v490_v4 = vpop.f32.mrf.mxu3  ;;  %v613_v9 = vadd.f32 %v587_v3, %v467_v0  ;;  %v1178_v0 = vld [vmem:[%s4423_s6 + $0x78] sm:$0xff]  ;;  %v1192_v3 = vld [vmem:[%s4423_s6 + $0xe8] sm:$0xff] }
 0x457   :  { %1200 = vmatpush.msra.mxu3 %v1178_v0  ;;  %1225 = vmatpush.msrb.mxu0 %v1192_v3 }
 0x459   :  { %1201 = vmatpush.msra.mxu3 %v1177_v2 }
 0x45b   :  { %1202 = vmatpush.msra.mxu3 %v1176_v1 }
 0x45e   :  { %v610_v5 = vpop.f32.mrf.mxu3  ;;  %v707_v6 = vpop.f32.mrf.mxu2 }
 0x45f   :  { %v733_v11 = vadd.f32 %v707_v6, %v613_v9  ;;  %v614_v17 = vadd.f32 %v610_v5, %v490_v4  ;;  %v1191_v4 = vld [vmem:[%s4423_s6 + $0xe0] sm:$0xff] }
 0x460   :  { %1226 = vmatpush.msrb.mxu0 %v1191_v4 }
 0x466   :  { %v730_v7 = vpop.f32.mrf.mxu3  ;;  %v827_v8 = vpop.f32.mrf.mxu2 }
 0x467   :  { %v853_v12 = vadd.f32 %v827_v8, %v733_v11  ;;  %v734_v18 = vadd.f32 %v730_v7, %v614_v17  ;;  %v1175_v7 = vld [vmem:[%s4423_s6 + $0x60] sm:$0xff]  ;;  %v1190_v8 = vld [vmem:[%s4423_s6 + $0xd8] sm:$0xff]  ;;  %v1188_v17 = vld [vmem:[%s4423_s6 + $0xc8] sm:$0xff] }
 0x468   :  { %1203 = vmatpush.msra.mxu3 %v1175_v7  ;;  %1227 = vmatpush.msrb.mxu0 %v1190_v8 }
 0x46e   :  { %v947_v14 = vpop.f32.mrf.mxu2 }
 0x46f   :  { %v850_v13 = vpop.f32.mrf.mxu3  ;;  %v973_v16 = vadd.f32 %v947_v14, %v853_v12  ;;  %v1174_v12 = vld [vmem:[%s4423_s6 + $0x58] sm:$0xff] }
 0x470   :  { %v854_v19 = vadd.f32 %v850_v13, %v734_v18  ;;  %v1189_v13 = vld [vmem:[%s4423_s6 + $0xd0] sm:$0xff]  ;;  %1204 = vmatpush.msra.mxu3 %v1174_v12 }
 0x471   :  { %3765 = vmatmul.msk.f32.vlgmr.msra.gmra.mxu0 %vm185_vm2, %v973_v16  ;;  %v1173_v16 = vld [vmem:[%s4423_s6 + $0x50] sm:$0xff] }
 0x472   :  { %1228 = vmatpush.msrb.mxu0 %v1189_v13  ;;  %1205 = vmatpush.msra.mxu3 %v1173_v16 }
 0x474   :  { %1229 = vmatpush.msrb.mxu0 %v1188_v17 }
 0x477   :  { %v970_v20 = vpop.f32.mrf.mxu3 }
 0x478   :  { %v974_v21 = vadd.f32 %v970_v20, %v854_v19  ;;  %v1172_v19 = vld [vmem:[%s4423_s6 + $0x48] sm:$0xff]  ;;  %v1187_v20 = vld [vmem:[%s4423_s6 + $0xc0] sm:$0xff] }
 0x479   :  { %1206 = vmatpush.msra.mxu3 %v1172_v19  ;;  %1230 = vmatpush.msrb.mxu0 %v1187_v20  ;;  %v4113_v19 = vld [vmem:[%s5518_s22] ss:$0 sm:$0xff] }
 0x47a   :  { %3766 = vmatmul.msk.f32.gmra.mxu0 %vm185_vm2, %v974_v21 }
 0x4ee   :  { %v1009_v24 = vpop.f32.mrf.mxu0 }
 0x4ef   :  { %v1015_v25 = vadd.f32 %v1009_v24, %v4520_v10  ;;  %v1186_v24 = vld [vmem:[%s4423_s6 + $0xb8] sm:$0xff] }
 0x4f0   :  { %1231 = vmatpush.msrb.mxu0 %v1186_v24 }
 0x4f1   :  { %v4750_v26 = vadd.f32 %v4110_v22, %v1015_v25 }
 0x4f3   :  { %v1025_v27 = vsel %vm185_vm2, %v4750_v26, 0.0 }
 0x4f4   :  { %1026 = vadd.xlane.f32.xlu1 %v1025_v27 }
 0x4f7   :  { %v1012_v28 = vpop.f32.mrf.mxu0 }
 0x4f8   :  { %v1016_v29 = vadd.f32 %v1012_v28, %v4524_v15  ;;  %v1170_v28 = vld [vmem:[%s4423_s6 + $0x38] sm:$0xff] }
 0x4fa   :  { %v4755_v30 = vadd.f32 %v4110_v22, %v1016_v29  ;;  %v1171_v22 = vld [vmem:[%s4423_s6 + $0x40] sm:$0xff]  ;;  %v1185_v29 = vld [vmem:[%s4423_s6 + $0xb0] sm:$0xff] }
 0x4fb   :  { %1207 = vmatpush.msra.mxu3 %v1171_v22  ;;  %1232 = vmatpush.msrb.mxu0 %v1185_v29 }
 0x4fc   :  { %v1028_v31 = vsel %vm185_vm2, %v4755_v30, 0.0 }
 0x4fd   :  { %1029 = vadd.xlane.f32.xlu2 %v1028_v31  ;;  %1208 = vmatpush.msra.mxu3 %v1170_v28 }
 0x4fe   :  { %1233 = vmatpush.msrb.mxu0 %v1184_v52  ;;  %v3778_v52 = vld [vmem:[%s4373_s17 + $0x48] sm:$0xff] }
 0x500   :  { %1234 = vmatpush.msrb.mxu0 %v1183_v57  ;;  %v3777_v57 = vld [vmem:[%s4373_s17 + $0x40] sm:$0xff] }
 0x567   :  { %v1027_v32 = vpop.xlane.xlu1 %1026 }
 0x568   :  { %v1031_v10 = vmul.f32 %v1027_v32, %v4528_v23 }
 0x56a   :  { %v4761_v36 = vsub.f32 %v4750_v26, %v1031_v10  ;;  %v4111_v10 = vld [vmem:[%s5515_s0] ss:$0 sm:$0xff] }
 0x56c   :  { %v1035_v37 = vmul.f32 %v4761_v36, %v4761_v36 }
 0x56e   :  { %v1037_v15 = vsel %vm185_vm2, %v1035_v37, 0.0  ;;  %v1169_v37 = vld [vmem:[%s4423_s6 + $0x30] sm:$0xff] }
 0x56f   :  { %1038 = vadd.xlane.f32.xlu0 %v1037_v15  ;;  %1209 = vmatpush.msra.mxu3 %v1169_v37 }
 0x570   :  { %v1030_v38 = vpop.xlane.xlu2 %1029 }
 0x571   :  { %v1032_v39 = vmul.f32 %v1030_v38, %v4528_v23 }
 0x573   :  { %v4768_v40 = vsub.f32 %v4755_v30, %v1032_v39 }
 0x575   :  { %v1036_v41 = vmul.f32 %v4768_v40, %v4768_v40 }
 0x577   :  { %v1040_v42 = vsel %vm185_vm2, %v1036_v41, 0.0  ;;  %v4112_v41 = vld [vmem:[%s5516_s5] ss:$0 sm:$0xff] }
 0x578   :  { %1041 = vadd.xlane.f32.xlu1 %v1040_v42  ;;  %v1168_v42 = vld [vmem:[%s4423_s6 + $0x28] sm:$0xff] }
 0x579   :  { %1210 = vmatpush.msra.mxu3 %v1168_v42 }
 0x57b   :  { %1211 = vmatpush.msra.mxu3 %v1167_v46  ;;  %v3783_v46 = vld [vmem:[%s4373_s17 + $0x70] sm:$0xff] }
 0x57d   :  { %1212 = vmatpush.msra.mxu3 %v1166_v33  ;;  %v3794_v33 = vld [vmem:[%s4383_s25 + $0x68] sm:$0xff] }
 0x57f   :  { %1213 = vmatpush.msra.mxu3 %v1165_v55  ;;  %v3791_v55 = vld [vmem:[%s4383_s25 + $0x50] sm:$0xff] }
 0x581   :  { %1214 = vmatpush.msra.mxu3 %v1164_v56  ;;  %v3790_v56 = vld [vmem:[%s4383_s25 + $0x48] sm:$0xff] }
 0x583   :  { %1215 = vmatpush.msra.mxu3 %v1163_v59  ;;  %v3789_v59 = vld [vmem:[%s4383_s25 + $0x40] sm:$0xff] }
 0x5e2   :  { %v1039_v61 = vpop.xlane.xlu0 %1038 }
 0x5e3   :  { %v1043_v62 = vmul.f32 %v1039_v61, %v4528_v23  ;;  %v1180_v61 = vld [vmem:[%s4423_s6 + $0x88] sm:$0xff] }
 0x5e5   :  { %v1045_v63 = vadd.f32 1e-05, %v1043_v62  ;;  %v1179_v62 = vld [vmem:[%s4423_s6 + $0x80] sm:$0xff] }
 0x5e7   :  { %4185 = vrsqrt.f32 %v1045_v63  ;;  %vm1053_vm12 = vweird.f32 %v1045_v63 }
 0x5eb   :  { %v1042_v5 = vpop.xlane.xlu1 %1041 }
 0x5ec   :  { %v1044_v6 = vmul.f32 %v1042_v5, %v4528_v23 }
 0x5ed   :  { %v4186_v9 = vpop.eup %4185 }
 0x5ee   :  { %v1046_v11 = vadd.f32 1e-05, %v1044_v6  ;;  %v1048_v14 = vmul.f32 %v4186_v9, %v1045_v63  ;;  %vm1054_vm11 = vweird.f32 %v4186_v9  ;;  %v1095_v63 = vld [vmem:[%s5517_s9] sm:$0x3] }
 0x5ef   :  { %vm1055_vm13 = vmor %vm1053_vm12, %vm1054_vm11  ;;  %v1097_v0 = vperm.slane %v1095_v63, 0  ;;  %v1098_v4 = vperm.slane %v1095_v63, 1 }
 0x5f0   :  { %4187 = vrsqrt.f32 %v1046_v11  ;;  %v1049_v18 = vmul.f32 %v4186_v9, %v1048_v14  ;;  %vm1063_vm15 = vweird.f32 %v1046_v11 }
 0x5f2   :  { %v1050_v21 = vmul.f32 0.5, %v1049_v18 }
 0x5f4   :  { %v1051_v25 = vsub.f32 1.5, %v1050_v21 }
 0x5f6   :  { %v4188_v27 = vpop.eup %4187  ;;  %v1052_v31 = vmul.f32 %v4186_v9, %v1051_v25 }
 0x5f7   :  { %v1058_v32 = vmul.f32 %v4188_v27, %v1046_v11  ;;  %vm1064_vm14 = vweird.f32 %v4188_v27 }
 0x5f8   :  { %v1056_v15 = vsel %vm1055_vm13, %v4186_v9, %v1052_v31  ;;  %vm1065_vm0 = vmor %vm1063_vm15, %vm1064_vm14 }
 0x5f9   :  { %v1059_v38 = vmul.f32 %v4188_v27, %v1058_v32  ;;  %v1067_v39 = vmul.f32 %v1056_v15, %v4761_v36 }
 0x5fb   :  { %v1060_v43 = vmul.f32 0.5, %v1059_v38  ;;  %v1072_v44 = vmul.f32 %v4111_v10, %v1067_v39 }
 0x5fd   :  { %v1061_v47 = vsub.f32 1.5, %v1060_v43  ;;  %v1077_v48 = vadd.f32 %v4112_v41, %v1072_v44  ;;  %v3784_v43 = vld [vmem:[%s4373_s17 + $0x78] sm:$0xf] }
 0x5fe   :  { %v3796_v44 = vld [vmem:[%s4383_s25 + $0x78] sm:$0xf]  ;;  %3786 = vmatpush.msk.msra.mxu1 %vm265_vm4, %v3784_v43 }
 0x5ff   :  { %v1062_v49 = vmul.f32 %v4188_v27, %v1061_v47  ;;  %3768 = vmatmul.msk.f32.vlgmr.msrb.gmra.mxu1 %vm185_vm2, %v1077_v48  ;;  %3771 = vmatmul.msk.f32.vlgmr.msrb.gmra.mxu2 %vm185_vm2, %v1077_v48  ;;  %v3795_v47 = vld [vmem:[%s4383_s25 + $0x70] sm:$0xff]  ;;  %v3782_v48 = vld [vmem:[%s4373_s17 + $0x68] sm:$0xff] }
 0x600   :  { %3798 = vmatpush.msk.msra.mxu2 %vm265_vm4, %v3796_v44  ;;  %1344 = vmatpush.msra.mxu1 %v3783_v46 }
 0x601   :  { %v1066_v36 = vsel %vm1065_vm0, %v4188_v27, %v1062_v49  ;;  %v3781_v49 = vld [vmem:[%s4373_s17 + $0x60] sm:$0xff] }
 0x602   :  { %v1068_v50 = vmul.f32 %v1066_v36, %v4768_v40  ;;  %v1182_v40 = vld [vmem:[%s4423_s6 + $0x98] sm:$0xff]  ;;  %1384 = vmatpush.msra.mxu2 %v3795_v47  ;;  %1345 = vmatpush.msra.mxu1 %v3782_v48  ;;  %v3793_v36 = vld [vmem:[%s4383_s25 + $0x60] sm:$0xff] }
 0x603   :  { %1235 = vmatpush.msrb.mxu0 %v1182_v40  ;;  %v3808_v40 = vld [vmem:[%s4393_s3 + $0x78] sm:$0xf]  ;;  %v4118_v48 = vld [vmem:[%s4398_s8 + $0x1] ss:$0 sm:$0xff] }
 0x604   :  { %v1073_v51 = vmul.f32 %v4111_v10, %v1068_v50  ;;  %1385 = vmatpush.msra.mxu2 %v3794_v33  ;;  %1346 = vmatpush.msra.mxu1 %v3781_v49  ;;  %v3780_v50 = vld [vmem:[%s4373_s17 + $0x58] sm:$0xff] }
 0x605   :  { %1236 = vmatpush.msrb.mxu0 %v1181_v60  ;;  %v3807_v60 = vld [vmem:[%s4393_s3 + $0x70] sm:$0xff] }
 0x606   :  { %v1078_v54 = vadd.f32 %v4112_v41, %v1073_v51  ;;  %1386 = vmatpush.msra.mxu2 %v3793_v36  ;;  %v3792_v51 = vld [vmem:[%s4383_s25 + $0x58] sm:$0xff]  ;;  %1347 = vmatpush.msra.mxu1 %v3780_v50 }
 0x607   :  { %1237 = vmatpush.msrb.mxu0 %v1180_v61 }
 0x608   :  { %3769 = vmatmul.msk.f32.gmra.mxu1 %vm185_vm2, %v1078_v54  ;;  %3772 = vmatmul.msk.f32.gmra.mxu2 %vm185_vm2, %v1078_v54  ;;  %v3779_v54 = vld [vmem:[%s4373_s17 + $0x50] sm:$0xff] }
 0x609   :  { %1238 = vmatpush.msrb.mxu0 %v1179_v62  ;;  %1387 = vmatpush.msra.mxu2 %v3792_v51  ;;  %v3806_v62 = vld [vmem:[%s4393_s3 + $0x68] sm:$0xff] }
 0x60a   :  { %1348 = vmatpush.msra.mxu1 %v3779_v54 }
 0x60b   :  { %1388 = vmatpush.msra.mxu2 %v3791_v55 }
 0x60c   :  { %1349 = vmatpush.msra.mxu1 %v3778_v52 }
 0x60d   :  { %1389 = vmatpush.msra.mxu2 %v3790_v56 }
 0x60e   :  { %1350 = vmatpush.msra.mxu1 %v3777_v57 }
 0x60f   :  { %1390 = vmatpush.msra.mxu2 %v3789_v59 }
 0x610   :  { %3810 = vmatpush.msk.msrb.mxu1 %vm265_vm4, %v3808_v40 }
 0x612   :  { %1424 = vmatpush.msrb.mxu1 %v3807_v60 }
 0x614   :  { %1425 = vmatpush.msrb.mxu1 %v3806_v62 }
 0x67c   :  { %v1130_v2 = vpop.f32.mrf.mxu1 }
 0x67d   :  { %v1131_v1 = vadd.f32 %v1130_v2, %v1097_v0 }
 0x67f   :  { %v1159_v3 = vmax.f32 %v1131_v1, 0.0  ;;  %v3804_v1 = vld [vmem:[%s4393_s3 + $0x58] sm:$0xff] }
 0x681   :  { %1216 = vmatmul.f32.vlgmr.msra.gmra.mxu3 %v1159_v3  ;;  %v3803_v3 = vld [vmem:[%s4393_s3 + $0x50] sm:$0xff] }
 0x682   :  { %v1153_v5 = vpop.f32.mrf.mxu2 }
 0x683   :  { %v1154_v6 = vadd.f32 %v1153_v5, %v1098_v4  ;;  %v3802_v5 = vld [vmem:[%s4393_s3 + $0x48] sm:$0xff] }
 0x685   :  { %v1133_v7 = vpop.f32.mrf.mxu1  ;;  %v1160_v8 = vmax.f32 %v1154_v6, 0.0 }
 0x686   :  { %v1134_v9 = vadd.f32 %v1133_v7, %v1097_v0  ;;  %v3805_v0 = vld [vmem:[%s4393_s3 + $0x60] sm:$0xff] }
 0x687   :  { %3773 = vmatmul.msk.f32.vlgmr.msrb.gmra.mxu0 %vm1193_vm1, %v1160_v8  ;;  %1426 = vmatpush.msrb.mxu1 %v3805_v0  ;;  %v3801_v7 = vld [vmem:[%s4393_s3 + $0x40] sm:$0xff] }
 0x688   :  { %v1161_v11 = vmax.f32 %v1134_v9, 0.0 }
 0x689   :  { %1427 = vmatpush.msrb.mxu1 %v3804_v1 }
 0x68a   :  { %1219 = vmatmul.f32.gmra.mxu3 %v1161_v11 }
 0x68b   :  { %v1156_v12 = vpop.f32.mrf.mxu2  ;;  %1428 = vmatpush.msrb.mxu1 %v3803_v3 }
 0x68c   :  { %v1157_v13 = vadd.f32 %v1156_v12, %v1098_v4 }
 0x68d   :  { %1429 = vmatpush.msrb.mxu1 %v3802_v5 }
 0x68e   :  { %v1162_v14 = vmax.f32 %v1157_v13, 0.0 }
 0x68f   :  { %1430 = vmatpush.msrb.mxu1 %v3801_v7 }
 0x690   :  { %3774 = vmatmul.msk.f32.gmra.mxu0 %vm1193_vm1, %v1162_v14 }
 0x704   :  { %v1217_v16 = vpop.f32.mrf.mxu3  ;;  %v1240_v17 = vpop.f32.mrf.mxu0 }
 0x705   :  { %v1241_v18 = vadd.f32 %v1240_v17, %v1217_v16 }
 0x707   :  { %v1246_v20 = vadd.f32 %v1241_v18, %v4750_v26 }
 0x709   :  { %v4836_v21 = vadd.f32 %v4113_v19, %v1246_v20 }
 0x70b   :  { %v1258_v22 = vsel %vm185_vm2, %v4836_v21, 0.0 }
 0x70c   :  { %1259 = vadd.xlane.f32.xlu2 %v1258_v22 }
 0x70d   :  { %v1220_v24 = vpop.f32.mrf.mxu3  ;;  %v1243_v25 = vpop.f32.mrf.mxu0 }
 0x70e   :  { %v1244_v27 = vadd.f32 %v1243_v25, %v1220_v24  ;;  %v4115_v25 = vld [vmem:[%s4438_s27 + $0x1] ss:$0 sm:$0xff] }
 0x710   :  { %v1247_v28 = vadd.f32 %v1244_v27, %v4755_v30 }
 0x712   :  { %v4841_v29 = vadd.f32 %v4113_v19, %v1247_v28  ;;  %v4114_v19 = vld [vmem:[%s4433_s20 + $0x1] ss:$0 sm:$0xff] }
 0x714   :  { %v1261_v31 = vsel %vm185_vm2, %v4841_v29, 0.0 }
 0x715   :  { %1262 = vadd.xlane.f32.xlu0 %v1261_v31 }
 0x77f   :  { %v1260_v26 = vpop.xlane.xlu2 %1259 }
 0x780   :  { %v1264_v32 = vmul.f32 %v1260_v26, %v4528_v23 }
 0x782   :  { %v4847_v10 = vsub.f32 %v4836_v21, %v1264_v32 }
 0x784   :  { %v1268_v37 = vmul.f32 %v4847_v10, %v4847_v10 }
 0x786   :  { %v1270_v30 = vsel %vm185_vm2, %v1268_v37, 0.0 }
 0x787   :  { %1271 = vadd.xlane.f32.xlu1 %v1270_v30 }
 0x788   :  { %v1263_v15 = vpop.xlane.xlu0 %1262 }
 0x789   :  { %v1265_v38 = vmul.f32 %v1263_v15, %v4528_v23 }
 0x78b   :  { %v4854_v39 = vsub.f32 %v4841_v29, %v1265_v38 }
 0x78d   :  { %v1269_v41 = vmul.f32 %v4854_v39, %v4854_v39 }
 0x78f   :  { %v1273_v42 = vsel %vm185_vm2, %v1269_v41, 0.0  ;;  %v4116_v41 = vld [vmem:[%s4378_s21 + $0x1] ss:$0 sm:$0xff] }
 0x790   :  { %1274 = vadd.xlane.f32.xlu2 %v1273_v42  ;;  %v4117_v42 = vld [vmem:[%s4388_s29 + $0x1] ss:$0 sm:$0xff] }
 0x7fa   :  { %v1272_v61 = vpop.xlane.xlu1 %1271 }
 0x7fb   :  { %v1276_v63 = vmul.f32 %v1272_v61, %v4528_v23 }
 0x7fd   :  { %v1278_v2 = vadd.f32 1e-05, %v1276_v63 }
 0x7ff   :  { %4189 = vrsqrt.f32 %v1278_v2  ;;  %vm1286_vm5 = vweird.f32 %v1278_v2 }
 0x803   :  { %v1275_v4 = vpop.xlane.xlu2 %1274 }
 0x804   :  { %v1277_v6 = vmul.f32 %v1275_v4, %v4528_v23 }
 0x805   :  { %v4190_v8 = vpop.eup %4189 }
 0x806   :  { %v1279_v9 = vadd.f32 1e-05, %v1277_v6  ;;  %v1281_v11 = vmul.f32 %v4190_v8, %v1278_v2  ;;  %vm1287_vm3 = vweird.f32 %v4190_v8 }
 0x807   :  { %vm1288_vm6 = vmor %vm1286_vm5, %vm1287_vm3 }
 0x808   :  { %4191 = vrsqrt.f32 %v1279_v9  ;;  %v1282_v12 = vmul.f32 %v4190_v8, %v1281_v11  ;;  %vm1296_vm8 = vweird.f32 %v1279_v9 }
 0x80a   :  { %v1283_v13 = vmul.f32 0.5, %v1282_v12 }
 0x80c   :  { %v1284_v14 = vsub.f32 1.5, %v1283_v13 }
 0x80e   :  { %v4192_v16 = vpop.eup %4191  ;;  %v1285_v17 = vmul.f32 %v4190_v8, %v1284_v14 }
 0x80f   :  { %v1291_v18 = vmul.f32 %v4192_v16, %v1279_v9  ;;  %vm1297_vm7 = vweird.f32 %v4192_v16 }
 0x810   :  { %v1289_v20 = vsel %vm1288_vm6, %v4190_v8, %v1285_v17  ;;  %vm1298_vm9 = vmor %vm1296_vm8, %vm1297_vm7 }
 0x811   :  { %v1292_v22 = vmul.f32 %v4192_v16, %v1291_v18  ;;  %v1300_v24 = vmul.f32 %v1289_v20, %v4847_v10 }
 0x813   :  { %v1293_v27 = vmul.f32 0.5, %v1292_v22  ;;  %v1305_v28 = vmul.f32 %v4114_v19, %v1300_v24 }
 0x815   :  { %v1294_v31 = vsub.f32 1.5, %v1293_v27  ;;  %v1310_v26 = vadd.f32 %v4115_v25, %v1305_v28 }
 0x817   :  { %v1295_v32 = vmul.f32 %v4192_v16, %v1294_v31  ;;  %3787 = vmatmul.msk.f32.vlgmr.msra.gmra.mxu1 %vm185_vm2, %v1310_v26  ;;  %3799 = vmatmul.msk.f32.vlgmr.msra.gmra.mxu2 %vm185_vm2, %v1310_v26 }
 0x819   :  { %v1299_v37 = vsel %vm1298_vm9, %v4192_v16, %v1295_v32 }
 0x81a   :  { %v1301_v30 = vmul.f32 %v1299_v37, %v4854_v39 }
 0x81c   :  { %v1306_v15 = vmul.f32 %v4114_v19, %v1301_v30 }
 0x81e   :  { %v1311_v10 = vadd.f32 %v4115_v25, %v1306_v15 }
 0x820   :  { %3788 = vmatmul.msk.f32.gmra.mxu1 %vm185_vm2, %v1311_v10  ;;  %3800 = vmatmul.msk.f32.gmra.mxu2 %vm185_vm2, %v1311_v10 }
 0x828   :  { %3811 = vmatmul.msk.f32.vlgmr.msrb.gmra.mxu1 %vm185_vm2, %v1310_v26 }
 0x830   :  { %3812 = vmatmul.msk.f32.gmra.mxu1 %vm185_vm2, %v1311_v10 }
 0x894   :  { %v1352_v38 = vpop.f32.mrf.mxu1 }
 0x895   :  { %v1353_v43 = vadd.f32 %v4116_v41, %v1352_v38 }
 0x897   :  { %v1438_v39 = vmul.f32 %v4612_v45, %v1353_v43  ;;  %v1564_v40 = vmul.f32 %v4596_v34, %v1353_v43  ;;  %v1684_v63 = vmul.f32 %v4599_v35, %v1353_v43  ;;  %v1804_v2 = vmul.f32 %v4633_v53, %v1353_v43 }
 0x898   :  { %v1924_v3 = vmul.f32 %v4647_v58, %v1353_v43 }
 0x89a   :  { %v1392_v44 = vpop.f32.mrf.mxu2 }
 0x89b   :  { %v1393_v46 = vadd.f32 %v4117_v42, %v1392_v44 }
 0x89d   :  { %v1355_v47 = vpop.f32.mrf.mxu1  ;;  %3813 = vmatpush.xpose.msk.msrb.mxu2 %vm185_vm2, %v1393_v46 }
 0x89e   :  { %v1356_v33 = vadd.f32 %v4116_v41, %v1355_v47 }
 0x8a0   :  { %3814 = vmatmul.msk.f32.vlgmr.msrb.gmra.mxu2 %vm185_vm2, %v1438_v39  ;;  %v1439_v54 = vmul.f32 %v4612_v45, %v1356_v33  ;;  %v1565_v55 = vmul.f32 %v4596_v34, %v1356_v33  ;;  %v1685_v60 = vmul.f32 %v4599_v35, %v1356_v33  ;;  %v1805_v0 = vmul.f32 %v4633_v53, %v1356_v33 }
 0x8a1   :  { %v1925_v1 = vmul.f32 %v4647_v58, %v1356_v33 }
 0x8a3   :  { %v1395_v49 = vpop.f32.mrf.mxu2 }
 0x8a4   :  { %v1396_v36 = vadd.f32 %v4117_v42, %v1395_v49 }
 0x8a5   :  { %v1432_v50 = vpop.f32.mrf.mxu1 }
 0x8a6   :  { %v4904_v51 = vadd.f32 %v4118_v48, %v1432_v50  ;;  %3815 = vmatpush.xpose.msk.msrb.mxu3 %vm185_vm2, %v1396_v36  ;;  %3821 = vmatpush.xpose.msk.msra.mxu1 %vm185_vm2, %v1396_v36 }
 0x8a8   :  { %v1514_v52 = vmul.f32 %v4612_v45, %v4904_v51  ;;  %v1634_v56 = vmul.f32 %v4596_v34, %v4904_v51 }
 0x8a9   :  { %3816 = vmatmul.msk.f32.vlgmr.msrb.gmra.mxu3 %vm185_vm2, %v1439_v54  ;;  %3822 = vmatmul.msk.f32.vlgmr.msra.gmra.mxu1 %vm185_vm2, %v1565_v55 }
 0x8aa   :  { %3819 = vmatpush.xpose.msk.msra.mxu3 %vm185_vm2, %v1393_v46  ;;  %3827 = vmatpush.xpose.msk.msrb.mxu1 %vm185_vm2, %v1396_v36 }
 0x8ab   :  { %1534 = vmatpush.msra.mxu2 %v1514_v52 }
 0x8ad   :  { %1654 = vmatpush.msrb.mxu2 %v1634_v56  ;;  %v1435_v57 = vpop.f32.mrf.mxu1 }
 0x8ae   :  { %3825 = vmatpush.xpose.msk.msrb.mxu3 %vm185_vm2, %v1393_v46  ;;  %3833 = vmatpush.xpose.msk.msra.mxu1 %vm185_vm2, %v1396_v36  ;;  %v4920_v59 = vadd.f32 %v4118_v48, %v1435_v57 }
 0x8b0   :  { %v1515_v61 = vmul.f32 %v4612_v45, %v4920_v59  ;;  %v1635_v62 = vmul.f32 %v4596_v34, %v4920_v59 }
 0x8b1   :  { %3820 = vmatmul.msk.f32.vlgmr.msra.gmra.mxu3 %vm185_vm2, %v1564_v40  ;;  %3828 = vmatmul.msk.f32.vlgmr.msrb.gmra.mxu1 %vm185_vm2, %v1685_v60 }
 0x8b2   :  { %3831 = vmatpush.xpose.msk.msra.mxu3 %vm185_vm2, %v1393_v46  ;;  %3839 = vmatpush.xpose.msk.msrb.mxu1 %vm185_vm2, %v1396_v36 }
 0x8b3   :  { %1557 = vmatpush.msra.mxu0 %v1515_v61 }
 0x8b5   :  { %1677 = vmatpush.msrb.mxu0 %v1635_v62 }
 0x8b9   :  { %3826 = vmatmul.msk.f32.vlgmr.msrb.gmra.mxu3 %vm185_vm2, %v1684_v63  ;;  %3834 = vmatmul.msk.f32.vlgmr.msra.gmra.mxu1 %vm185_vm2, %v1805_v0 }
 0x8ba   :  { %3837 = vmatpush.xpose.msk.msrb.mxu3 %vm185_vm2, %v1393_v46 }
 0x8c1   :  { %3832 = vmatmul.msk.f32.vlgmr.msra.gmra.mxu3 %vm185_vm2, %v1804_v2  ;;  %3840 = vmatmul.msk.f32.vlgmr.msrb.gmra.mxu1 %vm185_vm2, %v1925_v1 }
 0x8c9   :  { %3838 = vmatmul.msk.f32.vlgmr.msrb.gmra.mxu3 %vm185_vm2, %v1924_v3 }
 0x923   :  { %v1463_v4 = vpop.f32.mrf.mxu2 }
 0x924   :  { %v1492_v5 = vsel %vm422_vm10, %v1463_v4, -inf }
 0x925   :  { %1493 = vmax.xlane.f32.xlu0 %v1492_v5 }
 0x926   :  { %v1609_v7 = vpop.f32.mrf.mxu1 }
 0x927   :  { %v1615_v14 = vsel %vm422_vm10, %v1609_v7, -inf }
 0x92c   :  { %v1489_v6 = vpop.f32.mrf.mxu3 }
 0x92d   :  { %v1495_v8 = vsel %vm422_vm10, %v1489_v6, -inf }
 0x92e   :  { %1496 = vmax.xlane.f32.xlu2 %v1495_v8  ;;  %v1729_v12 = vpop.f32.mrf.mxu1 }
 0x92f   :  { %v1735_v20 = vsel %vm422_vm10, %v1729_v12, -inf }
 0x934   :  { %v1586_v9 = vpop.f32.mrf.mxu3 }
 0x935   :  { %v1612_v11 = vsel %vm422_vm10, %v1586_v9, -inf }
 0x936   :  { %1613 = vmax.xlane.f32.xlu1 %v1612_v11  ;;  %v4948_v17 = vpop.f32.mrf.mxu1 }
 0x937   :  { %v1855_v25 = vsel %vm422_vm10, %v4948_v17, -inf }
 0x93c   :  { %v1706_v13 = vpop.f32.mrf.mxu3 }
 0x93d   :  { %v1732_v16 = vsel %vm422_vm10, %v1706_v13, -inf }
 0x93e   :  { %1616 = vmax.xlane.f32.xlu1 %v1615_v14  ;;  %1733 = vmax.xlane.f32.xlu0 %v1732_v16  ;;  %v1969_v22 = vpop.f32.mrf.mxu1 }
 0x93f   :  { %v1975_v28 = vsel %vm422_vm10, %v1969_v22, -inf }
 0x944   :  { %v1826_v18 = vpop.f32.mrf.mxu3 }
 0x945   :  { %v1852_v19 = vsel %vm422_vm10, %v1826_v18, -inf }
 0x946   :  { %1853 = vmax.xlane.f32.xlu2 %v1852_v19  ;;  %1736 = vmax.xlane.f32.xlu0 %v1735_v20 }
 0x94c   :  { %v1946_v24 = vpop.f32.mrf.mxu3 }
 0x94d   :  { %v1972_v27 = vsel %vm422_vm10, %v1946_v24, -inf }
 0x94e   :  { %1856 = vmax.xlane.f32.xlu2 %v1855_v25  ;;  %1973 = vmax.xlane.f32.xlu1 %v1972_v27 }
 0x94f   :  { %1976 = vmax.xlane.f32.xlu0 %v1975_v28 }
 0x998   :  { %v1494_v31 = vpop.xlane.xlu0 %1493 }
 0x999   :  { %v1498_v26 = vsub.f32 %v1463_v4, %v1494_v31  ;;  %v1754_v31 = vmul.f32 %v4599_v35, %v4904_v51 }
 0x99b   :  { %v1500_v32 = vmul.f32 1.442695, %v1498_v26 }
 0x99d   :  { %4193 = vpow2.f32 %v1500_v32 }
 0x9a1   :  { %v1497_v37 = vpop.xlane.xlu2 %1496 }
 0x9a2   :  { %v1499_v30 = vsub.f32 %v1489_v6, %v1497_v37 }
 0x9a3   :  { %v4956_v15 = vpop.eup %4193 }
 0x9a4   :  { %v1502_v10 = vmul.f32 1.442695, %v1499_v30  ;;  %v1504_v38 = vsel %vm422_vm10, %v4956_v15, 0.0  ;;  %v1755_v30 = vmul.f32 %v4599_v35, %v4920_v59 }
 0x9a5   :  { %1505 = vadd.xlane.f32.xlu1 %v1504_v38 }
 0x9a6   :  { %4195 = vpow2.f32 %v1502_v10 }
 0x9a9   :  { %v1614_v41 = vpop.xlane.xlu1 %1613 }
 0x9aa   :  { %v1618_v42 = vsub.f32 %v1586_v9, %v1614_v41 }
 0x9ac   :  { %v4960_v43 = vpop.eup %4195  ;;  %v1620_v44 = vmul.f32 1.442695, %v1618_v42  ;;  %v1874_v42 = vmul.f32 %v4633_v53, %v4904_v51 }
 0x9ad   :  { %v1507_v46 = vsel %vm422_vm10, %v4960_v43, 0.0 }
 0x9ae   :  { %4197 = vpow2.f32 %v1620_v44  ;;  %1508 = vadd.xlane.f32.xlu0 %v1507_v46 }
 0x9b1   :  { %v1617_v47 = vpop.xlane.xlu1 %1616  ;;  %v1734_v39 = vpop.xlane.xlu0 %1733 }
 0x9b2   :  { %v1619_v48 = vsub.f32 %v1609_v7, %v1617_v47  ;;  %v1738_v33 = vsub.f32 %v1706_v13, %v1734_v39 }
 0x9b4   :  { %v4964_v49 = vpop.eup %4197  ;;  %v1622_v36 = vmul.f32 1.442695, %v1619_v48  ;;  %v1740_v50 = vmul.f32 1.442695, %v1738_v33  ;;  %v1875_v33 = vmul.f32 %v4633_v53, %v4920_v59 }
 0x9b5   :  { %v1624_v54 = vsel %vm422_vm10, %v4964_v49, 0.0 }
 0x9b6   :  { %4199 = vpow2.f32 %v1622_v36  ;;  %1625 = vadd.xlane.f32.xlu2 %v1624_v54 }
 0x9b7   :  { %4201 = vpow2.f32 %v1740_v50 }
 0x9b9   :  { %v1854_v55 = vpop.xlane.xlu2 %1853  ;;  %v1737_v52 = vpop.xlane.xlu0 %1736 }
 0x9ba   :  { %v1858_v56 = vsub.f32 %v1826_v18, %v1854_v55  ;;  %v1739_v57 = vsub.f32 %v1729_v12, %v1737_v52 }
 0x9bc   :  { %v4968_v40 = vpop.eup %4199  ;;  %v1860_v60 = vmul.f32 1.442695, %v1858_v56  ;;  %v1742_v61 = vmul.f32 1.442695, %v1739_v57  ;;  %v1995_v57 = vmul.f32 %v4647_v58, %v4920_v59 }
 0x9bd   :  { %v4970_v62 = vpop.eup %4201  ;;  %v1627_v63 = vsel %vm422_vm10, %v4968_v40, 0.0 }
 0x9be   :  { %4203 = vpow2.f32 %v1860_v60  ;;  %1628 = vadd.xlane.f32.xlu2 %v1627_v63  ;;  %v1744_v0 = vsel %vm422_vm10, %v4970_v62, 0.0 }
 0x9bf   :  { %4205 = vpow2.f32 %v1742_v61  ;;  %1745 = vadd.xlane.f32.xlu1 %v1744_v0  ;;  %v3850_v0 = vld [vmem:[%s4403_s14 + $0x78] sm:$0xf] }
 0x9c0   :  { %3851 = vmatpush.msk.msra.mxu3 %vm265_vm4, %v3850_v0  ;;  %v3860_v0 = vld [vmem:[%s4413_s24 + $0x98] sm:$0xff] }
 0x9c1   :  { %v1857_v2 = vpop.xlane.xlu2 %1856  ;;  %v1974_v1 = vpop.xlane.xlu1 %1973 }
 0x9c2   :  { %v1859_v3 = vsub.f32 %v4948_v17, %v1857_v2  ;;  %v1978_v4 = vsub.f32 %v1946_v24, %v1974_v1  ;;  %v1977_v5 = vpop.xlane.xlu0 %1976  ;;  %v3849_v2 = vld [vmem:[%s4403_s14 + $0x70] sm:$0xff]  ;;  %v3848_v1 = vld [vmem:[%s4403_s14 + $0x68] sm:$0xff] }
 0x9c3   :  { %v1979_v6 = vsub.f32 %v1969_v22, %v1977_v5  ;;  %2071 = vmatpush.msra.mxu3 %v3849_v2  ;;  %v3845_v5 = vld [vmem:[%s4403_s14 + $0x50] sm:$0xff]  ;;  %v3857_v2 = vld [vmem:[%s4413_s24 + $0x80] sm:$0xff] }
 0x9c4   :  { %v4204_v7 = vpop.eup %4203  ;;  %v1862_v8 = vmul.f32 1.442695, %v1859_v3  ;;  %v1980_v9 = vmul.f32 1.442695, %v1978_v4  ;;  %v3847_v3 = vld [vmem:[%s4403_s14 + $0x60] sm:$0xff]  ;;  %v3846_v4 = vld [vmem:[%s4403_s14 + $0x58] sm:$0xff] }
 0x9c5   :  { %v4206_v11 = vpop.eup %4205  ;;  %v1982_v12 = vmul.f32 1.442695, %v1979_v6  ;;  %v1864_v13 = vsel %vm422_vm10, %v4204_v7, 0.0  ;;  %2072 = vmatpush.msra.mxu3 %v3848_v1  ;;  %v3858_v1 = vld [vmem:[%s4413_s24 + $0x88] sm:$0xff] }
 0x9c6   :  { %4207 = vpow2.f32 %v1862_v8  ;;  %1865 = vadd.xlane.f32.xlu0 %v1864_v13  ;;  %v1747_v14 = vsel %vm422_vm10, %v4206_v11, 0.0 }
 0x9c7   :  { %4209 = vpow2.f32 %v1980_v9  ;;  %1748 = vadd.xlane.f32.xlu1 %v1747_v14  ;;  %2073 = vmatpush.msra.mxu3 %v3847_v3  ;;  %v3843_v9 = vld [vmem:[%s4403_s14 + $0x40] sm:$0xff] }
 0x9c8   :  { %4211 = vpow2.f32 %v1982_v12 }
 0x9c9   :  { %2074 = vmatpush.msra.mxu3 %v3846_v4 }
 0x9cb   :  { %2075 = vmatpush.msra.mxu3 %v3845_v5 }
 0x9cc   :  { %v4979_v16 = vpop.eup %4207 }
 0x9cd   :  { %v4981_v17 = vpop.eup %4209  ;;  %v1867_v18 = vsel %vm422_vm10, %v4979_v16, 0.0 }
 0x9ce   :  { %v4985_v19 = vpop.eup %4211  ;;  %v1984_v20 = vsel %vm422_vm10, %v4981_v17, 0.0  ;;  %1868 = vadd.xlane.f32.xlu0 %v1867_v18 }
 0x9cf   :  { %1985 = vadd.xlane.f32.xlu2 %v1984_v20  ;;  %v1987_v22 = vsel %vm422_vm10, %v4985_v19, 0.0 }
 0x9d0   :  { %1988 = vadd.xlane.f32.xlu1 %v1987_v22 }
 0xa18   :  { %v1506_v24 = vpop.xlane.xlu1 %1505 }
 0xa19   :  { %4213 = vrcp.f32 %v1506_v24 }
 0xa1f   :  { %v4214_v25 = vpop.eup %4213 }
 0xa20   :  { %v1512_v27 = vmul.f32 %v4214_v25, %v4956_v15 }
 0xa21   :  { %v1509_v28 = vpop.xlane.xlu0 %1508 }
 0xa22   :  { %4215 = vrcp.f32 %v1509_v28  ;;  %3817 = vmatmul.msk.f32.vlgmr.msra.gmra.mxu2 %vm422_vm10, %v1512_v27 }
 0xa23   :  { %1774 = vmatpush.msra.mxu2 %v1754_v31 }
 0xa28   :  { %v4216_v26 = vpop.eup %4215 }
 0xa29   :  { %v1513_v32 = vmul.f32 %v4216_v26, %v4960_v43  ;;  %v1626_v37 = vpop.xlane.xlu2 %1625 }
 0xa2a   :  { %4217 = vrcp.f32 %v1626_v37 }
 0xa2b   :  { %3818 = vmatmul.msk.f32.vlgmr.msra.gmra.mxu0 %vm422_vm10, %v1513_v32  ;;  %v4119_v32 = vld [vmem:[%s4408_s19 + $0x1] ss:$0 sm:$0xff] }
 0xa2c   :  { %1797 = vmatpush.msra.mxu0 %v1755_v30 }
 0xa30   :  { %v4218_v15 = vpop.eup %4217 }
 0xa31   :  { %v1632_v10 = vmul.f32 %v4218_v15, %v4964_v49  ;;  %v1629_v38 = vpop.xlane.xlu2 %1628  ;;  %v1994_v49 = vmul.f32 %v4647_v58, %v4904_v51 }
 0xa32   :  { %4219 = vrcp.f32 %v1629_v38  ;;  %v1746_v41 = vpop.xlane.xlu1 %1745 }
 0xa33   :  { %4221 = vrcp.f32 %v1746_v41  ;;  %3823 = vmatmul.msk.f32.vlgmr.msrb.gmra.mxu2 %vm422_vm10, %v1632_v10 }
 0xa34   :  { %1894 = vmatpush.msrb.mxu2 %v1874_v42 }
 0xa38   :  { %v4220_v43 = vpop.eup %4219 }
 0xa39   :  { %v4222_v44 = vpop.eup %4221  ;;  %v1633_v46 = vmul.f32 %v4220_v43, %v4968_v40  ;;  %v1866_v47 = vpop.xlane.xlu0 %1865 }
 0xa3a   :  { %v1752_v39 = vmul.f32 %v4222_v44, %v4970_v62  ;;  %v1749_v48 = vpop.xlane.xlu1 %1748  ;;  %4223 = vrcp.f32 %v1866_v47 }
 0xa3b   :  { %4225 = vrcp.f32 %v1749_v48  ;;  %3824 = vmatmul.msk.f32.vlgmr.msrb.gmra.mxu0 %vm422_vm10, %v1633_v46 }
 0xa3c   :  { %3829 = vmatmul.msk.f32.vlgmr.msra.gmra.mxu2 %vm422_vm10, %v1752_v39  ;;  %1917 = vmatpush.msrb.mxu0 %v1875_v33 }
 0xa3d   :  { %2014 = vmatpush.msra.mxu2 %v1994_v49 }
 0xa40   :  { %v4224_v36 = vpop.eup %4223 }
 0xa41   :  { %v4226_v50 = vpop.eup %4225  ;;  %v1872_v54 = vmul.f32 %v4224_v36, %v4204_v7  ;;  %v1869_v55 = vpop.xlane.xlu0 %1868  ;;  %v3844_v7 = vld [vmem:[%s4403_s14 + $0x48] sm:$0xff] }
 0xa42   :  { %v1753_v52 = vmul.f32 %v4226_v50, %v4206_v11  ;;  %v1986_v56 = vpop.xlane.xlu2 %1985  ;;  %4227 = vrcp.f32 %v1869_v55  ;;  %2076 = vmatpush.msra.mxu3 %v3844_v7  ;;  %v3871_v50 = vld [vmem:[%s4413_s24 + $0xf0] sm:$0xf]  ;;  %v3869_v55 = vld [vmem:[%s4413_s24 + $0xe0] sm:$0xff] }
 0xa43   :  { %4229 = vrcp.f32 %v1986_v56  ;;  %v1989_v51 = vpop.xlane.xlu1 %1988  ;;  %3874 = vmatpush.msk.msra.mxu1 %vm265_vm4, %v3871_v50  ;;  %v3867_v56 = vld [vmem:[%s4413_s24 + $0xd0] sm:$0xff]  ;;  %v3894_v7 = vld [vmem:[%s4423_s6 + $0x160] sm:$0xff] }
 0xa44   :  { %3830 = vmatmul.msk.f32.vlgmr.msra.gmra.mxu0 %vm422_vm10, %v1753_v52  ;;  %3835 = vmatmul.msk.f32.vlgmr.msrb.gmra.mxu2 %vm422_vm10, %v1872_v54  ;;  %4231 = vrcp.f32 %v1989_v51  ;;  %v3872_v54 = vld [vmem:[%s4413_s24 + $0xf8] sm:$0xf]  ;;  %v3870_v52 = vld [vmem:[%s4413_s24 + $0xe8] sm:$0xff]  ;;  %v3865_v51 = vld [vmem:[%s4413_s24 + $0xc0] sm:$0xff] }
 0xa45   :  { %2037 = vmatpush.msra.mxu0 %v1995_v57  ;;  %2077 = vmatpush.msra.mxu3 %v3843_v9  ;;  %v3868_v57 = vld [vmem:[%s4413_s24 + $0xd8] sm:$0xff] }
 0xa46   :  { %3877 = vmatpush.msk.msrb.mxu2 %vm265_vm4, %v3872_v54  ;;  %2197 = vmatpush.msra.mxu1 %v3869_v55  ;;  %v3909_v9 = vld [vmem:[%s4423_s6 + $0x1d8] sm:$0xff]  ;;  %v3884_v55 = vld [vmem:[%s4423_s6 + $0x110] sm:$0xff] }
 0xa47   :  { %2300 = vmatpush.msrb.mxu3 %v3909_v9 }
 0xa48   :  { %v4228_v40 = vpop.eup %4227  ;;  %2220 = vmatpush.msrb.mxu2 %v3870_v52  ;;  %2198 = vmatpush.msra.mxu1 %v3867_v56 }
 0xa49   :  { %v4230_v60 = vpop.eup %4229  ;;  %v1873_v61 = vmul.f32 %v4228_v40, %v4979_v16  ;;  %v3866_v40 = vld [vmem:[%s4413_s24 + $0xc8] sm:$0xff] }
 0xa4a   :  { %v1992_v62 = vmul.f32 %v4230_v60, %v4981_v17  ;;  %v4232_v59 = vpop.eup %4231  ;;  %2221 = vmatpush.msrb.mxu2 %v3868_v57  ;;  %2199 = vmatpush.msra.mxu1 %v3865_v51  ;;  %v3863_v60 = vld [vmem:[%s4413_s24 + $0xb0] sm:$0xff]  ;;  %v3883_v57 = vld [vmem:[%s4423_s6 + $0x108] sm:$0xff] }
 0xa4b   :  { %v1993_v63 = vmul.f32 %v4232_v59, %v4985_v19  ;;  %v3862_v59 = vld [vmem:[%s4413_s24 + $0xa8] sm:$0xff] }
 0xa4c   :  { %3836 = vmatmul.msk.f32.vlgmr.msrb.gmra.mxu0 %vm422_vm10, %v1873_v61  ;;  %3841 = vmatmul.msk.f32.vlgmr.msra.gmra.mxu2 %vm422_vm10, %v1992_v62  ;;  %v3864_v61 = vld [vmem:[%s4413_s24 + $0xb8] sm:$0xff]  ;;  %v3861_v62 = vld [vmem:[%s4413_s24 + $0xa0] sm:$0xff] }
 0xa4d   :  { %2222 = vmatpush.msrb.mxu2 %v3866_v40  ;;  %2200 = vmatpush.msra.mxu1 %v3863_v60 }
 0xa4f   :  { %2223 = vmatpush.msrb.mxu2 %v3864_v61  ;;  %2201 = vmatpush.msra.mxu1 %v3861_v62  ;;  %v3882_v62 = vld [vmem:[%s4423_s6 + $0x100] sm:$0xff] }
 0xa51   :  { %2224 = vmatpush.msrb.mxu2 %v3862_v59  ;;  %v3901_v59 = vld [vmem:[%s4423_s6 + $0x198] sm:$0xff] }
 0xa53   :  { %2225 = vmatpush.msrb.mxu2 %v3860_v0  ;;  %v3900_v0 = vld [vmem:[%s4423_s6 + $0x190] sm:$0xff] }
 0xa54   :  { %3842 = vmatmul.msk.f32.vlgmr.msra.gmra.mxu0 %vm422_vm10, %v1993_v63  ;;  %v3859_v63 = vld [vmem:[%s4413_s24 + $0x90] sm:$0xff] }
 0xa55   :  { %2202 = vmatpush.msra.mxu1 %v3859_v63  ;;  %2226 = vmatpush.msrb.mxu2 %v3858_v1  ;;  %v3881_v63 = vld [vmem:[%s4423_s6 + $0xf8] sm:$0xff]  ;;  %v3898_v1 = vld [vmem:[%s4423_s6 + $0x180] sm:$0xff] }
 0xa57   :  { %2203 = vmatpush.msra.mxu1 %v3857_v2  ;;  %v3880_v2 = vld [vmem:[%s4423_s6 + $0xf0] sm:$0xff] }
 0xaa5   :  { %v1536_v6 = vpop.f32.mrf.mxu2 }
 0xaa8   :  { %v1559_v8 = vpop.f32.mrf.mxu0 }
 0xab6   :  { %v1656_v11 = vpop.f32.mrf.mxu2 }
 0xab7   :  { %v1682_v17 = vadd.f32 %v1656_v11, %v1536_v6  ;;  %v3895_v6 = vld [vmem:[%s4423_s6 + $0x168] sm:$0xff]  ;;  %v3908_v11 = vld [vmem:[%s4423_s6 + $0x1d0] sm:$0xff] }
 0xab8   :  { %v1679_v12 = vpop.f32.mrf.mxu0  ;;  %2275 = vmatpush.msrb.mxu0 %v3895_v6  ;;  %2301 = vmatpush.msrb.mxu3 %v3908_v11 }
 0xab9   :  { %v1683_v25 = vadd.f32 %v1679_v12, %v1559_v8  ;;  %v3893_v8 = vld [vmem:[%s4423_s6 + $0x158] sm:$0xff] }
 0xaba   :  { %2276 = vmatpush.msrb.mxu0 %v3894_v7 }
 0xabc   :  { %2277 = vmatpush.msrb.mxu0 %v3893_v8 }
 0xabf   :  { %v1776_v13 = vpop.f32.mrf.mxu2 }
 0xac0   :  { %v1802_v19 = vadd.f32 %v1776_v13, %v1682_v17 }
 0xac1   :  { %v1799_v14 = vpop.f32.mrf.mxu0 }
 0xac2   :  { %v1803_v27 = vadd.f32 %v1799_v14, %v1683_v25  ;;  %v3892_v14 = vld [vmem:[%s4423_s6 + $0x150] sm:$0xff]  ;;  %v3905_v25 = vld [vmem:[%s4423_s6 + $0x1b8] sm:$0xff] }
 0xac3   :  { %2278 = vmatpush.msrb.mxu0 %v3892_v14 }
 0xac7   :  { %v1896_v16 = vpop.f32.mrf.mxu2 }
 0xac8   :  { %v1922_v20 = vadd.f32 %v1896_v16, %v1802_v19  ;;  %v3907_v16 = vld [vmem:[%s4423_s6 + $0x1c8] sm:$0xff] }
 0xac9   :  { %v1919_v18 = vpop.f32.mrf.mxu0  ;;  %v3891_v19 = vld [vmem:[%s4423_s6 + $0x148] sm:$0xff]  ;;  %2302 = vmatpush.msrb.mxu3 %v3907_v16 }
 0xaca   :  { %v1923_v31 = vadd.f32 %v1919_v18, %v1803_v27  ;;  %2279 = vmatpush.msrb.mxu0 %v3891_v19 }
 0xacf   :  { %v2016_v22 = vpop.f32.mrf.mxu2 }
 0xad0   :  { %v2042_v24 = vadd.f32 %v2016_v22, %v1922_v20  ;;  %v3906_v20 = vld [vmem:[%s4423_s6 + $0x1c0] sm:$0xff] }
 0xad1   :  { %v2039_v28 = vpop.f32.mrf.mxu0  ;;  %2303 = vmatpush.msrb.mxu3 %v3906_v20 }
 0xad2   :  { %3852 = vmatmul.msk.f32.vlgmr.msra.gmra.mxu3 %vm185_vm2, %v2042_v24  ;;  %v2043_v26 = vadd.f32 %v2039_v28, %v1923_v31  ;;  %v3890_v24 = vld [vmem:[%s4423_s6 + $0x140] sm:$0xff]  ;;  %v3889_v28 = vld [vmem:[%s4423_s6 + $0x138] sm:$0xff]  ;;  %v3904_v31 = vld [vmem:[%s4423_s6 + $0x1b0] sm:$0xff] }
 0xad3   :  { %2280 = vmatpush.msrb.mxu0 %v3890_v24  ;;  %2304 = vmatpush.msrb.mxu3 %v3905_v25 }
 0xad5   :  { %2281 = vmatpush.msrb.mxu0 %v3889_v28  ;;  %2305 = vmatpush.msrb.mxu3 %v3904_v31  ;;  %v4122_v28 = vld [vmem:[%s5518_s22 + $0x1] ss:$0 sm:$0xff] }
 0xada   :  { %3853 = vmatmul.msk.f32.gmra.mxu3 %vm185_vm2, %v2043_v26 }
 0xb55   :  { %v2079_v37 = vpop.f32.mrf.mxu3 }
 0xb56   :  { %v2085_v30 = vadd.f32 %v2079_v37, %v4836_v21  ;;  %v3903_v37 = vld [vmem:[%s4423_s6 + $0x1a8] sm:$0xff] }
 0xb57   :  { %2306 = vmatpush.msrb.mxu3 %v3903_v37 }
 0xb58   :  { %v5034_v15 = vadd.f32 %v4119_v32, %v2085_v30 }
 0xb5a   :  { %v2098_v10 = vsel %vm185_vm2, %v5034_v15, 0.0 }
 0xb5b   :  { %2099 = vadd.xlane.f32.xlu2 %v2098_v10 }
 0xb5d   :  { %v2082_v38 = vpop.f32.mrf.mxu3 }
 0xb5e   :  { %v2086_v41 = vadd.f32 %v2082_v38, %v4841_v29  ;;  %v3887_v38 = vld [vmem:[%s4423_s6 + $0x128] sm:$0xff] }
 0xb60   :  { %v5039_v42 = vadd.f32 %v4119_v32, %v2086_v41  ;;  %v3888_v32 = vld [vmem:[%s4423_s6 + $0x130] sm:$0xff]  ;;  %v3902_v41 = vld [vmem:[%s4423_s6 + $0x1a0] sm:$0xff] }
 0xb61   :  { %2282 = vmatpush.msrb.mxu0 %v3888_v32  ;;  %2307 = vmatpush.msrb.mxu3 %v3902_v41 }
 0xb62   :  { %v2101_v43 = vsel %vm185_vm2, %v5039_v42, 0.0 }
 0xb63   :  { %2102 = vadd.xlane.f32.xlu0 %v2101_v43  ;;  %2283 = vmatpush.msrb.mxu0 %v3887_v38 }
 0xb64   :  { %2308 = vmatpush.msrb.mxu3 %v3901_v59  ;;  %v3916_v59 = vld [vmem:[%s4373_s17 + $0x88] sm:$0xff] }
 0xb66   :  { %2309 = vmatpush.msrb.mxu3 %v3900_v0  ;;  %v3915_v0 = vld [vmem:[%s4373_s17 + $0x80] sm:$0xff] }
 0xbce   :  { %v2100_v44 = vpop.xlane.xlu2 %2099 }
 0xbcf   :  { %v2104_v21 = vmul.f32 %v2100_v44, %v4528_v23 }
 0xbd1   :  { %v5045_v46 = vsub.f32 %v5034_v15, %v2104_v21  ;;  %v4120_v21 = vld [vmem:[%s5515_s0 + $0x1] ss:$0 sm:$0xff] }
 0xbd3   :  { %v2108_v47 = vmul.f32 %v5045_v46, %v5045_v46 }
 0xbd5   :  { %v2110_v29 = vsel %vm185_vm2, %v2108_v47, 0.0  ;;  %v3886_v47 = vld [vmem:[%s4423_s6 + $0x120] sm:$0xff] }
 0xbd6   :  { %2111 = vadd.xlane.f32.xlu1 %v2110_v29  ;;  %v2103_v39 = vpop.xlane.xlu0 %2102  ;;  %2284 = vmatpush.msrb.mxu0 %v3886_v47 }
 0xbd7   :  { %v2105_v48 = vmul.f32 %v2103_v39, %v4528_v23 }
 0xbd9   :  { %v5052_v33 = vsub.f32 %v5039_v42, %v2105_v48 }
 0xbdb   :  { %v2109_v49 = vmul.f32 %v5052_v33, %v5052_v33 }
 0xbdd   :  { %v2113_v36 = vsel %vm185_vm2, %v2109_v49, 0.0  ;;  %v4121_v49 = vld [vmem:[%s5516_s5 + $0x1] ss:$0 sm:$0xff] }
 0xbde   :  { %2114 = vadd.xlane.f32.xlu2 %v2113_v36  ;;  %v3885_v36 = vld [vmem:[%s4423_s6 + $0x118] sm:$0xff] }
 0xbdf   :  { %2285 = vmatpush.msrb.mxu0 %v3885_v36 }
 0xbe1   :  { %2286 = vmatpush.msrb.mxu0 %v3884_v55  ;;  %v3921_v55 = vld [vmem:[%s4373_s17 + $0xb0] sm:$0xff] }
 0xbe3   :  { %2287 = vmatpush.msrb.mxu0 %v3883_v57  ;;  %v3932_v57 = vld [vmem:[%s4383_s25 + $0xa8] sm:$0xff] }
 0xbe5   :  { %2288 = vmatpush.msrb.mxu0 %v3882_v62  ;;  %v3929_v62 = vld [vmem:[%s4383_s25 + $0x90] sm:$0xff] }
 0xbe7   :  { %2289 = vmatpush.msrb.mxu0 %v3881_v63  ;;  %v3928_v63 = vld [vmem:[%s4383_s25 + $0x88] sm:$0xff] }
 0xbe9   :  { %2290 = vmatpush.msrb.mxu0 %v3880_v2  ;;  %v3927_v2 = vld [vmem:[%s4383_s25 + $0x80] sm:$0xff] }
 0xc49   :  { %v2112_v3 = vpop.xlane.xlu1 %2111 }
 0xc4a   :  { %v2116_v4 = vmul.f32 %v2112_v3, %v4528_v23  ;;  %v3897_v3 = vld [vmem:[%s4423_s6 + $0x178] sm:$0xff] }
 0xc4c   :  { %v2118_v5 = vadd.f32 1e-05, %v2116_v4  ;;  %v3896_v4 = vld [vmem:[%s4423_s6 + $0x170] sm:$0xff] }
 0xc4e   :  { %4233 = vrsqrt.f32 %v2118_v5  ;;  %vm2126_vm12 = vweird.f32 %v2118_v5 }
 0xc51   :  { %v2115_v12 = vpop.xlane.xlu2 %2114 }
 0xc52   :  { %v2117_v13 = vmul.f32 %v2115_v12, %v4528_v23 }
 0xc54   :  { %v4234_v17 = vpop.eup %4233  ;;  %v2119_v18 = vadd.f32 1e-05, %v2117_v13 }
 0xc55   :  { %v2121_v22 = vmul.f32 %v4234_v17, %v2118_v5  ;;  %vm2127_vm11 = vweird.f32 %v4234_v17  ;;  %v3873_v5 = vld [vmem:[%s5517_s9 + $0x2] sm:$0x3] }
 0xc56   :  { %4235 = vrsqrt.f32 %v2119_v18  ;;  %vm2128_vm13 = vmor %vm2126_vm12, %vm2127_vm11  ;;  %vm2136_vm15 = vweird.f32 %v2119_v18  ;;  %v2172_v6 = vperm.slane %v3873_v5, 0  ;;  %v2173_v11 = vperm.slane %v3873_v5, 1 }
 0xc57   :  { %v2122_v27 = vmul.f32 %v4234_v17, %v2121_v22 }
 0xc59   :  { %v2123_v26 = vmul.f32 0.5, %v2122_v27 }
 0xc5b   :  { %v2124_v30 = vsub.f32 1.5, %v2123_v26 }
 0xc5c   :  { %v4236_v10 = vpop.eup %4235 }
 0xc5d   :  { %v2125_v43 = vmul.f32 %v4234_v17, %v2124_v30  ;;  %v2131_v44 = vmul.f32 %v4236_v10, %v2119_v18  ;;  %vm2137_vm14 = vweird.f32 %v4236_v10 }
 0xc5e   :  { %vm2138_vm0 = vmor %vm2136_vm15, %vm2137_vm14 }
 0xc5f   :  { %v2129_v29 = vsel %vm2128_vm13, %v4234_v17, %v2125_v43  ;;  %v2132_v39 = vmul.f32 %v4236_v10, %v2131_v44 }
 0xc60   :  { %v2140_v48 = vmul.f32 %v2129_v29, %v5045_v46 }
 0xc61   :  { %v2133_v50 = vmul.f32 0.5, %v2132_v39 }
 0xc62   :  { %v2145_v54 = vmul.f32 %v4120_v21, %v2140_v48 }
 0xc63   :  { %v2134_v52 = vsub.f32 1.5, %v2133_v50  ;;  %v3922_v50 = vld [vmem:[%s4373_s17 + $0xb8] sm:$0xf] }
 0xc64   :  { %v2150_v56 = vadd.f32 %v4121_v49, %v2145_v54  ;;  %v3934_v54 = vld [vmem:[%s4383_s25 + $0xb8] sm:$0xf]  ;;  %3924 = vmatpush.msk.msrb.mxu1 %vm265_vm4, %v3922_v50 }
 0xc65   :  { %v2135_v51 = vmul.f32 %v4236_v10, %v2134_v52  ;;  %3936 = vmatpush.msk.msra.mxu2 %vm265_vm4, %v3934_v54  ;;  %v3933_v52 = vld [vmem:[%s4383_s25 + $0xb0] sm:$0xff] }
 0xc66   :  { %3875 = vmatmul.msk.f32.vlgmr.msra.gmra.mxu1 %vm185_vm2, %v2150_v56  ;;  %3878 = vmatmul.msk.f32.vlgmr.msrb.gmra.mxu2 %vm185_vm2, %v2150_v56  ;;  %v3920_v56 = vld [vmem:[%s4373_s17 + $0xa8] sm:$0xff] }
 0xc67   :  { %v2139_v46 = vsel %vm2138_vm0, %v4236_v10, %v2135_v51  ;;  %2420 = vmatpush.msrb.mxu1 %v3921_v55  ;;  %2460 = vmatpush.msra.mxu2 %v3933_v52  ;;  %v3919_v51 = vld [vmem:[%s4373_s17 + $0xa0] sm:$0xff] }
 0xc68   :  { %v2141_v40 = vmul.f32 %v2139_v46, %v5052_v33  ;;  %v3899_v33 = vld [vmem:[%s4423_s6 + $0x188] sm:$0xff]  ;;  %v3931_v46 = vld [vmem:[%s4383_s25 + $0xa0] sm:$0xff] }
 0xc69   :  { %2310 = vmatpush.msrb.mxu3 %v3899_v33  ;;  %2421 = vmatpush.msrb.mxu1 %v3920_v56  ;;  %v3946_v33 = vld [vmem:[%s4393_s3 + $0xb8] sm:$0xf]  ;;  %v4127_v56 = vld [vmem:[%s4398_s8 + $0x2] ss:$0 sm:$0xff]  ;;  %s5524_s8 = sld [smem:[#allocation18_spill]] }
 0xc6a   :  { %v2146_v60 = vmul.f32 %v4120_v21, %v2141_v40  ;;  %2461 = vmatpush.msra.mxu2 %v3932_v57  ;;  %v3918_v40 = vld [vmem:[%s4373_s17 + $0x98] sm:$0xff] }
 0xc6b   :  { %2311 = vmatpush.msrb.mxu3 %v3898_v1  ;;  %2422 = vmatpush.msrb.mxu1 %v3919_v51  ;;  %v3945_v1 = vld [vmem:[%s4393_s3 + $0xb0] sm:$0xff] }
 0xc6c   :  { %v2151_v61 = vadd.f32 %v4121_v49, %v2146_v60  ;;  %2462 = vmatpush.msra.mxu2 %v3931_v46  ;;  %v3930_v60 = vld [vmem:[%s4383_s25 + $0x98] sm:$0xff]  ;;  %s5521_s25 = sld [smem:[#allocation14_spill]] }
 0xc6d   :  { %2312 = vmatpush.msrb.mxu3 %v3897_v3  ;;  %2423 = vmatpush.msrb.mxu1 %v3918_v40 }
 0xc6e   :  { %3876 = vmatmul.msk.f32.gmra.mxu1 %vm185_vm2, %v2151_v61  ;;  %3879 = vmatmul.msk.f32.gmra.mxu2 %vm185_vm2, %v2151_v61  ;;  %v3917_v61 = vld [vmem:[%s4373_s17 + $0x90] sm:$0xff]  ;;  %s5519_s17 = sld [smem:[#allocation12_spill]] }
 0xc6f   :  { %2313 = vmatpush.msrb.mxu3 %v3896_v4  ;;  %2463 = vmatpush.msra.mxu2 %v3930_v60  ;;  %v3944_v4 = vld [vmem:[%s4393_s3 + $0xa8] sm:$0xff] }
 0xc70   :  { %2424 = vmatpush.msrb.mxu1 %v3917_v61 }
 0xc71   :  { %2464 = vmatpush.msra.mxu2 %v3929_v62 }
 0xc72   :  { %2425 = vmatpush.msrb.mxu1 %v3916_v59 }
 0xc73   :  { %2465 = vmatpush.msra.mxu2 %v3928_v63 }
 0xc74   :  { %2426 = vmatpush.msrb.mxu1 %v3915_v0 }
 0xc75   :  { %2466 = vmatpush.msra.mxu2 %v3927_v2 }
 0xc76   :  { %3948 = vmatpush.msk.msra.mxu1 %vm265_vm4, %v3946_v33 }
 0xc78   :  { %2500 = vmatpush.msra.mxu1 %v3945_v1 }
 0xc7a   :  { %2501 = vmatpush.msra.mxu1 %v3944_v4 }
 0xce3   :  { %v2205_v7 = vpop.f32.mrf.mxu1 }
 0xce4   :  { %v2206_v8 = vadd.f32 %v2205_v7, %v2172_v6 }
 0xce6   :  { %v2234_v9 = vmax.f32 %v2206_v8, 0.0  ;;  %v3942_v8 = vld [vmem:[%s4393_s3 + $0x98] sm:$0xff] }
 0xce8   :  { %2291 = vmatmul.f32.vlgmr.msrb.gmra.mxu0 %v2234_v9  ;;  %v3941_v9 = vld [vmem:[%s4393_s3 + $0x90] sm:$0xff] }
 0xce9   :  { %v2228_v12 = vpop.f32.mrf.mxu2 }
 0xcea   :  { %v2229_v13 = vadd.f32 %v2228_v12, %v2173_v11  ;;  %v3940_v12 = vld [vmem:[%s4393_s3 + $0x88] sm:$0xff] }
 0xceb   :  { %v2208_v14 = vpop.f32.mrf.mxu1 }
 0xcec   :  { %v2235_v16 = vmax.f32 %v2229_v13, 0.0  ;;  %v2209_v17 = vadd.f32 %v2208_v14, %v2172_v6  ;;  %v3943_v6 = vld [vmem:[%s4393_s3 + $0xa0] sm:$0xff] }
 0xced   :  { %2502 = vmatpush.msra.mxu1 %v3943_v6  ;;  %v3939_v14 = vld [vmem:[%s4393_s3 + $0x80] sm:$0xff]  ;;  %s5523_s3 = sld [smem:[#allocation11_spill]] }
 0xcee   :  { %v2236_v18 = vmax.f32 %v2209_v17, 0.0  ;;  %3910 = vmatmul.msk.f32.vlgmr.msrb.gmra.mxu3 %vm1193_vm1, %v2235_v16 }
 0xcef   :  { %2503 = vmatpush.msra.mxu1 %v3942_v8 }
 0xcf0   :  { %2294 = vmatmul.f32.gmra.mxu0 %v2236_v18 }
 0xcf1   :  { %v2231_v19 = vpop.f32.mrf.mxu2  ;;  %2504 = vmatpush.msra.mxu1 %v3941_v9 }
 0xcf2   :  { %v2232_v20 = vadd.f32 %v2231_v19, %v2173_v11 }
 0xcf3   :  { %2505 = vmatpush.msra.mxu1 %v3940_v12 }
 0xcf4   :  { %v2237_v22 = vmax.f32 %v2232_v20, 0.0 }
 0xcf5   :  { %2506 = vmatpush.msra.mxu1 %v3939_v14 }
 0xcf6   :  { %3911 = vmatmul.msk.f32.gmra.mxu3 %vm1193_vm1, %v2237_v22 }
 0xd65   :  { %v2292_v24 = vpop.f32.mrf.mxu0 }
 0xd6d   :  { %v2295_v37 = vpop.f32.mrf.mxu0 }
 0xd71   :  { %v2315_v25 = vpop.f32.mrf.mxu3 }
 0xd72   :  { %v2316_v27 = vadd.f32 %v2315_v25, %v2292_v24 }
 0xd74   :  { %v2321_v31 = vadd.f32 %v2316_v27, %v5034_v15 }
 0xd76   :  { %v5120_v26 = vadd.f32 %v4122_v28, %v2321_v31 }
 0xd78   :  { %v2334_v32 = vsel %vm185_vm2, %v5120_v26, 0.0 }
 0xd79   :  { %2335 = vadd.xlane.f32.xlu0 %v2334_v32  ;;  %v2318_v30 = vpop.f32.mrf.mxu3 }
 0xd7a   :  { %v2319_v10 = vadd.f32 %v2318_v30, %v2295_v37  ;;  %v4124_v30 = vld [vmem:[%s4438_s27 + $0x2] ss:$0 sm:$0xff] }
 0xd7c   :  { %v2322_v38 = vadd.f32 %v2319_v10, %v5039_v42 }
 0xd7e   :  { %v5125_v41 = vadd.f32 %v4122_v28, %v2322_v38  ;;  %v4123_v28 = vld [vmem:[%s4433_s20 + $0x2] ss:$0 sm:$0xff]  ;;  %s4349_s20 = smov [#allocation2]  }
 0xd7f   :  { %s3676_s27 = sshll.u32 %s4349_s20, 4  ;;  %s3677_s27 = int_to_ptr.vmem [resolvable:$true] %s3676_s27 }
 0xd80   :  { %v2337_v43 = vsel %vm185_vm2, %v5125_v41, 0.0 }
 0xd81   :  { %2338 = vadd.xlane.f32.xlu1 %v2337_v43 }
 0xdec   :  { %v2336_v15 = vpop.xlane.xlu0 %2335 }
 0xded   :  { %v2340_v44 = vmul.f32 %v2336_v15, %v4528_v23 }
 0xdef   :  { %v5131_v21 = vsub.f32 %v5120_v26, %v2340_v44 }
 0xdf1   :  { %v2344_v47 = vmul.f32 %v5131_v21, %v5131_v21 }
 0xdf3   :  { %v2346_v42 = vsel %vm185_vm2, %v2344_v47, 0.0 }
 0xdf4   :  { %v2339_v29 = vpop.xlane.xlu1 %2338  ;;  %2347 = vadd.xlane.f32.xlu2 %v2346_v42 }
 0xdf5   :  { %v2341_v39 = vmul.f32 %v2339_v29, %v4528_v23 }
 0xdf7   :  { %v5138_v48 = vsub.f32 %v5125_v41, %v2341_v39 }
 0xdf9   :  { %v2345_v49 = vmul.f32 %v5138_v48, %v5138_v48 }
 0xdfb   :  { %v2349_v36 = vsel %vm185_vm2, %v2345_v49, 0.0  ;;  %v4125_v49 = vld [vmem:[%s4378_s21 + $0x2] ss:$0 sm:$0xff]  ;;  %s5520_s21 = sld [smem:[#allocation16_spill]] }
 0xdfc   :  { %2350 = vadd.xlane.f32.xlu0 %v2349_v36  ;;  %v4126_v36 = vld [vmem:[%s4388_s29 + $0x2] ss:$0 sm:$0xff]  ;;  %s5522_s29 = sld [smem:[#allocation10_spill]] }
 0xe67   :  { %v2348_v3 = vpop.xlane.xlu2 %2347 }
 0xe68   :  { %v2352_v5 = vmul.f32 %v2348_v3, %v4528_v23 }
 0xe6a   :  { %v2354_v7 = vadd.f32 1e-05, %v2352_v5 }
 0xe6c   :  { %4237 = vrsqrt.f32 %v2354_v7  ;;  %vm2362_vm5 = vweird.f32 %v2354_v7 }
 0xe6f   :  { %v2351_v11 = vpop.xlane.xlu0 %2350 }
 0xe70   :  { %v2353_v13 = vmul.f32 %v2351_v11, %v4528_v23 }
 0xe72   :  { %v4238_v16 = vpop.eup %4237  ;;  %v2355_v17 = vadd.f32 1e-05, %v2353_v13 }
 0xe73   :  { %v2357_v18 = vmul.f32 %v4238_v16, %v2354_v7  ;;  %vm2363_vm3 = vweird.f32 %v4238_v16 }
 0xe74   :  { %4239 = vrsqrt.f32 %v2355_v17  ;;  %vm2364_vm6 = vmor %vm2362_vm5, %vm2363_vm3  ;;  %vm2372_vm8 = vweird.f32 %v2355_v17 }
 0xe75   :  { %v2358_v19 = vmul.f32 %v4238_v16, %v2357_v18 }
 0xe77   :  { %v2359_v20 = vmul.f32 0.5, %v2358_v19 }
 0xe79   :  { %v2360_v22 = vsub.f32 1.5, %v2359_v20 }
 0xe7a   :  { %v4240_v24 = vpop.eup %4239 }
 0xe7b   :  { %v2361_v25 = vmul.f32 %v4238_v16, %v2360_v22  ;;  %v2367_v27 = vmul.f32 %v4240_v24, %v2355_v17  ;;  %vm2373_vm7 = vweird.f32 %v4240_v24 }
 0xe7c   :  { %vm2374_vm9 = vmor %vm2372_vm8, %vm2373_vm7  ;;  %vm3478_vm8 = vcmask 1041409  }
 0xe7d   :  { %v2365_v31 = vsel %vm2364_vm6, %v4238_v16, %v2361_v25  ;;  %v2368_v32 = vmul.f32 %v4240_v24, %v2367_v27 }
 0xe7e   :  { %v2376_v37 = vmul.f32 %v2365_v31, %v5131_v21 }
 0xe7f   :  { %v2369_v10 = vmul.f32 0.5, %v2368_v32 }
 0xe80   :  { %v2381_v38 = vmul.f32 %v4123_v28, %v2376_v37 }
 0xe81   :  { %v2370_v43 = vsub.f32 1.5, %v2369_v10 }
 0xe82   :  { %v2386_v15 = vadd.f32 %v4124_v30, %v2381_v38 }
 0xe83   :  { %v2371_v44 = vmul.f32 %v4240_v24, %v2370_v43 }
 0xe84   :  { %3925 = vmatmul.msk.f32.vlgmr.msrb.gmra.mxu1 %vm185_vm2, %v2386_v15  ;;  %3937 = vmatmul.msk.f32.vlgmr.msra.gmra.mxu2 %vm185_vm2, %v2386_v15 }
 0xe85   :  { %v2375_v47 = vsel %vm2374_vm9, %v4240_v24, %v2371_v44  ;;  %vm3564_vm9 = vcmask 818176  }
 0xe86   :  { %v2377_v42 = vmul.f32 %v2375_v47, %v5138_v48 }
 0xe88   :  { %v2382_v29 = vmul.f32 %v4123_v28, %v2377_v42 }
 0xe8a   :  { %v2387_v21 = vadd.f32 %v4124_v30, %v2382_v29 }
 0xe8c   :  { %3926 = vmatmul.msk.f32.gmra.mxu1 %vm185_vm2, %v2387_v21  ;;  %3938 = vmatmul.msk.f32.gmra.mxu2 %vm185_vm2, %v2387_v21 }
 0xe94   :  { %3949 = vmatmul.msk.f32.vlgmr.msra.gmra.mxu1 %vm185_vm2, %v2386_v15 }
 0xe9c   :  { %3950 = vmatmul.msk.f32.gmra.mxu1 %vm185_vm2, %v2387_v21 }
 0xf01   :  { %v2428_v39 = vpop.f32.mrf.mxu1 }
 0xf02   :  { %v2429_v50 = vadd.f32 %v4125_v49, %v2428_v39 }
 0xf04   :  { %v2514_v48 = vmul.f32 %v4612_v45, %v2429_v50  ;;  %v2640_v33 = vmul.f32 %v4596_v34, %v2429_v50  ;;  %v2760_v5 = vmul.f32 %v4599_v35, %v2429_v50  ;;  %v3000_v7 = vmul.f32 %v4647_v58, %v2429_v50 }
 0xf07   :  { %v2468_v54 = vpop.f32.mrf.mxu2 }
 0xf08   :  { %v2469_v55 = vadd.f32 %v4126_v36, %v2468_v54 }
 0xf09   :  { %v2431_v52 = vpop.f32.mrf.mxu1 }
 0xf0a   :  { %3951 = vmatpush.xpose.msk.msrb.mxu2 %vm185_vm2, %v2469_v55  ;;  %v2432_v57 = vadd.f32 %v4125_v49, %v2431_v52 }
 0xf0c   :  { %v2515_v61 = vmul.f32 %v4612_v45, %v2432_v57  ;;  %v2641_v62 = vmul.f32 %v4596_v34, %v2432_v57  ;;  %v2761_v1 = vmul.f32 %v4599_v35, %v2432_v57  ;;  %v2881_v6 = vmul.f32 %v4633_v53, %v2432_v57 }
 0xf0d   :  { %3952 = vmatmul.msk.f32.vlgmr.msrb.gmra.mxu2 %vm185_vm2, %v2514_v48 }
 0xf0f   :  { %v2471_v51 = vpop.f32.mrf.mxu2 }
 0xf10   :  { %v2472_v46 = vadd.f32 %v4126_v36, %v2471_v51 }
 0xf11   :  { %v2508_v40 = vpop.f32.mrf.mxu1 }
 0xf12   :  { %v5188_v60 = vadd.f32 %v4127_v56, %v2508_v40  ;;  %3953 = vmatpush.xpose.msk.msra.mxu0 %vm185_vm2, %v2472_v46  ;;  %3959 = vmatpush.xpose.msk.msrb.mxu1 %vm185_vm2, %v2472_v46 }
 0xf14   :  { %v2590_v59 = vmul.f32 %v4612_v45, %v5188_v60  ;;  %v2710_v63 = vmul.f32 %v4596_v34, %v5188_v60 }
 0xf15   :  { %3954 = vmatmul.msk.f32.vlgmr.msra.gmra.mxu0 %vm185_vm2, %v2515_v61  ;;  %3960 = vmatmul.msk.f32.vlgmr.msrb.gmra.mxu1 %vm185_vm2, %v2641_v62 }
 0xf16   :  { %3957 = vmatpush.xpose.msk.msrb.mxu0 %vm185_vm2, %v2469_v55  ;;  %3965 = vmatpush.xpose.msk.msra.mxu1 %vm185_vm2, %v2472_v46 }
 0xf17   :  { %2610 = vmatpush.msra.mxu2 %v2590_v59 }
 0xf19   :  { %2730 = vmatpush.msrb.mxu2 %v2710_v63  ;;  %v2511_v0 = vpop.f32.mrf.mxu1 }
 0xf1a   :  { %3963 = vmatpush.xpose.msk.msra.mxu0 %vm185_vm2, %v2469_v55  ;;  %3971 = vmatpush.xpose.msk.msrb.mxu1 %vm185_vm2, %v2472_v46  ;;  %v5204_v2 = vadd.f32 %v4127_v56, %v2511_v0 }
 0xf1c   :  { %v2591_v3 = vmul.f32 %v4612_v45, %v5204_v2  ;;  %v2711_v4 = vmul.f32 %v4596_v34, %v5204_v2  ;;  %v3001_v34 = vmul.f32 %v4647_v58, %v2432_v57  ;;  %v2880_v45 = vmul.f32 %v4633_v53, %v2429_v50 }
 0xf1d   :  { %3958 = vmatmul.msk.f32.vlgmr.msrb.gmra.mxu0 %vm185_vm2, %v2640_v33  ;;  %3966 = vmatmul.msk.f32.vlgmr.msra.gmra.mxu1 %vm185_vm2, %v2761_v1 }
 0xf1e   :  { %3969 = vmatpush.xpose.msk.msrb.mxu0 %vm185_vm2, %v2469_v55  ;;  %3977 = vmatpush.xpose.msk.msra.mxu1 %vm185_vm2, %v2472_v46 }
 0xf1f   :  { %2633 = vmatpush.msra.mxu3 %v2591_v3 }
 0xf21   :  { %2753 = vmatpush.msrb.mxu3 %v2711_v4 }
 0xf25   :  { %3964 = vmatmul.msk.f32.vlgmr.msra.gmra.mxu0 %vm185_vm2, %v2760_v5  ;;  %3972 = vmatmul.msk.f32.vlgmr.msrb.gmra.mxu1 %vm185_vm2, %v2881_v6 }
 0xf26   :  { %3975 = vmatpush.xpose.msk.msra.mxu0 %vm185_vm2, %v2469_v55 }
 0xf2d   :  { %3970 = vmatmul.msk.f32.vlgmr.msrb.gmra.mxu0 %vm185_vm2, %v2880_v45  ;;  %3978 = vmatmul.msk.f32.vlgmr.msra.gmra.mxu1 %vm185_vm2, %v3001_v34 }
 0xf35   :  { %3976 = vmatmul.msk.f32.vlgmr.msra.gmra.mxu0 %vm185_vm2, %v3000_v7 }
 0xf90   :  { %v2539_v8 = vpop.f32.mrf.mxu2 }
 0xf91   :  { %v2568_v9 = vsel %vm422_vm10, %v2539_v8, -inf }
 0xf92   :  { %2569 = vmax.xlane.f32.xlu1 %v2568_v9  ;;  %v2565_v11 = vpop.f32.mrf.mxu0  ;;  %v2685_v12 = vpop.f32.mrf.mxu1 }
 0xf93   :  { %v2571_v13 = vsel %vm422_vm10, %v2565_v11, -inf  ;;  %v2691_v14 = vsel %vm422_vm10, %v2685_v12, -inf }
 0xf94   :  { %2572 = vmax.xlane.f32.xlu2 %v2571_v13 }
 0xf9a   :  { %2692 = vmax.xlane.f32.xlu1 %v2691_v14  ;;  %v2662_v16 = vpop.f32.mrf.mxu0  ;;  %v2805_v18 = vpop.f32.mrf.mxu1 }
 0xf9b   :  { %v2688_v17 = vsel %vm422_vm10, %v2662_v16, -inf  ;;  %v2811_v20 = vsel %vm422_vm10, %v2805_v18, -inf }
 0xf9c   :  { %2689 = vmax.xlane.f32.xlu0 %v2688_v17 }
 0xfa2   :  { %v2782_v19 = vpop.f32.mrf.mxu0  ;;  %v2925_v24 = vpop.f32.mrf.mxu1 }
 0xfa3   :  { %v2808_v22 = vsel %vm422_vm10, %v2782_v19, -inf  ;;  %v2931_v28 = vsel %vm422_vm10, %v2925_v24, -inf }
 0xfa4   :  { %2812 = vmax.xlane.f32.xlu0 %v2811_v20  ;;  %2809 = vmax.xlane.f32.xlu2 %v2808_v22 }
 0xfaa   :  { %v2902_v25 = vpop.f32.mrf.mxu0  ;;  %v3045_v31 = vpop.f32.mrf.mxu1 }
 0xfab   :  { %v2928_v27 = vsel %vm422_vm10, %v2902_v25, -inf  ;;  %v3051_v37 = vsel %vm422_vm10, %v3045_v31, -inf }
 0xfac   :  { %2929 = vmax.xlane.f32.xlu1 %v2928_v27  ;;  %2932 = vmax.xlane.f32.xlu2 %v2931_v28 }
 0xfb2   :  { %v3022_v32 = vpop.f32.mrf.mxu0 }
 0xfb3   :  { %v3048_v30 = vsel %vm422_vm10, %v3022_v32, -inf }
 0xfb4   :  { %3052 = vmax.xlane.f32.xlu1 %v3051_v37  ;;  %3049 = vmax.xlane.f32.xlu0 %v3048_v30 }
0x1005   :  { %v2570_v10 = vpop.xlane.xlu1 %2569 }
0x1006   :  { %v2574_v38 = vsub.f32 %v2539_v8, %v2570_v10  ;;  %v2830_v10 = vmul.f32 %v4599_v35, %v5188_v60 }
0x1007   :  { %v2573_v43 = vpop.xlane.xlu2 %2572 }
0x1008   :  { %v2576_v15 = vmul.f32 1.442695, %v2574_v38  ;;  %v2575_v44 = vsub.f32 %v2565_v11, %v2573_v43 }
0x100a   :  { %4241 = vpow2.f32 %v2576_v15  ;;  %v2578_v47 = vmul.f32 1.442695, %v2575_v44  ;;  %v2831_v15 = vmul.f32 %v4599_v35, %v5204_v2 }
0x100c   :  { %4243 = vpow2.f32 %v2578_v47 }
0x100d   :  { %v2693_v42 = vpop.xlane.xlu1 %2692 }
0x100e   :  { %v2695_v29 = vsub.f32 %v2685_v12, %v2693_v42 }
0x100f   :  { %v2690_v21 = vpop.xlane.xlu0 %2689 }
0x1010   :  { %v5237_v39 = vpop.eup %4241  ;;  %v2698_v49 = vmul.f32 1.442695, %v2695_v29  ;;  %v2694_v36 = vsub.f32 %v2662_v16, %v2690_v21 }
0x1011   :  { %v2580_v50 = vsel %vm422_vm10, %v5237_v39, 0.0 }
0x1012   :  { %v5241_v54 = vpop.eup %4243  ;;  %4245 = vpow2.f32 %v2698_v49  ;;  %v2696_v55 = vmul.f32 1.442695, %v2694_v36  ;;  %2581 = vadd.xlane.f32.xlu2 %v2580_v50  ;;  %v2950_v49 = vmul.f32 %v4633_v53, %v5188_v60  ;;  %v2951_v36 = vmul.f32 %v4633_v53, %v5204_v2 }
0x1013   :  { %v2583_v52 = vsel %vm422_vm10, %v5241_v54, 0.0  ;;  %v3070_v53 = vmul.f32 %v4647_v58, %v5188_v60 }
0x1014   :  { %4247 = vpow2.f32 %v2696_v55  ;;  %2584 = vadd.xlane.f32.xlu0 %v2583_v52 }
0x1017   :  { %v2813_v48 = vpop.xlane.xlu0 %2812  ;;  %v2810_v56 = vpop.xlane.xlu2 %2809 }
0x1018   :  { %v5245_v57 = vpop.eup %4245  ;;  %v2815_v51 = vsub.f32 %v2805_v18, %v2813_v48  ;;  %v2814_v46 = vsub.f32 %v2782_v19, %v2810_v56  ;;  %v3071_v56 = vmul.f32 %v4647_v58, %v5204_v2 }
0x1019   :  { %v2703_v40 = vsel %vm422_vm10, %v5245_v57, 0.0 }
0x101a   :  { %v5249_v61 = vpop.eup %4247  ;;  %v2818_v62 = vmul.f32 1.442695, %v2815_v51  ;;  %v2816_v59 = vmul.f32 1.442695, %v2814_v46  ;;  %2704 = vadd.xlane.f32.xlu2 %v2703_v40 }
0x101b   :  { %v2700_v63 = vsel %vm422_vm10, %v5249_v61, 0.0 }
0x101c   :  { %4249 = vpow2.f32 %v2818_v62  ;;  %2701 = vadd.xlane.f32.xlu1 %v2700_v63  ;;  %v3988_v63 = vld [vmem:[%s4403_s14 + $0xb8] sm:$0xf] }
0x101d   :  { %4251 = vpow2.f32 %v2816_v59  ;;  %3989 = vmatpush.msk.msrb.mxu0 %vm265_vm4, %v3988_v63 }
0x101f   :  { %v2930_v0 = vpop.xlane.xlu1 %2929  ;;  %v2933_v33 = vpop.xlane.xlu2 %2932 }
0x1020   :  { %v2934_v1 = vsub.f32 %v2902_v25, %v2930_v0  ;;  %v2935_v3 = vsub.f32 %v2925_v24, %v2933_v33  ;;  %v3987_v0 = vld [vmem:[%s4403_s14 + $0xb0] sm:$0xff]  ;;  %v3986_v33 = vld [vmem:[%s4403_s14 + $0xa8] sm:$0xff] }
0x1021   :  { %3147 = vmatpush.msrb.mxu0 %v3987_v0  ;;  %v4033_v0 = vld [vmem:[%s4423_s6 + $0x258] sm:$0xff] }
0x1022   :  { %v5253_v4 = vpop.eup %4249  ;;  %v2936_v5 = vmul.f32 1.442695, %v2934_v1  ;;  %v2938_v6 = vmul.f32 1.442695, %v2935_v3  ;;  %v3985_v1 = vld [vmem:[%s4403_s14 + $0xa0] sm:$0xff]  ;;  %v3984_v3 = vld [vmem:[%s4403_s14 + $0x98] sm:$0xff] }
0x1023   :  { %v5255_v34 = vpop.eup %4251  ;;  %v2823_v45 = vsel %vm422_vm10, %v5253_v4, 0.0  ;;  %3148 = vmatpush.msrb.mxu0 %v3986_v33  ;;  %v4032_v33 = vld [vmem:[%s4423_s6 + $0x250] sm:$0xff] }
0x1024   :  { %4253 = vpow2.f32 %v2936_v5  ;;  %2824 = vadd.xlane.f32.xlu1 %v2823_v45  ;;  %v2820_v7 = vsel %vm422_vm10, %v5255_v34, 0.0  ;;  %v3981_v45 = vld [vmem:[%s4403_s14 + $0x80] sm:$0xff] }
0x1025   :  { %4255 = vpow2.f32 %v2938_v6  ;;  %2821 = vadd.xlane.f32.xlu0 %v2820_v7  ;;  %3149 = vmatpush.msrb.mxu0 %v3985_v1  ;;  %v4031_v1 = vld [vmem:[%s4423_s6 + $0x248] sm:$0xff] }
0x1027   :  { %v3053_v8 = vpop.xlane.xlu1 %3052  ;;  %v3050_v9 = vpop.xlane.xlu0 %3049  ;;  %3150 = vmatpush.msrb.mxu0 %v3984_v3  ;;  %v4047_v3 = vld [vmem:[%s4423_s6 + $0x2c8] sm:$0xff] }
0x1028   :  { %v3055_v11 = vsub.f32 %v3045_v31, %v3053_v8  ;;  %v3054_v12 = vsub.f32 %v3022_v32, %v3050_v9 }
0x102a   :  { %v5261_v13 = vpop.eup %4253  ;;  %v3058_v14 = vmul.f32 1.442695, %v3055_v11  ;;  %v3056_v16 = vmul.f32 1.442695, %v3054_v12 }
0x102b   :  { %v5263_v17 = vpop.eup %4255  ;;  %v2940_v18 = vsel %vm422_vm10, %v5261_v13, 0.0 }
0x102c   :  { %4257 = vpow2.f32 %v3058_v14  ;;  %2941 = vadd.xlane.f32.xlu2 %v2940_v18  ;;  %v2943_v19 = vsel %vm422_vm10, %v5263_v17, 0.0 }
0x102d   :  { %4259 = vpow2.f32 %v3056_v16  ;;  %2944 = vadd.xlane.f32.xlu0 %v2943_v19 }
0x1032   :  { %v5269_v20 = vpop.eup %4257 }
0x1033   :  { %v5271_v22 = vpop.eup %4259  ;;  %v3063_v24 = vsel %vm422_vm10, %v5269_v20, 0.0 }
0x1034   :  { %v3060_v25 = vsel %vm422_vm10, %v5271_v22, 0.0  ;;  %3064 = vadd.xlane.f32.xlu2 %v3063_v24 }
0x1035   :  { %3061 = vadd.xlane.f32.xlu1 %v3060_v25 }
0x1085   :  { %v2582_v27 = vpop.xlane.xlu2 %2581 }
0x1086   :  { %4261 = vrcp.f32 %v2582_v27 }
0x1087   :  { %v2585_v28 = vpop.xlane.xlu0 %2584 }
0x1088   :  { %4263 = vrcp.f32 %v2585_v28  ;;  %v4128_v28 = vld [vmem:[%s4408_s19 + $0x2] ss:$0 sm:$0xff]  ;;  %s5526_s19 = sld [smem:[#allocation13_spill]] }
0x108c   :  { %v4262_v31 = vpop.eup %4261 }
0x108d   :  { %v2588_v32 = vmul.f32 %v4262_v31, %v5237_v39  ;;  %v2705_v37 = vpop.xlane.xlu2 %2704 }
0x108e   :  { %v4264_v30 = vpop.eup %4263  ;;  %4265 = vrcp.f32 %v2705_v37 }
0x108f   :  { %v2589_v38 = vmul.f32 %v4264_v30, %v5241_v54  ;;  %v2702_v43 = vpop.xlane.xlu1 %2701  ;;  %3955 = vmatmul.msk.f32.vlgmr.msra.gmra.mxu2 %vm422_vm10, %v2588_v32 }
0x1090   :  { %4267 = vrcp.f32 %v2702_v43  ;;  %2850 = vmatpush.msra.mxu2 %v2830_v10 }
0x1091   :  { %3956 = vmatmul.msk.f32.vlgmr.msra.gmra.mxu3 %vm422_vm10, %v2589_v38 }
0x1092   :  { %2873 = vmatpush.msra.mxu3 %v2831_v15 }
0x1094   :  { %v4266_v44 = vpop.eup %4265 }
0x1095   :  { %v2709_v42 = vmul.f32 %v4266_v44, %v5245_v57 }
0x1096   :  { %v4268_v47 = vpop.eup %4267 }
0x1097   :  { %v2708_v29 = vmul.f32 %v4268_v47, %v5249_v61  ;;  %v2825_v21 = vpop.xlane.xlu1 %2824 }
0x1098   :  { %4269 = vrcp.f32 %v2825_v21  ;;  %v2822_v39 = vpop.xlane.xlu0 %2821 }
0x1099   :  { %4271 = vrcp.f32 %v2822_v39  ;;  %3961 = vmatmul.msk.f32.vlgmr.msrb.gmra.mxu2 %vm422_vm10, %v2708_v29  ;;  %3962 = vmatmul.msk.f32.vlgmr.msrb.gmra.mxu3 %vm422_vm10, %v2709_v42 }
0x109a   :  { %2970 = vmatpush.msrb.mxu2 %v2950_v49  ;;  %2993 = vmatpush.msrb.mxu3 %v2951_v36 }
0x109e   :  { %v4270_v35 = vpop.eup %4269 }
0x109f   :  { %v4272_v50 = vpop.eup %4271  ;;  %v2829_v54 = vmul.f32 %v4270_v35, %v5253_v4  ;;  %v2942_v55 = vpop.xlane.xlu2 %2941  ;;  %v3983_v4 = vld [vmem:[%s4403_s14 + $0x90] sm:$0xff] }
0x10a0   :  { %v2828_v52 = vmul.f32 %v4272_v50, %v5255_v34  ;;  %v2945_v48 = vpop.xlane.xlu0 %2944  ;;  %4273 = vrcp.f32 %v2942_v55  ;;  %3151 = vmatpush.msrb.mxu0 %v3983_v4  ;;  %v3982_v34 = vld [vmem:[%s4403_s14 + $0x88] sm:$0xff]  ;;  %v4009_v35 = vld [vmem:[%s4413_s24 + $0x170] sm:$0xf]  ;;  %v4010_v50 = vld [vmem:[%s4413_s24 + $0x178] sm:$0xf]  ;;  %s5525_s14 = sld [smem:[#allocation5_spill]] }
0x10a1   :  { %4275 = vrcp.f32 %v2945_v48  ;;  %3968 = vmatmul.msk.f32.vlgmr.msra.gmra.mxu3 %vm422_vm10, %v2829_v54  ;;  %4012 = vmatpush.msk.msrb.mxu1 %vm265_vm4, %v4009_v35  ;;  %v4007_v54 = vld [vmem:[%s4413_s24 + $0x160] sm:$0xff]  ;;  %v4008_v55 = vld [vmem:[%s4413_s24 + $0x168] sm:$0xff]  ;;  %v4006_v48 = vld [vmem:[%s4413_s24 + $0x158] sm:$0xff] }
0x10a2   :  { %3967 = vmatmul.msk.f32.vlgmr.msra.gmra.mxu2 %vm422_vm10, %v2828_v52  ;;  %3113 = vmatpush.msra.mxu3 %v3071_v56  ;;  %v4005_v52 = vld [vmem:[%s4413_s24 + $0x150] sm:$0xff]  ;;  %v4003_v56 = vld [vmem:[%s4413_s24 + $0x140] sm:$0xff]  ;;  %v4021_v35 = vld [vmem:[%s4423_s6 + $0x1f8] sm:$0xff] }
0x10a3   :  { %3090 = vmatpush.msra.mxu2 %v3070_v53  ;;  %3152 = vmatpush.msrb.mxu0 %v3982_v34  ;;  %v4004_v53 = vld [vmem:[%s4413_s24 + $0x148] sm:$0xff]  ;;  %v4046_v4 = vld [vmem:[%s4423_s6 + $0x2c0] sm:$0xff] }
0x10a4   :  { %3273 = vmatpush.msrb.mxu1 %v4007_v54  ;;  %v4030_v34 = vld [vmem:[%s4423_s6 + $0x240] sm:$0xff] }
0x10a5   :  { %3153 = vmatpush.msrb.mxu0 %v3981_v45  ;;  %v4045_v45 = vld [vmem:[%s4423_s6 + $0x2b8] sm:$0xff] }
0x10a6   :  { %v4274_v57 = vpop.eup %4273  ;;  %3274 = vmatpush.msrb.mxu1 %v4005_v52 }
0x10a7   :  { %v4276_v51 = vpop.eup %4275  ;;  %v2948_v46 = vmul.f32 %v4274_v57, %v5261_v13  ;;  %v3065_v40 = vpop.xlane.xlu2 %3064  ;;  %v4001_v57 = vld [vmem:[%s4413_s24 + $0x130] sm:$0xff]  ;;  %3376 = vmatpush.msra.mxu0 %v4047_v3 }
0x10a8   :  { %v2949_v61 = vmul.f32 %v4276_v51, %v5263_v17  ;;  %v3062_v2 = vpop.xlane.xlu1 %3061  ;;  %4277 = vrcp.f32 %v3065_v40  ;;  %3275 = vmatpush.msrb.mxu1 %v4003_v56  ;;  %v4002_v51 = vld [vmem:[%s4413_s24 + $0x138] sm:$0xff]  ;;  %v4000_v40 = vld [vmem:[%s4413_s24 + $0x128] sm:$0xff] }
0x10a9   :  { %4279 = vrcp.f32 %v3062_v2  ;;  %v3998_v2 = vld [vmem:[%s4413_s24 + $0x118] sm:$0xff]  ;;  %3377 = vmatpush.msra.mxu0 %v4046_v4  ;;  %v4039_v56 = vld [vmem:[%s4423_s6 + $0x288] sm:$0xff] }
0x10aa   :  { %3973 = vmatmul.msk.f32.vlgmr.msrb.gmra.mxu2 %vm422_vm10, %v2948_v46  ;;  %3974 = vmatmul.msk.f32.vlgmr.msrb.gmra.mxu3 %vm422_vm10, %v2949_v61  ;;  %v3999_v46 = vld [vmem:[%s4413_s24 + $0x120] sm:$0xff]  ;;  %v3997_v61 = vld [vmem:[%s4413_s24 + $0x110] sm:$0xff] }
0x10ab   :  { %4015 = vmatpush.msk.msrb.mxu2 %vm265_vm4, %v4010_v50  ;;  %3276 = vmatpush.msrb.mxu1 %v4001_v57  ;;  %v4038_v57 = vld [vmem:[%s4423_s6 + $0x280] sm:$0xff] }
0x10ac   :  { %3351 = vmatpush.msrb.mxu3 %v4033_v0  ;;  %3378 = vmatpush.msra.mxu0 %v4045_v45 }
0x10ad   :  { %3296 = vmatpush.msrb.mxu2 %v4008_v55  ;;  %3277 = vmatpush.msrb.mxu1 %v3999_v46  ;;  %v4036_v46 = vld [vmem:[%s4423_s6 + $0x270] sm:$0xff] }
0x10ae   :  { %v4278_v58 = vpop.eup %4277  ;;  %3352 = vmatpush.msrb.mxu3 %v4032_v33 }
0x10af   :  { %v4280_v60 = vpop.eup %4279  ;;  %v3069_v62 = vmul.f32 %v4278_v58, %v5269_v20  ;;  %3297 = vmatpush.msrb.mxu2 %v4006_v48  ;;  %3278 = vmatpush.msrb.mxu1 %v3997_v61  ;;  %v3995_v58 = vld [vmem:[%s4413_s24 + $0x100] sm:$0xff]  ;;  %v4020_v48 = vld [vmem:[%s4423_s6 + $0x1f0] sm:$0xff] }
0x10b0   :  { %v3068_v59 = vmul.f32 %v4280_v60, %v5271_v22  ;;  %v3996_v60 = vld [vmem:[%s4413_s24 + $0x108] sm:$0xff]  ;;  %3353 = vmatpush.msrb.mxu3 %v4031_v1  ;;  %v4034_v61 = vld [vmem:[%s4423_s6 + $0x260] sm:$0xff]  ;;  %s5527_s24 = sld [smem:[#allocation17_spill]] }
0x10b1   :  { %3298 = vmatpush.msrb.mxu2 %v4004_v53  ;;  %3279 = vmatpush.msrb.mxu1 %v3995_v58  ;;  %v4019_v53 = vld [vmem:[%s4423_s6 + $0x1e8] sm:$0xff] }
0x10b2   :  { %3979 = vmatmul.msk.f32.vlgmr.msra.gmra.mxu2 %vm422_vm10, %v3068_v59  ;;  %3980 = vmatmul.msk.f32.vlgmr.msra.gmra.mxu3 %vm422_vm10, %v3069_v62 }
0x10b3   :  { %3299 = vmatpush.msrb.mxu2 %v4002_v51  ;;  %3354 = vmatpush.msrb.mxu3 %v4030_v34  ;;  %v4018_v51 = vld [vmem:[%s4423_s6 + $0x1e0] sm:$0xff] }
0x10b5   :  { %3300 = vmatpush.msrb.mxu2 %v4000_v40  ;;  %v4035_v40 = vld [vmem:[%s4423_s6 + $0x268] sm:$0xff] }
0x10b7   :  { %3301 = vmatpush.msrb.mxu2 %v3998_v2  ;;  %v4011_v2 = vld [vmem:[%s5517_s9 + $0x4] sm:$0x3] }
0x10b8   :  { %v3248_v58 = vperm.slane %v4011_v2, 0 }
0x10b9   :  { %3302 = vmatpush.msrb.mxu2 %v3996_v60 }
0x1112   :  { %v2612_v5 = vpop.f32.mrf.mxu2 }
0x1114   :  { %v2635_v6 = vpop.f32.mrf.mxu3 }
0x111c   :  { %v2732_v7 = vpop.f32.mrf.mxu2  ;;  %v2755_v8 = vpop.f32.mrf.mxu3 }
0x111d   :  { %v2758_v13 = vadd.f32 %v2732_v7, %v2612_v5  ;;  %v2759_v20 = vadd.f32 %v2755_v8, %v2635_v6 }
0x1124   :  { %v2875_v11 = vpop.f32.mrf.mxu3 }
0x1125   :  { %v2852_v9 = vpop.f32.mrf.mxu2  ;;  %v2879_v22 = vadd.f32 %v2875_v11, %v2759_v20  ;;  %v4044_v11 = vld [vmem:[%s4423_s6 + $0x2b0] sm:$0xff]  ;;  %v4026_v20 = vld [vmem:[%s4423_s6 + $0x220] sm:$0xff] }
0x1126   :  { %v2878_v16 = vadd.f32 %v2852_v9, %v2758_v13  ;;  %v4029_v9 = vld [vmem:[%s4423_s6 + $0x238] sm:$0xff]  ;;  %v4028_v13 = vld [vmem:[%s4423_s6 + $0x230] sm:$0xff]  ;;  %3379 = vmatpush.msra.mxu0 %v4044_v11  ;;  %v4131_v11 = vld [vmem:[%s5518_s22 + $0x2] ss:$0 sm:$0xff] }
0x1127   :  { %3355 = vmatpush.msrb.mxu3 %v4029_v9 }
0x1129   :  { %3356 = vmatpush.msrb.mxu3 %v4028_v13 }
0x112d   :  { %v2972_v12 = vpop.f32.mrf.mxu2  ;;  %v2995_v14 = vpop.f32.mrf.mxu3 }
0x112e   :  { %v2998_v17 = vadd.f32 %v2972_v12, %v2878_v16  ;;  %v2999_v25 = vadd.f32 %v2995_v14, %v2879_v22  ;;  %v4043_v14 = vld [vmem:[%s4423_s6 + $0x2a8] sm:$0xff]  ;;  %v4041_v22 = vld [vmem:[%s4423_s6 + $0x298] sm:$0xff] }
0x112f   :  { %3380 = vmatpush.msra.mxu0 %v4043_v14 }
0x1135   :  { %v3092_v18 = vpop.f32.mrf.mxu2  ;;  %v3115_v24 = vpop.f32.mrf.mxu3 }
0x1136   :  { %v3118_v19 = vadd.f32 %v3092_v18, %v2998_v17  ;;  %v3119_v27 = vadd.f32 %v3115_v24, %v2999_v25  ;;  %v4027_v17 = vld [vmem:[%s4423_s6 + $0x228] sm:$0xff]  ;;  %v4042_v18 = vld [vmem:[%s4423_s6 + $0x2a0] sm:$0xff] }
0x1137   :  { %3357 = vmatpush.msrb.mxu3 %v4027_v17  ;;  %3381 = vmatpush.msra.mxu0 %v4042_v18 }
0x1138   :  { %3990 = vmatmul.msk.f32.vlgmr.msrb.gmra.mxu0 %vm185_vm2, %v3118_v19 }
0x1139   :  { %3358 = vmatpush.msrb.mxu3 %v4026_v20  ;;  %3382 = vmatpush.msra.mxu0 %v4041_v22 }
0x1140   :  { %3991 = vmatmul.msk.f32.gmra.mxu0 %vm185_vm2, %v3119_v27  ;;  %v4025_v27 = vld [vmem:[%s4423_s6 + $0x218] sm:$0xff] }
0x1141   :  { %3359 = vmatpush.msrb.mxu3 %v4025_v27 }
0x11b5   :  { %v3155_v31 = vpop.f32.mrf.mxu0 }
0x11b6   :  { %v3161_v32 = vadd.f32 %v3155_v31, %v5120_v26 }
0x11b8   :  { %v5322_v37 = vadd.f32 %v4128_v28, %v3161_v32 }
0x11ba   :  { %v3174_v30 = vsel %vm185_vm2, %v5322_v37, 0.0 }
0x11bb   :  { %3175 = vadd.xlane.f32.xlu0 %v3174_v30  ;;  %v4129_v30 = vld [vmem:[%s5515_s0 + $0x2] ss:$0 sm:$0xff] }
0x11bd   :  { %v3158_v10 = vpop.f32.mrf.mxu0 }
0x11be   :  { %v3162_v38 = vadd.f32 %v3158_v10, %v5125_v41  ;;  %v4024_v10 = vld [vmem:[%s4423_s6 + $0x210] sm:$0xff] }
0x11bf   :  { %3360 = vmatpush.msrb.mxu3 %v4024_v10 }
0x11c0   :  { %v5327_v43 = vadd.f32 %v4128_v28, %v3162_v38  ;;  %v4040_v28 = vld [vmem:[%s4423_s6 + $0x290] sm:$0xff] }
0x11c1   :  { %3383 = vmatpush.msra.mxu0 %v4040_v28 }
0x11c2   :  { %v3177_v15 = vsel %vm185_vm2, %v5327_v43, 0.0 }
0x11c3   :  { %3178 = vadd.xlane.f32.xlu1 %v3177_v15  ;;  %3384 = vmatpush.msra.mxu0 %v4039_v56 }
0x11c5   :  { %3385 = vmatpush.msra.mxu0 %v4038_v57  ;;  %v3551_v57 = vld [vmem:[%s5520_s21 + $0x20] sm:$0xff] }
0x122e   :  { %v3176_v44 = vpop.xlane.xlu0 %3175 }
0x122f   :  { %v3180_v26 = vmul.f32 %v3176_v44, %v4528_v23  ;;  %v4130_v44 = vld [vmem:[%s5516_s5 + $0x2] ss:$0 sm:$0xff] }
0x1231   :  { %v5333_v47 = vsub.f32 %v5322_v37, %v3180_v26 }
0x1233   :  { %v3184_v42 = vmul.f32 %v5333_v47, %v5333_v47 }
0x1235   :  { %v3186_v41 = vsel %vm185_vm2, %v3184_v42, 0.0  ;;  %v4023_v42 = vld [vmem:[%s4423_s6 + $0x208] sm:$0xff] }
0x1236   :  { %3187 = vadd.xlane.f32.xlu2 %v3186_v41  ;;  %v3179_v29 = vpop.xlane.xlu1 %3178  ;;  %3361 = vmatpush.msrb.mxu3 %v4023_v42  ;;  %v3465_v42 = vld [vmem:[%s5519_s17 + $0x18] sm:$0xff] }
0x1237   :  { %v3181_v21 = vmul.f32 %v3179_v29, %v4528_v23 }
0x1239   :  { %v5340_v39 = vsub.f32 %v5327_v43, %v3181_v21  ;;  %v4022_v21 = vld [vmem:[%s4423_s6 + $0x200] sm:$0xff] }
0x123a   :  { %3362 = vmatpush.msrb.mxu3 %v4022_v21  ;;  %v3462_v21 = vld [vmem:[%s5519_s17] sm:$0xff] }
0x123b   :  { %v3185_v49 = vmul.f32 %v5340_v39, %v5340_v39 }
0x123c   :  { %3363 = vmatpush.msrb.mxu3 %v4021_v35  ;;  %v3557_v35 = vld [vmem:[%s5520_s21 + $0x50] sm:$0xff] }
0x123d   :  { %v3189_v36 = vsel %vm185_vm2, %v3185_v49, 0.0 }
0x123e   :  { %3190 = vadd.xlane.f32.xlu0 %v3189_v36  ;;  %3364 = vmatpush.msrb.mxu3 %v4020_v48  ;;  %v3553_v48 = vld [vmem:[%s5520_s21 + $0x30] sm:$0xff] }
0x1240   :  { %3365 = vmatpush.msrb.mxu3 %v4019_v53  ;;  %v3552_v53 = vld [vmem:[%s5520_s21 + $0x28] sm:$0xff] }
0x1242   :  { %3366 = vmatpush.msrb.mxu3 %v4018_v51 }
0x12a9   :  { %v3188_v62 = vpop.xlane.xlu2 %3187 }
0x12aa   :  { %v3192_v59 = vmul.f32 %v3188_v62, %v4528_v23 }
0x12ac   :  { %v3194_v63 = vadd.f32 1e-05, %v3192_v59 }
0x12ae   :  { %4281 = vrsqrt.f32 %v3194_v63  ;;  %vm3202_vm11 = vweird.f32 %v3194_v63 }
0x12b1   :  { %v3191_v5 = vpop.xlane.xlu0 %3190 }
0x12b2   :  { %v3193_v6 = vmul.f32 %v3191_v5, %v4528_v23 }
0x12b4   :  { %v4282_v7 = vpop.eup %4281  ;;  %v3195_v8 = vadd.f32 1e-05, %v3193_v6 }
0x12b5   :  { %v3197_v12 = vmul.f32 %v4282_v7, %v3194_v63  ;;  %vm3203_vm10 = vweird.f32 %v4282_v7  ;;  %v3249_v63 = vperm.slane %v4011_v2, 1 }
0x12b6   :  { %4283 = vrsqrt.f32 %v3195_v8  ;;  %vm3204_vm12 = vmor %vm3202_vm11, %vm3203_vm10  ;;  %vm3212_vm14 = vweird.f32 %v3195_v8 }
0x12b7   :  { %v3198_v16 = vmul.f32 %v4282_v7, %v3197_v12 }
0x12b9   :  { %v3199_v19 = vmul.f32 0.5, %v3198_v16 }
0x12bb   :  { %v3200_v24 = vsub.f32 1.5, %v3199_v19 }
0x12bc   :  { %v4284_v25 = vpop.eup %4283 }
0x12bd   :  { %v3201_v31 = vmul.f32 %v4282_v7, %v3200_v24  ;;  %v3207_v32 = vmul.f32 %v4284_v25, %v3195_v8  ;;  %vm3213_vm13 = vweird.f32 %v4284_v25 }
0x12be   :  { %vm3214_vm15 = vmor %vm3212_vm14, %vm3213_vm13 }
0x12bf   :  { %v3205_v38 = vsel %vm3204_vm12, %v4282_v7, %v3201_v31  ;;  %v3208_v15 = vmul.f32 %v4284_v25, %v3207_v32 }
0x12c0   :  { %v3216_v26 = vmul.f32 %v3205_v38, %v5333_v47  ;;  %v3469_v38 = vld [vmem:[%s5519_s17 + $0x38] sm:$0xf] }
0x12c1   :  { %v3209_v41 = vmul.f32 0.5, %v3208_v15  ;;  %4051 = vmatpush.msk.msra.mxu1 %vm265_vm4, %v3469_v38  ;;  %v3468_v15 = vld [vmem:[%s5519_s17 + $0x30] sm:$0xff]  ;;  %v3596_v38 = vld [vmem:[%s5524_s8 + $0x20] sm:$0xff] }
0x12c2   :  { %v3221_v29 = vmul.f32 %v4129_v30, %v3216_v26  ;;  %v3466_v26 = vld [vmem:[%s5519_s17 + $0x20] sm:$0xff] }
0x12c3   :  { %v3210_v49 = vsub.f32 1.5, %v3209_v41  ;;  %3494 = vmatpush.msra.mxu1 %v3468_v15  ;;  %v3464_v41 = vld [vmem:[%s5519_s17 + $0x10] sm:$0xff]  ;;  %v3595_v15 = vld [vmem:[%s5524_s8 + $0x18] sm:$0xff] }
0x12c4   :  { %v3226_v36 = vadd.f32 %v4130_v44, %v3221_v29  ;;  %v3463_v29 = vld [vmem:[%s5519_s17 + $0x8] sm:$0xff] }
0x12c5   :  { %v3211_v50 = vmul.f32 %v4284_v25, %v3210_v49  ;;  %v3559_v49 = vld [vmem:[%s5520_s21 + $0x60] sm:$0xf] }
0x12c6   :  { %4013 = vmatmul.msk.f32.vlgmr.msrb.gmra.mxu1 %vm185_vm2, %v3226_v36  ;;  %4016 = vmatmul.msk.f32.vlgmr.msrb.gmra.mxu2 %vm185_vm2, %v3226_v36  ;;  %v3558_v36 = vld [vmem:[%s5520_s21 + $0x58] sm:$0xff] }
0x12c7   :  { %v3215_v47 = vsel %vm3214_vm15, %v4284_v25, %v3211_v50  ;;  %v3556_v50 = vld [vmem:[%s5520_s21 + $0x48] sm:$0xff] }
0x12c8   :  { %v3217_v54 = vmul.f32 %v3215_v47, %v5340_v39  ;;  %v4037_v39 = vld [vmem:[%s4423_s6 + $0x278] sm:$0xff]  ;;  %v3555_v47 = vld [vmem:[%s5520_s21 + $0x40] sm:$0xff]  ;;  %s5528_s6 = sld [smem:[#allocation15_spill]] }
0x12c9   :  { %3386 = vmatpush.msra.mxu0 %v4037_v39  ;;  %v3550_v39 = vld [vmem:[%s5520_s21 + $0x18] sm:$0xff] }
0x12ca   :  { %v3222_v55 = vmul.f32 %v4129_v30, %v3217_v54 }
0x12cb   :  { %3387 = vmatpush.msra.mxu0 %v4036_v46 }
0x12cc   :  { %v3227_v52 = vadd.f32 %v4130_v44, %v3222_v55  ;;  %v3467_v44 = vld [vmem:[%s5519_s17 + $0x28] sm:$0xff] }
0x12cd   :  { %3388 = vmatpush.msra.mxu0 %v4035_v40  ;;  %3495 = vmatpush.msra.mxu1 %v3467_v44  ;;  %v3549_v40 = vld [vmem:[%s5520_s21 + $0x10] sm:$0xff] }
0x12ce   :  { %4014 = vmatmul.msk.f32.gmra.mxu1 %vm185_vm2, %v3227_v52  ;;  %4017 = vmatmul.msk.f32.gmra.mxu2 %vm185_vm2, %v3227_v52  ;;  %v3554_v52 = vld [vmem:[%s5520_s21 + $0x38] sm:$0xff]  ;;  %v3594_v44 = vld [vmem:[%s5524_s8 + $0x10] sm:$0xff] }
0x12cf   :  { %3389 = vmatpush.msra.mxu0 %v4034_v61  ;;  %3496 = vmatpush.msra.mxu1 %v3466_v26  ;;  %v3593_v26 = vld [vmem:[%s5524_s8 + $0x8] sm:$0xff] }
0x12d1   :  { %3497 = vmatpush.msra.mxu1 %v3465_v42  ;;  %v3592_v42 = vld [vmem:[%s5524_s8] sm:$0xff] }
0x12d3   :  { %3498 = vmatpush.msra.mxu1 %v3464_v41  ;;  %v3638_v41 = vld [vmem:[%s4503_s4 + $0x38] sm:$0xf] }
0x12d4   :  { %4059 = vmatpush.msk.msra.mxu3 %vm265_vm4, %v3638_v41 }
0x12d5   :  { %3499 = vmatpush.msra.mxu1 %v3463_v29  ;;  %v4134_v29 = vld [vmem:[%s5526_s19] ss:$0 sm:$0xff] }
0x12d7   :  { %3500 = vmatpush.msra.mxu1 %v3462_v21 }
0x12d9   :  { %4055 = vmatpush.msk.msrb.mxu1 %vm265_vm4, %v3559_v49 }
0x12db   :  { %3575 = vmatpush.msrb.mxu1 %v3558_v36 }
0x12dd   :  { %3576 = vmatpush.msrb.mxu1 %v3557_v35  ;;  %v4135_v35 = vld [vmem:[%s5527_s24] ss:$0 sm:$0xff] }
0x12df   :  { %3577 = vmatpush.msrb.mxu1 %v3556_v50 }
0x12e1   :  { %3578 = vmatpush.msrb.mxu1 %v3555_v47 }
0x12e3   :  { %3579 = vmatpush.msrb.mxu1 %v3554_v52  ;;  %v3636_v52 = vld [vmem:[%s4503_s4 + $0x28] sm:$0xff] }
0x12e5   :  { %3580 = vmatpush.msrb.mxu1 %v3553_v48  ;;  %v3635_v48 = vld [vmem:[%s4503_s4 + $0x20] sm:$0xff] }
0x12e7   :  { %3581 = vmatpush.msrb.mxu1 %v3552_v53  ;;  %v3633_v53 = vld [vmem:[%s4503_s4 + $0x10] sm:$0xff] }
0x12e9   :  { %3582 = vmatpush.msrb.mxu1 %v3551_v57  ;;  %v3632_v57 = vld [vmem:[%s4503_s4 + $0x8] sm:$0xff] }
0x12eb   :  { %3583 = vmatpush.msrb.mxu1 %v3550_v39 }
0x12ed   :  { %3584 = vmatpush.msrb.mxu1 %v3549_v40 }
0x1343   :  { %v3281_v60 = vpop.f32.mrf.mxu1 }
0x1344   :  { %v3282_v62 = vadd.f32 %v3281_v60, %v3248_v58 }
0x1346   :  { %v3310_v59 = vmax.f32 %v3282_v62, 0.0  ;;  %v3547_v62 = vld [vmem:[%s5520_s21] sm:$0xff] }
0x1348   :  { %3367 = vmatmul.f32.vlgmr.msrb.gmra.mxu3 %v3310_v59 }
0x1349   :  { %v3304_v0 = vpop.f32.mrf.mxu2 }
0x134a   :  { %v3305_v33 = vadd.f32 %v3304_v0, %v3249_v63  ;;  %v3513_v0 = vld [vmem:[%s5521_s25 + $0x38] sm:$0xf] }
0x134b   :  { %v3284_v1 = vpop.f32.mrf.mxu1  ;;  %4053 = vmatpush.msk.msra.mxu2 %vm265_vm4, %v3513_v0 }
0x134c   :  { %v3311_v3 = vmax.f32 %v3305_v33, 0.0  ;;  %v3285_v4 = vadd.f32 %v3284_v1, %v3248_v58  ;;  %v3548_v58 = vld [vmem:[%s5520_s21 + $0x8] sm:$0xff]  ;;  %v3512_v33 = vld [vmem:[%s5521_s25 + $0x30] sm:$0xff] }
0x134d   :  { %3585 = vmatpush.msrb.mxu1 %v3548_v58  ;;  %v3511_v1 = vld [vmem:[%s5521_s25 + $0x28] sm:$0xff]  ;;  %3533 = vmatpush.msra.mxu2 %v3512_v33 }
0x134e   :  { %v3312_v5 = vmax.f32 %v3285_v4, 0.0  ;;  %4048 = vmatmul.msk.f32.vlgmr.msra.gmra.mxu0 %vm1193_vm1, %v3311_v3 }
0x134f   :  { %3586 = vmatpush.msrb.mxu1 %v3547_v62  ;;  %3534 = vmatpush.msra.mxu2 %v3511_v1 }
0x1350   :  { %3370 = vmatmul.f32.gmra.mxu3 %v3312_v5 }
0x1351   :  { %v3307_v6 = vpop.f32.mrf.mxu2 }
0x1352   :  { %v3308_v34 = vadd.f32 %v3307_v6, %v3249_v63  ;;  %v3510_v6 = vld [vmem:[%s5521_s25 + $0x20] sm:$0xff] }
0x1353   :  { %3535 = vmatpush.msra.mxu2 %v3510_v6 }
0x1354   :  { %v3313_v45 = vmax.f32 %v3308_v34, 0.0 }
0x1356   :  { %4049 = vmatmul.msk.f32.gmra.mxu0 %vm1193_vm1, %v3313_v45 }
0x13cb   :  { %v3368_v7 = vpop.f32.mrf.mxu3  ;;  %v3391_v8 = vpop.f32.mrf.mxu0 }
0x13cc   :  { %v3392_v9 = vadd.f32 %v3391_v8, %v3368_v7  ;;  %v3509_v7 = vld [vmem:[%s5521_s25 + $0x18] sm:$0xff] }
0x13cd   :  { %3536 = vmatpush.msra.mxu2 %v3509_v7 }
0x13ce   :  { %v3397_v12 = vadd.f32 %v3392_v9, %v5322_v37  ;;  %v3508_v9 = vld [vmem:[%s5521_s25 + $0x10] sm:$0xff] }
0x13cf   :  { %3537 = vmatpush.msra.mxu2 %v3508_v9 }
0x13d0   :  { %v3404_v13 = vadd.f32 %v4131_v11, %v3397_v12 }
0x13d2   :  { %v3408_v14 = vsel %vm185_vm2, %v3404_v13, 0.0 }
0x13d3   :  { %v3394_v16 = vpop.f32.mrf.mxu0  ;;  %3409 = vadd.xlane.f32.xlu1 %v3408_v14  ;;  %v3371_v17 = vpop.f32.mrf.mxu3  ;;  %v3507_v14 = vld [vmem:[%s5521_s25 + $0x8] sm:$0xff] }
0x13d4   :  { %v3395_v18 = vadd.f32 %v3394_v16, %v3371_v17  ;;  %v3506_v17 = vld [vmem:[%s5521_s25] sm:$0xff]  ;;  %3538 = vmatpush.msra.mxu2 %v3507_v14 }
0x13d6   :  { %v3398_v19 = vadd.f32 %v3395_v18, %v5327_v43  ;;  %3539 = vmatpush.msra.mxu2 %v3506_v17 }
0x13d8   :  { %v3405_v20 = vadd.f32 %v4131_v11, %v3398_v19  ;;  %v4132_v11 = vld [vmem:[%s5522_s29] ss:$0 sm:$0xff] }
0x13d9   :  { %v4133_v19 = vld [vmem:[%s5523_s3] ss:$0 sm:$0xff] }
0x13da   :  { %v3411_v22 = vsel %vm185_vm2, %v3405_v20, 0.0 }
0x13db   :  { %3412 = vadd.xlane.f32.xlu2 %v3411_v22 }
0x1446   :  { %v3410_v24 = vpop.xlane.xlu1 %3409 }
0x1447   :  { %v3414_v25 = vmul.f32 %v3410_v24, %v4528_v23 }
0x1449   :  { %v5412_v37 = vsub.f32 %v3404_v13, %v3414_v25 }
0x144b   :  { %v3418_v27 = vmul.f32 %v5412_v37, %v5412_v37 }
0x144d   :  { %v3420_v28 = vsel %vm185_vm2, %v3418_v27, 0.0 }
0x144e   :  { %3421 = vadd.xlane.f32.xlu0 %v3420_v28  ;;  %v3413_v43 = vpop.xlane.xlu2 %3412 }
0x144f   :  { %v3415_v31 = vmul.f32 %v3413_v43, %v4528_v23 }
0x1451   :  { %v5418_v32 = vsub.f32 %v3405_v20, %v3415_v31  ;;  %v3599_v20 = vld [vmem:[%s5524_s8 + $0x38] sm:$0xf] }
0x1452   :  { %4057 = vmatpush.msk.msrb.mxu2 %vm265_vm4, %v3599_v20  ;;  %vm3669_vm4 = vcmask 17408  }
0x1453   :  { %v3419_v30 = vmul.f32 %v5418_v32, %v5418_v32 }
0x1455   :  { %v3423_v10 = vsel %vm185_vm2, %v3419_v30, 0.0  ;;  %v3546_v30 = vld [vmem:[%s5525_s14] sm:$0x3] }
0x1456   :  { %3424 = vadd.xlane.f32.xlu1 %v3423_v10  ;;  %v3597_v10 = vld [vmem:[%s5524_s8 + $0x28] sm:$0xff] }
0x14c1   :  { %v3422_v54 = vpop.xlane.xlu0 %3421 }
0x14c2   :  { %v3426_v55 = vmul.f32 %v3422_v54, %v4528_v23 }
0x14c4   :  { %v3428_v56 = vadd.f32 1e-05, %v3426_v55  ;;  %v3637_v55 = vld [vmem:[%s4503_s4 + $0x30] sm:$0xff] }
0x14c5   :  { %3658 = vmatpush.msra.mxu3 %v3637_v55 }
0x14c6   :  { %4285 = vrsqrt.f32 %v3428_v56  ;;  %vm3436_vm0 = vweird.f32 %v3428_v56 }
0x14c7   :  { %3659 = vmatpush.msra.mxu3 %v3636_v52 }
0x14c9   :  { %v3425_v51 = vpop.xlane.xlu1 %3424  ;;  %3660 = vmatpush.msra.mxu3 %v3635_v48 }
0x14ca   :  { %v3427_v46 = vmul.f32 %v3425_v51, %v4528_v23  ;;  %v3631_v51 = vld [vmem:[%s4503_s4] sm:$0xff] }
0x14cc   :  { %v4286_v61 = vpop.eup %4285  ;;  %v3429_v2 = vadd.f32 1e-05, %v3427_v46  ;;  %v4136_v46 = vld [vmem:[%s5528_s6] ss:$0 sm:$0xff] }
0x14cd   :  { %v3431_v60 = vmul.f32 %v4286_v61, %v3428_v56  ;;  %vm3437_vm1 = vweird.f32 %v4286_v61  ;;  %v3634_v56 = vld [vmem:[%s4503_s4 + $0x18] sm:$0xff]  ;;  %s4301_s4 = sshra.s32 %s3679_s23, 4  ;;  %s4302_s4 = int_to_ptr.hbm [resolvable:$true] %s4301_s4 }
0x14ce   :  { %4287 = vrsqrt.f32 %v3429_v2  ;;  %vm3438_vm3 = vmor %vm3436_vm0, %vm3437_vm1  ;;  %vm3446_vm6 = vweird.f32 %v3429_v2  ;;  %3661 = vmatpush.msra.mxu3 %v3634_v56  ;;  %p4306_p1 = scmp.lt.s32.totalorder %s4302_s4, %s4513_s12 }
0x14cf   :  { %v3432_v59 = vmul.f32 %v4286_v61, %v3431_v60 }
0x14d0   :  { %3662 = vmatpush.msra.mxu3 %v3633_v53 }
0x14d1   :  { %v3433_v63 = vmul.f32 0.5, %v3432_v59  ;;  %v4138_v59 = vld [vmem:[%s4508_s13] ss:$0 sm:$0xff] }
0x14d2   :  { %3663 = vmatpush.msra.mxu3 %v3632_v57 }
0x14d3   :  { %v3434_v23 = vsub.f32 1.5, %v3433_v63 }
0x14d4   :  { %v4288_v3 = vpop.eup %4287  ;;  %3664 = vmatpush.msra.mxu3 %v3631_v51 }
0x14d5   :  { %v3435_v4 = vmul.f32 %v4286_v61, %v3434_v23  ;;  %v3441_v5 = vmul.f32 %v4288_v3, %v3429_v2  ;;  %vm3447_vm5 = vweird.f32 %v4288_v3 }
0x14d6   :  { %vm3448_vm7 = vmor %vm3446_vm6, %vm3447_vm5 }
0x14d7   :  { %v3439_v34 = vsel %vm3438_vm3, %v4286_v61, %v3435_v4  ;;  %v3442_v45 = vmul.f32 %v4288_v3, %v3441_v5  ;;  %v4137_v61 = vld [vmem:[%s4498_s30] ss:$0 sm:$0xff]  ;;  %s4303_s30 = scalar_lea.hbm %s4302_s4, 2 }
0x14d8   :  { %v3450_v12 = vmul.f32 %v3439_v34, %v5412_v37  ;;  %p4304_p0 = scmp.ne.s32.totalorder %s4302_s4, %s4303_s30  ;;  %p4307_p2 = scmp.lt.s32.totalorder %s4305_s26, %s4303_s30 }
0x14d9   :  { %v3443_v8 = vmul.f32 0.5, %v3442_v45 }
0x14da   :  { %v3455_v18 = vmul.f32 %v4132_v11, %v3450_v12  ;;  %p4308_p3 = por %p4307_p2, %p4306_p1 }
0x14db   :  { %v3444_v13 = vsub.f32 1.5, %v3443_v8 }
0x14dc   :  { %v3460_v37 = vadd.f32 %v4133_v19, %v3455_v18  ;;  %p4309_p4 = pnand %p4308_p3, %p4304_p0 }
0x14dd   :  { %v3445_v16 = vmul.f32 %v4288_v3, %v3444_v13 }
0x14de   :  { %v3476_v28 = vrot.slane %v3460_v37, 7 }
0x14df   :  { %v3449_v22 = vsel %vm3448_vm7, %v4288_v3, %v3445_v16 }
0x14e0   :  { %v3451_v24 = vmul.f32 %v3449_v22, %v5418_v32  ;;  %v3598_v32 = vld [vmem:[%s5524_s8 + $0x30] sm:$0xff] }
0x14e1   :  { %3619 = vmatpush.msrb.mxu2 %v3598_v32 }
0x14e2   :  { %v3456_v25 = vmul.f32 %v4132_v11, %v3451_v24 }
0x14e3   :  { %3620 = vmatpush.msrb.mxu2 %v3597_v10 }
0x14e4   :  { %v3461_v27 = vadd.f32 %v4133_v19, %v3456_v25 }
0x14e5   :  { %3621 = vmatpush.msrb.mxu2 %v3596_v38 }
0x14e6   :  { %v3477_v43 = vrot.slane %v3461_v27, 6 }
0x14e7   :  { %3622 = vmatpush.msrb.mxu2 %v3595_v15 }
0x14e8   :  { %v3479_v31 = vsel %vm3478_vm8, %v3477_v43, %v3476_v28 }
0x14e9   :  { %4052 = vmatmul.msk.f32.vlgmr.msra.gmra.mxu1 %vm185_vm2, %v3479_v31  ;;  %3623 = vmatpush.msrb.mxu2 %v3594_v44 }
0x14eb   :  { %3624 = vmatpush.msrb.mxu2 %v3593_v26 }
0x14ed   :  { %3625 = vmatpush.msrb.mxu2 %v3592_v42 }
0x14f1   :  { %4056 = vmatmul.msk.f32.vlgmr.msrb.gmra.mxu1 %vm3564_vm9, %v3546_v30 }
0x1566   :  { %v3502_v21 = vpop.f32.mrf.mxu1 }
0x1567   :  { %v3503_v49 = vadd.f32 %v4134_v29, %v3502_v21 }
0x1569   :  { %v3505_v36 = vmax.f32 %v3503_v49, 0.0 }
0x156b   :  { %4054 = vmatmul.msk.f32.vlgmr.msra.gmra.mxu2 %vm185_vm2, %v3505_v36 }
0x156e   :  { %v3588_v50 = vpop.f32.mrf.mxu1 }
0x156f   :  { %v3589_v47 = vadd.f32 %v4135_v35, %v3588_v50 }
0x1571   :  { %v3591_v54 = vmax.f32 %v3589_v47, 0.0 }
0x1573   :  { %4058 = vmatmul.msk.f32.vlgmr.msrb.gmra.mxu2 %vm185_vm2, %v3591_v54 }
0x15ee   :  { %v3541_v39 = vpop.f32.mrf.mxu2 }
0x15ef   :  { %v3542_v40 = vadd.f32 %v4136_v46, %v3541_v39 }
0x15f1   :  { %v3545_v58 = vadd.f32 %v3542_v40, %v3479_v31 }
0x15f6   :  { %v3627_v2 = vpop.f32.mrf.mxu2 }
0x15f7   :  { %v3628_v60 = vadd.f32 %v4137_v61, %v3627_v2 }
0x15f9   :  { %v3630_v62 = vadd.f32 %v3628_v60, %v3545_v58 }
0x15fb   :  { %4060 = vmatmul.msk.f32.vlgmr.msra.gmra.mxu3 %vm185_vm2, %v3630_v62 }
0x167e   :  { %v3666_v63 = vpop.f32.mrf.mxu3 }
0x167f   :  { %v3667_v0 = vadd.f32 %v4138_v59, %v3666_v63 }
0x1681   :  { %3670 = vst.msk [vmem:[#allocation2] sm:$0x3] %vm3669_vm4, %v3667_v0 }
0x1682   :  { %4312 = shalt.err (!%p4309_p4)
}
0x1683   :  { %3681 = dma.vmem_to_hbm [thread:$0]  %s3677_s27, 32, %s3679_s23, [#allocation3]  }
0x1684   :  { %4313 = dma.done.wait [#allocation3], 32  }
0x1685   :  { %4314 = vsyncadd [#allocation3], 4294967264 }
0x1686   :  { %3686 = vsyncpa [#allocation3], 1 }

</bundles_post_ra>
